<compile_context>
chip_gen: v5e
topology: v5e:2x2
jax: 0.10.0
libtpu: 0.0.40
codegen_flags: <defaults>
</compile_context>

<pallas_src>
import functools

import jax
import jax.numpy as jnp
from jax.experimental import pallas as pl
from jax.experimental.pallas import tpu as pltpu


# ------------------------------------------------------------------------- math utils
def _erf_approx(x):
    # Abramowitz & Stegun 7.1.26, |err| < 1.5e-7 (matches exact-erf GELU in f32).
    a1, a2, a3, a4, a5 = 0.254829592, -0.284496736, 1.421413741, -1.453152027, 1.061405429
    p = 0.3275911
    s = jnp.where(x >= 0.0, 1.0, -1.0)
    ax = jnp.abs(x)
    t = 1.0 / (1.0 + p * ax)
    poly = ((((a5 * t + a4) * t + a3) * t + a2) * t + a1) * t
    return s * (1.0 - poly * jnp.exp(-ax * ax))


def _gelu_exact(x):
    return 0.5 * x * (1.0 + _erf_approx(x * 0.7071067811865476))


def _layernorm(x, g, b, eps=1e-6):
    m = jnp.mean(x, axis=-1, keepdims=True)
    v = jnp.mean(jnp.square(x - m), axis=-1, keepdims=True)
    return (x - m) * jax.lax.rsqrt(v + eps) * g + b


# ----------------------------------------------- fused, layer-streamed per-stream kernel
def _vit_layer_kernel(patches_ref, addend_ref, patch_w_ref,
                      ln1_g_ref, ln1_b_ref, qkv_w_ref, qkv_b_ref,
                      proj_w_ref, proj_b_ref, ln2_g_ref, ln2_b_ref,
                      fc1_w_ref, fc1_b_ref, fc2_w_ref, fc2_b_ref,
                      norm_g_ref, norm_b_ref,
                      theta_w_ref, phi_w_ref, phi_b_ref,
                      psi_w_ref, psi_b_ref, w_w_ref, w_b_ref,
                      out_ref,
                      x_scratch, ctx_scratch,
                      *, depth, heads, hd, T, C, bi):
    """Grid = (stream, batch_block, layer).  x_scratch carries the residual stream
    across the (innermost, "arbitrary") layer axis; only layer `d`'s weights are
    resident in VMEM at any step."""
    f32, bf16 = jnp.float32, jnp.bfloat16
    d = pl.program_id(2)

    # ---------------- d == 0: patch embedding + cls token + positional embedding ----
    # patches row 0 is an all-zero "cls slot"; addend row 0 = cls + pos[0],
    # addend rows 1.. = pos[i] + patch_bias, so no concatenation is needed.
    @pl.when(d == 0)
    def _():
        pw = patch_w_ref[0]                                   # (PD, C) bf16
        add = addend_ref[0]                                   # (T, C)  f32
        for i in range(bi):
            tok = jnp.dot(patches_ref[0, i], pw, preferred_element_type=f32)
            x_scratch[i] = tok + add

    # ---------------- transformer block `d` (runs at every grid step) ---------------
    ln1_g, ln1_b = ln1_g_ref[0, 0], ln1_b_ref[0, 0]
    ln2_g, ln2_b = ln2_g_ref[0, 0], ln2_b_ref[0, 0]
    qkv_w, qkv_b = qkv_w_ref[0, 0], qkv_b_ref[0, 0]
    proj_w, proj_b = proj_w_ref[0, 0], proj_b_ref[0, 0]
    fc1_w, fc1_b = fc1_w_ref[0, 0], fc1_b_ref[0, 0]
    fc2_w, fc2_b = fc2_w_ref[0, 0], fc2_b_ref[0, 0]

    for i in range(bi):     # layer-d weight fetch amortized over bi images
        x = x_scratch[i]                                      # (T, C) f32
        # ------------------------- Multi-head self-attention ------------------------
        y = _layernorm(x, ln1_g, ln1_b)
        qkv = jnp.dot(y.astype(bf16), qkv_w, preferred_element_type=f32) + qkv_b
        # q/k/v slabs at offsets 0, C, 2C (lane-aligned when C % 128 == 0); the
        # hd**-0.5 scale is already folded into the q columns at pack time.
        q_all = qkv[:, :C]
        k_all = qkv[:, C:2 * C]
        v_all = qkv[:, 2 * C:]
        for h in range(heads):
            lo, hi = h * hd, (h + 1) * hd
            # TODO(synk): for hd=64 (ViT-Base) group head pairs so these per-head
            # extracts become 128-lane-aligned views.
            s = jax.lax.dot_general(q_all[:, lo:hi].astype(bf16),
                                    k_all[:, lo:hi].astype(bf16),
                                    (((1,), (1,)), ((), ())),
                                    preferred_element_type=f32)          # (T, T)
            m = jnp.max(s, axis=-1, keepdims=True)
            e = jnp.exp(s - m)
            p = e * pl.reciprocal(jnp.sum(e, axis=-1, keepdims=True), approx=True)
            ctx = jnp.dot(p.astype(bf16), v_all[:, lo:hi].astype(bf16),
                          preferred_element_type=f32)                    # (T, hd)
            # Concatenate heads at static lane offsets in a VMEM scratch ...
            ctx_scratch[:, lo:hi] = ctx.astype(bf16)
        # ... then ONE full-contraction (K = C) output projection.
        attn = jnp.dot(ctx_scratch[...], proj_w, preferred_element_type=f32)
        x = x + attn + proj_b
        # ------------------------------------ MLP -----------------------------------
        y = _layernorm(x, ln2_g, ln2_b)
        h1 = jnp.dot(y.astype(bf16), fc1_w, preferred_element_type=f32) + fc1_b
        h1 = _gelu_exact(h1)
        h2 = jnp.dot(h1.astype(bf16), fc2_w, preferred_element_type=f32) + fc2_b
        x_scratch[i] = x + h2

    # ------------- d == depth-1: final LN + GridAttention gate + average pool -------
    @pl.when(d == depth - 1)
    def _():
        nrm_g, nrm_b = norm_g_ref[0], norm_b_ref[0]
        theta_w = theta_w_ref[0]
        phi_w, phi_b = phi_w_ref[0], phi_b_ref[0]
        psi_w, psi_b = psi_w_ref[0], psi_b_ref[0]
        w_w, w_b = w_w_ref[0], w_b_ref[0]
        row = jax.lax.broadcasted_iota(jnp.int32, (T, 1), 0)
        mask = (row > 0).astype(f32)                          # drop cls token in pool
        for i in range(bi):
            feat = _layernorm(x_scratch[i], nrm_g, nrm_b)     # (T, C)
            fb = feat.astype(bf16)
            theta_x = jnp.dot(fb, theta_w, preferred_element_type=f32)        # (T, I)
            phi_g = jnp.dot(fb, phi_w, preferred_element_type=f32) + phi_b
            f_rel = jnp.maximum(theta_x + phi_g, 0.0)
            psi = jnp.sum(f_rel * psi_w, axis=-1, keepdims=True) + psi_b      # (T, 1)
            gated = feat * jax.nn.sigmoid(psi)
            wy = jnp.dot(gated.astype(bf16), w_w, preferred_element_type=f32) + w_b
            out_ref[0, i] = jnp.sum(wy * mask, axis=0, keepdims=True) * (1.0 / (T - 1))


# ------------------------------------------------------------------------ forward
def vit_gate_attention_forward(packed, v00, v12, v24, *, cfg,
                               single_buffer_weights=True):
    P, C = cfg["patch"], cfg["embed_dim"]
    depth, heads, inter = cfg["depth"], cfg["heads"], cfg["inter"]
    hd = C // heads

    x = jnp.stack([v00, v12, v24], axis=0)                    # (S, B, 3, H, W)
    S, B, in_ch, H, W = x.shape
    bi = cfg.get("img_block", 1)
    if B % bi != 0:
        bi = 1
    nb = B // bi
    Hp, Wp = H // P, W // P
    N = Hp * Wp
    T = N + 1
    PD = in_ch * P * P

    # Patch extraction (Conv2d k=P s=P as a matmul over flattened patches); prepend an
    # all-zero row for the cls slot so the kernel needs no concatenation.
    patches = x.reshape(S, B, in_ch, Hp, P, Wp, P)
    patches = patches.transpose(0, 1, 3, 5, 2, 4, 6).reshape(S, B, N, PD)
    patches = jnp.pad(patches, ((0, 0), (0, 0), (1, 0), (0, 0))).astype(jnp.bfloat16)

    def stream_spec(shape):
        """Full per-stream block; index depends on s only -> request single buffering
        (never re-fetched across the inner batch/layer axes)."""
        zeros = (0,) * len(shape)
        imap = lambda s, b, d, _z=zeros: (s,) + _z
        if single_buffer_weights and hasattr(pl, "Buffered"):
            try:
                return pl.BlockSpec((1,) + tuple(shape), imap,
                                    pipeline_mode=pl.Buffered(1))
            except TypeError:        # older Pallas: no pipeline_mode kwarg
                pass
        return pl.BlockSpec((1,) + tuple(shape), imap)

    def layer_spec(shape):
        """Per-(stream, layer) block: only one layer's weights resident per step,
        default double-buffering prefetches layer d+1 while computing layer d."""
        zeros = (0,) * len(shape)
        return pl.BlockSpec((1, 1) + tuple(shape),
                            lambda s, b, d, _z=zeros: (s, d) + _z)

    in_specs = [
        pl.BlockSpec((1, bi, T, PD), lambda s, b, d: (s, b, 0, 0)),   # patches
        stream_spec((T, C)),                                          # addend (cls+pos)
        stream_spec((PD, C)),                                         # patch_w
        layer_spec((1, C)), layer_spec((1, C)),                       # ln1 g/b
        layer_spec((C, 3 * C)), layer_spec((1, 3 * C)),               # qkv w/b (q scaled)
        layer_spec((C, C)), layer_spec((1, C)),                       # proj w/b
        layer_spec((1, C)), layer_spec((1, C)),                       # ln2 g/b
        layer_spec((C, 4 * C)), layer_spec((1, 4 * C)),               # fc1 w/b
        layer_spec((4 * C, C)), layer_spec((1, C)),                   # fc2 w/b
        stream_spec((1, C)), stream_spec((1, C)),                     # final norm g/b
        stream_spec((C, inter)), stream_spec((C, inter)),             # theta, phi w
        stream_spec((1, inter)),                                      # phi b
        stream_spec((1, inter)), stream_spec((1, 1)),                 # psi w/b
        stream_spec((C, C)), stream_spec((1, C)),                     # W w/b (BN folded)
    ]

    kernel = functools.partial(_vit_layer_kernel, depth=depth, heads=heads,
                               hd=hd, T=T, C=C, bi=bi)

    pooled = pl.pallas_call(
        kernel,
        out_shape=jax.ShapeDtypeStruct((S, B, 1, C), jnp.float32),
        grid_spec=pltpu.PrefetchScalarGridSpec(
            num_scalar_prefetch=0,
            grid=(S, nb, depth),
            in_specs=in_specs,
            out_specs=pl.BlockSpec((1, bi, 1, C), lambda s, b, d: (s, b, 0, 0)),
            scratch_shapes=[
                pltpu.VMEM((bi, T, C), jnp.float32),    # residual stream (carried over d)
                pltpu.VMEM((T, C), jnp.bfloat16),       # concatenated per-head context
            ]),
        compiler_params=pltpu.CompilerParams(
            dimension_semantics=("parallel", "parallel", "arbitrary"),
            # TODO(synk): re-derive for production ViT-Base shapes on v7x (64 MiB VMEM)
            # and raise further for v5e layer streaming (~28-35 MiB needed).
            vmem_limit_bytes=32 * 1024 * 1024),
    )(patches, packed["addend"], packed["patch_w"],
      packed["ln1_g"], packed["ln1_b"], packed["qkv_w"], packed["qkv_b"],
      packed["proj_w"], packed["proj_b"], packed["ln2_g"], packed["ln2_b"],
      packed["fc1_w"], packed["fc1_b"], packed["fc2_w"], packed["fc2_b"],
      packed["norm_g"], packed["norm_b"],
      packed["theta_w"], packed["phi_w"], packed["phi_b"],
      packed["psi_w"], packed["psi_b"], packed["W_w"], packed["W_b"])

    # concat order [v00 | v12 | v24]; tiny classifier head stays in XLA (sub-us matmul,
    # nc-wide output -> no pallas launch / masked-lane-store overhead).
    fusion = pooled.reshape(S, B, C).transpose(1, 0, 2).reshape(B, S * C)
    return fusion @ packed["head_w"] + packed["head_b"]


# ------------------------------------------------------------------- parameter init
def _nrm(key, shape, scale=0.02):
    return scale * jax.random.normal(key, shape, jnp.float32)


def init_vit(key, cfg):
    C, depth, P, in_ch = cfg["embed_dim"], cfg["depth"], cfg["patch"], cfg["in_chans"]
    N = (cfg["img"] // P) ** 2
    keys = jax.random.split(key, 4 + depth)
    p = {
        "patch_w": _nrm(keys[0], (in_ch * P * P, C)),
        "patch_b": _nrm(keys[1], (C,)),
        "cls": _nrm(keys[2], (1, 1, C)),
        "pos": _nrm(keys[3], (1, N + 1, C)),
        "norm_g": jnp.ones((C,), jnp.float32),
        "norm_b": jnp.zeros((C,), jnp.float32),
        "blocks": [],
    }
    for d in range(depth):
        bk = jax.random.split(keys[4 + d], 8)
        p["blocks"].append(dict(
            ln1_g=jnp.ones((C,), jnp.float32), ln1_b=jnp.zeros((C,), jnp.float32),
            qkv_w=_nrm(bk[0], (C, 3 * C)), qkv_b=_nrm(bk[1], (3 * C,)),
            proj_w=_nrm(bk[2], (C, C)), proj_b=_nrm(bk[3], (C,)),
            ln2_g=jnp.ones((C,), jnp.float32), ln2_b=jnp.zeros((C,), jnp.float32),
            fc1_w=_nrm(bk[4], (C, 4 * C)), fc1_b=_nrm(bk[5], (4 * C,)),
            fc2_w=_nrm(bk[6], (C * 4, C)), fc2_b=_nrm(bk[7], (C,)),
        ))
    return p


def init_gate(key, C, inter):
    ks = jax.random.split(key, 10)
    theta_w = _nrm(ks[0], (C, inter), 0.05)
    phi_w = _nrm(ks[1], (C, inter), 0.05)
    phi_b = _nrm(ks[2], (inter,), 0.05)
    psi_w = _nrm(ks[3], (inter, 1), 0.05)
    psi_b = _nrm(ks[4], (1,), 0.05)
    W_w = _nrm(ks[5], (C, C), 0.05)
    W_b = _nrm(ks[6], (C,), 0.05)
    # BatchNorm2d after W, eval mode: fold y_bn = gamma*(y-mean)/sqrt(var+eps)+beta.
    bn_g = 1.0 + _nrm(ks[7], (C,), 0.1)
    bn_b = _nrm(ks[8], (C,), 0.1)
    bn_mean = _nrm(ks[9], (C,), 0.1)
    bn_var = jnp.ones((C,), jnp.float32)
    scale = bn_g / jnp.sqrt(bn_var + 1e-5)
    # TODO(synk): verify TORR mode flags (theta bias-free, phi bias, sigmoid psi, BN in W)
    # against the reference GridAttentionBlock2D_TORR configuration.
    return dict(theta_w=theta_w, phi_w=phi_w, phi_b=phi_b, psi_w=psi_w, psi_b=psi_b,
                W_w=W_w * scale[None, :], W_b=(W_b - bn_mean) * scale + bn_b)


def init_params(key, cfg):
    C, nc = cfg["embed_dim"], cfg["num_class"]
    ks = jax.random.split(key, 8)
    return {
        "v00_vit": init_vit(ks[0], cfg),
        "v12_vit": init_vit(ks[1], cfg),
        "v24_vit": init_vit(ks[2], cfg),
        "att_v00": init_gate(ks[3], C, cfg["inter"]),
        "att_v12": init_gate(ks[4], C, cfg["inter"]),
        "att_v24": init_gate(ks[5], C, cfg["inter"]),
        "concat_w": _nrm(ks[6], (3 * C, nc)),
        "concat_b": _nrm(ks[7], (nc,)),
    }


def pack_params(params, cfg):
    """Stack the 3 streams (and depth), pre-cast MXU weights to bf16, fold cls/pos/
    patch-bias into a single addend and the hd**-0.5 scale into the q columns.
    Done ONCE outside jit so the hot path has no pad / cast / slice traffic."""
    f32, bf16 = jnp.float32, jnp.bfloat16
    C, heads = cfg["embed_dim"], cfg["heads"]
    hd = C // heads
    vits = [params["v00_vit"], params["v12_vit"], params["v24_vit"]]
    gates = [params["att_v00"], params["att_v12"], params["att_v24"]]

    def vstack(name):
        return jnp.stack([v[name] for v in vits], axis=0)

    def bstack(name):
        return jnp.stack(
            [jnp.stack([blk[name] for blk in v["blocks"]], axis=0) for v in vits], axis=0)

    def gstack(name):
        return jnp.stack([g[name] for g in gates], axis=0)

    addend = []
    for v in vits:
        cls_row = v["cls"][0] + v["pos"][0, :1]               # (1, C): cls + pos[0]
        rest = v["pos"][0, 1:] + v["patch_b"][None, :]        # (N, C): pos[i] + patch_b
        addend.append(jnp.concatenate([cls_row, rest], axis=0))

    # Fold attention scale into the q third of qkv: (xWq+bq)*scale == x(Wq*s)+(bq*s).
    qkv_w = bstack("qkv_w")                                   # (S, D, C, 3C)
    qkv_b = bstack("qkv_b")                                   # (S, D, 3C)
    q_scale = jnp.concatenate(
        [jnp.full((C,), hd ** -0.5, f32), jnp.ones((2 * C,), f32)], axis=0)
    qkv_w = qkv_w * q_scale[None, None, None, :]
    qkv_b = qkv_b * q_scale[None, None, :]

    return dict(
        addend=jnp.stack(addend, axis=0).astype(f32),          # (S, T, C)
        patch_w=vstack("patch_w").astype(bf16),                # (S, PD, C)
        ln1_g=bstack("ln1_g")[:, :, None, :].astype(f32),
        ln1_b=bstack("ln1_b")[:, :, None, :].astype(f32),
        qkv_w=qkv_w.astype(bf16),
        qkv_b=qkv_b[:, :, None, :].astype(f32),
        proj_w=bstack("proj_w").astype(bf16),
        proj_b=bstack("proj_b")[:, :, None, :].astype(f32),
        ln2_g=bstack("ln2_g")[:, :, None, :].astype(f32),
        ln2_b=bstack("ln2_b")[:, :, None, :].astype(f32),
        fc1_w=bstack("fc1_w").astype(bf16),
        fc1_b=bstack("fc1_b")[:, :, None, :].astype(f32),
        fc2_w=bstack("fc2_w").astype(bf16),
        fc2_b=bstack("fc2_b")[:, :, None, :].astype(f32),
        norm_g=vstack("norm_g")[:, None, :].astype(f32),
        norm_b=vstack("norm_b")[:, None, :].astype(f32),
        theta_w=gstack("theta_w").astype(bf16),
        phi_w=gstack("phi_w").astype(bf16),
        phi_b=gstack("phi_b")[:, None, :].astype(f32),
        psi_w=gstack("psi_w")[:, :, 0][:, None, :].astype(f32),   # (S, 1, inter)
        psi_b=gstack("psi_b")[:, None, :].astype(f32),            # (S, 1, 1)
        W_w=gstack("W_w").astype(bf16),
        W_b=gstack("W_b")[:, None, :].astype(f32),
        head_w=params["concat_w"].astype(f32),                    # XLA head, keep f32
        head_b=params["concat_b"][None, :].astype(f32),
    )


# --------------------------------------------------------------------------- main
if __name__ == "__main__":
    # Small-but-consistent shapes: img 32x32, patch 16 -> 2x2 token grid (perfect
    # square, as vit_feat_to_grid requires); embed_dim 64, 4 heads, depth 2,
    # GridAttention inter_channels 32, num_class 3; 2 images per grid step.
    cfg = dict(img=32, patch=16, in_chans=3, embed_dim=64, depth=2, heads=4,
               inter=32, num_class=3, img_block=2)
    B = 2

    key = jax.random.PRNGKey(0)
    kp, k0, k1, k2 = jax.random.split(key, 4)
    params = init_params(kp, cfg)
    packed = pack_params(params, cfg)

    v00 = jax.random.normal(k0, (B, cfg["in_chans"], cfg["img"], cfg["img"]), jnp.float32)
    v12 = jax.random.normal(k1, (B, cfg["in_chans"], cfg["img"], cfg["img"]), jnp.float32)
    v24 = jax.random.normal(k2, (B, cfg["in_chans"], cfg["img"], cfg["img"]), jnp.float32)

    # Prefer single-buffered stream-invariant weights; fall back to default double
    # buffering if this Pallas build does not support pipeline_mode=pl.Buffered(1).
    logits, last_err = None, None
    for single_buffer in (True, False):
        try:
            forward = jax.jit(functools.partial(
                vit_gate_attention_forward, cfg=cfg,
                single_buffer_weights=single_buffer))
            logits = forward(packed, v00, v12, v24)
            jax.block_until_ready(logits)
            break
        except Exception as e:  # noqa: BLE001 - retry once without single buffering
            last_err = e
    if logits is None:
        raise last_err

    assert logits.shape == (B, cfg["num_class"]), logits.shape
    assert bool(jnp.all(jnp.isfinite(logits)))
    print("KERNEL_OK")
</pallas_src>

<mosaic_0001>
module attributes {stable_mosaic.version = 11 : i64} {
  func.func @_vit_layer_kernel(%arg0: i32, %arg1: i32, %arg2: i32, %arg3: memref<1x2x5x768xbf16, #tpu.memory_space<vmem>>, %arg4: memref<1x5x64xf32, #tpu.memory_space<vmem>>, %arg5: memref<1x768x64xbf16, #tpu.memory_space<vmem>>, %arg6: memref<1x1x1x64xf32, #tpu.memory_space<vmem>>, %arg7: memref<1x1x1x64xf32, #tpu.memory_space<vmem>>, %arg8: memref<1x1x64x192xbf16, #tpu.memory_space<vmem>>, %arg9: memref<1x1x1x192xf32, #tpu.memory_space<vmem>>, %arg10: memref<1x1x64x64xbf16, #tpu.memory_space<vmem>>, %arg11: memref<1x1x1x64xf32, #tpu.memory_space<vmem>>, %arg12: memref<1x1x1x64xf32, #tpu.memory_space<vmem>>, %arg13: memref<1x1x1x64xf32, #tpu.memory_space<vmem>>, %arg14: memref<1x1x64x256xbf16, #tpu.memory_space<vmem>>, %arg15: memref<1x1x1x256xf32, #tpu.memory_space<vmem>>, %arg16: memref<1x1x256x64xbf16, #tpu.memory_space<vmem>>, %arg17: memref<1x1x1x64xf32, #tpu.memory_space<vmem>>, %arg18: memref<1x1x64xf32, #tpu.memory_space<vmem>>, %arg19: memref<1x1x64xf32, #tpu.memory_space<vmem>>, %arg20: memref<1x64x32xbf16, #tpu.memory_space<vmem>>, %arg21: memref<1x64x32xbf16, #tpu.memory_space<vmem>>, %arg22: memref<1x1x32xf32, #tpu.memory_space<vmem>>, %arg23: memref<1x1x32xf32, #tpu.memory_space<vmem>>, %arg24: memref<1x1x1xf32, #tpu.memory_space<vmem>>, %arg25: memref<1x64x64xbf16, #tpu.memory_space<vmem>>, %arg26: memref<1x1x64xf32, #tpu.memory_space<vmem>>, %arg27: memref<1x2x1x64xf32, #tpu.memory_space<vmem>>, %arg28: memref<2x5x64xf32, #tpu.memory_space<vmem>>, %arg29: memref<5x64xbf16, #tpu.memory_space<vmem>>) attributes {dimension_semantics = [#tpu.dimension_semantics<parallel>, #tpu.dimension_semantics<parallel>, #tpu.dimension_semantics<arbitrary>], iteration_bounds = array<i64: 3, 1, 2>, scalar_prefetch = 0 : i64, scratch_operands = 2 : i64, tpu.core_type = #tpu.core_type<tc>, window_params = [{transform_indices = @transform_0, window_bounds = array<i64: 1, 2, 5, 768>}, {pipeline_mode = #tpu.pipeline_mode<synchronous>, transform_indices = @transform_1, window_bounds = array<i64: 1, 5, 64>}, {pipeline_mode = #tpu.pipeline_mode<synchronous>, transform_indices = @transform_2, window_bounds = array<i64: 1, 768, 64>}, {transform_indices = @transform_3, window_bounds = array<i64: 1, 1, 1, 64>}, {transform_indices = @transform_4, window_bounds = array<i64: 1, 1, 1, 64>}, {transform_indices = @transform_5, window_bounds = array<i64: 1, 1, 64, 192>}, {transform_indices = @transform_6, window_bounds = array<i64: 1, 1, 1, 192>}, {transform_indices = @transform_7, window_bounds = array<i64: 1, 1, 64, 64>}, {transform_indices = @transform_8, window_bounds = array<i64: 1, 1, 1, 64>}, {transform_indices = @transform_9, window_bounds = array<i64: 1, 1, 1, 64>}, {transform_indices = @transform_10, window_bounds = array<i64: 1, 1, 1, 64>}, {transform_indices = @transform_11, window_bounds = array<i64: 1, 1, 64, 256>}, {transform_indices = @transform_12, window_bounds = array<i64: 1, 1, 1, 256>}, {transform_indices = @transform_13, window_bounds = array<i64: 1, 1, 256, 64>}, {transform_indices = @transform_14, window_bounds = array<i64: 1, 1, 1, 64>}, {pipeline_mode = #tpu.pipeline_mode<synchronous>, transform_indices = @transform_15, window_bounds = array<i64: 1, 1, 64>}, {pipeline_mode = #tpu.pipeline_mode<synchronous>, transform_indices = @transform_16, window_bounds = array<i64: 1, 1, 64>}, {pipeline_mode = #tpu.pipeline_mode<synchronous>, transform_indices = @transform_17, window_bounds = array<i64: 1, 64, 32>}, {pipeline_mode = #tpu.pipeline_mode<synchronous>, transform_indices = @transform_18, window_bounds = array<i64: 1, 64, 32>}, {pipeline_mode = #tpu.pipeline_mode<synchronous>, transform_indices = @transform_19, window_bounds = array<i64: 1, 1, 32>}, {pipeline_mode = #tpu.pipeline_mode<synchronous>, transform_indices = @transform_20, window_bounds = array<i64: 1, 1, 32>}, {pipeline_mode = #tpu.pipeline_mode<synchronous>, transform_indices = @transform_21, window_bounds = array<i64: 1, 1, 1>}, {pipeline_mode = #tpu.pipeline_mode<synchronous>, transform_indices = @transform_22, window_bounds = array<i64: 1, 64, 64>}, {pipeline_mode = #tpu.pipeline_mode<synchronous>, transform_indices = @transform_23, window_bounds = array<i64: 1, 1, 64>}, {transform_indices = @transform_24, window_bounds = array<i64: 1, 2, 1, 64>}]} {
    %c0_i32 = arith.constant 0 : i32
    %0 = arith.cmpi eq, %arg2, %c0_i32 : i32
    %1 = arith.extui %0 : i1 to i32
    %c0_i32_0 = arith.constant 0 : i32
    %2 = arith.cmpi ne, %1, %c0_i32_0 : i32
    scf.if %2 {
      %c0_168 = arith.constant 0 : index
      %c0_169 = arith.constant 0 : index
      %c0_170 = arith.constant 0 : index
      %420 = vector.load %arg5[%c0_168, %c0_169, %c0_170] : memref<1x768x64xbf16, #tpu.memory_space<vmem>>, vector<1x768x64xbf16>
      %421 = vector.shape_cast %420 : vector<1x768x64xbf16> to vector<768x64xbf16>
      %c0_171 = arith.constant 0 : index
      %c0_172 = arith.constant 0 : index
      %c0_173 = arith.constant 0 : index
      %422 = vector.load %arg4[%c0_171, %c0_172, %c0_173] : memref<1x5x64xf32, #tpu.memory_space<vmem>>, vector<1x5x64xf32>
      %423 = vector.shape_cast %422 : vector<1x5x64xf32> to vector<5x64xf32>
      %c0_174 = arith.constant 0 : index
      %c0_175 = arith.constant 0 : index
      %c0_176 = arith.constant 0 : index
      %c0_177 = arith.constant 0 : index
      %424 = vector.load %arg3[%c0_174, %c0_175, %c0_176, %c0_177] : memref<1x2x5x768xbf16, #tpu.memory_space<vmem>>, vector<1x1x5x768xbf16>
      %425 = vector.shape_cast %424 : vector<1x1x5x768xbf16> to vector<5x768xbf16>
      %cst_178 = arith.constant dense<0.000000e+00> : vector<5x64xf32>
      %426 = tpu.matmul %425, %421, %cst_178 {dimension_numbers = #tpu.dot_dimension_numbers<[1], [0], [0], [1], [0, 0, 1, 1], [], []>} : vector<5x768xbf16>, vector<768x64xbf16>, vector<5x64xf32> -> vector<5x64xf32>
      %427 = arith.addf %426, %423 : vector<5x64xf32>
      %c0_179 = arith.constant 0 : index
      %c0_180 = arith.constant 0 : index
      %c0_181 = arith.constant 0 : index
      %428 = vector.load %arg28[%c0_179, %c0_180, %c0_181] : memref<2x5x64xf32, #tpu.memory_space<vmem>>, vector<1x5x64xf32>
      %429 = vector.shape_cast %428 : vector<1x5x64xf32> to vector<5x64xf32>
      %430 = vector.shape_cast %427 : vector<5x64xf32> to vector<1x5x64xf32>
      tpu.vector_store %arg28[%c0_179, %c0_180, %c0_181], %430 {strides = array<i32>} : memref<2x5x64xf32, #tpu.memory_space<vmem>>, vector<1x5x64xf32>,
      %c0_182 = arith.constant 0 : index
      %c1_183 = arith.constant 1 : index
      %c0_184 = arith.constant 0 : index
      %c0_185 = arith.constant 0 : index
      %431 = vector.load %arg3[%c0_182, %c1_183, %c0_184, %c0_185] : memref<1x2x5x768xbf16, #tpu.memory_space<vmem>>, vector<1x1x5x768xbf16>
      %432 = vector.shape_cast %431 : vector<1x1x5x768xbf16> to vector<5x768xbf16>
      %cst_186 = arith.constant dense<0.000000e+00> : vector<5x64xf32>
      %433 = tpu.matmul %432, %421, %cst_186 {dimension_numbers = #tpu.dot_dimension_numbers<[1], [0], [0], [1], [0, 0, 1, 1], [], []>} : vector<5x768xbf16>, vector<768x64xbf16>, vector<5x64xf32> -> vector<5x64xf32>
      %434 = arith.addf %433, %423 : vector<5x64xf32>
      %c1_187 = arith.constant 1 : index
      %c0_188 = arith.constant 0 : index
      %c0_189 = arith.constant 0 : index
      %435 = vector.load %arg28[%c1_187, %c0_188, %c0_189] : memref<2x5x64xf32, #tpu.memory_space<vmem>>, vector<1x5x64xf32>
      %436 = vector.shape_cast %435 : vector<1x5x64xf32> to vector<5x64xf32>
      %437 = vector.shape_cast %434 : vector<5x64xf32> to vector<1x5x64xf32>
      tpu.vector_store %arg28[%c1_187, %c0_188, %c0_189], %437 {strides = array<i32>} : memref<2x5x64xf32, #tpu.memory_space<vmem>>, vector<1x5x64xf32>,
    } else {
    }
    %c0 = arith.constant 0 : index
    %c0_1 = arith.constant 0 : index
    %c0_2 = arith.constant 0 : index
    %c0_3 = arith.constant 0 : index
    %3 = vector.load %arg6[%c0, %c0_1, %c0_2, %c0_3] : memref<1x1x1x64xf32, #tpu.memory_space<vmem>>, vector<1x1x1x64xf32>
    %4 = vector.shape_cast %3 : vector<1x1x1x64xf32> to vector<1x64xf32>
    %c0_4 = arith.constant 0 : index
    %c0_5 = arith.constant 0 : index
    %c0_6 = arith.constant 0 : index
    %c0_7 = arith.constant 0 : index
    %5 = vector.load %arg7[%c0_4, %c0_5, %c0_6, %c0_7] : memref<1x1x1x64xf32, #tpu.memory_space<vmem>>, vector<1x1x1x64xf32>
    %6 = vector.shape_cast %5 : vector<1x1x1x64xf32> to vector<1x64xf32>
    %c0_8 = arith.constant 0 : index
    %c0_9 = arith.constant 0 : index
    %c0_10 = arith.constant 0 : index
    %c0_11 = arith.constant 0 : index
    %7 = vector.load %arg12[%c0_8, %c0_9, %c0_10, %c0_11] : memref<1x1x1x64xf32, #tpu.memory_space<vmem>>, vector<1x1x1x64xf32>
    %8 = vector.shape_cast %7 : vector<1x1x1x64xf32> to vector<1x64xf32>
    %c0_12 = arith.constant 0 : index
    %c0_13 = arith.constant 0 : index
    %c0_14 = arith.constant 0 : index
    %c0_15 = arith.constant 0 : index
    %9 = vector.load %arg13[%c0_12, %c0_13, %c0_14, %c0_15] : memref<1x1x1x64xf32, #tpu.memory_space<vmem>>, vector<1x1x1x64xf32>
    %10 = vector.shape_cast %9 : vector<1x1x1x64xf32> to vector<1x64xf32>
    %c0_16 = arith.constant 0 : index
    %c0_17 = arith.constant 0 : index
    %c0_18 = arith.constant 0 : index
    %c0_19 = arith.constant 0 : index
    %11 = vector.load %arg8[%c0_16, %c0_17, %c0_18, %c0_19] : memref<1x1x64x192xbf16, #tpu.memory_space<vmem>>, vector<1x1x64x192xbf16>
    %12 = vector.shape_cast %11 : vector<1x1x64x192xbf16> to vector<64x192xbf16>
    %c0_20 = arith.constant 0 : index
    %c0_21 = arith.constant 0 : index
    %c0_22 = arith.constant 0 : index
    %c0_23 = arith.constant 0 : index
    %13 = vector.load %arg9[%c0_20, %c0_21, %c0_22, %c0_23] : memref<1x1x1x192xf32, #tpu.memory_space<vmem>>, vector<1x1x1x192xf32>
    %14 = vector.shape_cast %13 : vector<1x1x1x192xf32> to vector<1x192xf32>
    %c0_24 = arith.constant 0 : index
    %c0_25 = arith.constant 0 : index
    %c0_26 = arith.constant 0 : index
    %c0_27 = arith.constant 0 : index
    %15 = vector.load %arg10[%c0_24, %c0_25, %c0_26, %c0_27] : memref<1x1x64x64xbf16, #tpu.memory_space<vmem>>, vector<1x1x64x64xbf16>
    %16 = vector.shape_cast %15 : vector<1x1x64x64xbf16> to vector<64x64xbf16>
    %c0_28 = arith.constant 0 : index
    %c0_29 = arith.constant 0 : index
    %c0_30 = arith.constant 0 : index
    %c0_31 = arith.constant 0 : index
    %17 = vector.load %arg11[%c0_28, %c0_29, %c0_30, %c0_31] : memref<1x1x1x64xf32, #tpu.memory_space<vmem>>, vector<1x1x1x64xf32>
    %18 = vector.shape_cast %17 : vector<1x1x1x64xf32> to vector<1x64xf32>
    %c0_32 = arith.constant 0 : index
    %c0_33 = arith.constant 0 : index
    %c0_34 = arith.constant 0 : index
    %c0_35 = arith.constant 0 : index
    %19 = vector.load %arg14[%c0_32, %c0_33, %c0_34, %c0_35] : memref<1x1x64x256xbf16, #tpu.memory_space<vmem>>, vector<1x1x64x256xbf16>
    %20 = vector.shape_cast %19 : vector<1x1x64x256xbf16> to vector<64x256xbf16>
    %c0_36 = arith.constant 0 : index
    %c0_37 = arith.constant 0 : index
    %c0_38 = arith.constant 0 : index
    %c0_39 = arith.constant 0 : index
    %21 = vector.load %arg15[%c0_36, %c0_37, %c0_38, %c0_39] : memref<1x1x1x256xf32, #tpu.memory_space<vmem>>, vector<1x1x1x256xf32>
    %22 = vector.shape_cast %21 : vector<1x1x1x256xf32> to vector<1x256xf32>
    %c0_40 = arith.constant 0 : index
    %c0_41 = arith.constant 0 : index
    %c0_42 = arith.constant 0 : index
    %c0_43 = arith.constant 0 : index
    %23 = vector.load %arg16[%c0_40, %c0_41, %c0_42, %c0_43] : memref<1x1x256x64xbf16, #tpu.memory_space<vmem>>, vector<1x1x256x64xbf16>
    %24 = vector.shape_cast %23 : vector<1x1x256x64xbf16> to vector<256x64xbf16>
    %c0_44 = arith.constant 0 : index
    %c0_45 = arith.constant 0 : index
    %c0_46 = arith.constant 0 : index
    %c0_47 = arith.constant 0 : index
    %25 = vector.load %arg17[%c0_44, %c0_45, %c0_46, %c0_47] : memref<1x1x1x64xf32, #tpu.memory_space<vmem>>, vector<1x1x1x64xf32>
    %26 = vector.shape_cast %25 : vector<1x1x1x64xf32> to vector<1x64xf32>
    %c0_48 = arith.constant 0 : index
    %c0_49 = arith.constant 0 : index
    %c0_50 = arith.constant 0 : index
    %27 = vector.load %arg28[%c0_48, %c0_49, %c0_50] : memref<2x5x64xf32, #tpu.memory_space<vmem>>, vector<1x5x64xf32>
    %28 = vector.shape_cast %27 : vector<1x5x64xf32> to vector<5x64xf32>
    %cst = arith.constant dense<0.000000e+00> : vector<5xf32>
    %29 = vector.multi_reduction <add>, %28, %cst [1] : vector<5x64xf32> to vector<5xf32>
    %30 = vector.shape_cast %29 : vector<5xf32> to vector<5x1xf32>
    %cst_51 = arith.constant 6.400000e+01 : f32
    %31 = vector.broadcast %cst_51 : f32 to vector<5x1xf32>
    %32 = arith.divf %30, %31 : vector<5x1xf32>
    %33 = vector.broadcast %32 : vector<5x1xf32> to vector<5x64xf32>
    %34 = arith.subf %28, %33 : vector<5x64xf32>
    %35 = arith.mulf %34, %34 : vector<5x64xf32>
    %cst_52 = arith.constant dense<0.000000e+00> : vector<5xf32>
    %36 = vector.multi_reduction <add>, %35, %cst_52 [1] : vector<5x64xf32> to vector<5xf32>
    %37 = vector.shape_cast %36 : vector<5xf32> to vector<5x1xf32>
    %cst_53 = arith.constant 6.400000e+01 : f32
    %38 = vector.broadcast %cst_53 : f32 to vector<5x1xf32>
    %39 = arith.divf %37, %38 : vector<5x1xf32>
    %40 = vector.broadcast %32 : vector<5x1xf32> to vector<5x64xf32>
    %41 = arith.subf %28, %40 : vector<5x64xf32>
    %cst_54 = arith.constant 9.99999997E-7 : f32
    %42 = vector.broadcast %cst_54 : f32 to vector<5x1xf32>
    %43 = arith.addf %39, %42 : vector<5x1xf32>
    %44 = math.rsqrt %43 : vector<5x1xf32>
    %45 = vector.broadcast %44 : vector<5x1xf32> to vector<5x64xf32>
    %46 = arith.mulf %41, %45 : vector<5x64xf32>
    %47 = vector.broadcast %4 : vector<1x64xf32> to vector<5x64xf32>
    %48 = arith.mulf %46, %47 : vector<5x64xf32>
    %49 = vector.broadcast %6 : vector<1x64xf32> to vector<5x64xf32>
    %50 = arith.addf %48, %49 : vector<5x64xf32>
    %51 = arith.truncf %50 : vector<5x64xf32> to vector<5x64xbf16>
    %cst_55 = arith.constant dense<0.000000e+00> : vector<5x192xf32>
    %52 = tpu.matmul %51, %12, %cst_55 {dimension_numbers = #tpu.dot_dimension_numbers<[1], [0], [0], [1], [0, 0, 1, 1], [], []>} : vector<5x64xbf16>, vector<64x192xbf16>, vector<5x192xf32> -> vector<5x192xf32>
    %53 = vector.broadcast %14 : vector<1x192xf32> to vector<5x192xf32>
    %54 = arith.addf %52, %53 : vector<5x192xf32>
    %55 = vector.extract_strided_slice %54 {offsets = [0, 0], sizes = [5, 64], strides = [1, 1]} : vector<5x192xf32> to vector<5x64xf32>
    %56 = vector.extract_strided_slice %54 {offsets = [0, 64], sizes = [5, 64], strides = [1, 1]} : vector<5x192xf32> to vector<5x64xf32>
    %57 = vector.extract_strided_slice %54 {offsets = [0, 128], sizes = [5, 64], strides = [1, 1]} : vector<5x192xf32> to vector<5x64xf32>
    %58 = vector.extract_strided_slice %55 {offsets = [0, 0], sizes = [5, 16], strides = [1, 1]} : vector<5x64xf32> to vector<5x16xf32>
    %59 = arith.truncf %58 : vector<5x16xf32> to vector<5x16xbf16>
    %60 = vector.extract_strided_slice %56 {offsets = [0, 0], sizes = [5, 16], strides = [1, 1]} : vector<5x64xf32> to vector<5x16xf32>
    %61 = arith.truncf %60 : vector<5x16xf32> to vector<5x16xbf16>
    %cst_56 = arith.constant dense<0.000000e+00> : vector<5x5xf32>
    %62 = tpu.matmul %59, %61, %cst_56 {dimension_numbers = #tpu.dot_dimension_numbers<[1], [1], [0], [0], [0, 0, 1, 0], [], []>} : vector<5x16xbf16>, vector<5x16xbf16>, vector<5x5xf32> -> vector<5x5xf32>
    %cst_57 = arith.constant dense<0xFF800000> : vector<5xf32>
    %63 = vector.multi_reduction <maximumf>, %62, %cst_57 [1] : vector<5x5xf32> to vector<5xf32>
    %64 = vector.shape_cast %63 : vector<5xf32> to vector<5x1xf32>
    %65 = vector.broadcast %64 : vector<5x1xf32> to vector<5x5xf32>
    %66 = arith.subf %62, %65 : vector<5x5xf32>
    %67 = math.exp %66 : vector<5x5xf32>
    %cst_58 = arith.constant dense<0.000000e+00> : vector<5xf32>
    %68 = vector.multi_reduction <add>, %67, %cst_58 [1] : vector<5x5xf32> to vector<5xf32>
    %69 = vector.shape_cast %68 : vector<5xf32> to vector<5x1xf32>
    %70 = tpu.reciprocal %69 {approx = true} : vector<5x1xf32> -> vector<5x1xf32>
    %71 = vector.broadcast %70 : vector<5x1xf32> to vector<5x5xf32>
    %72 = arith.mulf %67, %71 : vector<5x5xf32>
    %73 = arith.truncf %72 : vector<5x5xf32> to vector<5x5xbf16>
    %74 = vector.extract_strided_slice %57 {offsets = [0, 0], sizes = [5, 16], strides = [1, 1]} : vector<5x64xf32> to vector<5x16xf32>
    %75 = arith.truncf %74 : vector<5x16xf32> to vector<5x16xbf16>
    %cst_59 = arith.constant dense<0.000000e+00> : vector<5x16xf32>
    %76 = tpu.matmul %73, %75, %cst_59 {dimension_numbers = #tpu.dot_dimension_numbers<[1], [0], [0], [1], [0, 0, 1, 1], [], []>} : vector<5x5xbf16>, vector<5x16xbf16>, vector<5x16xf32> -> vector<5x16xf32>
    %77 = arith.truncf %76 : vector<5x16xf32> to vector<5x16xbf16>
    %c0_60 = arith.constant 0 : index
    %c0_61 = arith.constant 0 : index
    %78 = vector.load %arg29[%c0_60, %c0_61] : memref<5x64xbf16, #tpu.memory_space<vmem>>, vector<5x16xbf16>
    tpu.vector_store %arg29[%c0_60, %c0_61], %77 {strides = array<i32>} : memref<5x64xbf16, #tpu.memory_space<vmem>>, vector<5x16xbf16>,
    %79 = vector.extract_strided_slice %55 {offsets = [0, 16], sizes = [5, 16], strides = [1, 1]} : vector<5x64xf32> to vector<5x16xf32>
    %80 = arith.truncf %79 : vector<5x16xf32> to vector<5x16xbf16>
    %81 = vector.extract_strided_slice %56 {offsets = [0, 16], sizes = [5, 16], strides = [1, 1]} : vector<5x64xf32> to vector<5x16xf32>
    %82 = arith.truncf %81 : vector<5x16xf32> to vector<5x16xbf16>
    %cst_62 = arith.constant dense<0.000000e+00> : vector<5x5xf32>
    %83 = tpu.matmul %80, %82, %cst_62 {dimension_numbers = #tpu.dot_dimension_numbers<[1], [1], [0], [0], [0, 0, 1, 0], [], []>} : vector<5x16xbf16>, vector<5x16xbf16>, vector<5x5xf32> -> vector<5x5xf32>
    %cst_63 = arith.constant dense<0xFF800000> : vector<5xf32>
    %84 = vector.multi_reduction <maximumf>, %83, %cst_63 [1] : vector<5x5xf32> to vector<5xf32>
    %85 = vector.shape_cast %84 : vector<5xf32> to vector<5x1xf32>
    %86 = vector.broadcast %85 : vector<5x1xf32> to vector<5x5xf32>
    %87 = arith.subf %83, %86 : vector<5x5xf32>
    %88 = math.exp %87 : vector<5x5xf32>
    %cst_64 = arith.constant dense<0.000000e+00> : vector<5xf32>
    %89 = vector.multi_reduction <add>, %88, %cst_64 [1] : vector<5x5xf32> to vector<5xf32>
    %90 = vector.shape_cast %89 : vector<5xf32> to vector<5x1xf32>
    %91 = tpu.reciprocal %90 {approx = true} : vector<5x1xf32> -> vector<5x1xf32>
    %92 = vector.broadcast %91 : vector<5x1xf32> to vector<5x5xf32>
    %93 = arith.mulf %88, %92 : vector<5x5xf32>
    %94 = arith.truncf %93 : vector<5x5xf32> to vector<5x5xbf16>
    %95 = vector.extract_strided_slice %57 {offsets = [0, 16], sizes = [5, 16], strides = [1, 1]} : vector<5x64xf32> to vector<5x16xf32>
    %96 = arith.truncf %95 : vector<5x16xf32> to vector<5x16xbf16>
    %cst_65 = arith.constant dense<0.000000e+00> : vector<5x16xf32>
    %97 = tpu.matmul %94, %96, %cst_65 {dimension_numbers = #tpu.dot_dimension_numbers<[1], [0], [0], [1], [0, 0, 1, 1], [], []>} : vector<5x5xbf16>, vector<5x16xbf16>, vector<5x16xf32> -> vector<5x16xf32>
    %98 = arith.truncf %97 : vector<5x16xf32> to vector<5x16xbf16>
    %c0_66 = arith.constant 0 : index
    %c16 = arith.constant 16 : index
    %99 = vector.load %arg29[%c0_66, %c16] : memref<5x64xbf16, #tpu.memory_space<vmem>>, vector<5x16xbf16>
    tpu.vector_store %arg29[%c0_66, %c16], %98 {strides = array<i32>} : memref<5x64xbf16, #tpu.memory_space<vmem>>, vector<5x16xbf16>,
    %100 = vector.extract_strided_slice %55 {offsets = [0, 32], sizes = [5, 16], strides = [1, 1]} : vector<5x64xf32> to vector<5x16xf32>
    %101 = arith.truncf %100 : vector<5x16xf32> to vector<5x16xbf16>
    %102 = vector.extract_strided_slice %56 {offsets = [0, 32], sizes = [5, 16], strides = [1, 1]} : vector<5x64xf32> to vector<5x16xf32>
    %103 = arith.truncf %102 : vector<5x16xf32> to vector<5x16xbf16>
    %cst_67 = arith.constant dense<0.000000e+00> : vector<5x5xf32>
    %104 = tpu.matmul %101, %103, %cst_67 {dimension_numbers = #tpu.dot_dimension_numbers<[1], [1], [0], [0], [0, 0, 1, 0], [], []>} : vector<5x16xbf16>, vector<5x16xbf16>, vector<5x5xf32> -> vector<5x5xf32>
    %cst_68 = arith.constant dense<0xFF800000> : vector<5xf32>
    %105 = vector.multi_reduction <maximumf>, %104, %cst_68 [1] : vector<5x5xf32> to vector<5xf32>
    %106 = vector.shape_cast %105 : vector<5xf32> to vector<5x1xf32>
    %107 = vector.broadcast %106 : vector<5x1xf32> to vector<5x5xf32>
    %108 = arith.subf %104, %107 : vector<5x5xf32>
    %109 = math.exp %108 : vector<5x5xf32>
    %cst_69 = arith.constant dense<0.000000e+00> : vector<5xf32>
    %110 = vector.multi_reduction <add>, %109, %cst_69 [1] : vector<5x5xf32> to vector<5xf32>
    %111 = vector.shape_cast %110 : vector<5xf32> to vector<5x1xf32>
    %112 = tpu.reciprocal %111 {approx = true} : vector<5x1xf32> -> vector<5x1xf32>
    %113 = vector.broadcast %112 : vector<5x1xf32> to vector<5x5xf32>
    %114 = arith.mulf %109, %113 : vector<5x5xf32>
    %115 = arith.truncf %114 : vector<5x5xf32> to vector<5x5xbf16>
    %116 = vector.extract_strided_slice %57 {offsets = [0, 32], sizes = [5, 16], strides = [1, 1]} : vector<5x64xf32> to vector<5x16xf32>
    %117 = arith.truncf %116 : vector<5x16xf32> to vector<5x16xbf16>
    %cst_70 = arith.constant dense<0.000000e+00> : vector<5x16xf32>
    %118 = tpu.matmul %115, %117, %cst_70 {dimension_numbers = #tpu.dot_dimension_numbers<[1], [0], [0], [1], [0, 0, 1, 1], [], []>} : vector<5x5xbf16>, vector<5x16xbf16>, vector<5x16xf32> -> vector<5x16xf32>
    %119 = arith.truncf %118 : vector<5x16xf32> to vector<5x16xbf16>
    %c0_71 = arith.constant 0 : index
    %c32 = arith.constant 32 : index
    %120 = vector.load %arg29[%c0_71, %c32] : memref<5x64xbf16, #tpu.memory_space<vmem>>, vector<5x16xbf16>
    tpu.vector_store %arg29[%c0_71, %c32], %119 {strides = array<i32>} : memref<5x64xbf16, #tpu.memory_space<vmem>>, vector<5x16xbf16>,
    %121 = vector.extract_strided_slice %55 {offsets = [0, 48], sizes = [5, 16], strides = [1, 1]} : vector<5x64xf32> to vector<5x16xf32>
    %122 = arith.truncf %121 : vector<5x16xf32> to vector<5x16xbf16>
    %123 = vector.extract_strided_slice %56 {offsets = [0, 48], sizes = [5, 16], strides = [1, 1]} : vector<5x64xf32> to vector<5x16xf32>
    %124 = arith.truncf %123 : vector<5x16xf32> to vector<5x16xbf16>
    %cst_72 = arith.constant dense<0.000000e+00> : vector<5x5xf32>
    %125 = tpu.matmul %122, %124, %cst_72 {dimension_numbers = #tpu.dot_dimension_numbers<[1], [1], [0], [0], [0, 0, 1, 0], [], []>} : vector<5x16xbf16>, vector<5x16xbf16>, vector<5x5xf32> -> vector<5x5xf32>
    %cst_73 = arith.constant dense<0xFF800000> : vector<5xf32>
    %126 = vector.multi_reduction <maximumf>, %125, %cst_73 [1] : vector<5x5xf32> to vector<5xf32>
    %127 = vector.shape_cast %126 : vector<5xf32> to vector<5x1xf32>
    %128 = vector.broadcast %127 : vector<5x1xf32> to vector<5x5xf32>
    %129 = arith.subf %125, %128 : vector<5x5xf32>
    %130 = math.exp %129 : vector<5x5xf32>
    %cst_74 = arith.constant dense<0.000000e+00> : vector<5xf32>
    %131 = vector.multi_reduction <add>, %130, %cst_74 [1] : vector<5x5xf32> to vector<5xf32>
    %132 = vector.shape_cast %131 : vector<5xf32> to vector<5x1xf32>
    %133 = tpu.reciprocal %132 {approx = true} : vector<5x1xf32> -> vector<5x1xf32>
    %134 = vector.broadcast %133 : vector<5x1xf32> to vector<5x5xf32>
    %135 = arith.mulf %130, %134 : vector<5x5xf32>
    %136 = arith.truncf %135 : vector<5x5xf32> to vector<5x5xbf16>
    %137 = vector.extract_strided_slice %57 {offsets = [0, 48], sizes = [5, 16], strides = [1, 1]} : vector<5x64xf32> to vector<5x16xf32>
    %138 = arith.truncf %137 : vector<5x16xf32> to vector<5x16xbf16>
    %cst_75 = arith.constant dense<0.000000e+00> : vector<5x16xf32>
    %139 = tpu.matmul %136, %138, %cst_75 {dimension_numbers = #tpu.dot_dimension_numbers<[1], [0], [0], [1], [0, 0, 1, 1], [], []>} : vector<5x5xbf16>, vector<5x16xbf16>, vector<5x16xf32> -> vector<5x16xf32>
    %140 = arith.truncf %139 : vector<5x16xf32> to vector<5x16xbf16>
    %c0_76 = arith.constant 0 : index
    %c48 = arith.constant 48 : index
    %141 = vector.load %arg29[%c0_76, %c48] : memref<5x64xbf16, #tpu.memory_space<vmem>>, vector<5x16xbf16>
    tpu.vector_store %arg29[%c0_76, %c48], %140 {strides = array<i32>} : memref<5x64xbf16, #tpu.memory_space<vmem>>, vector<5x16xbf16>,
    %c0_77 = arith.constant 0 : index
    %c0_78 = arith.constant 0 : index
    %142 = vector.load %arg29[%c0_77, %c0_78] : memref<5x64xbf16, #tpu.memory_space<vmem>>, vector<5x64xbf16>
    %cst_79 = arith.constant dense<0.000000e+00> : vector<5x64xf32>
    %143 = tpu.matmul %142, %16, %cst_79 {dimension_numbers = #tpu.dot_dimension_numbers<[1], [0], [0], [1], [0, 0, 1, 1], [], []>} : vector<5x64xbf16>, vector<64x64xbf16>, vector<5x64xf32> -> vector<5x64xf32>
    %144 = arith.addf %28, %143 : vector<5x64xf32>
    %145 = vector.broadcast %18 : vector<1x64xf32> to vector<5x64xf32>
    %146 = arith.addf %144, %145 : vector<5x64xf32>
    %cst_80 = arith.constant dense<0.000000e+00> : vector<5xf32>
    %147 = vector.multi_reduction <add>, %146, %cst_80 [1] : vector<5x64xf32> to vector<5xf32>
    %148 = vector.shape_cast %147 : vector<5xf32> to vector<5x1xf32>
    %cst_81 = arith.constant 6.400000e+01 : f32
    %149 = vector.broadcast %cst_81 : f32 to vector<5x1xf32>
    %150 = arith.divf %148, %149 : vector<5x1xf32>
    %151 = vector.broadcast %150 : vector<5x1xf32> to vector<5x64xf32>
    %152 = arith.subf %146, %151 : vector<5x64xf32>
    %153 = arith.mulf %152, %152 : vector<5x64xf32>
    %cst_82 = arith.constant dense<0.000000e+00> : vector<5xf32>
    %154 = vector.multi_reduction <add>, %153, %cst_82 [1] : vector<5x64xf32> to vector<5xf32>
    %155 = vector.shape_cast %154 : vector<5xf32> to vector<5x1xf32>
    %cst_83 = arith.constant 6.400000e+01 : f32
    %156 = vector.broadcast %cst_83 : f32 to vector<5x1xf32>
    %157 = arith.divf %155, %156 : vector<5x1xf32>
    %158 = vector.broadcast %150 : vector<5x1xf32> to vector<5x64xf32>
    %159 = arith.subf %146, %158 : vector<5x64xf32>
    %cst_84 = arith.constant 9.99999997E-7 : f32
    %160 = vector.broadcast %cst_84 : f32 to vector<5x1xf32>
    %161 = arith.addf %157, %160 : vector<5x1xf32>
    %162 = math.rsqrt %161 : vector<5x1xf32>
    %163 = vector.broadcast %162 : vector<5x1xf32> to vector<5x64xf32>
    %164 = arith.mulf %159, %163 : vector<5x64xf32>
    %165 = vector.broadcast %8 : vector<1x64xf32> to vector<5x64xf32>
    %166 = arith.mulf %164, %165 : vector<5x64xf32>
    %167 = vector.broadcast %10 : vector<1x64xf32> to vector<5x64xf32>
    %168 = arith.addf %166, %167 : vector<5x64xf32>
    %169 = arith.truncf %168 : vector<5x64xf32> to vector<5x64xbf16>
    %cst_85 = arith.constant dense<0.000000e+00> : vector<5x256xf32>
    %170 = tpu.matmul %169, %20, %cst_85 {dimension_numbers = #tpu.dot_dimension_numbers<[1], [0], [0], [1], [0, 0, 1, 1], [], []>} : vector<5x64xbf16>, vector<64x256xbf16>, vector<5x256xf32> -> vector<5x256xf32>
    %171 = vector.broadcast %22 : vector<1x256xf32> to vector<5x256xf32>
    %172 = arith.addf %170, %171 : vector<5x256xf32>
    %cst_86 = arith.constant 5.000000e-01 : f32
    %173 = vector.broadcast %cst_86 : f32 to vector<5x256xf32>
    %174 = arith.mulf %173, %172 : vector<5x256xf32>
    %cst_87 = arith.constant 0.707106769 : f32
    %175 = vector.broadcast %cst_87 : f32 to vector<5x256xf32>
    %176 = arith.mulf %172, %175 : vector<5x256xf32>
    %cst_88 = arith.constant 0.000000e+00 : f32
    %177 = vector.broadcast %cst_88 : f32 to vector<5x256xf32>
    %178 = arith.cmpf oge, %176, %177 : vector<5x256xf32>
    %cst_89 = arith.constant 1.000000e+00 : f32
    %cst_90 = arith.constant -1.000000e+00 : f32
    %179 = vector.broadcast %cst_89 : f32 to vector<5x256xf32>
    %180 = vector.broadcast %cst_90 : f32 to vector<5x256xf32>
    %181 = arith.select %178, %179, %180 : vector<5x256xi1>, vector<5x256xf32>
    %182 = math.absf %176 : vector<5x256xf32>
    %cst_91 = arith.constant 0.327591091 : f32
    %183 = vector.broadcast %cst_91 : f32 to vector<5x256xf32>
    %184 = arith.mulf %183, %182 : vector<5x256xf32>
    %cst_92 = arith.constant 1.000000e+00 : f32
    %185 = vector.broadcast %cst_92 : f32 to vector<5x256xf32>
    %186 = arith.addf %185, %184 : vector<5x256xf32>
    %cst_93 = arith.constant 1.000000e+00 : f32
    %187 = vector.broadcast %cst_93 : f32 to vector<5x256xf32>
    %188 = arith.divf %187, %186 : vector<5x256xf32>
    %cst_94 = arith.constant 1.06140542 : f32
    %189 = vector.broadcast %cst_94 : f32 to vector<5x256xf32>
    %190 = arith.mulf %189, %188 : vector<5x256xf32>
    %cst_95 = arith.constant -1.45315206 : f32
    %191 = vector.broadcast %cst_95 : f32 to vector<5x256xf32>
    %192 = arith.addf %190, %191 : vector<5x256xf32>
    %193 = arith.mulf %192, %188 : vector<5x256xf32>
    %cst_96 = arith.constant 1.42141378 : f32
    %194 = vector.broadcast %cst_96 : f32 to vector<5x256xf32>
    %195 = arith.addf %193, %194 : vector<5x256xf32>
    %196 = arith.mulf %195, %188 : vector<5x256xf32>
    %cst_97 = arith.constant -0.284496725 : f32
    %197 = vector.broadcast %cst_97 : f32 to vector<5x256xf32>
    %198 = arith.addf %196, %197 : vector<5x256xf32>
    %199 = arith.mulf %198, %188 : vector<5x256xf32>
    %cst_98 = arith.constant 0.254829586 : f32
    %200 = vector.broadcast %cst_98 : f32 to vector<5x256xf32>
    %201 = arith.addf %199, %200 : vector<5x256xf32>
    %202 = arith.mulf %201, %188 : vector<5x256xf32>
    %cst_99 = arith.constant 0.000000e+00 : f32
    %203 = vector.broadcast %cst_99 : f32 to vector<5x256xf32>
    %204 = arith.subf %203, %182 : vector<5x256xf32>
    %205 = arith.mulf %204, %182 : vector<5x256xf32>
    %206 = math.exp %205 : vector<5x256xf32>
    %207 = arith.mulf %202, %206 : vector<5x256xf32>
    %cst_100 = arith.constant 1.000000e+00 : f32
    %208 = vector.broadcast %cst_100 : f32 to vector<5x256xf32>
    %209 = arith.subf %208, %207 : vector<5x256xf32>
    %210 = arith.mulf %181, %209 : vector<5x256xf32>
    %cst_101 = arith.constant 1.000000e+00 : f32
    %211 = vector.broadcast %cst_101 : f32 to vector<5x256xf32>
    %212 = arith.addf %211, %210 : vector<5x256xf32>
    %213 = arith.mulf %174, %212 : vector<5x256xf32>
    %214 = arith.truncf %213 : vector<5x256xf32> to vector<5x256xbf16>
    %cst_102 = arith.constant dense<0.000000e+00> : vector<5x64xf32>
    %215 = tpu.matmul %214, %24, %cst_102 {dimension_numbers = #tpu.dot_dimension_numbers<[1], [0], [0], [1], [0, 0, 1, 1], [], []>} : vector<5x256xbf16>, vector<256x64xbf16>, vector<5x64xf32> -> vector<5x64xf32>
    %216 = vector.broadcast %26 : vector<1x64xf32> to vector<5x64xf32>
    %217 = arith.addf %215, %216 : vector<5x64xf32>
    %218 = arith.addf %146, %217 : vector<5x64xf32>
    %c0_103 = arith.constant 0 : index
    %c0_104 = arith.constant 0 : index
    %c0_105 = arith.constant 0 : index
    %219 = vector.load %arg28[%c0_103, %c0_104, %c0_105] : memref<2x5x64xf32, #tpu.memory_space<vmem>>, vector<1x5x64xf32>
    %220 = vector.shape_cast %219 : vector<1x5x64xf32> to vector<5x64xf32>
    %221 = vector.shape_cast %218 : vector<5x64xf32> to vector<1x5x64xf32>
    tpu.vector_store %arg28[%c0_103, %c0_104, %c0_105], %221 {strides = array<i32>} : memref<2x5x64xf32, #tpu.memory_space<vmem>>, vector<1x5x64xf32>,
    %c1 = arith.constant 1 : index
    %c0_106 = arith.constant 0 : index
    %c0_107 = arith.constant 0 : index
    %222 = vector.load %arg28[%c1, %c0_106, %c0_107] : memref<2x5x64xf32, #tpu.memory_space<vmem>>, vector<1x5x64xf32>
    %223 = vector.shape_cast %222 : vector<1x5x64xf32> to vector<5x64xf32>
    %cst_108 = arith.constant dense<0.000000e+00> : vector<5xf32>
    %224 = vector.multi_reduction <add>, %223, %cst_108 [1] : vector<5x64xf32> to vector<5xf32>
    %225 = vector.shape_cast %224 : vector<5xf32> to vector<5x1xf32>
    %cst_109 = arith.constant 6.400000e+01 : f32
    %226 = vector.broadcast %cst_109 : f32 to vector<5x1xf32>
    %227 = arith.divf %225, %226 : vector<5x1xf32>
    %228 = vector.broadcast %227 : vector<5x1xf32> to vector<5x64xf32>
    %229 = arith.subf %223, %228 : vector<5x64xf32>
    %230 = arith.mulf %229, %229 : vector<5x64xf32>
    %cst_110 = arith.constant dense<0.000000e+00> : vector<5xf32>
    %231 = vector.multi_reduction <add>, %230, %cst_110 [1] : vector<5x64xf32> to vector<5xf32>
    %232 = vector.shape_cast %231 : vector<5xf32> to vector<5x1xf32>
    %cst_111 = arith.constant 6.400000e+01 : f32
    %233 = vector.broadcast %cst_111 : f32 to vector<5x1xf32>
    %234 = arith.divf %232, %233 : vector<5x1xf32>
    %235 = vector.broadcast %227 : vector<5x1xf32> to vector<5x64xf32>
    %236 = arith.subf %223, %235 : vector<5x64xf32>
    %cst_112 = arith.constant 9.99999997E-7 : f32
    %237 = vector.broadcast %cst_112 : f32 to vector<5x1xf32>
    %238 = arith.addf %234, %237 : vector<5x1xf32>
    %239 = math.rsqrt %238 : vector<5x1xf32>
    %240 = vector.broadcast %239 : vector<5x1xf32> to vector<5x64xf32>
    %241 = arith.mulf %236, %240 : vector<5x64xf32>
    %242 = vector.broadcast %4 : vector<1x64xf32> to vector<5x64xf32>
    %243 = arith.mulf %241, %242 : vector<5x64xf32>
    %244 = vector.broadcast %6 : vector<1x64xf32> to vector<5x64xf32>
    %245 = arith.addf %243, %244 : vector<5x64xf32>
    %246 = arith.truncf %245 : vector<5x64xf32> to vector<5x64xbf16>
    %cst_113 = arith.constant dense<0.000000e+00> : vector<5x192xf32>
    %247 = tpu.matmul %246, %12, %cst_113 {dimension_numbers = #tpu.dot_dimension_numbers<[1], [0], [0], [1], [0, 0, 1, 1], [], []>} : vector<5x64xbf16>, vector<64x192xbf16>, vector<5x192xf32> -> vector<5x192xf32>
    %248 = vector.broadcast %14 : vector<1x192xf32> to vector<5x192xf32>
    %249 = arith.addf %247, %248 : vector<5x192xf32>
    %250 = vector.extract_strided_slice %249 {offsets = [0, 0], sizes = [5, 64], strides = [1, 1]} : vector<5x192xf32> to vector<5x64xf32>
    %251 = vector.extract_strided_slice %249 {offsets = [0, 64], sizes = [5, 64], strides = [1, 1]} : vector<5x192xf32> to vector<5x64xf32>
    %252 = vector.extract_strided_slice %249 {offsets = [0, 128], sizes = [5, 64], strides = [1, 1]} : vector<5x192xf32> to vector<5x64xf32>
    %253 = vector.extract_strided_slice %250 {offsets = [0, 0], sizes = [5, 16], strides = [1, 1]} : vector<5x64xf32> to vector<5x16xf32>
    %254 = arith.truncf %253 : vector<5x16xf32> to vector<5x16xbf16>
    %255 = vector.extract_strided_slice %251 {offsets = [0, 0], sizes = [5, 16], strides = [1, 1]} : vector<5x64xf32> to vector<5x16xf32>
    %256 = arith.truncf %255 : vector<5x16xf32> to vector<5x16xbf16>
    %cst_114 = arith.constant dense<0.000000e+00> : vector<5x5xf32>
    %257 = tpu.matmul %254, %256, %cst_114 {dimension_numbers = #tpu.dot_dimension_numbers<[1], [1], [0], [0], [0, 0, 1, 0], [], []>} : vector<5x16xbf16>, vector<5x16xbf16>, vector<5x5xf32> -> vector<5x5xf32>
    %cst_115 = arith.constant dense<0xFF800000> : vector<5xf32>
    %258 = vector.multi_reduction <maximumf>, %257, %cst_115 [1] : vector<5x5xf32> to vector<5xf32>
    %259 = vector.shape_cast %258 : vector<5xf32> to vector<5x1xf32>
    %260 = vector.broadcast %259 : vector<5x1xf32> to vector<5x5xf32>
    %261 = arith.subf %257, %260 : vector<5x5xf32>
    %262 = math.exp %261 : vector<5x5xf32>
    %cst_116 = arith.constant dense<0.000000e+00> : vector<5xf32>
    %263 = vector.multi_reduction <add>, %262, %cst_116 [1] : vector<5x5xf32> to vector<5xf32>
    %264 = vector.shape_cast %263 : vector<5xf32> to vector<5x1xf32>
    %265 = tpu.reciprocal %264 {approx = true} : vector<5x1xf32> -> vector<5x1xf32>
    %266 = vector.broadcast %265 : vector<5x1xf32> to vector<5x5xf32>
    %267 = arith.mulf %262, %266 : vector<5x5xf32>
    %268 = arith.truncf %267 : vector<5x5xf32> to vector<5x5xbf16>
    %269 = vector.extract_strided_slice %252 {offsets = [0, 0], sizes = [5, 16], strides = [1, 1]} : vector<5x64xf32> to vector<5x16xf32>
    %270 = arith.truncf %269 : vector<5x16xf32> to vector<5x16xbf16>
    %cst_117 = arith.constant dense<0.000000e+00> : vector<5x16xf32>
    %271 = tpu.matmul %268, %270, %cst_117 {dimension_numbers = #tpu.dot_dimension_numbers<[1], [0], [0], [1], [0, 0, 1, 1], [], []>} : vector<5x5xbf16>, vector<5x16xbf16>, vector<5x16xf32> -> vector<5x16xf32>
    %272 = arith.truncf %271 : vector<5x16xf32> to vector<5x16xbf16>
    %c0_118 = arith.constant 0 : index
    %c0_119 = arith.constant 0 : index
    %273 = vector.load %arg29[%c0_118, %c0_119] : memref<5x64xbf16, #tpu.memory_space<vmem>>, vector<5x16xbf16>
    tpu.vector_store %arg29[%c0_118, %c0_119], %272 {strides = array<i32>} : memref<5x64xbf16, #tpu.memory_space<vmem>>, vector<5x16xbf16>,
    %274 = vector.extract_strided_slice %250 {offsets = [0, 16], sizes = [5, 16], strides = [1, 1]} : vector<5x64xf32> to vector<5x16xf32>
    %275 = arith.truncf %274 : vector<5x16xf32> to vector<5x16xbf16>
    %276 = vector.extract_strided_slice %251 {offsets = [0, 16], sizes = [5, 16], strides = [1, 1]} : vector<5x64xf32> to vector<5x16xf32>
    %277 = arith.truncf %276 : vector<5x16xf32> to vector<5x16xbf16>
    %cst_120 = arith.constant dense<0.000000e+00> : vector<5x5xf32>
    %278 = tpu.matmul %275, %277, %cst_120 {dimension_numbers = #tpu.dot_dimension_numbers<[1], [1], [0], [0], [0, 0, 1, 0], [], []>} : vector<5x16xbf16>, vector<5x16xbf16>, vector<5x5xf32> -> vector<5x5xf32>
    %cst_121 = arith.constant dense<0xFF800000> : vector<5xf32>
    %279 = vector.multi_reduction <maximumf>, %278, %cst_121 [1] : vector<5x5xf32> to vector<5xf32>
    %280 = vector.shape_cast %279 : vector<5xf32> to vector<5x1xf32>
    %281 = vector.broadcast %280 : vector<5x1xf32> to vector<5x5xf32>
    %282 = arith.subf %278, %281 : vector<5x5xf32>
    %283 = math.exp %282 : vector<5x5xf32>
    %cst_122 = arith.constant dense<0.000000e+00> : vector<5xf32>
    %284 = vector.multi_reduction <add>, %283, %cst_122 [1] : vector<5x5xf32> to vector<5xf32>
    %285 = vector.shape_cast %284 : vector<5xf32> to vector<5x1xf32>
    %286 = tpu.reciprocal %285 {approx = true} : vector<5x1xf32> -> vector<5x1xf32>
    %287 = vector.broadcast %286 : vector<5x1xf32> to vector<5x5xf32>
    %288 = arith.mulf %283, %287 : vector<5x5xf32>
    %289 = arith.truncf %288 : vector<5x5xf32> to vector<5x5xbf16>
    %290 = vector.extract_strided_slice %252 {offsets = [0, 16], sizes = [5, 16], strides = [1, 1]} : vector<5x64xf32> to vector<5x16xf32>
    %291 = arith.truncf %290 : vector<5x16xf32> to vector<5x16xbf16>
    %cst_123 = arith.constant dense<0.000000e+00> : vector<5x16xf32>
    %292 = tpu.matmul %289, %291, %cst_123 {dimension_numbers = #tpu.dot_dimension_numbers<[1], [0], [0], [1], [0, 0, 1, 1], [], []>} : vector<5x5xbf16>, vector<5x16xbf16>, vector<5x16xf32> -> vector<5x16xf32>
    %293 = arith.truncf %292 : vector<5x16xf32> to vector<5x16xbf16>
    %c0_124 = arith.constant 0 : index
    %c16_125 = arith.constant 16 : index
    %294 = vector.load %arg29[%c0_124, %c16_125] : memref<5x64xbf16, #tpu.memory_space<vmem>>, vector<5x16xbf16>
    tpu.vector_store %arg29[%c0_124, %c16_125], %293 {strides = array<i32>} : memref<5x64xbf16, #tpu.memory_space<vmem>>, vector<5x16xbf16>,
    %295 = vector.extract_strided_slice %250 {offsets = [0, 32], sizes = [5, 16], strides = [1, 1]} : vector<5x64xf32> to vector<5x16xf32>
    %296 = arith.truncf %295 : vector<5x16xf32> to vector<5x16xbf16>
    %297 = vector.extract_strided_slice %251 {offsets = [0, 32], sizes = [5, 16], strides = [1, 1]} : vector<5x64xf32> to vector<5x16xf32>
    %298 = arith.truncf %297 : vector<5x16xf32> to vector<5x16xbf16>
    %cst_126 = arith.constant dense<0.000000e+00> : vector<5x5xf32>
    %299 = tpu.matmul %296, %298, %cst_126 {dimension_numbers = #tpu.dot_dimension_numbers<[1], [1], [0], [0], [0, 0, 1, 0], [], []>} : vector<5x16xbf16>, vector<5x16xbf16>, vector<5x5xf32> -> vector<5x5xf32>
    %cst_127 = arith.constant dense<0xFF800000> : vector<5xf32>
    %300 = vector.multi_reduction <maximumf>, %299, %cst_127 [1] : vector<5x5xf32> to vector<5xf32>
    %301 = vector.shape_cast %300 : vector<5xf32> to vector<5x1xf32>
    %302 = vector.broadcast %301 : vector<5x1xf32> to vector<5x5xf32>
    %303 = arith.subf %299, %302 : vector<5x5xf32>
    %304 = math.exp %303 : vector<5x5xf32>
    %cst_128 = arith.constant dense<0.000000e+00> : vector<5xf32>
    %305 = vector.multi_reduction <add>, %304, %cst_128 [1] : vector<5x5xf32> to vector<5xf32>
    %306 = vector.shape_cast %305 : vector<5xf32> to vector<5x1xf32>
    %307 = tpu.reciprocal %306 {approx = true} : vector<5x1xf32> -> vector<5x1xf32>
    %308 = vector.broadcast %307 : vector<5x1xf32> to vector<5x5xf32>
    %309 = arith.mulf %304, %308 : vector<5x5xf32>
    %310 = arith.truncf %309 : vector<5x5xf32> to vector<5x5xbf16>
    %311 = vector.extract_strided_slice %252 {offsets = [0, 32], sizes = [5, 16], strides = [1, 1]} : vector<5x64xf32> to vector<5x16xf32>
    %312 = arith.truncf %311 : vector<5x16xf32> to vector<5x16xbf16>
    %cst_129 = arith.constant dense<0.000000e+00> : vector<5x16xf32>
    %313 = tpu.matmul %310, %312, %cst_129 {dimension_numbers = #tpu.dot_dimension_numbers<[1], [0], [0], [1], [0, 0, 1, 1], [], []>} : vector<5x5xbf16>, vector<5x16xbf16>, vector<5x16xf32> -> vector<5x16xf32>
    %314 = arith.truncf %313 : vector<5x16xf32> to vector<5x16xbf16>
    %c0_130 = arith.constant 0 : index
    %c32_131 = arith.constant 32 : index
    %315 = vector.load %arg29[%c0_130, %c32_131] : memref<5x64xbf16, #tpu.memory_space<vmem>>, vector<5x16xbf16>
    tpu.vector_store %arg29[%c0_130, %c32_131], %314 {strides = array<i32>} : memref<5x64xbf16, #tpu.memory_space<vmem>>, vector<5x16xbf16>,
    %316 = vector.extract_strided_slice %250 {offsets = [0, 48], sizes = [5, 16], strides = [1, 1]} : vector<5x64xf32> to vector<5x16xf32>
    %317 = arith.truncf %316 : vector<5x16xf32> to vector<5x16xbf16>
    %318 = vector.extract_strided_slice %251 {offsets = [0, 48], sizes = [5, 16], strides = [1, 1]} : vector<5x64xf32> to vector<5x16xf32>
    %319 = arith.truncf %318 : vector<5x16xf32> to vector<5x16xbf16>
    %cst_132 = arith.constant dense<0.000000e+00> : vector<5x5xf32>
    %320 = tpu.matmul %317, %319, %cst_132 {dimension_numbers = #tpu.dot_dimension_numbers<[1], [1], [0], [0], [0, 0, 1, 0], [], []>} : vector<5x16xbf16>, vector<5x16xbf16>, vector<5x5xf32> -> vector<5x5xf32>
    %cst_133 = arith.constant dense<0xFF800000> : vector<5xf32>
    %321 = vector.multi_reduction <maximumf>, %320, %cst_133 [1] : vector<5x5xf32> to vector<5xf32>
    %322 = vector.shape_cast %321 : vector<5xf32> to vector<5x1xf32>
    %323 = vector.broadcast %322 : vector<5x1xf32> to vector<5x5xf32>
    %324 = arith.subf %320, %323 : vector<5x5xf32>
    %325 = math.exp %324 : vector<5x5xf32>
    %cst_134 = arith.constant dense<0.000000e+00> : vector<5xf32>
    %326 = vector.multi_reduction <add>, %325, %cst_134 [1] : vector<5x5xf32> to vector<5xf32>
    %327 = vector.shape_cast %326 : vector<5xf32> to vector<5x1xf32>
    %328 = tpu.reciprocal %327 {approx = true} : vector<5x1xf32> -> vector<5x1xf32>
    %329 = vector.broadcast %328 : vector<5x1xf32> to vector<5x5xf32>
    %330 = arith.mulf %325, %329 : vector<5x5xf32>
    %331 = arith.truncf %330 : vector<5x5xf32> to vector<5x5xbf16>
    %332 = vector.extract_strided_slice %252 {offsets = [0, 48], sizes = [5, 16], strides = [1, 1]} : vector<5x64xf32> to vector<5x16xf32>
    %333 = arith.truncf %332 : vector<5x16xf32> to vector<5x16xbf16>
    %cst_135 = arith.constant dense<0.000000e+00> : vector<5x16xf32>
    %334 = tpu.matmul %331, %333, %cst_135 {dimension_numbers = #tpu.dot_dimension_numbers<[1], [0], [0], [1], [0, 0, 1, 1], [], []>} : vector<5x5xbf16>, vector<5x16xbf16>, vector<5x16xf32> -> vector<5x16xf32>
    %335 = arith.truncf %334 : vector<5x16xf32> to vector<5x16xbf16>
    %c0_136 = arith.constant 0 : index
    %c48_137 = arith.constant 48 : index
    %336 = vector.load %arg29[%c0_136, %c48_137] : memref<5x64xbf16, #tpu.memory_space<vmem>>, vector<5x16xbf16>
    tpu.vector_store %arg29[%c0_136, %c48_137], %335 {strides = array<i32>} : memref<5x64xbf16, #tpu.memory_space<vmem>>, vector<5x16xbf16>,
    %c0_138 = arith.constant 0 : index
    %c0_139 = arith.constant 0 : index
    %337 = vector.load %arg29[%c0_138, %c0_139] : memref<5x64xbf16, #tpu.memory_space<vmem>>, vector<5x64xbf16>
    %cst_140 = arith.constant dense<0.000000e+00> : vector<5x64xf32>
    %338 = tpu.matmul %337, %16, %cst_140 {dimension_numbers = #tpu.dot_dimension_numbers<[1], [0], [0], [1], [0, 0, 1, 1], [], []>} : vector<5x64xbf16>, vector<64x64xbf16>, vector<5x64xf32> -> vector<5x64xf32>
    %339 = arith.addf %223, %338 : vector<5x64xf32>
    %340 = vector.broadcast %18 : vector<1x64xf32> to vector<5x64xf32>
    %341 = arith.addf %339, %340 : vector<5x64xf32>
    %cst_141 = arith.constant dense<0.000000e+00> : vector<5xf32>
    %342 = vector.multi_reduction <add>, %341, %cst_141 [1] : vector<5x64xf32> to vector<5xf32>
    %343 = vector.shape_cast %342 : vector<5xf32> to vector<5x1xf32>
    %cst_142 = arith.constant 6.400000e+01 : f32
    %344 = vector.broadcast %cst_142 : f32 to vector<5x1xf32>
    %345 = arith.divf %343, %344 : vector<5x1xf32>
    %346 = vector.broadcast %345 : vector<5x1xf32> to vector<5x64xf32>
    %347 = arith.subf %341, %346 : vector<5x64xf32>
    %348 = arith.mulf %347, %347 : vector<5x64xf32>
    %cst_143 = arith.constant dense<0.000000e+00> : vector<5xf32>
    %349 = vector.multi_reduction <add>, %348, %cst_143 [1] : vector<5x64xf32> to vector<5xf32>
    %350 = vector.shape_cast %349 : vector<5xf32> to vector<5x1xf32>
    %cst_144 = arith.constant 6.400000e+01 : f32
    %351 = vector.broadcast %cst_144 : f32 to vector<5x1xf32>
    %352 = arith.divf %350, %351 : vector<5x1xf32>
    %353 = vector.broadcast %345 : vector<5x1xf32> to vector<5x64xf32>
    %354 = arith.subf %341, %353 : vector<5x64xf32>
    %cst_145 = arith.constant 9.99999997E-7 : f32
    %355 = vector.broadcast %cst_145 : f32 to vector<5x1xf32>
    %356 = arith.addf %352, %355 : vector<5x1xf32>
    %357 = math.rsqrt %356 : vector<5x1xf32>
    %358 = vector.broadcast %357 : vector<5x1xf32> to vector<5x64xf32>
    %359 = arith.mulf %354, %358 : vector<5x64xf32>
    %360 = vector.broadcast %8 : vector<1x64xf32> to vector<5x64xf32>
    %361 = arith.mulf %359, %360 : vector<5x64xf32>
    %362 = vector.broadcast %10 : vector<1x64xf32> to vector<5x64xf32>
    %363 = arith.addf %361, %362 : vector<5x64xf32>
    %364 = arith.truncf %363 : vector<5x64xf32> to vector<5x64xbf16>
    %cst_146 = arith.constant dense<0.000000e+00> : vector<5x256xf32>
    %365 = tpu.matmul %364, %20, %cst_146 {dimension_numbers = #tpu.dot_dimension_numbers<[1], [0], [0], [1], [0, 0, 1, 1], [], []>} : vector<5x64xbf16>, vector<64x256xbf16>, vector<5x256xf32> -> vector<5x256xf32>
    %366 = vector.broadcast %22 : vector<1x256xf32> to vector<5x256xf32>
    %367 = arith.addf %365, %366 : vector<5x256xf32>
    %cst_147 = arith.constant 5.000000e-01 : f32
    %368 = vector.broadcast %cst_147 : f32 to vector<5x256xf32>
    %369 = arith.mulf %368, %367 : vector<5x256xf32>
    %cst_148 = arith.constant 0.707106769 : f32
    %370 = vector.broadcast %cst_148 : f32 to vector<5x256xf32>
    %371 = arith.mulf %367, %370 : vector<5x256xf32>
    %cst_149 = arith.constant 0.000000e+00 : f32
    %372 = vector.broadcast %cst_149 : f32 to vector<5x256xf32>
    %373 = arith.cmpf oge, %371, %372 : vector<5x256xf32>
    %cst_150 = arith.constant 1.000000e+00 : f32
    %cst_151 = arith.constant -1.000000e+00 : f32
    %374 = vector.broadcast %cst_150 : f32 to vector<5x256xf32>
    %375 = vector.broadcast %cst_151 : f32 to vector<5x256xf32>
    %376 = arith.select %373, %374, %375 : vector<5x256xi1>, vector<5x256xf32>
    %377 = math.absf %371 : vector<5x256xf32>
    %cst_152 = arith.constant 0.327591091 : f32
    %378 = vector.broadcast %cst_152 : f32 to vector<5x256xf32>
    %379 = arith.mulf %378, %377 : vector<5x256xf32>
    %cst_153 = arith.constant 1.000000e+00 : f32
    %380 = vector.broadcast %cst_153 : f32 to vector<5x256xf32>
    %381 = arith.addf %380, %379 : vector<5x256xf32>
    %cst_154 = arith.constant 1.000000e+00 : f32
    %382 = vector.broadcast %cst_154 : f32 to vector<5x256xf32>
    %383 = arith.divf %382, %381 : vector<5x256xf32>
    %cst_155 = arith.constant 1.06140542 : f32
    %384 = vector.broadcast %cst_155 : f32 to vector<5x256xf32>
    %385 = arith.mulf %384, %383 : vector<5x256xf32>
    %cst_156 = arith.constant -1.45315206 : f32
    %386 = vector.broadcast %cst_156 : f32 to vector<5x256xf32>
    %387 = arith.addf %385, %386 : vector<5x256xf32>
    %388 = arith.mulf %387, %383 : vector<5x256xf32>
    %cst_157 = arith.constant 1.42141378 : f32
    %389 = vector.broadcast %cst_157 : f32 to vector<5x256xf32>
    %390 = arith.addf %388, %389 : vector<5x256xf32>
    %391 = arith.mulf %390, %383 : vector<5x256xf32>
    %cst_158 = arith.constant -0.284496725 : f32
    %392 = vector.broadcast %cst_158 : f32 to vector<5x256xf32>
    %393 = arith.addf %391, %392 : vector<5x256xf32>
    %394 = arith.mulf %393, %383 : vector<5x256xf32>
    %cst_159 = arith.constant 0.254829586 : f32
    %395 = vector.broadcast %cst_159 : f32 to vector<5x256xf32>
    %396 = arith.addf %394, %395 : vector<5x256xf32>
    %397 = arith.mulf %396, %383 : vector<5x256xf32>
    %cst_160 = arith.constant 0.000000e+00 : f32
    %398 = vector.broadcast %cst_160 : f32 to vector<5x256xf32>
    %399 = arith.subf %398, %377 : vector<5x256xf32>
    %400 = arith.mulf %399, %377 : vector<5x256xf32>
    %401 = math.exp %400 : vector<5x256xf32>
    %402 = arith.mulf %397, %401 : vector<5x256xf32>
    %cst_161 = arith.constant 1.000000e+00 : f32
    %403 = vector.broadcast %cst_161 : f32 to vector<5x256xf32>
    %404 = arith.subf %403, %402 : vector<5x256xf32>
    %405 = arith.mulf %376, %404 : vector<5x256xf32>
    %cst_162 = arith.constant 1.000000e+00 : f32
    %406 = vector.broadcast %cst_162 : f32 to vector<5x256xf32>
    %407 = arith.addf %406, %405 : vector<5x256xf32>
    %408 = arith.mulf %369, %407 : vector<5x256xf32>
    %409 = arith.truncf %408 : vector<5x256xf32> to vector<5x256xbf16>
    %cst_163 = arith.constant dense<0.000000e+00> : vector<5x64xf32>
    %410 = tpu.matmul %409, %24, %cst_163 {dimension_numbers = #tpu.dot_dimension_numbers<[1], [0], [0], [1], [0, 0, 1, 1], [], []>} : vector<5x256xbf16>, vector<256x64xbf16>, vector<5x64xf32> -> vector<5x64xf32>
    %411 = vector.broadcast %26 : vector<1x64xf32> to vector<5x64xf32>
    %412 = arith.addf %410, %411 : vector<5x64xf32>
    %413 = arith.addf %341, %412 : vector<5x64xf32>
    %c1_164 = arith.constant 1 : index
    %c0_165 = arith.constant 0 : index
    %c0_166 = arith.constant 0 : index
    %414 = vector.load %arg28[%c1_164, %c0_165, %c0_166] : memref<2x5x64xf32, #tpu.memory_space<vmem>>, vector<1x5x64xf32>
    %415 = vector.shape_cast %414 : vector<1x5x64xf32> to vector<5x64xf32>
    %416 = vector.shape_cast %413 : vector<5x64xf32> to vector<1x5x64xf32>
    tpu.vector_store %arg28[%c1_164, %c0_165, %c0_166], %416 {strides = array<i32>} : memref<2x5x64xf32, #tpu.memory_space<vmem>>, vector<1x5x64xf32>,
    %c1_i32 = arith.constant 1 : i32
    %417 = arith.cmpi eq, %arg2, %c1_i32 : i32
    %418 = arith.extui %417 : i1 to i32
    %c0_i32_167 = arith.constant 0 : i32
    %419 = arith.cmpi ne, %418, %c0_i32_167 : i32
    scf.if %419 {
      %c0_168 = arith.constant 0 : index
      %c0_169 = arith.constant 0 : index
      %c0_170 = arith.constant 0 : index
      %420 = vector.load %arg18[%c0_168, %c0_169, %c0_170] : memref<1x1x64xf32, #tpu.memory_space<vmem>>, vector<1x1x64xf32>
      %421 = vector.shape_cast %420 : vector<1x1x64xf32> to vector<1x64xf32>
      %c0_171 = arith.constant 0 : index
      %c0_172 = arith.constant 0 : index
      %c0_173 = arith.constant 0 : index
      %422 = vector.load %arg19[%c0_171, %c0_172, %c0_173] : memref<1x1x64xf32, #tpu.memory_space<vmem>>, vector<1x1x64xf32>
      %423 = vector.shape_cast %422 : vector<1x1x64xf32> to vector<1x64xf32>
      %c0_174 = arith.constant 0 : index
      %c0_175 = arith.constant 0 : index
      %c0_176 = arith.constant 0 : index
      %424 = vector.load %arg20[%c0_174, %c0_175, %c0_176] : memref<1x64x32xbf16, #tpu.memory_space<vmem>>, vector<1x64x32xbf16>
      %425 = vector.shape_cast %424 : vector<1x64x32xbf16> to vector<64x32xbf16>
      %c0_177 = arith.constant 0 : index
      %c0_178 = arith.constant 0 : index
      %c0_179 = arith.constant 0 : index
      %426 = vector.load %arg21[%c0_177, %c0_178, %c0_179] : memref<1x64x32xbf16, #tpu.memory_space<vmem>>, vector<1x64x32xbf16>
      %427 = vector.shape_cast %426 : vector<1x64x32xbf16> to vector<64x32xbf16>
      %c0_180 = arith.constant 0 : index
      %c0_181 = arith.constant 0 : index
      %c0_182 = arith.constant 0 : index
      %428 = vector.load %arg22[%c0_180, %c0_181, %c0_182] : memref<1x1x32xf32, #tpu.memory_space<vmem>>, vector<1x1x32xf32>
      %429 = vector.shape_cast %428 : vector<1x1x32xf32> to vector<1x32xf32>
      %c0_183 = arith.constant 0 : index
      %c0_184 = arith.constant 0 : index
      %c0_185 = arith.constant 0 : index
      %430 = vector.load %arg23[%c0_183, %c0_184, %c0_185] : memref<1x1x32xf32, #tpu.memory_space<vmem>>, vector<1x1x32xf32>
      %431 = vector.shape_cast %430 : vector<1x1x32xf32> to vector<1x32xf32>
      %c0_186 = arith.constant 0 : index
      %c0_187 = arith.constant 0 : index
      %c0_188 = arith.constant 0 : index
      %432 = vector.load %arg24[%c0_186, %c0_187, %c0_188] : memref<1x1x1xf32, #tpu.memory_space<vmem>>, vector<1x1x1xf32>
      %433 = vector.shape_cast %432 : vector<1x1x1xf32> to vector<1x1xf32>
      %c0_189 = arith.constant 0 : index
      %c0_190 = arith.constant 0 : index
      %c0_191 = arith.constant 0 : index
      %434 = vector.load %arg25[%c0_189, %c0_190, %c0_191] : memref<1x64x64xbf16, #tpu.memory_space<vmem>>, vector<1x64x64xbf16>
      %435 = vector.shape_cast %434 : vector<1x64x64xbf16> to vector<64x64xbf16>
      %c0_192 = arith.constant 0 : index
      %c0_193 = arith.constant 0 : index
      %c0_194 = arith.constant 0 : index
      %436 = vector.load %arg26[%c0_192, %c0_193, %c0_194] : memref<1x1x64xf32, #tpu.memory_space<vmem>>, vector<1x1x64xf32>
      %437 = vector.shape_cast %436 : vector<1x1x64xf32> to vector<1x64xf32>
      %438 = tpu.iota {dimensions = array<i32: 0>} : vector<5x1xi32>
      %c0_i32_195 = arith.constant 0 : i32
      %439 = vector.broadcast %c0_i32_195 : i32 to vector<5x1xi32>
      %440 = arith.cmpi sgt, %438, %439 : vector<5x1xi32>
      %441 = arith.extui %440 : vector<5x1xi1> to vector<5x1xi32>
      %442 = arith.sitofp %441 : vector<5x1xi32> to vector<5x1xf32>
      %c0_196 = arith.constant 0 : index
      %c0_197 = arith.constant 0 : index
      %c0_198 = arith.constant 0 : index
      %443 = vector.load %arg28[%c0_196, %c0_197, %c0_198] : memref<2x5x64xf32, #tpu.memory_space<vmem>>, vector<1x5x64xf32>
      %444 = vector.shape_cast %443 : vector<1x5x64xf32> to vector<5x64xf32>
      %cst_199 = arith.constant dense<0.000000e+00> : vector<5xf32>
      %445 = vector.multi_reduction <add>, %444, %cst_199 [1] : vector<5x64xf32> to vector<5xf32>
      %446 = vector.shape_cast %445 : vector<5xf32> to vector<5x1xf32>
      %cst_200 = arith.constant 6.400000e+01 : f32
      %447 = vector.broadcast %cst_200 : f32 to vector<5x1xf32>
      %448 = arith.divf %446, %447 : vector<5x1xf32>
      %449 = vector.broadcast %448 : vector<5x1xf32> to vector<5x64xf32>
      %450 = arith.subf %444, %449 : vector<5x64xf32>
      %451 = arith.mulf %450, %450 : vector<5x64xf32>
      %cst_201 = arith.constant dense<0.000000e+00> : vector<5xf32>
      %452 = vector.multi_reduction <add>, %451, %cst_201 [1] : vector<5x64xf32> to vector<5xf32>
      %453 = vector.shape_cast %452 : vector<5xf32> to vector<5x1xf32>
      %cst_202 = arith.constant 6.400000e+01 : f32
      %454 = vector.broadcast %cst_202 : f32 to vector<5x1xf32>
      %455 = arith.divf %453, %454 : vector<5x1xf32>
      %456 = vector.broadcast %448 : vector<5x1xf32> to vector<5x64xf32>
      %457 = arith.subf %444, %456 : vector<5x64xf32>
      %cst_203 = arith.constant 9.99999997E-7 : f32
      %458 = vector.broadcast %cst_203 : f32 to vector<5x1xf32>
      %459 = arith.addf %455, %458 : vector<5x1xf32>
      %460 = math.rsqrt %459 : vector<5x1xf32>
      %461 = vector.broadcast %460 : vector<5x1xf32> to vector<5x64xf32>
      %462 = arith.mulf %457, %461 : vector<5x64xf32>
      %463 = vector.broadcast %421 : vector<1x64xf32> to vector<5x64xf32>
      %464 = arith.mulf %462, %463 : vector<5x64xf32>
      %465 = vector.broadcast %423 : vector<1x64xf32> to vector<5x64xf32>
      %466 = arith.addf %464, %465 : vector<5x64xf32>
      %467 = arith.truncf %466 : vector<5x64xf32> to vector<5x64xbf16>
      %cst_204 = arith.constant dense<0.000000e+00> : vector<5x32xf32>
      %468 = tpu.matmul %467, %425, %cst_204 {dimension_numbers = #tpu.dot_dimension_numbers<[1], [0], [0], [1], [0, 0, 1, 1], [], []>} : vector<5x64xbf16>, vector<64x32xbf16>, vector<5x32xf32> -> vector<5x32xf32>
      %cst_205 = arith.constant dense<0.000000e+00> : vector<5x32xf32>
      %469 = tpu.matmul %467, %427, %cst_205 {dimension_numbers = #tpu.dot_dimension_numbers<[1], [0], [0], [1], [0, 0, 1, 1], [], []>} : vector<5x64xbf16>, vector<64x32xbf16>, vector<5x32xf32> -> vector<5x32xf32>
      %470 = vector.broadcast %429 : vector<1x32xf32> to vector<5x32xf32>
      %471 = arith.addf %469, %470 : vector<5x32xf32>
      %472 = arith.addf %468, %471 : vector<5x32xf32>
      %cst_206 = arith.constant 0.000000e+00 : f32
      %473 = vector.broadcast %cst_206 : f32 to vector<5x32xf32>
      %474 = arith.maximumf %472, %473 : vector<5x32xf32>
      %475 = vector.broadcast %431 : vector<1x32xf32> to vector<5x32xf32>
      %476 = arith.mulf %474, %475 : vector<5x32xf32>
      %cst_207 = arith.constant dense<0.000000e+00> : vector<5xf32>
      %477 = vector.multi_reduction <add>, %476, %cst_207 [1] : vector<5x32xf32> to vector<5xf32>
      %478 = vector.shape_cast %477 : vector<5xf32> to vector<5x1xf32>
      %479 = vector.broadcast %433 : vector<1x1xf32> to vector<5x1xf32>
      %480 = arith.addf %478, %479 : vector<5x1xf32>
      %481 = arith.negf %480 : vector<5x1xf32>
      %482 = math.exp %481 : vector<5x1xf32>
      %cst_208 = arith.constant 1.000000e+00 : f32
      %483 = vector.broadcast %cst_208 : f32 to vector<5x1xf32>
      %484 = arith.addf %483, %482 : vector<5x1xf32>
      %485 = arith.divf %483, %484 : vector<5x1xf32>
      %486 = vector.broadcast %485 : vector<5x1xf32> to vector<5x64xf32>
      %487 = arith.mulf %466, %486 : vector<5x64xf32>
      %488 = arith.truncf %487 : vector<5x64xf32> to vector<5x64xbf16>
      %cst_209 = arith.constant dense<0.000000e+00> : vector<5x64xf32>
      %489 = tpu.matmul %488, %435, %cst_209 {dimension_numbers = #tpu.dot_dimension_numbers<[1], [0], [0], [1], [0, 0, 1, 1], [], []>} : vector<5x64xbf16>, vector<64x64xbf16>, vector<5x64xf32> -> vector<5x64xf32>
      %490 = vector.broadcast %437 : vector<1x64xf32> to vector<5x64xf32>
      %491 = arith.addf %489, %490 : vector<5x64xf32>
      %492 = vector.broadcast %442 : vector<5x1xf32> to vector<5x64xf32>
      %493 = arith.mulf %491, %492 : vector<5x64xf32>
      %cst_210 = arith.constant dense<0.000000e+00> : vector<64xf32>
      %494 = vector.multi_reduction <add>, %493, %cst_210 [0] : vector<5x64xf32> to vector<64xf32>
      %495 = vector.shape_cast %494 : vector<64xf32> to vector<1x64xf32>
      %cst_211 = arith.constant 2.500000e-01 : f32
      %496 = vector.broadcast %cst_211 : f32 to vector<1x64xf32>
      %497 = arith.mulf %495, %496 : vector<1x64xf32>
      %c0_212 = arith.constant 0 : index
      %c0_213 = arith.constant 0 : index
      %c0_214 = arith.constant 0 : index
      %c0_215 = arith.constant 0 : index
      %498 = vector.load %arg27[%c0_212, %c0_213, %c0_214, %c0_215] : memref<1x2x1x64xf32, #tpu.memory_space<vmem>>, vector<1x1x1x64xf32>
      %499 = vector.shape_cast %498 : vector<1x1x1x64xf32> to vector<1x64xf32>
      %500 = vector.shape_cast %497 : vector<1x64xf32> to vector<1x1x1x64xf32>
      tpu.vector_store %arg27[%c0_212, %c0_213, %c0_214, %c0_215], %500 {strides = array<i32>} : memref<1x2x1x64xf32, #tpu.memory_space<vmem>>, vector<1x1x1x64xf32>,
      %c1_216 = arith.constant 1 : index
      %c0_217 = arith.constant 0 : index
      %c0_218 = arith.constant 0 : index
      %501 = vector.load %arg28[%c1_216, %c0_217, %c0_218] : memref<2x5x64xf32, #tpu.memory_space<vmem>>, vector<1x5x64xf32>
      %502 = vector.shape_cast %501 : vector<1x5x64xf32> to vector<5x64xf32>
      %cst_219 = arith.constant dense<0.000000e+00> : vector<5xf32>
      %503 = vector.multi_reduction <add>, %502, %cst_219 [1] : vector<5x64xf32> to vector<5xf32>
      %504 = vector.shape_cast %503 : vector<5xf32> to vector<5x1xf32>
      %cst_220 = arith.constant 6.400000e+01 : f32
      %505 = vector.broadcast %cst_220 : f32 to vector<5x1xf32>
      %506 = arith.divf %504, %505 : vector<5x1xf32>
      %507 = vector.broadcast %506 : vector<5x1xf32> to vector<5x64xf32>
      %508 = arith.subf %502, %507 : vector<5x64xf32>
      %509 = arith.mulf %508, %508 : vector<5x64xf32>
      %cst_221 = arith.constant dense<0.000000e+00> : vector<5xf32>
      %510 = vector.multi_reduction <add>, %509, %cst_221 [1] : vector<5x64xf32> to vector<5xf32>
      %511 = vector.shape_cast %510 : vector<5xf32> to vector<5x1xf32>
      %cst_222 = arith.constant 6.400000e+01 : f32
      %512 = vector.broadcast %cst_222 : f32 to vector<5x1xf32>
      %513 = arith.divf %511, %512 : vector<5x1xf32>
      %514 = vector.broadcast %506 : vector<5x1xf32> to vector<5x64xf32>
      %515 = arith.subf %502, %514 : vector<5x64xf32>
      %cst_223 = arith.constant 9.99999997E-7 : f32
      %516 = vector.broadcast %cst_223 : f32 to vector<5x1xf32>
      %517 = arith.addf %513, %516 : vector<5x1xf32>
      %518 = math.rsqrt %517 : vector<5x1xf32>
      %519 = vector.broadcast %518 : vector<5x1xf32> to vector<5x64xf32>
      %520 = arith.mulf %515, %519 : vector<5x64xf32>
      %521 = vector.broadcast %421 : vector<1x64xf32> to vector<5x64xf32>
      %522 = arith.mulf %520, %521 : vector<5x64xf32>
      %523 = vector.broadcast %423 : vector<1x64xf32> to vector<5x64xf32>
      %524 = arith.addf %522, %523 : vector<5x64xf32>
      %525 = arith.truncf %524 : vector<5x64xf32> to vector<5x64xbf16>
      %cst_224 = arith.constant dense<0.000000e+00> : vector<5x32xf32>
      %526 = tpu.matmul %525, %425, %cst_224 {dimension_numbers = #tpu.dot_dimension_numbers<[1], [0], [0], [1], [0, 0, 1, 1], [], []>} : vector<5x64xbf16>, vector<64x32xbf16>, vector<5x32xf32> -> vector<5x32xf32>
      %cst_225 = arith.constant dense<0.000000e+00> : vector<5x32xf32>
      %527 = tpu.matmul %525, %427, %cst_225 {dimension_numbers = #tpu.dot_dimension_numbers<[1], [0], [0], [1], [0, 0, 1, 1], [], []>} : vector<5x64xbf16>, vector<64x32xbf16>, vector<5x32xf32> -> vector<5x32xf32>
      %528 = vector.broadcast %429 : vector<1x32xf32> to vector<5x32xf32>
      %529 = arith.addf %527, %528 : vector<5x32xf32>
      %530 = arith.addf %526, %529 : vector<5x32xf32>
      %cst_226 = arith.constant 0.000000e+00 : f32
      %531 = vector.broadcast %cst_226 : f32 to vector<5x32xf32>
      %532 = arith.maximumf %530, %531 : vector<5x32xf32>
      %533 = vector.broadcast %431 : vector<1x32xf32> to vector<5x32xf32>
      %534 = arith.mulf %532, %533 : vector<5x32xf32>
      %cst_227 = arith.constant dense<0.000000e+00> : vector<5xf32>
      %535 = vector.multi_reduction <add>, %534, %cst_227 [1] : vector<5x32xf32> to vector<5xf32>
      %536 = vector.shape_cast %535 : vector<5xf32> to vector<5x1xf32>
      %537 = vector.broadcast %433 : vector<1x1xf32> to vector<5x1xf32>
      %538 = arith.addf %536, %537 : vector<5x1xf32>
      %539 = arith.negf %538 : vector<5x1xf32>
      %540 = math.exp %539 : vector<5x1xf32>
      %cst_228 = arith.constant 1.000000e+00 : f32
      %541 = vector.broadcast %cst_228 : f32 to vector<5x1xf32>
      %542 = arith.addf %541, %540 : vector<5x1xf32>
      %543 = arith.divf %541, %542 : vector<5x1xf32>
      %544 = vector.broadcast %543 : vector<5x1xf32> to vector<5x64xf32>
      %545 = arith.mulf %524, %544 : vector<5x64xf32>
      %546 = arith.truncf %545 : vector<5x64xf32> to vector<5x64xbf16>
      %cst_229 = arith.constant dense<0.000000e+00> : vector<5x64xf32>
      %547 = tpu.matmul %546, %435, %cst_229 {dimension_numbers = #tpu.dot_dimension_numbers<[1], [0], [0], [1], [0, 0, 1, 1], [], []>} : vector<5x64xbf16>, vector<64x64xbf16>, vector<5x64xf32> -> vector<5x64xf32>
      %548 = vector.broadcast %437 : vector<1x64xf32> to vector<5x64xf32>
      %549 = arith.addf %547, %548 : vector<5x64xf32>
      %550 = vector.broadcast %442 : vector<5x1xf32> to vector<5x64xf32>
      %551 = arith.mulf %549, %550 : vector<5x64xf32>
      %cst_230 = arith.constant dense<0.000000e+00> : vector<64xf32>
      %552 = vector.multi_reduction <add>, %551, %cst_230 [0] : vector<5x64xf32> to vector<64xf32>
      %553 = vector.shape_cast %552 : vector<64xf32> to vector<1x64xf32>
      %cst_231 = arith.constant 2.500000e-01 : f32
      %554 = vector.broadcast %cst_231 : f32 to vector<1x64xf32>
      %555 = arith.mulf %553, %554 : vector<1x64xf32>
      %c0_232 = arith.constant 0 : index
      %c1_233 = arith.constant 1 : index
      %c0_234 = arith.constant 0 : index
      %c0_235 = arith.constant 0 : index
      %556 = vector.load %arg27[%c0_232, %c1_233, %c0_234, %c0_235] : memref<1x2x1x64xf32, #tpu.memory_space<vmem>>, vector<1x1x1x64xf32>
      %557 = vector.shape_cast %556 : vector<1x1x1x64xf32> to vector<1x64xf32>
      %558 = vector.shape_cast %555 : vector<1x64xf32> to vector<1x1x1x64xf32>
      tpu.vector_store %arg27[%c0_232, %c1_233, %c0_234, %c0_235], %558 {strides = array<i32>} : memref<1x2x1x64xf32, #tpu.memory_space<vmem>>, vector<1x1x1x64xf32>,
    } else {
    }
    return
  }
  func.func @transform_0(%arg0: i32, %arg1: i32, %arg2: i32) -> (i32, i32, i32, i32) {
    %c0_i32 = arith.constant 0 : i32
    %c0_i32_0 = arith.constant 0 : i32
    %c0_i32_1 = arith.constant 0 : i32
    return %arg0, %arg1, %c0_i32, %c0_i32_0 : i32, i32, i32, i32
  }
  func.func @transform_1(%arg0: i32, %arg1: i32, %arg2: i32) -> (i32, i32, i32) {
    %c0_i32 = arith.constant 0 : i32
    %c0_i32_0 = arith.constant 0 : i32
    %c0_i32_1 = arith.constant 0 : i32
    return %arg0, %c0_i32, %c0_i32_0 : i32, i32, i32
  }
  func.func @transform_2(%arg0: i32, %arg1: i32, %arg2: i32) -> (i32, i32, i32) {
    %c0_i32 = arith.constant 0 : i32
    %c0_i32_0 = arith.constant 0 : i32
    %c0_i32_1 = arith.constant 0 : i32
    return %arg0, %c0_i32, %c0_i32_0 : i32, i32, i32
  }
  func.func @transform_3(%arg0: i32, %arg1: i32, %arg2: i32) -> (i32, i32, i32, i32) {
    %c0_i32 = arith.constant 0 : i32
    %c0_i32_0 = arith.constant 0 : i32
    %c0_i32_1 = arith.constant 0 : i32
    return %arg0, %arg2, %c0_i32, %c0_i32_0 : i32, i32, i32, i32
  }
  func.func @transform_4(%arg0: i32, %arg1: i32, %arg2: i32) -> (i32, i32, i32, i32) {
    %c0_i32 = arith.constant 0 : i32
    %c0_i32_0 = arith.constant 0 : i32
    %c0_i32_1 = arith.constant 0 : i32
    return %arg0, %arg2, %c0_i32, %c0_i32_0 : i32, i32, i32, i32
  }
  func.func @transform_5(%arg0: i32, %arg1: i32, %arg2: i32) -> (i32, i32, i32, i32) {
    %c0_i32 = arith.constant 0 : i32
    %c0_i32_0 = arith.constant 0 : i32
    %c0_i32_1 = arith.constant 0 : i32
    return %arg0, %arg2, %c0_i32, %c0_i32_0 : i32, i32, i32, i32
  }
  func.func @transform_6(%arg0: i32, %arg1: i32, %arg2: i32) -> (i32, i32, i32, i32) {
    %c0_i32 = arith.constant 0 : i32
    %c0_i32_0 = arith.constant 0 : i32
    %c0_i32_1 = arith.constant 0 : i32
    return %arg0, %arg2, %c0_i32, %c0_i32_0 : i32, i32, i32, i32
  }
  func.func @transform_7(%arg0: i32, %arg1: i32, %arg2: i32) -> (i32, i32, i32, i32) {
    %c0_i32 = arith.constant 0 : i32
    %c0_i32_0 = arith.constant 0 : i32
    %c0_i32_1 = arith.constant 0 : i32
    return %arg0, %arg2, %c0_i32, %c0_i32_0 : i32, i32, i32, i32
  }
  func.func @transform_8(%arg0: i32, %arg1: i32, %arg2: i32) -> (i32, i32, i32, i32) {
    %c0_i32 = arith.constant 0 : i32
    %c0_i32_0 = arith.constant 0 : i32
    %c0_i32_1 = arith.constant 0 : i32
    return %arg0, %arg2, %c0_i32, %c0_i32_0 : i32, i32, i32, i32
  }
  func.func @transform_9(%arg0: i32, %arg1: i32, %arg2: i32) -> (i32, i32, i32, i32) {
    %c0_i32 = arith.constant 0 : i32
    %c0_i32_0 = arith.constant 0 : i32
    %c0_i32_1 = arith.constant 0 : i32
    return %arg0, %arg2, %c0_i32, %c0_i32_0 : i32, i32, i32, i32
  }
  func.func @transform_10(%arg0: i32, %arg1: i32, %arg2: i32) -> (i32, i32, i32, i32) {
    %c0_i32 = arith.constant 0 : i32
    %c0_i32_0 = arith.constant 0 : i32
    %c0_i32_1 = arith.constant 0 : i32
    return %arg0, %arg2, %c0_i32, %c0_i32_0 : i32, i32, i32, i32
  }
  func.func @transform_11(%arg0: i32, %arg1: i32, %arg2: i32) -> (i32, i32, i32, i32) {
    %c0_i32 = arith.constant 0 : i32
    %c0_i32_0 = arith.constant 0 : i32
    %c0_i32_1 = arith.constant 0 : i32
    return %arg0, %arg2, %c0_i32, %c0_i32_0 : i32, i32, i32, i32
  }
  func.func @transform_12(%arg0: i32, %arg1: i32, %arg2: i32) -> (i32, i32, i32, i32) {
    %c0_i32 = arith.constant 0 : i32
    %c0_i32_0 = arith.constant 0 : i32
    %c0_i32_1 = arith.constant 0 : i32
    return %arg0, %arg2, %c0_i32, %c0_i32_0 : i32, i32, i32, i32
  }
  func.func @transform_13(%arg0: i32, %arg1: i32, %arg2: i32) -> (i32, i32, i32, i32) {
    %c0_i32 = arith.constant 0 : i32
    %c0_i32_0 = arith.constant 0 : i32
    %c0_i32_1 = arith.constant 0 : i32
    return %arg0, %arg2, %c0_i32, %c0_i32_0 : i32, i32, i32, i32
  }
  func.func @transform_14(%arg0: i32, %arg1: i32, %arg2: i32) -> (i32, i32, i32, i32) {
    %c0_i32 = arith.constant 0 : i32
    %c0_i32_0 = arith.constant 0 : i32
    %c0_i32_1 = arith.constant 0 : i32
    return %arg0, %arg2, %c0_i32, %c0_i32_0 : i32, i32, i32, i32
  }
  func.func @transform_15(%arg0: i32, %arg1: i32, %arg2: i32) -> (i32, i32, i32) {
    %c0_i32 = arith.constant 0 : i32
    %c0_i32_0 = arith.constant 0 : i32
    %c0_i32_1 = arith.constant 0 : i32
    return %arg0, %c0_i32, %c0_i32_0 : i32, i32, i32
  }
  func.func @transform_16(%arg0: i32, %arg1: i32, %arg2: i32) -> (i32, i32, i32) {
    %c0_i32 = arith.constant 0 : i32
    %c0_i32_0 = arith.constant 0 : i32
    %c0_i32_1 = arith.constant 0 : i32
    return %arg0, %c0_i32, %c0_i32_0 : i32, i32, i32
  }
  func.func @transform_17(%arg0: i32, %arg1: i32, %arg2: i32) -> (i32, i32, i32) {
    %c0_i32 = arith.constant 0 : i32
    %c0_i32_0 = arith.constant 0 : i32
    %c0_i32_1 = arith.constant 0 : i32
    return %arg0, %c0_i32, %c0_i32_0 : i32, i32, i32
  }
  func.func @transform_18(%arg0: i32, %arg1: i32, %arg2: i32) -> (i32, i32, i32) {
    %c0_i32 = arith.constant 0 : i32
    %c0_i32_0 = arith.constant 0 : i32
    %c0_i32_1 = arith.constant 0 : i32
    return %arg0, %c0_i32, %c0_i32_0 : i32, i32, i32
  }
  func.func @transform_19(%arg0: i32, %arg1: i32, %arg2: i32) -> (i32, i32, i32) {
    %c0_i32 = arith.constant 0 : i32
    %c0_i32_0 = arith.constant 0 : i32
    %c0_i32_1 = arith.constant 0 : i32
    return %arg0, %c0_i32, %c0_i32_0 : i32, i32, i32
  }
  func.func @transform_20(%arg0: i32, %arg1: i32, %arg2: i32) -> (i32, i32, i32) {
    %c0_i32 = arith.constant 0 : i32
    %c0_i32_0 = arith.constant 0 : i32
    %c0_i32_1 = arith.constant 0 : i32
    return %arg0, %c0_i32, %c0_i32_0 : i32, i32, i32
  }
  func.func @transform_21(%arg0: i32, %arg1: i32, %arg2: i32) -> (i32, i32, i32) {
    %c0_i32 = arith.constant 0 : i32
    %c0_i32_0 = arith.constant 0 : i32
    %c0_i32_1 = arith.constant 0 : i32
    return %arg0, %c0_i32, %c0_i32_0 : i32, i32, i32
  }
  func.func @transform_22(%arg0: i32, %arg1: i32, %arg2: i32) -> (i32, i32, i32) {
    %c0_i32 = arith.constant 0 : i32
    %c0_i32_0 = arith.constant 0 : i32
    %c0_i32_1 = arith.constant 0 : i32
    return %arg0, %c0_i32, %c0_i32_0 : i32, i32, i32
  }
  func.func @transform_23(%arg0: i32, %arg1: i32, %arg2: i32) -> (i32, i32, i32) {
    %c0_i32 = arith.constant 0 : i32
    %c0_i32_0 = arith.constant 0 : i32
    %c0_i32_1 = arith.constant 0 : i32
    return %arg0, %c0_i32, %c0_i32_0 : i32, i32, i32
  }
  func.func @transform_24(%arg0: i32, %arg1: i32, %arg2: i32) -> (i32, i32, i32, i32) {
    %c0_i32 = arith.constant 0 : i32
    %c0_i32_0 = arith.constant 0 : i32
    %c0_i32_1 = arith.constant 0 : i32
    return %arg0, %arg1, %c0_i32, %c0_i32_0 : i32, i32, i32, i32
  }
}

module attributes {stable_mosaic.version = 11 : i64} {
  func.func @_vit_layer_kernel(%arg0: i32, %arg1: i32, %arg2: i32, %arg3: memref<1x2x5x768xbf16, #tpu.memory_space<vmem>>, %arg4: memref<1x5x64xf32, #tpu.memory_space<vmem>>, %arg5: memref<1x768x64xbf16, #tpu.memory_space<vmem>>, %arg6: memref<1x1x1x64xf32, #tpu.memory_space<vmem>>, %arg7: memref<1x1x1x64xf32, #tpu.memory_space<vmem>>, %arg8: memref<1x1x64x192xbf16, #tpu.memory_space<vmem>>, %arg9: memref<1x1x1x192xf32, #tpu.memory_space<vmem>>, %arg10: memref<1x1x64x64xbf16, #tpu.memory_space<vmem>>, %arg11: memref<1x1x1x64xf32, #tpu.memory_space<vmem>>, %arg12: memref<1x1x1x64xf32, #tpu.memory_space<vmem>>, %arg13: memref<1x1x1x64xf32, #tpu.memory_space<vmem>>, %arg14: memref<1x1x64x256xbf16, #tpu.memory_space<vmem>>, %arg15: memref<1x1x1x256xf32, #tpu.memory_space<vmem>>, %arg16: memref<1x1x256x64xbf16, #tpu.memory_space<vmem>>, %arg17: memref<1x1x1x64xf32, #tpu.memory_space<vmem>>, %arg18: memref<1x1x64xf32, #tpu.memory_space<vmem>>, %arg19: memref<1x1x64xf32, #tpu.memory_space<vmem>>, %arg20: memref<1x64x32xbf16, #tpu.memory_space<vmem>>, %arg21: memref<1x64x32xbf16, #tpu.memory_space<vmem>>, %arg22: memref<1x1x32xf32, #tpu.memory_space<vmem>>, %arg23: memref<1x1x32xf32, #tpu.memory_space<vmem>>, %arg24: memref<1x1x1xf32, #tpu.memory_space<vmem>>, %arg25: memref<1x64x64xbf16, #tpu.memory_space<vmem>>, %arg26: memref<1x1x64xf32, #tpu.memory_space<vmem>>, %arg27: memref<1x2x1x64xf32, #tpu.memory_space<vmem>>, %arg28: memref<2x5x64xf32, #tpu.memory_space<vmem>>, %arg29: memref<5x64xbf16, #tpu.memory_space<vmem>>) attributes {dimension_semantics = [#tpu.dimension_semantics<parallel>, #tpu.dimension_semantics<parallel>, #tpu.dimension_semantics<arbitrary>], iteration_bounds = array<i64: 3, 1, 2>, scalar_prefetch = 0 : i64, scratch_operands = 2 : i64, tpu.core_type = #tpu.core_type<tc>, window_params = [{transform_indices = @transform_0, window_bounds = array<i64: 1, 2, 5, 768>}, {transform_indices = @transform_1, window_bounds = array<i64: 1, 5, 64>}, {transform_indices = @transform_2, window_bounds = array<i64: 1, 768, 64>}, {transform_indices = @transform_3, window_bounds = array<i64: 1, 1, 1, 64>}, {transform_indices = @transform_4, window_bounds = array<i64: 1, 1, 1, 64>}, {transform_indices = @transform_5, window_bounds = array<i64: 1, 1, 64, 192>}, {transform_indices = @transform_6, window_bounds = array<i64: 1, 1, 1, 192>}, {transform_indices = @transform_7, window_bounds = array<i64: 1, 1, 64, 64>}, {transform_indices = @transform_8, window_bounds = array<i64: 1, 1, 1, 64>}, {transform_indices = @transform_9, window_bounds = array<i64: 1, 1, 1, 64>}, {transform_indices = @transform_10, window_bounds = array<i64: 1, 1, 1, 64>}, {transform_indices = @transform_11, window_bounds = array<i64: 1, 1, 64, 256>}, {transform_indices = @transform_12, window_bounds = array<i64: 1, 1, 1, 256>}, {transform_indices = @transform_13, window_bounds = array<i64: 1, 1, 256, 64>}, {transform_indices = @transform_14, window_bounds = array<i64: 1, 1, 1, 64>}, {transform_indices = @transform_15, window_bounds = array<i64: 1, 1, 64>}, {transform_indices = @transform_16, window_bounds = array<i64: 1, 1, 64>}, {transform_indices = @transform_17, window_bounds = array<i64: 1, 64, 32>}, {transform_indices = @transform_18, window_bounds = array<i64: 1, 64, 32>}, {transform_indices = @transform_19, window_bounds = array<i64: 1, 1, 32>}, {transform_indices = @transform_20, window_bounds = array<i64: 1, 1, 32>}, {transform_indices = @transform_21, window_bounds = array<i64: 1, 1, 1>}, {transform_indices = @transform_22, window_bounds = array<i64: 1, 64, 64>}, {transform_indices = @transform_23, window_bounds = array<i64: 1, 1, 64>}, {transform_indices = @transform_24, window_bounds = array<i64: 1, 2, 1, 64>}]} {
    %c0_i32 = arith.constant 0 : i32
    %0 = arith.cmpi eq, %arg2, %c0_i32 : i32
    %1 = arith.extui %0 : i1 to i32
    %c0_i32_0 = arith.constant 0 : i32
    %2 = arith.cmpi ne, %1, %c0_i32_0 : i32
    scf.if %2 {
      %c0_168 = arith.constant 0 : index
      %c0_169 = arith.constant 0 : index
      %c0_170 = arith.constant 0 : index
      %420 = vector.load %arg5[%c0_168, %c0_169, %c0_170] : memref<1x768x64xbf16, #tpu.memory_space<vmem>>, vector<1x768x64xbf16>
      %421 = vector.shape_cast %420 : vector<1x768x64xbf16> to vector<768x64xbf16>
      %c0_171 = arith.constant 0 : index
      %c0_172 = arith.constant 0 : index
      %c0_173 = arith.constant 0 : index
      %422 = vector.load %arg4[%c0_171, %c0_172, %c0_173] : memref<1x5x64xf32, #tpu.memory_space<vmem>>, vector<1x5x64xf32>
      %423 = vector.shape_cast %422 : vector<1x5x64xf32> to vector<5x64xf32>
      %c0_174 = arith.constant 0 : index
      %c0_175 = arith.constant 0 : index
      %c0_176 = arith.constant 0 : index
      %c0_177 = arith.constant 0 : index
      %424 = vector.load %arg3[%c0_174, %c0_175, %c0_176, %c0_177] : memref<1x2x5x768xbf16, #tpu.memory_space<vmem>>, vector<1x1x5x768xbf16>
      %425 = vector.shape_cast %424 : vector<1x1x5x768xbf16> to vector<5x768xbf16>
      %cst_178 = arith.constant dense<0.000000e+00> : vector<5x64xf32>
      %426 = tpu.matmul %425, %421, %cst_178 {dimension_numbers = #tpu.dot_dimension_numbers<[1], [0], [0], [1], [0, 0, 1, 1], [], []>} : vector<5x768xbf16>, vector<768x64xbf16>, vector<5x64xf32> -> vector<5x64xf32>
      %427 = arith.addf %426, %423 : vector<5x64xf32>
      %c0_179 = arith.constant 0 : index
      %c0_180 = arith.constant 0 : index
      %c0_181 = arith.constant 0 : index
      %428 = vector.load %arg28[%c0_179, %c0_180, %c0_181] : memref<2x5x64xf32, #tpu.memory_space<vmem>>, vector<1x5x64xf32>
      %429 = vector.shape_cast %428 : vector<1x5x64xf32> to vector<5x64xf32>
      %430 = vector.shape_cast %427 : vector<5x64xf32> to vector<1x5x64xf32>
      tpu.vector_store %arg28[%c0_179, %c0_180, %c0_181], %430 {strides = array<i32>} : memref<2x5x64xf32, #tpu.memory_space<vmem>>, vector<1x5x64xf32>,
      %c0_182 = arith.constant 0 : index
      %c1_183 = arith.constant 1 : index
      %c0_184 = arith.constant 0 : index
      %c0_185 = arith.constant 0 : index
      %431 = vector.load %arg3[%c0_182, %c1_183, %c0_184, %c0_185] : memref<1x2x5x768xbf16, #tpu.memory_space<vmem>>, vector<1x1x5x768xbf16>
      %432 = vector.shape_cast %431 : vector<1x1x5x768xbf16> to vector<5x768xbf16>
      %cst_186 = arith.constant dense<0.000000e+00> : vector<5x64xf32>
      %433 = tpu.matmul %432, %421, %cst_186 {dimension_numbers = #tpu.dot_dimension_numbers<[1], [0], [0], [1], [0, 0, 1, 1], [], []>} : vector<5x768xbf16>, vector<768x64xbf16>, vector<5x64xf32> -> vector<5x64xf32>
      %434 = arith.addf %433, %423 : vector<5x64xf32>
      %c1_187 = arith.constant 1 : index
      %c0_188 = arith.constant 0 : index
      %c0_189 = arith.constant 0 : index
      %435 = vector.load %arg28[%c1_187, %c0_188, %c0_189] : memref<2x5x64xf32, #tpu.memory_space<vmem>>, vector<1x5x64xf32>
      %436 = vector.shape_cast %435 : vector<1x5x64xf32> to vector<5x64xf32>
      %437 = vector.shape_cast %434 : vector<5x64xf32> to vector<1x5x64xf32>
      tpu.vector_store %arg28[%c1_187, %c0_188, %c0_189], %437 {strides = array<i32>} : memref<2x5x64xf32, #tpu.memory_space<vmem>>, vector<1x5x64xf32>,
    } else {
    }
    %c0 = arith.constant 0 : index
    %c0_1 = arith.constant 0 : index
    %c0_2 = arith.constant 0 : index
    %c0_3 = arith.constant 0 : index
    %3 = vector.load %arg6[%c0, %c0_1, %c0_2, %c0_3] : memref<1x1x1x64xf32, #tpu.memory_space<vmem>>, vector<1x1x1x64xf32>
    %4 = vector.shape_cast %3 : vector<1x1x1x64xf32> to vector<1x64xf32>
    %c0_4 = arith.constant 0 : index
    %c0_5 = arith.constant 0 : index
    %c0_6 = arith.constant 0 : index
    %c0_7 = arith.constant 0 : index
    %5 = vector.load %arg7[%c0_4, %c0_5, %c0_6, %c0_7] : memref<1x1x1x64xf32, #tpu.memory_space<vmem>>, vector<1x1x1x64xf32>
    %6 = vector.shape_cast %5 : vector<1x1x1x64xf32> to vector<1x64xf32>
    %c0_8 = arith.constant 0 : index
    %c0_9 = arith.constant 0 : index
    %c0_10 = arith.constant 0 : index
    %c0_11 = arith.constant 0 : index
    %7 = vector.load %arg12[%c0_8, %c0_9, %c0_10, %c0_11] : memref<1x1x1x64xf32, #tpu.memory_space<vmem>>, vector<1x1x1x64xf32>
    %8 = vector.shape_cast %7 : vector<1x1x1x64xf32> to vector<1x64xf32>
    %c0_12 = arith.constant 0 : index
    %c0_13 = arith.constant 0 : index
    %c0_14 = arith.constant 0 : index
    %c0_15 = arith.constant 0 : index
    %9 = vector.load %arg13[%c0_12, %c0_13, %c0_14, %c0_15] : memref<1x1x1x64xf32, #tpu.memory_space<vmem>>, vector<1x1x1x64xf32>
    %10 = vector.shape_cast %9 : vector<1x1x1x64xf32> to vector<1x64xf32>
    %c0_16 = arith.constant 0 : index
    %c0_17 = arith.constant 0 : index
    %c0_18 = arith.constant 0 : index
    %c0_19 = arith.constant 0 : index
    %11 = vector.load %arg8[%c0_16, %c0_17, %c0_18, %c0_19] : memref<1x1x64x192xbf16, #tpu.memory_space<vmem>>, vector<1x1x64x192xbf16>
    %12 = vector.shape_cast %11 : vector<1x1x64x192xbf16> to vector<64x192xbf16>
    %c0_20 = arith.constant 0 : index
    %c0_21 = arith.constant 0 : index
    %c0_22 = arith.constant 0 : index
    %c0_23 = arith.constant 0 : index
    %13 = vector.load %arg9[%c0_20, %c0_21, %c0_22, %c0_23] : memref<1x1x1x192xf32, #tpu.memory_space<vmem>>, vector<1x1x1x192xf32>
    %14 = vector.shape_cast %13 : vector<1x1x1x192xf32> to vector<1x192xf32>
    %c0_24 = arith.constant 0 : index
    %c0_25 = arith.constant 0 : index
    %c0_26 = arith.constant 0 : index
    %c0_27 = arith.constant 0 : index
    %15 = vector.load %arg10[%c0_24, %c0_25, %c0_26, %c0_27] : memref<1x1x64x64xbf16, #tpu.memory_space<vmem>>, vector<1x1x64x64xbf16>
    %16 = vector.shape_cast %15 : vector<1x1x64x64xbf16> to vector<64x64xbf16>
    %c0_28 = arith.constant 0 : index
    %c0_29 = arith.constant 0 : index
    %c0_30 = arith.constant 0 : index
    %c0_31 = arith.constant 0 : index
    %17 = vector.load %arg11[%c0_28, %c0_29, %c0_30, %c0_31] : memref<1x1x1x64xf32, #tpu.memory_space<vmem>>, vector<1x1x1x64xf32>
    %18 = vector.shape_cast %17 : vector<1x1x1x64xf32> to vector<1x64xf32>
    %c0_32 = arith.constant 0 : index
    %c0_33 = arith.constant 0 : index
    %c0_34 = arith.constant 0 : index
    %c0_35 = arith.constant 0 : index
    %19 = vector.load %arg14[%c0_32, %c0_33, %c0_34, %c0_35] : memref<1x1x64x256xbf16, #tpu.memory_space<vmem>>, vector<1x1x64x256xbf16>
    %20 = vector.shape_cast %19 : vector<1x1x64x256xbf16> to vector<64x256xbf16>
    %c0_36 = arith.constant 0 : index
    %c0_37 = arith.constant 0 : index
    %c0_38 = arith.constant 0 : index
    %c0_39 = arith.constant 0 : index
    %21 = vector.load %arg15[%c0_36, %c0_37, %c0_38, %c0_39] : memref<1x1x1x256xf32, #tpu.memory_space<vmem>>, vector<1x1x1x256xf32>
    %22 = vector.shape_cast %21 : vector<1x1x1x256xf32> to vector<1x256xf32>
    %c0_40 = arith.constant 0 : index
    %c0_41 = arith.constant 0 : index
    %c0_42 = arith.constant 0 : index
    %c0_43 = arith.constant 0 : index
    %23 = vector.load %arg16[%c0_40, %c0_41, %c0_42, %c0_43] : memref<1x1x256x64xbf16, #tpu.memory_space<vmem>>, vector<1x1x256x64xbf16>
    %24 = vector.shape_cast %23 : vector<1x1x256x64xbf16> to vector<256x64xbf16>
    %c0_44 = arith.constant 0 : index
    %c0_45 = arith.constant 0 : index
    %c0_46 = arith.constant 0 : index
    %c0_47 = arith.constant 0 : index
    %25 = vector.load %arg17[%c0_44, %c0_45, %c0_46, %c0_47] : memref<1x1x1x64xf32, #tpu.memory_space<vmem>>, vector<1x1x1x64xf32>
    %26 = vector.shape_cast %25 : vector<1x1x1x64xf32> to vector<1x64xf32>
    %c0_48 = arith.constant 0 : index
    %c0_49 = arith.constant 0 : index
    %c0_50 = arith.constant 0 : index
    %27 = vector.load %arg28[%c0_48, %c0_49, %c0_50] : memref<2x5x64xf32, #tpu.memory_space<vmem>>, vector<1x5x64xf32>
    %28 = vector.shape_cast %27 : vector<1x5x64xf32> to vector<5x64xf32>
    %cst = arith.constant dense<0.000000e+00> : vector<5xf32>
    %29 = vector.multi_reduction <add>, %28, %cst [1] : vector<5x64xf32> to vector<5xf32>
    %30 = vector.shape_cast %29 : vector<5xf32> to vector<5x1xf32>
    %cst_51 = arith.constant 6.400000e+01 : f32
    %31 = vector.broadcast %cst_51 : f32 to vector<5x1xf32>
    %32 = arith.divf %30, %31 : vector<5x1xf32>
    %33 = vector.broadcast %32 : vector<5x1xf32> to vector<5x64xf32>
    %34 = arith.subf %28, %33 : vector<5x64xf32>
    %35 = arith.mulf %34, %34 : vector<5x64xf32>
    %cst_52 = arith.constant dense<0.000000e+00> : vector<5xf32>
    %36 = vector.multi_reduction <add>, %35, %cst_52 [1] : vector<5x64xf32> to vector<5xf32>
    %37 = vector.shape_cast %36 : vector<5xf32> to vector<5x1xf32>
    %cst_53 = arith.constant 6.400000e+01 : f32
    %38 = vector.broadcast %cst_53 : f32 to vector<5x1xf32>
    %39 = arith.divf %37, %38 : vector<5x1xf32>
    %40 = vector.broadcast %32 : vector<5x1xf32> to vector<5x64xf32>
    %41 = arith.subf %28, %40 : vector<5x64xf32>
    %cst_54 = arith.constant 9.99999997E-7 : f32
    %42 = vector.broadcast %cst_54 : f32 to vector<5x1xf32>
    %43 = arith.addf %39, %42 : vector<5x1xf32>
    %44 = math.rsqrt %43 : vector<5x1xf32>
    %45 = vector.broadcast %44 : vector<5x1xf32> to vector<5x64xf32>
    %46 = arith.mulf %41, %45 : vector<5x64xf32>
    %47 = vector.broadcast %4 : vector<1x64xf32> to vector<5x64xf32>
    %48 = arith.mulf %46, %47 : vector<5x64xf32>
    %49 = vector.broadcast %6 : vector<1x64xf32> to vector<5x64xf32>
    %50 = arith.addf %48, %49 : vector<5x64xf32>
    %51 = arith.truncf %50 : vector<5x64xf32> to vector<5x64xbf16>
    %cst_55 = arith.constant dense<0.000000e+00> : vector<5x192xf32>
    %52 = tpu.matmul %51, %12, %cst_55 {dimension_numbers = #tpu.dot_dimension_numbers<[1], [0], [0], [1], [0, 0, 1, 1], [], []>} : vector<5x64xbf16>, vector<64x192xbf16>, vector<5x192xf32> -> vector<5x192xf32>
    %53 = vector.broadcast %14 : vector<1x192xf32> to vector<5x192xf32>
    %54 = arith.addf %52, %53 : vector<5x192xf32>
    %55 = vector.extract_strided_slice %54 {offsets = [0, 0], sizes = [5, 64], strides = [1, 1]} : vector<5x192xf32> to vector<5x64xf32>
    %56 = vector.extract_strided_slice %54 {offsets = [0, 64], sizes = [5, 64], strides = [1, 1]} : vector<5x192xf32> to vector<5x64xf32>
    %57 = vector.extract_strided_slice %54 {offsets = [0, 128], sizes = [5, 64], strides = [1, 1]} : vector<5x192xf32> to vector<5x64xf32>
    %58 = vector.extract_strided_slice %55 {offsets = [0, 0], sizes = [5, 16], strides = [1, 1]} : vector<5x64xf32> to vector<5x16xf32>
    %59 = arith.truncf %58 : vector<5x16xf32> to vector<5x16xbf16>
    %60 = vector.extract_strided_slice %56 {offsets = [0, 0], sizes = [5, 16], strides = [1, 1]} : vector<5x64xf32> to vector<5x16xf32>
    %61 = arith.truncf %60 : vector<5x16xf32> to vector<5x16xbf16>
    %cst_56 = arith.constant dense<0.000000e+00> : vector<5x5xf32>
    %62 = tpu.matmul %59, %61, %cst_56 {dimension_numbers = #tpu.dot_dimension_numbers<[1], [1], [0], [0], [0, 0, 1, 0], [], []>} : vector<5x16xbf16>, vector<5x16xbf16>, vector<5x5xf32> -> vector<5x5xf32>
    %cst_57 = arith.constant dense<0xFF800000> : vector<5xf32>
    %63 = vector.multi_reduction <maximumf>, %62, %cst_57 [1] : vector<5x5xf32> to vector<5xf32>
    %64 = vector.shape_cast %63 : vector<5xf32> to vector<5x1xf32>
    %65 = vector.broadcast %64 : vector<5x1xf32> to vector<5x5xf32>
    %66 = arith.subf %62, %65 : vector<5x5xf32>
    %67 = math.exp %66 : vector<5x5xf32>
    %cst_58 = arith.constant dense<0.000000e+00> : vector<5xf32>
    %68 = vector.multi_reduction <add>, %67, %cst_58 [1] : vector<5x5xf32> to vector<5xf32>
    %69 = vector.shape_cast %68 : vector<5xf32> to vector<5x1xf32>
    %70 = tpu.reciprocal %69 {approx = true} : vector<5x1xf32> -> vector<5x1xf32>
    %71 = vector.broadcast %70 : vector<5x1xf32> to vector<5x5xf32>
    %72 = arith.mulf %67, %71 : vector<5x5xf32>
    %73 = arith.truncf %72 : vector<5x5xf32> to vector<5x5xbf16>
    %74 = vector.extract_strided_slice %57 {offsets = [0, 0], sizes = [5, 16], strides = [1, 1]} : vector<5x64xf32> to vector<5x16xf32>
    %75 = arith.truncf %74 : vector<5x16xf32> to vector<5x16xbf16>
    %cst_59 = arith.constant dense<0.000000e+00> : vector<5x16xf32>
    %76 = tpu.matmul %73, %75, %cst_59 {dimension_numbers = #tpu.dot_dimension_numbers<[1], [0], [0], [1], [0, 0, 1, 1], [], []>} : vector<5x5xbf16>, vector<5x16xbf16>, vector<5x16xf32> -> vector<5x16xf32>
    %77 = arith.truncf %76 : vector<5x16xf32> to vector<5x16xbf16>
    %c0_60 = arith.constant 0 : index
    %c0_61 = arith.constant 0 : index
    %78 = vector.load %arg29[%c0_60, %c0_61] : memref<5x64xbf16, #tpu.memory_space<vmem>>, vector<5x16xbf16>
    tpu.vector_store %arg29[%c0_60, %c0_61], %77 {strides = array<i32>} : memref<5x64xbf16, #tpu.memory_space<vmem>>, vector<5x16xbf16>,
    %79 = vector.extract_strided_slice %55 {offsets = [0, 16], sizes = [5, 16], strides = [1, 1]} : vector<5x64xf32> to vector<5x16xf32>
    %80 = arith.truncf %79 : vector<5x16xf32> to vector<5x16xbf16>
    %81 = vector.extract_strided_slice %56 {offsets = [0, 16], sizes = [5, 16], strides = [1, 1]} : vector<5x64xf32> to vector<5x16xf32>
    %82 = arith.truncf %81 : vector<5x16xf32> to vector<5x16xbf16>
    %cst_62 = arith.constant dense<0.000000e+00> : vector<5x5xf32>
    %83 = tpu.matmul %80, %82, %cst_62 {dimension_numbers = #tpu.dot_dimension_numbers<[1], [1], [0], [0], [0, 0, 1, 0], [], []>} : vector<5x16xbf16>, vector<5x16xbf16>, vector<5x5xf32> -> vector<5x5xf32>
    %cst_63 = arith.constant dense<0xFF800000> : vector<5xf32>
    %84 = vector.multi_reduction <maximumf>, %83, %cst_63 [1] : vector<5x5xf32> to vector<5xf32>
    %85 = vector.shape_cast %84 : vector<5xf32> to vector<5x1xf32>
    %86 = vector.broadcast %85 : vector<5x1xf32> to vector<5x5xf32>
    %87 = arith.subf %83, %86 : vector<5x5xf32>
    %88 = math.exp %87 : vector<5x5xf32>
    %cst_64 = arith.constant dense<0.000000e+00> : vector<5xf32>
    %89 = vector.multi_reduction <add>, %88, %cst_64 [1] : vector<5x5xf32> to vector<5xf32>
    %90 = vector.shape_cast %89 : vector<5xf32> to vector<5x1xf32>
    %91 = tpu.reciprocal %90 {approx = true} : vector<5x1xf32> -> vector<5x1xf32>
    %92 = vector.broadcast %91 : vector<5x1xf32> to vector<5x5xf32>
    %93 = arith.mulf %88, %92 : vector<5x5xf32>
    %94 = arith.truncf %93 : vector<5x5xf32> to vector<5x5xbf16>
    %95 = vector.extract_strided_slice %57 {offsets = [0, 16], sizes = [5, 16], strides = [1, 1]} : vector<5x64xf32> to vector<5x16xf32>
    %96 = arith.truncf %95 : vector<5x16xf32> to vector<5x16xbf16>
    %cst_65 = arith.constant dense<0.000000e+00> : vector<5x16xf32>
    %97 = tpu.matmul %94, %96, %cst_65 {dimension_numbers = #tpu.dot_dimension_numbers<[1], [0], [0], [1], [0, 0, 1, 1], [], []>} : vector<5x5xbf16>, vector<5x16xbf16>, vector<5x16xf32> -> vector<5x16xf32>
    %98 = arith.truncf %97 : vector<5x16xf32> to vector<5x16xbf16>
    %c0_66 = arith.constant 0 : index
    %c16 = arith.constant 16 : index
    %99 = vector.load %arg29[%c0_66, %c16] : memref<5x64xbf16, #tpu.memory_space<vmem>>, vector<5x16xbf16>
    tpu.vector_store %arg29[%c0_66, %c16], %98 {strides = array<i32>} : memref<5x64xbf16, #tpu.memory_space<vmem>>, vector<5x16xbf16>,
    %100 = vector.extract_strided_slice %55 {offsets = [0, 32], sizes = [5, 16], strides = [1, 1]} : vector<5x64xf32> to vector<5x16xf32>
    %101 = arith.truncf %100 : vector<5x16xf32> to vector<5x16xbf16>
    %102 = vector.extract_strided_slice %56 {offsets = [0, 32], sizes = [5, 16], strides = [1, 1]} : vector<5x64xf32> to vector<5x16xf32>
    %103 = arith.truncf %102 : vector<5x16xf32> to vector<5x16xbf16>
    %cst_67 = arith.constant dense<0.000000e+00> : vector<5x5xf32>
    %104 = tpu.matmul %101, %103, %cst_67 {dimension_numbers = #tpu.dot_dimension_numbers<[1], [1], [0], [0], [0, 0, 1, 0], [], []>} : vector<5x16xbf16>, vector<5x16xbf16>, vector<5x5xf32> -> vector<5x5xf32>
    %cst_68 = arith.constant dense<0xFF800000> : vector<5xf32>
    %105 = vector.multi_reduction <maximumf>, %104, %cst_68 [1] : vector<5x5xf32> to vector<5xf32>
    %106 = vector.shape_cast %105 : vector<5xf32> to vector<5x1xf32>
    %107 = vector.broadcast %106 : vector<5x1xf32> to vector<5x5xf32>
    %108 = arith.subf %104, %107 : vector<5x5xf32>
    %109 = math.exp %108 : vector<5x5xf32>
    %cst_69 = arith.constant dense<0.000000e+00> : vector<5xf32>
    %110 = vector.multi_reduction <add>, %109, %cst_69 [1] : vector<5x5xf32> to vector<5xf32>
    %111 = vector.shape_cast %110 : vector<5xf32> to vector<5x1xf32>
    %112 = tpu.reciprocal %111 {approx = true} : vector<5x1xf32> -> vector<5x1xf32>
    %113 = vector.broadcast %112 : vector<5x1xf32> to vector<5x5xf32>
    %114 = arith.mulf %109, %113 : vector<5x5xf32>
    %115 = arith.truncf %114 : vector<5x5xf32> to vector<5x5xbf16>
    %116 = vector.extract_strided_slice %57 {offsets = [0, 32], sizes = [5, 16], strides = [1, 1]} : vector<5x64xf32> to vector<5x16xf32>
    %117 = arith.truncf %116 : vector<5x16xf32> to vector<5x16xbf16>
    %cst_70 = arith.constant dense<0.000000e+00> : vector<5x16xf32>
    %118 = tpu.matmul %115, %117, %cst_70 {dimension_numbers = #tpu.dot_dimension_numbers<[1], [0], [0], [1], [0, 0, 1, 1], [], []>} : vector<5x5xbf16>, vector<5x16xbf16>, vector<5x16xf32> -> vector<5x16xf32>
    %119 = arith.truncf %118 : vector<5x16xf32> to vector<5x16xbf16>
    %c0_71 = arith.constant 0 : index
    %c32 = arith.constant 32 : index
    %120 = vector.load %arg29[%c0_71, %c32] : memref<5x64xbf16, #tpu.memory_space<vmem>>, vector<5x16xbf16>
    tpu.vector_store %arg29[%c0_71, %c32], %119 {strides = array<i32>} : memref<5x64xbf16, #tpu.memory_space<vmem>>, vector<5x16xbf16>,
    %121 = vector.extract_strided_slice %55 {offsets = [0, 48], sizes = [5, 16], strides = [1, 1]} : vector<5x64xf32> to vector<5x16xf32>
    %122 = arith.truncf %121 : vector<5x16xf32> to vector<5x16xbf16>
    %123 = vector.extract_strided_slice %56 {offsets = [0, 48], sizes = [5, 16], strides = [1, 1]} : vector<5x64xf32> to vector<5x16xf32>
    %124 = arith.truncf %123 : vector<5x16xf32> to vector<5x16xbf16>
    %cst_72 = arith.constant dense<0.000000e+00> : vector<5x5xf32>
    %125 = tpu.matmul %122, %124, %cst_72 {dimension_numbers = #tpu.dot_dimension_numbers<[1], [1], [0], [0], [0, 0, 1, 0], [], []>} : vector<5x16xbf16>, vector<5x16xbf16>, vector<5x5xf32> -> vector<5x5xf32>
    %cst_73 = arith.constant dense<0xFF800000> : vector<5xf32>
    %126 = vector.multi_reduction <maximumf>, %125, %cst_73 [1] : vector<5x5xf32> to vector<5xf32>
    %127 = vector.shape_cast %126 : vector<5xf32> to vector<5x1xf32>
    %128 = vector.broadcast %127 : vector<5x1xf32> to vector<5x5xf32>
    %129 = arith.subf %125, %128 : vector<5x5xf32>
    %130 = math.exp %129 : vector<5x5xf32>
    %cst_74 = arith.constant dense<0.000000e+00> : vector<5xf32>
    %131 = vector.multi_reduction <add>, %130, %cst_74 [1] : vector<5x5xf32> to vector<5xf32>
    %132 = vector.shape_cast %131 : vector<5xf32> to vector<5x1xf32>
    %133 = tpu.reciprocal %132 {approx = true} : vector<5x1xf32> -> vector<5x1xf32>
    %134 = vector.broadcast %133 : vector<5x1xf32> to vector<5x5xf32>
    %135 = arith.mulf %130, %134 : vector<5x5xf32>
    %136 = arith.truncf %135 : vector<5x5xf32> to vector<5x5xbf16>
    %137 = vector.extract_strided_slice %57 {offsets = [0, 48], sizes = [5, 16], strides = [1, 1]} : vector<5x64xf32> to vector<5x16xf32>
    %138 = arith.truncf %137 : vector<5x16xf32> to vector<5x16xbf16>
    %cst_75 = arith.constant dense<0.000000e+00> : vector<5x16xf32>
    %139 = tpu.matmul %136, %138, %cst_75 {dimension_numbers = #tpu.dot_dimension_numbers<[1], [0], [0], [1], [0, 0, 1, 1], [], []>} : vector<5x5xbf16>, vector<5x16xbf16>, vector<5x16xf32> -> vector<5x16xf32>
    %140 = arith.truncf %139 : vector<5x16xf32> to vector<5x16xbf16>
    %c0_76 = arith.constant 0 : index
    %c48 = arith.constant 48 : index
    %141 = vector.load %arg29[%c0_76, %c48] : memref<5x64xbf16, #tpu.memory_space<vmem>>, vector<5x16xbf16>
    tpu.vector_store %arg29[%c0_76, %c48], %140 {strides = array<i32>} : memref<5x64xbf16, #tpu.memory_space<vmem>>, vector<5x16xbf16>,
    %c0_77 = arith.constant 0 : index
    %c0_78 = arith.constant 0 : index
    %142 = vector.load %arg29[%c0_77, %c0_78] : memref<5x64xbf16, #tpu.memory_space<vmem>>, vector<5x64xbf16>
    %cst_79 = arith.constant dense<0.000000e+00> : vector<5x64xf32>
    %143 = tpu.matmul %142, %16, %cst_79 {dimension_numbers = #tpu.dot_dimension_numbers<[1], [0], [0], [1], [0, 0, 1, 1], [], []>} : vector<5x64xbf16>, vector<64x64xbf16>, vector<5x64xf32> -> vector<5x64xf32>
    %144 = arith.addf %28, %143 : vector<5x64xf32>
    %145 = vector.broadcast %18 : vector<1x64xf32> to vector<5x64xf32>
    %146 = arith.addf %144, %145 : vector<5x64xf32>
    %cst_80 = arith.constant dense<0.000000e+00> : vector<5xf32>
    %147 = vector.multi_reduction <add>, %146, %cst_80 [1] : vector<5x64xf32> to vector<5xf32>
    %148 = vector.shape_cast %147 : vector<5xf32> to vector<5x1xf32>
    %cst_81 = arith.constant 6.400000e+01 : f32
    %149 = vector.broadcast %cst_81 : f32 to vector<5x1xf32>
    %150 = arith.divf %148, %149 : vector<5x1xf32>
    %151 = vector.broadcast %150 : vector<5x1xf32> to vector<5x64xf32>
    %152 = arith.subf %146, %151 : vector<5x64xf32>
    %153 = arith.mulf %152, %152 : vector<5x64xf32>
    %cst_82 = arith.constant dense<0.000000e+00> : vector<5xf32>
    %154 = vector.multi_reduction <add>, %153, %cst_82 [1] : vector<5x64xf32> to vector<5xf32>
    %155 = vector.shape_cast %154 : vector<5xf32> to vector<5x1xf32>
    %cst_83 = arith.constant 6.400000e+01 : f32
    %156 = vector.broadcast %cst_83 : f32 to vector<5x1xf32>
    %157 = arith.divf %155, %156 : vector<5x1xf32>
    %158 = vector.broadcast %150 : vector<5x1xf32> to vector<5x64xf32>
    %159 = arith.subf %146, %158 : vector<5x64xf32>
    %cst_84 = arith.constant 9.99999997E-7 : f32
    %160 = vector.broadcast %cst_84 : f32 to vector<5x1xf32>
    %161 = arith.addf %157, %160 : vector<5x1xf32>
    %162 = math.rsqrt %161 : vector<5x1xf32>
    %163 = vector.broadcast %162 : vector<5x1xf32> to vector<5x64xf32>
    %164 = arith.mulf %159, %163 : vector<5x64xf32>
    %165 = vector.broadcast %8 : vector<1x64xf32> to vector<5x64xf32>
    %166 = arith.mulf %164, %165 : vector<5x64xf32>
    %167 = vector.broadcast %10 : vector<1x64xf32> to vector<5x64xf32>
    %168 = arith.addf %166, %167 : vector<5x64xf32>
    %169 = arith.truncf %168 : vector<5x64xf32> to vector<5x64xbf16>
    %cst_85 = arith.constant dense<0.000000e+00> : vector<5x256xf32>
    %170 = tpu.matmul %169, %20, %cst_85 {dimension_numbers = #tpu.dot_dimension_numbers<[1], [0], [0], [1], [0, 0, 1, 1], [], []>} : vector<5x64xbf16>, vector<64x256xbf16>, vector<5x256xf32> -> vector<5x256xf32>
    %171 = vector.broadcast %22 : vector<1x256xf32> to vector<5x256xf32>
    %172 = arith.addf %170, %171 : vector<5x256xf32>
    %cst_86 = arith.constant 5.000000e-01 : f32
    %173 = vector.broadcast %cst_86 : f32 to vector<5x256xf32>
    %174 = arith.mulf %173, %172 : vector<5x256xf32>
    %cst_87 = arith.constant 0.707106769 : f32
    %175 = vector.broadcast %cst_87 : f32 to vector<5x256xf32>
    %176 = arith.mulf %172, %175 : vector<5x256xf32>
    %cst_88 = arith.constant 0.000000e+00 : f32
    %177 = vector.broadcast %cst_88 : f32 to vector<5x256xf32>
    %178 = arith.cmpf oge, %176, %177 : vector<5x256xf32>
    %cst_89 = arith.constant 1.000000e+00 : f32
    %cst_90 = arith.constant -1.000000e+00 : f32
    %179 = vector.broadcast %cst_89 : f32 to vector<5x256xf32>
    %180 = vector.broadcast %cst_90 : f32 to vector<5x256xf32>
    %181 = arith.select %178, %179, %180 : vector<5x256xi1>, vector<5x256xf32>
    %182 = math.absf %176 : vector<5x256xf32>
    %cst_91 = arith.constant 0.327591091 : f32
    %183 = vector.broadcast %cst_91 : f32 to vector<5x256xf32>
    %184 = arith.mulf %183, %182 : vector<5x256xf32>
    %cst_92 = arith.constant 1.000000e+00 : f32
    %185 = vector.broadcast %cst_92 : f32 to vector<5x256xf32>
    %186 = arith.addf %185, %184 : vector<5x256xf32>
    %cst_93 = arith.constant 1.000000e+00 : f32
    %187 = vector.broadcast %cst_93 : f32 to vector<5x256xf32>
    %188 = arith.divf %187, %186 : vector<5x256xf32>
    %cst_94 = arith.constant 1.06140542 : f32
    %189 = vector.broadcast %cst_94 : f32 to vector<5x256xf32>
    %190 = arith.mulf %189, %188 : vector<5x256xf32>
    %cst_95 = arith.constant -1.45315206 : f32
    %191 = vector.broadcast %cst_95 : f32 to vector<5x256xf32>
    %192 = arith.addf %190, %191 : vector<5x256xf32>
    %193 = arith.mulf %192, %188 : vector<5x256xf32>
    %cst_96 = arith.constant 1.42141378 : f32
    %194 = vector.broadcast %cst_96 : f32 to vector<5x256xf32>
    %195 = arith.addf %193, %194 : vector<5x256xf32>
    %196 = arith.mulf %195, %188 : vector<5x256xf32>
    %cst_97 = arith.constant -0.284496725 : f32
    %197 = vector.broadcast %cst_97 : f32 to vector<5x256xf32>
    %198 = arith.addf %196, %197 : vector<5x256xf32>
    %199 = arith.mulf %198, %188 : vector<5x256xf32>
    %cst_98 = arith.constant 0.254829586 : f32
    %200 = vector.broadcast %cst_98 : f32 to vector<5x256xf32>
    %201 = arith.addf %199, %200 : vector<5x256xf32>
    %202 = arith.mulf %201, %188 : vector<5x256xf32>
    %cst_99 = arith.constant 0.000000e+00 : f32
    %203 = vector.broadcast %cst_99 : f32 to vector<5x256xf32>
    %204 = arith.subf %203, %182 : vector<5x256xf32>
    %205 = arith.mulf %204, %182 : vector<5x256xf32>
    %206 = math.exp %205 : vector<5x256xf32>
    %207 = arith.mulf %202, %206 : vector<5x256xf32>
    %cst_100 = arith.constant 1.000000e+00 : f32
    %208 = vector.broadcast %cst_100 : f32 to vector<5x256xf32>
    %209 = arith.subf %208, %207 : vector<5x256xf32>
    %210 = arith.mulf %181, %209 : vector<5x256xf32>
    %cst_101 = arith.constant 1.000000e+00 : f32
    %211 = vector.broadcast %cst_101 : f32 to vector<5x256xf32>
    %212 = arith.addf %211, %210 : vector<5x256xf32>
    %213 = arith.mulf %174, %212 : vector<5x256xf32>
    %214 = arith.truncf %213 : vector<5x256xf32> to vector<5x256xbf16>
    %cst_102 = arith.constant dense<0.000000e+00> : vector<5x64xf32>
    %215 = tpu.matmul %214, %24, %cst_102 {dimension_numbers = #tpu.dot_dimension_numbers<[1], [0], [0], [1], [0, 0, 1, 1], [], []>} : vector<5x256xbf16>, vector<256x64xbf16>, vector<5x64xf32> -> vector<5x64xf32>
    %216 = vector.broadcast %26 : vector<1x64xf32> to vector<5x64xf32>
    %217 = arith.addf %215, %216 : vector<5x64xf32>
    %218 = arith.addf %146, %217 : vector<5x64xf32>
    %c0_103 = arith.constant 0 : index
    %c0_104 = arith.constant 0 : index
    %c0_105 = arith.constant 0 : index
    %219 = vector.load %arg28[%c0_103, %c0_104, %c0_105] : memref<2x5x64xf32, #tpu.memory_space<vmem>>, vector<1x5x64xf32>
    %220 = vector.shape_cast %219 : vector<1x5x64xf32> to vector<5x64xf32>
    %221 = vector.shape_cast %218 : vector<5x64xf32> to vector<1x5x64xf32>
    tpu.vector_store %arg28[%c0_103, %c0_104, %c0_105], %221 {strides = array<i32>} : memref<2x5x64xf32, #tpu.memory_space<vmem>>, vector<1x5x64xf32>,
    %c1 = arith.constant 1 : index
    %c0_106 = arith.constant 0 : index
    %c0_107 = arith.constant 0 : index
    %222 = vector.load %arg28[%c1, %c0_106, %c0_107] : memref<2x5x64xf32, #tpu.memory_space<vmem>>, vector<1x5x64xf32>
    %223 = vector.shape_cast %222 : vector<1x5x64xf32> to vector<5x64xf32>
    %cst_108 = arith.constant dense<0.000000e+00> : vector<5xf32>
    %224 = vector.multi_reduction <add>, %223, %cst_108 [1] : vector<5x64xf32> to vector<5xf32>
    %225 = vector.shape_cast %224 : vector<5xf32> to vector<5x1xf32>
    %cst_109 = arith.constant 6.400000e+01 : f32
    %226 = vector.broadcast %cst_109 : f32 to vector<5x1xf32>
    %227 = arith.divf %225, %226 : vector<5x1xf32>
    %228 = vector.broadcast %227 : vector<5x1xf32> to vector<5x64xf32>
    %229 = arith.subf %223, %228 : vector<5x64xf32>
    %230 = arith.mulf %229, %229 : vector<5x64xf32>
    %cst_110 = arith.constant dense<0.000000e+00> : vector<5xf32>
    %231 = vector.multi_reduction <add>, %230, %cst_110 [1] : vector<5x64xf32> to vector<5xf32>
    %232 = vector.shape_cast %231 : vector<5xf32> to vector<5x1xf32>
    %cst_111 = arith.constant 6.400000e+01 : f32
    %233 = vector.broadcast %cst_111 : f32 to vector<5x1xf32>
    %234 = arith.divf %232, %233 : vector<5x1xf32>
    %235 = vector.broadcast %227 : vector<5x1xf32> to vector<5x64xf32>
    %236 = arith.subf %223, %235 : vector<5x64xf32>
    %cst_112 = arith.constant 9.99999997E-7 : f32
    %237 = vector.broadcast %cst_112 : f32 to vector<5x1xf32>
    %238 = arith.addf %234, %237 : vector<5x1xf32>
    %239 = math.rsqrt %238 : vector<5x1xf32>
    %240 = vector.broadcast %239 : vector<5x1xf32> to vector<5x64xf32>
    %241 = arith.mulf %236, %240 : vector<5x64xf32>
    %242 = vector.broadcast %4 : vector<1x64xf32> to vector<5x64xf32>
    %243 = arith.mulf %241, %242 : vector<5x64xf32>
    %244 = vector.broadcast %6 : vector<1x64xf32> to vector<5x64xf32>
    %245 = arith.addf %243, %244 : vector<5x64xf32>
    %246 = arith.truncf %245 : vector<5x64xf32> to vector<5x64xbf16>
    %cst_113 = arith.constant dense<0.000000e+00> : vector<5x192xf32>
    %247 = tpu.matmul %246, %12, %cst_113 {dimension_numbers = #tpu.dot_dimension_numbers<[1], [0], [0], [1], [0, 0, 1, 1], [], []>} : vector<5x64xbf16>, vector<64x192xbf16>, vector<5x192xf32> -> vector<5x192xf32>
    %248 = vector.broadcast %14 : vector<1x192xf32> to vector<5x192xf32>
    %249 = arith.addf %247, %248 : vector<5x192xf32>
    %250 = vector.extract_strided_slice %249 {offsets = [0, 0], sizes = [5, 64], strides = [1, 1]} : vector<5x192xf32> to vector<5x64xf32>
    %251 = vector.extract_strided_slice %249 {offsets = [0, 64], sizes = [5, 64], strides = [1, 1]} : vector<5x192xf32> to vector<5x64xf32>
    %252 = vector.extract_strided_slice %249 {offsets = [0, 128], sizes = [5, 64], strides = [1, 1]} : vector<5x192xf32> to vector<5x64xf32>
    %253 = vector.extract_strided_slice %250 {offsets = [0, 0], sizes = [5, 16], strides = [1, 1]} : vector<5x64xf32> to vector<5x16xf32>
    %254 = arith.truncf %253 : vector<5x16xf32> to vector<5x16xbf16>
    %255 = vector.extract_strided_slice %251 {offsets = [0, 0], sizes = [5, 16], strides = [1, 1]} : vector<5x64xf32> to vector<5x16xf32>
    %256 = arith.truncf %255 : vector<5x16xf32> to vector<5x16xbf16>
    %cst_114 = arith.constant dense<0.000000e+00> : vector<5x5xf32>
    %257 = tpu.matmul %254, %256, %cst_114 {dimension_numbers = #tpu.dot_dimension_numbers<[1], [1], [0], [0], [0, 0, 1, 0], [], []>} : vector<5x16xbf16>, vector<5x16xbf16>, vector<5x5xf32> -> vector<5x5xf32>
    %cst_115 = arith.constant dense<0xFF800000> : vector<5xf32>
    %258 = vector.multi_reduction <maximumf>, %257, %cst_115 [1] : vector<5x5xf32> to vector<5xf32>
    %259 = vector.shape_cast %258 : vector<5xf32> to vector<5x1xf32>
    %260 = vector.broadcast %259 : vector<5x1xf32> to vector<5x5xf32>
    %261 = arith.subf %257, %260 : vector<5x5xf32>
    %262 = math.exp %261 : vector<5x5xf32>
    %cst_116 = arith.constant dense<0.000000e+00> : vector<5xf32>
    %263 = vector.multi_reduction <add>, %262, %cst_116 [1] : vector<5x5xf32> to vector<5xf32>
    %264 = vector.shape_cast %263 : vector<5xf32> to vector<5x1xf32>
    %265 = tpu.reciprocal %264 {approx = true} : vector<5x1xf32> -> vector<5x1xf32>
    %266 = vector.broadcast %265 : vector<5x1xf32> to vector<5x5xf32>
    %267 = arith.mulf %262, %266 : vector<5x5xf32>
    %268 = arith.truncf %267 : vector<5x5xf32> to vector<5x5xbf16>
    %269 = vector.extract_strided_slice %252 {offsets = [0, 0], sizes = [5, 16], strides = [1, 1]} : vector<5x64xf32> to vector<5x16xf32>
    %270 = arith.truncf %269 : vector<5x16xf32> to vector<5x16xbf16>
    %cst_117 = arith.constant dense<0.000000e+00> : vector<5x16xf32>
    %271 = tpu.matmul %268, %270, %cst_117 {dimension_numbers = #tpu.dot_dimension_numbers<[1], [0], [0], [1], [0, 0, 1, 1], [], []>} : vector<5x5xbf16>, vector<5x16xbf16>, vector<5x16xf32> -> vector<5x16xf32>
    %272 = arith.truncf %271 : vector<5x16xf32> to vector<5x16xbf16>
    %c0_118 = arith.constant 0 : index
    %c0_119 = arith.constant 0 : index
    %273 = vector.load %arg29[%c0_118, %c0_119] : memref<5x64xbf16, #tpu.memory_space<vmem>>, vector<5x16xbf16>
    tpu.vector_store %arg29[%c0_118, %c0_119], %272 {strides = array<i32>} : memref<5x64xbf16, #tpu.memory_space<vmem>>, vector<5x16xbf16>,
    %274 = vector.extract_strided_slice %250 {offsets = [0, 16], sizes = [5, 16], strides = [1, 1]} : vector<5x64xf32> to vector<5x16xf32>
    %275 = arith.truncf %274 : vector<5x16xf32> to vector<5x16xbf16>
    %276 = vector.extract_strided_slice %251 {offsets = [0, 16], sizes = [5, 16], strides = [1, 1]} : vector<5x64xf32> to vector<5x16xf32>
    %277 = arith.truncf %276 : vector<5x16xf32> to vector<5x16xbf16>
    %cst_120 = arith.constant dense<0.000000e+00> : vector<5x5xf32>
    %278 = tpu.matmul %275, %277, %cst_120 {dimension_numbers = #tpu.dot_dimension_numbers<[1], [1], [0], [0], [0, 0, 1, 0], [], []>} : vector<5x16xbf16>, vector<5x16xbf16>, vector<5x5xf32> -> vector<5x5xf32>
    %cst_121 = arith.constant dense<0xFF800000> : vector<5xf32>
    %279 = vector.multi_reduction <maximumf>, %278, %cst_121 [1] : vector<5x5xf32> to vector<5xf32>
    %280 = vector.shape_cast %279 : vector<5xf32> to vector<5x1xf32>
    %281 = vector.broadcast %280 : vector<5x1xf32> to vector<5x5xf32>
    %282 = arith.subf %278, %281 : vector<5x5xf32>
    %283 = math.exp %282 : vector<5x5xf32>
    %cst_122 = arith.constant dense<0.000000e+00> : vector<5xf32>
    %284 = vector.multi_reduction <add>, %283, %cst_122 [1] : vector<5x5xf32> to vector<5xf32>
    %285 = vector.shape_cast %284 : vector<5xf32> to vector<5x1xf32>
    %286 = tpu.reciprocal %285 {approx = true} : vector<5x1xf32> -> vector<5x1xf32>
    %287 = vector.broadcast %286 : vector<5x1xf32> to vector<5x5xf32>
    %288 = arith.mulf %283, %287 : vector<5x5xf32>
    %289 = arith.truncf %288 : vector<5x5xf32> to vector<5x5xbf16>
    %290 = vector.extract_strided_slice %252 {offsets = [0, 16], sizes = [5, 16], strides = [1, 1]} : vector<5x64xf32> to vector<5x16xf32>
    %291 = arith.truncf %290 : vector<5x16xf32> to vector<5x16xbf16>
    %cst_123 = arith.constant dense<0.000000e+00> : vector<5x16xf32>
    %292 = tpu.matmul %289, %291, %cst_123 {dimension_numbers = #tpu.dot_dimension_numbers<[1], [0], [0], [1], [0, 0, 1, 1], [], []>} : vector<5x5xbf16>, vector<5x16xbf16>, vector<5x16xf32> -> vector<5x16xf32>
    %293 = arith.truncf %292 : vector<5x16xf32> to vector<5x16xbf16>
    %c0_124 = arith.constant 0 : index
    %c16_125 = arith.constant 16 : index
    %294 = vector.load %arg29[%c0_124, %c16_125] : memref<5x64xbf16, #tpu.memory_space<vmem>>, vector<5x16xbf16>
    tpu.vector_store %arg29[%c0_124, %c16_125], %293 {strides = array<i32>} : memref<5x64xbf16, #tpu.memory_space<vmem>>, vector<5x16xbf16>,
    %295 = vector.extract_strided_slice %250 {offsets = [0, 32], sizes = [5, 16], strides = [1, 1]} : vector<5x64xf32> to vector<5x16xf32>
    %296 = arith.truncf %295 : vector<5x16xf32> to vector<5x16xbf16>
    %297 = vector.extract_strided_slice %251 {offsets = [0, 32], sizes = [5, 16], strides = [1, 1]} : vector<5x64xf32> to vector<5x16xf32>
    %298 = arith.truncf %297 : vector<5x16xf32> to vector<5x16xbf16>
    %cst_126 = arith.constant dense<0.000000e+00> : vector<5x5xf32>
    %299 = tpu.matmul %296, %298, %cst_126 {dimension_numbers = #tpu.dot_dimension_numbers<[1], [1], [0], [0], [0, 0, 1, 0], [], []>} : vector<5x16xbf16>, vector<5x16xbf16>, vector<5x5xf32> -> vector<5x5xf32>
    %cst_127 = arith.constant dense<0xFF800000> : vector<5xf32>
    %300 = vector.multi_reduction <maximumf>, %299, %cst_127 [1] : vector<5x5xf32> to vector<5xf32>
    %301 = vector.shape_cast %300 : vector<5xf32> to vector<5x1xf32>
    %302 = vector.broadcast %301 : vector<5x1xf32> to vector<5x5xf32>
    %303 = arith.subf %299, %302 : vector<5x5xf32>
    %304 = math.exp %303 : vector<5x5xf32>
    %cst_128 = arith.constant dense<0.000000e+00> : vector<5xf32>
    %305 = vector.multi_reduction <add>, %304, %cst_128 [1] : vector<5x5xf32> to vector<5xf32>
    %306 = vector.shape_cast %305 : vector<5xf32> to vector<5x1xf32>
    %307 = tpu.reciprocal %306 {approx = true} : vector<5x1xf32> -> vector<5x1xf32>
    %308 = vector.broadcast %307 : vector<5x1xf32> to vector<5x5xf32>
    %309 = arith.mulf %304, %308 : vector<5x5xf32>
    %310 = arith.truncf %309 : vector<5x5xf32> to vector<5x5xbf16>
    %311 = vector.extract_strided_slice %252 {offsets = [0, 32], sizes = [5, 16], strides = [1, 1]} : vector<5x64xf32> to vector<5x16xf32>
    %312 = arith.truncf %311 : vector<5x16xf32> to vector<5x16xbf16>
    %cst_129 = arith.constant dense<0.000000e+00> : vector<5x16xf32>
    %313 = tpu.matmul %310, %312, %cst_129 {dimension_numbers = #tpu.dot_dimension_numbers<[1], [0], [0], [1], [0, 0, 1, 1], [], []>} : vector<5x5xbf16>, vector<5x16xbf16>, vector<5x16xf32> -> vector<5x16xf32>
    %314 = arith.truncf %313 : vector<5x16xf32> to vector<5x16xbf16>
    %c0_130 = arith.constant 0 : index
    %c32_131 = arith.constant 32 : index
    %315 = vector.load %arg29[%c0_130, %c32_131] : memref<5x64xbf16, #tpu.memory_space<vmem>>, vector<5x16xbf16>
    tpu.vector_store %arg29[%c0_130, %c32_131], %314 {strides = array<i32>} : memref<5x64xbf16, #tpu.memory_space<vmem>>, vector<5x16xbf16>,
    %316 = vector.extract_strided_slice %250 {offsets = [0, 48], sizes = [5, 16], strides = [1, 1]} : vector<5x64xf32> to vector<5x16xf32>
    %317 = arith.truncf %316 : vector<5x16xf32> to vector<5x16xbf16>
    %318 = vector.extract_strided_slice %251 {offsets = [0, 48], sizes = [5, 16], strides = [1, 1]} : vector<5x64xf32> to vector<5x16xf32>
    %319 = arith.truncf %318 : vector<5x16xf32> to vector<5x16xbf16>
    %cst_132 = arith.constant dense<0.000000e+00> : vector<5x5xf32>
    %320 = tpu.matmul %317, %319, %cst_132 {dimension_numbers = #tpu.dot_dimension_numbers<[1], [1], [0], [0], [0, 0, 1, 0], [], []>} : vector<5x16xbf16>, vector<5x16xbf16>, vector<5x5xf32> -> vector<5x5xf32>
    %cst_133 = arith.constant dense<0xFF800000> : vector<5xf32>
    %321 = vector.multi_reduction <maximumf>, %320, %cst_133 [1] : vector<5x5xf32> to vector<5xf32>
    %322 = vector.shape_cast %321 : vector<5xf32> to vector<5x1xf32>
    %323 = vector.broadcast %322 : vector<5x1xf32> to vector<5x5xf32>
    %324 = arith.subf %320, %323 : vector<5x5xf32>
    %325 = math.exp %324 : vector<5x5xf32>
    %cst_134 = arith.constant dense<0.000000e+00> : vector<5xf32>
    %326 = vector.multi_reduction <add>, %325, %cst_134 [1] : vector<5x5xf32> to vector<5xf32>
    %327 = vector.shape_cast %326 : vector<5xf32> to vector<5x1xf32>
    %328 = tpu.reciprocal %327 {approx = true} : vector<5x1xf32> -> vector<5x1xf32>
    %329 = vector.broadcast %328 : vector<5x1xf32> to vector<5x5xf32>
    %330 = arith.mulf %325, %329 : vector<5x5xf32>
    %331 = arith.truncf %330 : vector<5x5xf32> to vector<5x5xbf16>
    %332 = vector.extract_strided_slice %252 {offsets = [0, 48], sizes = [5, 16], strides = [1, 1]} : vector<5x64xf32> to vector<5x16xf32>
    %333 = arith.truncf %332 : vector<5x16xf32> to vector<5x16xbf16>
    %cst_135 = arith.constant dense<0.000000e+00> : vector<5x16xf32>
    %334 = tpu.matmul %331, %333, %cst_135 {dimension_numbers = #tpu.dot_dimension_numbers<[1], [0], [0], [1], [0, 0, 1, 1], [], []>} : vector<5x5xbf16>, vector<5x16xbf16>, vector<5x16xf32> -> vector<5x16xf32>
    %335 = arith.truncf %334 : vector<5x16xf32> to vector<5x16xbf16>
    %c0_136 = arith.constant 0 : index
    %c48_137 = arith.constant 48 : index
    %336 = vector.load %arg29[%c0_136, %c48_137] : memref<5x64xbf16, #tpu.memory_space<vmem>>, vector<5x16xbf16>
    tpu.vector_store %arg29[%c0_136, %c48_137], %335 {strides = array<i32>} : memref<5x64xbf16, #tpu.memory_space<vmem>>, vector<5x16xbf16>,
    %c0_138 = arith.constant 0 : index
    %c0_139 = arith.constant 0 : index
    %337 = vector.load %arg29[%c0_138, %c0_139] : memref<5x64xbf16, #tpu.memory_space<vmem>>, vector<5x64xbf16>
    %cst_140 = arith.constant dense<0.000000e+00> : vector<5x64xf32>
    %338 = tpu.matmul %337, %16, %cst_140 {dimension_numbers = #tpu.dot_dimension_numbers<[1], [0], [0], [1], [0, 0, 1, 1], [], []>} : vector<5x64xbf16>, vector<64x64xbf16>, vector<5x64xf32> -> vector<5x64xf32>
    %339 = arith.addf %223, %338 : vector<5x64xf32>
    %340 = vector.broadcast %18 : vector<1x64xf32> to vector<5x64xf32>
    %341 = arith.addf %339, %340 : vector<5x64xf32>
    %cst_141 = arith.constant dense<0.000000e+00> : vector<5xf32>
    %342 = vector.multi_reduction <add>, %341, %cst_141 [1] : vector<5x64xf32> to vector<5xf32>
    %343 = vector.shape_cast %342 : vector<5xf32> to vector<5x1xf32>
    %cst_142 = arith.constant 6.400000e+01 : f32
    %344 = vector.broadcast %cst_142 : f32 to vector<5x1xf32>
    %345 = arith.divf %343, %344 : vector<5x1xf32>
    %346 = vector.broadcast %345 : vector<5x1xf32> to vector<5x64xf32>
    %347 = arith.subf %341, %346 : vector<5x64xf32>
    %348 = arith.mulf %347, %347 : vector<5x64xf32>
    %cst_143 = arith.constant dense<0.000000e+00> : vector<5xf32>
    %349 = vector.multi_reduction <add>, %348, %cst_143 [1] : vector<5x64xf32> to vector<5xf32>
    %350 = vector.shape_cast %349 : vector<5xf32> to vector<5x1xf32>
    %cst_144 = arith.constant 6.400000e+01 : f32
    %351 = vector.broadcast %cst_144 : f32 to vector<5x1xf32>
    %352 = arith.divf %350, %351 : vector<5x1xf32>
    %353 = vector.broadcast %345 : vector<5x1xf32> to vector<5x64xf32>
    %354 = arith.subf %341, %353 : vector<5x64xf32>
    %cst_145 = arith.constant 9.99999997E-7 : f32
    %355 = vector.broadcast %cst_145 : f32 to vector<5x1xf32>
    %356 = arith.addf %352, %355 : vector<5x1xf32>
    %357 = math.rsqrt %356 : vector<5x1xf32>
    %358 = vector.broadcast %357 : vector<5x1xf32> to vector<5x64xf32>
    %359 = arith.mulf %354, %358 : vector<5x64xf32>
    %360 = vector.broadcast %8 : vector<1x64xf32> to vector<5x64xf32>
    %361 = arith.mulf %359, %360 : vector<5x64xf32>
    %362 = vector.broadcast %10 : vector<1x64xf32> to vector<5x64xf32>
    %363 = arith.addf %361, %362 : vector<5x64xf32>
    %364 = arith.truncf %363 : vector<5x64xf32> to vector<5x64xbf16>
    %cst_146 = arith.constant dense<0.000000e+00> : vector<5x256xf32>
    %365 = tpu.matmul %364, %20, %cst_146 {dimension_numbers = #tpu.dot_dimension_numbers<[1], [0], [0], [1], [0, 0, 1, 1], [], []>} : vector<5x64xbf16>, vector<64x256xbf16>, vector<5x256xf32> -> vector<5x256xf32>
    %366 = vector.broadcast %22 : vector<1x256xf32> to vector<5x256xf32>
    %367 = arith.addf %365, %366 : vector<5x256xf32>
    %cst_147 = arith.constant 5.000000e-01 : f32
    %368 = vector.broadcast %cst_147 : f32 to vector<5x256xf32>
    %369 = arith.mulf %368, %367 : vector<5x256xf32>
    %cst_148 = arith.constant 0.707106769 : f32
    %370 = vector.broadcast %cst_148 : f32 to vector<5x256xf32>
    %371 = arith.mulf %367, %370 : vector<5x256xf32>
    %cst_149 = arith.constant 0.000000e+00 : f32
    %372 = vector.broadcast %cst_149 : f32 to vector<5x256xf32>
    %373 = arith.cmpf oge, %371, %372 : vector<5x256xf32>
    %cst_150 = arith.constant 1.000000e+00 : f32
    %cst_151 = arith.constant -1.000000e+00 : f32
    %374 = vector.broadcast %cst_150 : f32 to vector<5x256xf32>
    %375 = vector.broadcast %cst_151 : f32 to vector<5x256xf32>
    %376 = arith.select %373, %374, %375 : vector<5x256xi1>, vector<5x256xf32>
    %377 = math.absf %371 : vector<5x256xf32>
    %cst_152 = arith.constant 0.327591091 : f32
    %378 = vector.broadcast %cst_152 : f32 to vector<5x256xf32>
    %379 = arith.mulf %378, %377 : vector<5x256xf32>
    %cst_153 = arith.constant 1.000000e+00 : f32
    %380 = vector.broadcast %cst_153 : f32 to vector<5x256xf32>
    %381 = arith.addf %380, %379 : vector<5x256xf32>
    %cst_154 = arith.constant 1.000000e+00 : f32
    %382 = vector.broadcast %cst_154 : f32 to vector<5x256xf32>
    %383 = arith.divf %382, %381 : vector<5x256xf32>
    %cst_155 = arith.constant 1.06140542 : f32
    %384 = vector.broadcast %cst_155 : f32 to vector<5x256xf32>
    %385 = arith.mulf %384, %383 : vector<5x256xf32>
    %cst_156 = arith.constant -1.45315206 : f32
    %386 = vector.broadcast %cst_156 : f32 to vector<5x256xf32>
    %387 = arith.addf %385, %386 : vector<5x256xf32>
    %388 = arith.mulf %387, %383 : vector<5x256xf32>
    %cst_157 = arith.constant 1.42141378 : f32
    %389 = vector.broadcast %cst_157 : f32 to vector<5x256xf32>
    %390 = arith.addf %388, %389 : vector<5x256xf32>
    %391 = arith.mulf %390, %383 : vector<5x256xf32>
    %cst_158 = arith.constant -0.284496725 : f32
    %392 = vector.broadcast %cst_158 : f32 to vector<5x256xf32>
    %393 = arith.addf %391, %392 : vector<5x256xf32>
    %394 = arith.mulf %393, %383 : vector<5x256xf32>
    %cst_159 = arith.constant 0.254829586 : f32
    %395 = vector.broadcast %cst_159 : f32 to vector<5x256xf32>
    %396 = arith.addf %394, %395 : vector<5x256xf32>
    %397 = arith.mulf %396, %383 : vector<5x256xf32>
    %cst_160 = arith.constant 0.000000e+00 : f32
    %398 = vector.broadcast %cst_160 : f32 to vector<5x256xf32>
    %399 = arith.subf %398, %377 : vector<5x256xf32>
    %400 = arith.mulf %399, %377 : vector<5x256xf32>
    %401 = math.exp %400 : vector<5x256xf32>
    %402 = arith.mulf %397, %401 : vector<5x256xf32>
    %cst_161 = arith.constant 1.000000e+00 : f32
    %403 = vector.broadcast %cst_161 : f32 to vector<5x256xf32>
    %404 = arith.subf %403, %402 : vector<5x256xf32>
    %405 = arith.mulf %376, %404 : vector<5x256xf32>
    %cst_162 = arith.constant 1.000000e+00 : f32
    %406 = vector.broadcast %cst_162 : f32 to vector<5x256xf32>
    %407 = arith.addf %406, %405 : vector<5x256xf32>
    %408 = arith.mulf %369, %407 : vector<5x256xf32>
    %409 = arith.truncf %408 : vector<5x256xf32> to vector<5x256xbf16>
    %cst_163 = arith.constant dense<0.000000e+00> : vector<5x64xf32>
    %410 = tpu.matmul %409, %24, %cst_163 {dimension_numbers = #tpu.dot_dimension_numbers<[1], [0], [0], [1], [0, 0, 1, 1], [], []>} : vector<5x256xbf16>, vector<256x64xbf16>, vector<5x64xf32> -> vector<5x64xf32>
    %411 = vector.broadcast %26 : vector<1x64xf32> to vector<5x64xf32>
    %412 = arith.addf %410, %411 : vector<5x64xf32>
    %413 = arith.addf %341, %412 : vector<5x64xf32>
    %c1_164 = arith.constant 1 : index
    %c0_165 = arith.constant 0 : index
    %c0_166 = arith.constant 0 : index
    %414 = vector.load %arg28[%c1_164, %c0_165, %c0_166] : memref<2x5x64xf32, #tpu.memory_space<vmem>>, vector<1x5x64xf32>
    %415 = vector.shape_cast %414 : vector<1x5x64xf32> to vector<5x64xf32>
    %416 = vector.shape_cast %413 : vector<5x64xf32> to vector<1x5x64xf32>
    tpu.vector_store %arg28[%c1_164, %c0_165, %c0_166], %416 {strides = array<i32>} : memref<2x5x64xf32, #tpu.memory_space<vmem>>, vector<1x5x64xf32>,
    %c1_i32 = arith.constant 1 : i32
    %417 = arith.cmpi eq, %arg2, %c1_i32 : i32
    %418 = arith.extui %417 : i1 to i32
    %c0_i32_167 = arith.constant 0 : i32
    %419 = arith.cmpi ne, %418, %c0_i32_167 : i32
    scf.if %419 {
      %c0_168 = arith.constant 0 : index
      %c0_169 = arith.constant 0 : index
      %c0_170 = arith.constant 0 : index
      %420 = vector.load %arg18[%c0_168, %c0_169, %c0_170] : memref<1x1x64xf32, #tpu.memory_space<vmem>>, vector<1x1x64xf32>
      %421 = vector.shape_cast %420 : vector<1x1x64xf32> to vector<1x64xf32>
      %c0_171 = arith.constant 0 : index
      %c0_172 = arith.constant 0 : index
      %c0_173 = arith.constant 0 : index
      %422 = vector.load %arg19[%c0_171, %c0_172, %c0_173] : memref<1x1x64xf32, #tpu.memory_space<vmem>>, vector<1x1x64xf32>
      %423 = vector.shape_cast %422 : vector<1x1x64xf32> to vector<1x64xf32>
      %c0_174 = arith.constant 0 : index
      %c0_175 = arith.constant 0 : index
      %c0_176 = arith.constant 0 : index
      %424 = vector.load %arg20[%c0_174, %c0_175, %c0_176] : memref<1x64x32xbf16, #tpu.memory_space<vmem>>, vector<1x64x32xbf16>
      %425 = vector.shape_cast %424 : vector<1x64x32xbf16> to vector<64x32xbf16>
      %c0_177 = arith.constant 0 : index
      %c0_178 = arith.constant 0 : index
      %c0_179 = arith.constant 0 : index
      %426 = vector.load %arg21[%c0_177, %c0_178, %c0_179] : memref<1x64x32xbf16, #tpu.memory_space<vmem>>, vector<1x64x32xbf16>
      %427 = vector.shape_cast %426 : vector<1x64x32xbf16> to vector<64x32xbf16>
      %c0_180 = arith.constant 0 : index
      %c0_181 = arith.constant 0 : index
      %c0_182 = arith.constant 0 : index
      %428 = vector.load %arg22[%c0_180, %c0_181, %c0_182] : memref<1x1x32xf32, #tpu.memory_space<vmem>>, vector<1x1x32xf32>
      %429 = vector.shape_cast %428 : vector<1x1x32xf32> to vector<1x32xf32>
      %c0_183 = arith.constant 0 : index
      %c0_184 = arith.constant 0 : index
      %c0_185 = arith.constant 0 : index
      %430 = vector.load %arg23[%c0_183, %c0_184, %c0_185] : memref<1x1x32xf32, #tpu.memory_space<vmem>>, vector<1x1x32xf32>
      %431 = vector.shape_cast %430 : vector<1x1x32xf32> to vector<1x32xf32>
      %c0_186 = arith.constant 0 : index
      %c0_187 = arith.constant 0 : index
      %c0_188 = arith.constant 0 : index
      %432 = vector.load %arg24[%c0_186, %c0_187, %c0_188] : memref<1x1x1xf32, #tpu.memory_space<vmem>>, vector<1x1x1xf32>
      %433 = vector.shape_cast %432 : vector<1x1x1xf32> to vector<1x1xf32>
      %c0_189 = arith.constant 0 : index
      %c0_190 = arith.constant 0 : index
      %c0_191 = arith.constant 0 : index
      %434 = vector.load %arg25[%c0_189, %c0_190, %c0_191] : memref<1x64x64xbf16, #tpu.memory_space<vmem>>, vector<1x64x64xbf16>
      %435 = vector.shape_cast %434 : vector<1x64x64xbf16> to vector<64x64xbf16>
      %c0_192 = arith.constant 0 : index
      %c0_193 = arith.constant 0 : index
      %c0_194 = arith.constant 0 : index
      %436 = vector.load %arg26[%c0_192, %c0_193, %c0_194] : memref<1x1x64xf32, #tpu.memory_space<vmem>>, vector<1x1x64xf32>
      %437 = vector.shape_cast %436 : vector<1x1x64xf32> to vector<1x64xf32>
      %438 = tpu.iota {dimensions = array<i32: 0>} : vector<5x1xi32>
      %c0_i32_195 = arith.constant 0 : i32
      %439 = vector.broadcast %c0_i32_195 : i32 to vector<5x1xi32>
      %440 = arith.cmpi sgt, %438, %439 : vector<5x1xi32>
      %441 = arith.extui %440 : vector<5x1xi1> to vector<5x1xi32>
      %442 = arith.sitofp %441 : vector<5x1xi32> to vector<5x1xf32>
      %c0_196 = arith.constant 0 : index
      %c0_197 = arith.constant 0 : index
      %c0_198 = arith.constant 0 : index
      %443 = vector.load %arg28[%c0_196, %c0_197, %c0_198] : memref<2x5x64xf32, #tpu.memory_space<vmem>>, vector<1x5x64xf32>
      %444 = vector.shape_cast %443 : vector<1x5x64xf32> to vector<5x64xf32>
      %cst_199 = arith.constant dense<0.000000e+00> : vector<5xf32>
      %445 = vector.multi_reduction <add>, %444, %cst_199 [1] : vector<5x64xf32> to vector<5xf32>
      %446 = vector.shape_cast %445 : vector<5xf32> to vector<5x1xf32>
      %cst_200 = arith.constant 6.400000e+01 : f32
      %447 = vector.broadcast %cst_200 : f32 to vector<5x1xf32>
      %448 = arith.divf %446, %447 : vector<5x1xf32>
      %449 = vector.broadcast %448 : vector<5x1xf32> to vector<5x64xf32>
      %450 = arith.subf %444, %449 : vector<5x64xf32>
      %451 = arith.mulf %450, %450 : vector<5x64xf32>
      %cst_201 = arith.constant dense<0.000000e+00> : vector<5xf32>
      %452 = vector.multi_reduction <add>, %451, %cst_201 [1] : vector<5x64xf32> to vector<5xf32>
      %453 = vector.shape_cast %452 : vector<5xf32> to vector<5x1xf32>
      %cst_202 = arith.constant 6.400000e+01 : f32
      %454 = vector.broadcast %cst_202 : f32 to vector<5x1xf32>
      %455 = arith.divf %453, %454 : vector<5x1xf32>
      %456 = vector.broadcast %448 : vector<5x1xf32> to vector<5x64xf32>
      %457 = arith.subf %444, %456 : vector<5x64xf32>
      %cst_203 = arith.constant 9.99999997E-7 : f32
      %458 = vector.broadcast %cst_203 : f32 to vector<5x1xf32>
      %459 = arith.addf %455, %458 : vector<5x1xf32>
      %460 = math.rsqrt %459 : vector<5x1xf32>
      %461 = vector.broadcast %460 : vector<5x1xf32> to vector<5x64xf32>
      %462 = arith.mulf %457, %461 : vector<5x64xf32>
      %463 = vector.broadcast %421 : vector<1x64xf32> to vector<5x64xf32>
      %464 = arith.mulf %462, %463 : vector<5x64xf32>
      %465 = vector.broadcast %423 : vector<1x64xf32> to vector<5x64xf32>
      %466 = arith.addf %464, %465 : vector<5x64xf32>
      %467 = arith.truncf %466 : vector<5x64xf32> to vector<5x64xbf16>
      %cst_204 = arith.constant dense<0.000000e+00> : vector<5x32xf32>
      %468 = tpu.matmul %467, %425, %cst_204 {dimension_numbers = #tpu.dot_dimension_numbers<[1], [0], [0], [1], [0, 0, 1, 1], [], []>} : vector<5x64xbf16>, vector<64x32xbf16>, vector<5x32xf32> -> vector<5x32xf32>
      %cst_205 = arith.constant dense<0.000000e+00> : vector<5x32xf32>
      %469 = tpu.matmul %467, %427, %cst_205 {dimension_numbers = #tpu.dot_dimension_numbers<[1], [0], [0], [1], [0, 0, 1, 1], [], []>} : vector<5x64xbf16>, vector<64x32xbf16>, vector<5x32xf32> -> vector<5x32xf32>
      %470 = vector.broadcast %429 : vector<1x32xf32> to vector<5x32xf32>
      %471 = arith.addf %469, %470 : vector<5x32xf32>
      %472 = arith.addf %468, %471 : vector<5x32xf32>
      %cst_206 = arith.constant 0.000000e+00 : f32
      %473 = vector.broadcast %cst_206 : f32 to vector<5x32xf32>
      %474 = arith.maximumf %472, %473 : vector<5x32xf32>
      %475 = vector.broadcast %431 : vector<1x32xf32> to vector<5x32xf32>
      %476 = arith.mulf %474, %475 : vector<5x32xf32>
      %cst_207 = arith.constant dense<0.000000e+00> : vector<5xf32>
      %477 = vector.multi_reduction <add>, %476, %cst_207 [1] : vector<5x32xf32> to vector<5xf32>
      %478 = vector.shape_cast %477 : vector<5xf32> to vector<5x1xf32>
      %479 = vector.broadcast %433 : vector<1x1xf32> to vector<5x1xf32>
      %480 = arith.addf %478, %479 : vector<5x1xf32>
      %481 = arith.negf %480 : vector<5x1xf32>
      %482 = math.exp %481 : vector<5x1xf32>
      %cst_208 = arith.constant 1.000000e+00 : f32
      %483 = vector.broadcast %cst_208 : f32 to vector<5x1xf32>
      %484 = arith.addf %483, %482 : vector<5x1xf32>
      %485 = arith.divf %483, %484 : vector<5x1xf32>
      %486 = vector.broadcast %485 : vector<5x1xf32> to vector<5x64xf32>
      %487 = arith.mulf %466, %486 : vector<5x64xf32>
      %488 = arith.truncf %487 : vector<5x64xf32> to vector<5x64xbf16>
      %cst_209 = arith.constant dense<0.000000e+00> : vector<5x64xf32>
      %489 = tpu.matmul %488, %435, %cst_209 {dimension_numbers = #tpu.dot_dimension_numbers<[1], [0], [0], [1], [0, 0, 1, 1], [], []>} : vector<5x64xbf16>, vector<64x64xbf16>, vector<5x64xf32> -> vector<5x64xf32>
      %490 = vector.broadcast %437 : vector<1x64xf32> to vector<5x64xf32>
      %491 = arith.addf %489, %490 : vector<5x64xf32>
      %492 = vector.broadcast %442 : vector<5x1xf32> to vector<5x64xf32>
      %493 = arith.mulf %491, %492 : vector<5x64xf32>
      %cst_210 = arith.constant dense<0.000000e+00> : vector<64xf32>
      %494 = vector.multi_reduction <add>, %493, %cst_210 [0] : vector<5x64xf32> to vector<64xf32>
      %495 = vector.shape_cast %494 : vector<64xf32> to vector<1x64xf32>
      %cst_211 = arith.constant 2.500000e-01 : f32
      %496 = vector.broadcast %cst_211 : f32 to vector<1x64xf32>
      %497 = arith.mulf %495, %496 : vector<1x64xf32>
      %c0_212 = arith.constant 0 : index
      %c0_213 = arith.constant 0 : index
      %c0_214 = arith.constant 0 : index
      %c0_215 = arith.constant 0 : index
      %498 = vector.load %arg27[%c0_212, %c0_213, %c0_214, %c0_215] : memref<1x2x1x64xf32, #tpu.memory_space<vmem>>, vector<1x1x1x64xf32>
      %499 = vector.shape_cast %498 : vector<1x1x1x64xf32> to vector<1x64xf32>
      %500 = vector.shape_cast %497 : vector<1x64xf32> to vector<1x1x1x64xf32>
      tpu.vector_store %arg27[%c0_212, %c0_213, %c0_214, %c0_215], %500 {strides = array<i32>} : memref<1x2x1x64xf32, #tpu.memory_space<vmem>>, vector<1x1x1x64xf32>,
      %c1_216 = arith.constant 1 : index
      %c0_217 = arith.constant 0 : index
      %c0_218 = arith.constant 0 : index
      %501 = vector.load %arg28[%c1_216, %c0_217, %c0_218] : memref<2x5x64xf32, #tpu.memory_space<vmem>>, vector<1x5x64xf32>
      %502 = vector.shape_cast %501 : vector<1x5x64xf32> to vector<5x64xf32>
      %cst_219 = arith.constant dense<0.000000e+00> : vector<5xf32>
      %503 = vector.multi_reduction <add>, %502, %cst_219 [1] : vector<5x64xf32> to vector<5xf32>
      %504 = vector.shape_cast %503 : vector<5xf32> to vector<5x1xf32>
      %cst_220 = arith.constant 6.400000e+01 : f32
      %505 = vector.broadcast %cst_220 : f32 to vector<5x1xf32>
      %506 = arith.divf %504, %505 : vector<5x1xf32>
      %507 = vector.broadcast %506 : vector<5x1xf32> to vector<5x64xf32>
      %508 = arith.subf %502, %507 : vector<5x64xf32>
      %509 = arith.mulf %508, %508 : vector<5x64xf32>
      %cst_221 = arith.constant dense<0.000000e+00> : vector<5xf32>
      %510 = vector.multi_reduction <add>, %509, %cst_221 [1] : vector<5x64xf32> to vector<5xf32>
      %511 = vector.shape_cast %510 : vector<5xf32> to vector<5x1xf32>
      %cst_222 = arith.constant 6.400000e+01 : f32
      %512 = vector.broadcast %cst_222 : f32 to vector<5x1xf32>
      %513 = arith.divf %511, %512 : vector<5x1xf32>
      %514 = vector.broadcast %506 : vector<5x1xf32> to vector<5x64xf32>
      %515 = arith.subf %502, %514 : vector<5x64xf32>
      %cst_223 = arith.constant 9.99999997E-7 : f32
      %516 = vector.broadcast %cst_223 : f32 to vector<5x1xf32>
      %517 = arith.addf %513, %516 : vector<5x1xf32>
      %518 = math.rsqrt %517 : vector<5x1xf32>
      %519 = vector.broadcast %518 : vector<5x1xf32> to vector<5x64xf32>
      %520 = arith.mulf %515, %519 : vector<5x64xf32>
      %521 = vector.broadcast %421 : vector<1x64xf32> to vector<5x64xf32>
      %522 = arith.mulf %520, %521 : vector<5x64xf32>
      %523 = vector.broadcast %423 : vector<1x64xf32> to vector<5x64xf32>
      %524 = arith.addf %522, %523 : vector<5x64xf32>
      %525 = arith.truncf %524 : vector<5x64xf32> to vector<5x64xbf16>
      %cst_224 = arith.constant dense<0.000000e+00> : vector<5x32xf32>
      %526 = tpu.matmul %525, %425, %cst_224 {dimension_numbers = #tpu.dot_dimension_numbers<[1], [0], [0], [1], [0, 0, 1, 1], [], []>} : vector<5x64xbf16>, vector<64x32xbf16>, vector<5x32xf32> -> vector<5x32xf32>
      %cst_225 = arith.constant dense<0.000000e+00> : vector<5x32xf32>
      %527 = tpu.matmul %525, %427, %cst_225 {dimension_numbers = #tpu.dot_dimension_numbers<[1], [0], [0], [1], [0, 0, 1, 1], [], []>} : vector<5x64xbf16>, vector<64x32xbf16>, vector<5x32xf32> -> vector<5x32xf32>
      %528 = vector.broadcast %429 : vector<1x32xf32> to vector<5x32xf32>
      %529 = arith.addf %527, %528 : vector<5x32xf32>
      %530 = arith.addf %526, %529 : vector<5x32xf32>
      %cst_226 = arith.constant 0.000000e+00 : f32
      %531 = vector.broadcast %cst_226 : f32 to vector<5x32xf32>
      %532 = arith.maximumf %530, %531 : vector<5x32xf32>
      %533 = vector.broadcast %431 : vector<1x32xf32> to vector<5x32xf32>
      %534 = arith.mulf %532, %533 : vector<5x32xf32>
      %cst_227 = arith.constant dense<0.000000e+00> : vector<5xf32>
      %535 = vector.multi_reduction <add>, %534, %cst_227 [1] : vector<5x32xf32> to vector<5xf32>
      %536 = vector.shape_cast %535 : vector<5xf32> to vector<5x1xf32>
      %537 = vector.broadcast %433 : vector<1x1xf32> to vector<5x1xf32>
      %538 = arith.addf %536, %537 : vector<5x1xf32>
      %539 = arith.negf %538 : vector<5x1xf32>
      %540 = math.exp %539 : vector<5x1xf32>
      %cst_228 = arith.constant 1.000000e+00 : f32
      %541 = vector.broadcast %cst_228 : f32 to vector<5x1xf32>
      %542 = arith.addf %541, %540 : vector<5x1xf32>
      %543 = arith.divf %541, %542 : vector<5x1xf32>
      %544 = vector.broadcast %543 : vector<5x1xf32> to vector<5x64xf32>
      %545 = arith.mulf %524, %544 : vector<5x64xf32>
      %546 = arith.truncf %545 : vector<5x64xf32> to vector<5x64xbf16>
      %cst_229 = arith.constant dense<0.000000e+00> : vector<5x64xf32>
      %547 = tpu.matmul %546, %435, %cst_229 {dimension_numbers = #tpu.dot_dimension_numbers<[1], [0], [0], [1], [0, 0, 1, 1], [], []>} : vector<5x64xbf16>, vector<64x64xbf16>, vector<5x64xf32> -> vector<5x64xf32>
      %548 = vector.broadcast %437 : vector<1x64xf32> to vector<5x64xf32>
      %549 = arith.addf %547, %548 : vector<5x64xf32>
      %550 = vector.broadcast %442 : vector<5x1xf32> to vector<5x64xf32>
      %551 = arith.mulf %549, %550 : vector<5x64xf32>
      %cst_230 = arith.constant dense<0.000000e+00> : vector<64xf32>
      %552 = vector.multi_reduction <add>, %551, %cst_230 [0] : vector<5x64xf32> to vector<64xf32>
      %553 = vector.shape_cast %552 : vector<64xf32> to vector<1x64xf32>
      %cst_231 = arith.constant 2.500000e-01 : f32
      %554 = vector.broadcast %cst_231 : f32 to vector<1x64xf32>
      %555 = arith.mulf %553, %554 : vector<1x64xf32>
      %c0_232 = arith.constant 0 : index
      %c1_233 = arith.constant 1 : index
      %c0_234 = arith.constant 0 : index
      %c0_235 = arith.constant 0 : index
      %556 = vector.load %arg27[%c0_232, %c1_233, %c0_234, %c0_235] : memref<1x2x1x64xf32, #tpu.memory_space<vmem>>, vector<1x1x1x64xf32>
      %557 = vector.shape_cast %556 : vector<1x1x1x64xf32> to vector<1x64xf32>
      %558 = vector.shape_cast %555 : vector<1x64xf32> to vector<1x1x1x64xf32>
      tpu.vector_store %arg27[%c0_232, %c1_233, %c0_234, %c0_235], %558 {strides = array<i32>} : memref<1x2x1x64xf32, #tpu.memory_space<vmem>>, vector<1x1x1x64xf32>,
    } else {
    }
    return
  }
  func.func @transform_0(%arg0: i32, %arg1: i32, %arg2: i32) -> (i32, i32, i32, i32) {
    %c0_i32 = arith.constant 0 : i32
    %c0_i32_0 = arith.constant 0 : i32
    %c0_i32_1 = arith.constant 0 : i32
    return %arg0, %arg1, %c0_i32, %c0_i32_0 : i32, i32, i32, i32
  }
  func.func @transform_1(%arg0: i32, %arg1: i32, %arg2: i32) -> (i32, i32, i32) {
    %c0_i32 = arith.constant 0 : i32
    %c0_i32_0 = arith.constant 0 : i32
    %c0_i32_1 = arith.constant 0 : i32
    return %arg0, %c0_i32, %c0_i32_0 : i32, i32, i32
  }
  func.func @transform_2(%arg0: i32, %arg1: i32, %arg2: i32) -> (i32, i32, i32) {
    %c0_i32 = arith.constant 0 : i32
    %c0_i32_0 = arith.constant 0 : i32
    %c0_i32_1 = arith.constant 0 : i32
    return %arg0, %c0_i32, %c0_i32_0 : i32, i32, i32
  }
  func.func @transform_3(%arg0: i32, %arg1: i32, %arg2: i32) -> (i32, i32, i32, i32) {
    %c0_i32 = arith.constant 0 : i32
    %c0_i32_0 = arith.constant 0 : i32
    %c0_i32_1 = arith.constant 0 : i32
    return %arg0, %arg2, %c0_i32, %c0_i32_0 : i32, i32, i32, i32
  }
  func.func @transform_4(%arg0: i32, %arg1: i32, %arg2: i32) -> (i32, i32, i32, i32) {
    %c0_i32 = arith.constant 0 : i32
    %c0_i32_0 = arith.constant 0 : i32
    %c0_i32_1 = arith.constant 0 : i32
    return %arg0, %arg2, %c0_i32, %c0_i32_0 : i32, i32, i32, i32
  }
  func.func @transform_5(%arg0: i32, %arg1: i32, %arg2: i32) -> (i32, i32, i32, i32) {
    %c0_i32 = arith.constant 0 : i32
    %c0_i32_0 = arith.constant 0 : i32
    %c0_i32_1 = arith.constant 0 : i32
    return %arg0, %arg2, %c0_i32, %c0_i32_0 : i32, i32, i32, i32
  }
  func.func @transform_6(%arg0: i32, %arg1: i32, %arg2: i32) -> (i32, i32, i32, i32) {
    %c0_i32 = arith.constant 0 : i32
    %c0_i32_0 = arith.constant 0 : i32
    %c0_i32_1 = arith.constant 0 : i32
    return %arg0, %arg2, %c0_i32, %c0_i32_0 : i32, i32, i32, i32
  }
  func.func @transform_7(%arg0: i32, %arg1: i32, %arg2: i32) -> (i32, i32, i32, i32) {
    %c0_i32 = arith.constant 0 : i32
    %c0_i32_0 = arith.constant 0 : i32
    %c0_i32_1 = arith.constant 0 : i32
    return %arg0, %arg2, %c0_i32, %c0_i32_0 : i32, i32, i32, i32
  }
  func.func @transform_8(%arg0: i32, %arg1: i32, %arg2: i32) -> (i32, i32, i32, i32) {
    %c0_i32 = arith.constant 0 : i32
    %c0_i32_0 = arith.constant 0 : i32
    %c0_i32_1 = arith.constant 0 : i32
    return %arg0, %arg2, %c0_i32, %c0_i32_0 : i32, i32, i32, i32
  }
  func.func @transform_9(%arg0: i32, %arg1: i32, %arg2: i32) -> (i32, i32, i32, i32) {
    %c0_i32 = arith.constant 0 : i32
    %c0_i32_0 = arith.constant 0 : i32
    %c0_i32_1 = arith.constant 0 : i32
    return %arg0, %arg2, %c0_i32, %c0_i32_0 : i32, i32, i32, i32
  }
  func.func @transform_10(%arg0: i32, %arg1: i32, %arg2: i32) -> (i32, i32, i32, i32) {
    %c0_i32 = arith.constant 0 : i32
    %c0_i32_0 = arith.constant 0 : i32
    %c0_i32_1 = arith.constant 0 : i32
    return %arg0, %arg2, %c0_i32, %c0_i32_0 : i32, i32, i32, i32
  }
  func.func @transform_11(%arg0: i32, %arg1: i32, %arg2: i32) -> (i32, i32, i32, i32) {
    %c0_i32 = arith.constant 0 : i32
    %c0_i32_0 = arith.constant 0 : i32
    %c0_i32_1 = arith.constant 0 : i32
    return %arg0, %arg2, %c0_i32, %c0_i32_0 : i32, i32, i32, i32
  }
  func.func @transform_12(%arg0: i32, %arg1: i32, %arg2: i32) -> (i32, i32, i32, i32) {
    %c0_i32 = arith.constant 0 : i32
    %c0_i32_0 = arith.constant 0 : i32
    %c0_i32_1 = arith.constant 0 : i32
    return %arg0, %arg2, %c0_i32, %c0_i32_0 : i32, i32, i32, i32
  }
  func.func @transform_13(%arg0: i32, %arg1: i32, %arg2: i32) -> (i32, i32, i32, i32) {
    %c0_i32 = arith.constant 0 : i32
    %c0_i32_0 = arith.constant 0 : i32
    %c0_i32_1 = arith.constant 0 : i32
    return %arg0, %arg2, %c0_i32, %c0_i32_0 : i32, i32, i32, i32
  }
  func.func @transform_14(%arg0: i32, %arg1: i32, %arg2: i32) -> (i32, i32, i32, i32) {
    %c0_i32 = arith.constant 0 : i32
    %c0_i32_0 = arith.constant 0 : i32
    %c0_i32_1 = arith.constant 0 : i32
    return %arg0, %arg2, %c0_i32, %c0_i32_0 : i32, i32, i32, i32
  }
  func.func @transform_15(%arg0: i32, %arg1: i32, %arg2: i32) -> (i32, i32, i32) {
    %c0_i32 = arith.constant 0 : i32
    %c0_i32_0 = arith.constant 0 : i32
    %c0_i32_1 = arith.constant 0 : i32
    return %arg0, %c0_i32, %c0_i32_0 : i32, i32, i32
  }
  func.func @transform_16(%arg0: i32, %arg1: i32, %arg2: i32) -> (i32, i32, i32) {
    %c0_i32 = arith.constant 0 : i32
    %c0_i32_0 = arith.constant 0 : i32
    %c0_i32_1 = arith.constant 0 : i32
    return %arg0, %c0_i32, %c0_i32_0 : i32, i32, i32
  }
  func.func @transform_17(%arg0: i32, %arg1: i32, %arg2: i32) -> (i32, i32, i32) {
    %c0_i32 = arith.constant 0 : i32
    %c0_i32_0 = arith.constant 0 : i32
    %c0_i32_1 = arith.constant 0 : i32
    return %arg0, %c0_i32, %c0_i32_0 : i32, i32, i32
  }
  func.func @transform_18(%arg0: i32, %arg1: i32, %arg2: i32) -> (i32, i32, i32) {
    %c0_i32 = arith.constant 0 : i32
    %c0_i32_0 = arith.constant 0 : i32
    %c0_i32_1 = arith.constant 0 : i32
    return %arg0, %c0_i32, %c0_i32_0 : i32, i32, i32
  }
  func.func @transform_19(%arg0: i32, %arg1: i32, %arg2: i32) -> (i32, i32, i32) {
    %c0_i32 = arith.constant 0 : i32
    %c0_i32_0 = arith.constant 0 : i32
    %c0_i32_1 = arith.constant 0 : i32
    return %arg0, %c0_i32, %c0_i32_0 : i32, i32, i32
  }
  func.func @transform_20(%arg0: i32, %arg1: i32, %arg2: i32) -> (i32, i32, i32) {
    %c0_i32 = arith.constant 0 : i32
    %c0_i32_0 = arith.constant 0 : i32
    %c0_i32_1 = arith.constant 0 : i32
    return %arg0, %c0_i32, %c0_i32_0 : i32, i32, i32
  }
  func.func @transform_21(%arg0: i32, %arg1: i32, %arg2: i32) -> (i32, i32, i32) {
    %c0_i32 = arith.constant 0 : i32
    %c0_i32_0 = arith.constant 0 : i32
    %c0_i32_1 = arith.constant 0 : i32
    return %arg0, %c0_i32, %c0_i32_0 : i32, i32, i32
  }
  func.func @transform_22(%arg0: i32, %arg1: i32, %arg2: i32) -> (i32, i32, i32) {
    %c0_i32 = arith.constant 0 : i32
    %c0_i32_0 = arith.constant 0 : i32
    %c0_i32_1 = arith.constant 0 : i32
    return %arg0, %c0_i32, %c0_i32_0 : i32, i32, i32
  }
  func.func @transform_23(%arg0: i32, %arg1: i32, %arg2: i32) -> (i32, i32, i32) {
    %c0_i32 = arith.constant 0 : i32
    %c0_i32_0 = arith.constant 0 : i32
    %c0_i32_1 = arith.constant 0 : i32
    return %arg0, %c0_i32, %c0_i32_0 : i32, i32, i32
  }
  func.func @transform_24(%arg0: i32, %arg1: i32, %arg2: i32) -> (i32, i32, i32, i32) {
    %c0_i32 = arith.constant 0 : i32
    %c0_i32_0 = arith.constant 0 : i32
    %c0_i32_1 = arith.constant 0 : i32
    return %arg0, %arg1, %c0_i32, %c0_i32_0 : i32, i32, i32, i32
  }
}

</mosaic_0001>

<bundles_post_ra>
// kernel: vit_gate_attention_forward.1
= control target key start
LH: loop header
LB: loop body
LE: loop exit
PB: predicated region body
PF: predicated region fallthrough
CT: control target
= control target key end

     0   :  { %s4914_s26 = smov 0   ;;  %s4916_s27 = smov 0   ;;  %s5912_s0 = inlined_call_operand.vmem [shape: bf16[3,2,5,768], index: 0, kind: input, shape index: {}]   ;;  %s5913_s1 = inlined_call_operand.vmem [shape: f32[3,5,64], index: 1, kind: input, shape index: {}]   ;;  %s5914_s2 = inlined_call_operand.vmem [shape: bf16[3,768,64], index: 2, kind: input, shape index: {}]   ;;  %s5915_s3 = inlined_call_operand.vmem [shape: f32[3,2,1,64], index: 3, kind: input, shape index: {}]   ;;  %s5916_s4 = inlined_call_operand.vmem [shape: f32[3,2,1,64], index: 4, kind: input, shape index: {}]   ;;  %s5917_s5 = inlined_call_operand.vmem [shape: bf16[3,2,64,192], index: 5, kind: input, shape index: {}]   ;;  %s5918_s6 = inlined_call_operand.vmem [shape: f32[3,2,1,192], index: 6, kind: input, shape index: {}]   ;;  %s5919_s7 = inlined_call_operand.vmem [shape: bf16[3,2,64,64], index: 7, kind: input, shape index: {}]   ;;  %s5920_s8 = inlined_call_operand.vmem [shape: f32[3,2,1,64], index: 8, kind: input, shape index: {}]   ;;  %s5921_s9 = inlined_call_operand.vmem [shape: f32[3,2,1,64], index: 9, kind: input, shape index: {}]   ;;  %s5922_s10 = inlined_call_operand.vmem [shape: f32[3,2,1,64], index: 10, kind: input, shape index: {}]   ;;  %s5923_s11 = inlined_call_operand.vmem [shape: bf16[3,2,64,256], index: 11, kind: input, shape index: {}]   ;;  %s5924_s12 = inlined_call_operand.vmem [shape: f32[3,2,1,256], index: 12, kind: input, shape index: {}]   ;;  %s5925_s13 = inlined_call_operand.vmem [shape: bf16[3,2,256,64], index: 13, kind: input, shape index: {}]   ;;  %s5926_s14 = inlined_call_operand.vmem [shape: f32[3,2,1,64], index: 14, kind: input, shape index: {}]   ;;  %s5927_s15 = inlined_call_operand.vmem [shape: f32[3,1,64], index: 15, kind: input, shape index: {}]   ;;  %s5928_s16 = inlined_call_operand.vmem [shape: f32[3,1,64], index: 16, kind: input, shape index: {}]   ;;  %s5929_s17 = inlined_call_operand.vmem [shape: bf16[3,64,32], index: 17, kind: input, shape index: {}]   ;;  %s5930_s18 = inlined_call_operand.vmem [shape: bf16[3,64,32], index: 18, kind: input, shape index: {}]   ;;  %s5931_s19 = inlined_call_operand.vmem [shape: f32[3,1,32], index: 19, kind: input, shape index: {}]   ;;  %s5932_s20 = inlined_call_operand.vmem [shape: f32[3,1,32], index: 20, kind: input, shape index: {}]   ;;  %s5933_s21 = inlined_call_operand.vmem [shape: f32[3,1,1], index: 21, kind: input, shape index: {}]   ;;  %s5934_s22 = inlined_call_operand.vmem [shape: bf16[3,64,64], index: 22, kind: input, shape index: {}]   ;;  %s5935_s23 = inlined_call_operand.vmem [shape: f32[3,1,64], index: 23, kind: input, shape index: {}]   ;;  %s5936_s24 = inlined_call_operand.vmem [shape: f32[3,2,1,64], index: 24, kind: output, shape index: {}]  }
   0x1   :  { %5957 = sst [smem:[#allocation21_spill]] %s5912_s0  ;;  %s4918_s28 = smov 0  }
   0x2   :  { %5958 = sst [smem:[#allocation22_spill]] %s5913_s1 }
   0x3   :  { %5959 = sst [smem:[#allocation23_spill]] %s5914_s2 }
   0x4   :  { %5960 = sst [smem:[#allocation24_spill]] %s5915_s3 }
   0x5   :  { %5961 = sst [smem:[#allocation25_spill]] %s5916_s4 }
   0x6   :  { %5962 = sst [smem:[#allocation26_spill]] %s5917_s5  ;;  %s4912_s5 = smov 0  }
   0x7   :  { %5963 = sst [smem:[#allocation27_spill]] %s5918_s6  ;;  %s4920_s6 = smov 0  }
   0x8   :  { %5964 = sst [smem:[#allocation28_spill]] %s5919_s7 }
   0x9   :  { %5965 = sst [smem:[#allocation29_spill]] %s5920_s8 }
   0xa   :  { %5966 = sst [smem:[#allocation30_spill]] %s5923_s11 }
   0xb   :  { %5967 = sst [smem:[#allocation31_spill]] %s5924_s12 }
   0xc   :  { %5968 = sst [smem:[#allocation32_spill]] %s5925_s13 }
   0xd   :  { %5969 = sst [smem:[#allocation33_spill]] %s5927_s15 }
   0xe   :  { %5970 = sst [smem:[#allocation34_spill]] %s5928_s16 }
   0xf   :  { %5971 = sst [smem:[#allocation35_spill]] %s5929_s17 }
  0x10   :  { %5972 = sst [smem:[#allocation36_spill]] %s5930_s18 }
  0x11   :  { %5973 = sst [smem:[#allocation37_spill]] %s5931_s19 }
  0x12   :  { %5974 = sst [smem:[#allocation38_spill]] %s5932_s20 }
  0x13   :  { %5975 = sst [smem:[#allocation39_spill]] %s5933_s21 }
  0x14   :  { %5976 = sst [smem:[#allocation40_spill]] %s5934_s22 }
  0x15   :  { %5977 = sst [smem:[#allocation41_spill]] %s5935_s23 }
  0x16   :  { %5978 = sst [smem:[#allocation42_spill]] %s5936_s24 }
  0x17 LB: > { %5979 = sst [smem:[#allocation4_spill]] %s4757_s5  ;;  %s46_s2 = sadd.s32 1, %s4765_s27  ;;  %s4773_s6 = sphi %s4920_s6, %s34_s6   ;;  %s4769_s28 = sphi %s4918_s28, %s6069_s28   ;;  %s4765_s27 = sphi %s4916_s27, %s6068_s27   ;;  %s4761_s26 = sphi %s4914_s26, %s6067_s26   ;;  %s4757_s5 = sphi %s4912_s5, %s6066_s5  }
  0x18   : > { %5980 = sst [smem:[#allocation5_spill]] %s4765_s27  ;;  %s53_s29 = sadd.s32 1, %s4769_s28 }
  0x19   : > { %5981 = sst [smem:[#allocation6_spill]] %s4769_s28  ;;  %p47_p0 = scmp.ge.s32.totalorder %s46_s2, 2 }
  0x1a   : > { %5982 = sst [smem:[#allocation7_spill]] %s4773_s6  ;;  %p4038_p1 = scmp.ge.s32.totalorder %s4773_s6, 1 }
  0x1b   : > { %p966_p2 = scmp.lt.s32.totalorder %s4773_s6, 7  ;;  %s6071_s2 = smov (%p47_p0, %s46_s2), 0 }
  0x1c   : > { %5983 = sst [smem:[#allocation8_spill]] %s6071_s2  ;;  %s6073_s29 = smov (!%p47_p0, %s53_s29), %s4769_s28 }
  0x1d   : > { %p967_p3 = pnand %p4038_p1, %p966_p2  ;;  %p55_p4 = scmp.ge.s32.totalorder %s6073_s29, 3 }
  0x1f   : > { %s6075_s29 = smov (%p55_p4, %s6073_s29), 0  ;;  %970 = sbr.rel (%p967_p3) target bundleno = 4821 (0x12d5), region = 116 }
  0x20   : > { %5984 = sst [smem:[#allocation9_spill]] %s6075_s29 }
  0x24   : > { %p1177_p5 = scmp.lt.s32.totalorder %s4761_s26, 2  ;;  %p1198_p6 = scmp.lt.s32.totalorder %s4757_s5, 1 }
  0x25   : > { %s5985_s8 = sld [smem:[#allocation22_spill]] }
  0x26   : > { %s6077_s26 = smov (!%p1177_p5, %s4761_s26), 2  ;;  %s5987_s28 = sld [smem:[#allocation21_spill]] }
  0x27   : > { %s4948_s0 = scalar_select %p1198_p6, %s4757_s5, 1 }
  0x28   : > { %s4597_s7 = smul.u32 48, %s6077_s26  ;;  %s4040_s30 = sshll.u32 %s6077_s26, 3 }
  0x29   : > { %s4598_s1 = smul.u32 384, %s6077_s26  ;;  %s5941_s6 = sshll.u32 %s6077_s26, 1 }
  0x2a   : > { %s5989_s23 = sld [smem:[#allocation23_spill]]  ;;  %s4972_s21 = sadd.s32 %s5941_s6, %s4948_s0 }
  0x2b   : > { %s4955_s4 = scalar_lea.vmem %s5985_s8, %s4040_s30  ;;  %s4984_s24 = sshll.u32 %s6077_s26, 5 }
  0x2c   : > { %5986 = sst [smem:[#allocation10_spill]] %s4955_s4  ;;  %s4961_s27 = scalar_lea.vmem %s5987_s28, %s4597_s7 }
  0x2d   : > { %5988 = sst [smem:[#allocation11_spill]] %s4961_s27  ;;  %s4044_s4 = sshll.u32 %s4948_s0, 4 }
  0x2e   : > { %s4047_s5 = sshll.u32 %s4948_s0, 1  ;;  %s4048_s6 = sshll.u32 %s6077_s26, 2 }
  0x2f   : > { %s5993_s27 = sld [smem:[#allocation26_spill]]  ;;  %s4994_s2 = sadd.s32 %s4048_s6, %s4047_s5 }
  0x30   : > { %s4967_s22 = scalar_lea.vmem %s5989_s23, %s4598_s1  ;;  %s1216_s23 = sadd.s32 %s4984_s24, %s4044_s4 }
  0x31   : > { %5990 = sst [smem:[#allocation12_spill]] %s4967_s22  ;;  %s4046_s1 = sshll.u32 %s1216_s23, 2 }
  0x32   : > { %s4049_s8 = sshll.u32 %s4948_s0, 3  ;;  %s4050_s23 = sshll.u32 %s6077_s26, 4 }
  0x33   : > { %s1233_s30 = sadd.s32 %s4050_s23, %s4049_s8  ;;  %s5997_s17 = sld [smem:[#allocation28_spill]] }
  0x34   : > { %s4051_s5 = sshll.u32 %s1233_s30, 2  ;;  %s5998_s11 = sld [smem:[#allocation30_spill]] }
  0x35   : > { %s4992_s25 = scalar_lea.vmem %s5993_s27, %s4046_s1  ;;  %s4060_s3 = sshll.u32 %s4948_s0, 5 }
  0x36   : > { %5994 = sst [smem:[#allocation13_spill]] %s4992_s25  ;;  %s4061_s28 = sshll.u32 %s6077_s26, 6 }
  0x37   : > { %s6002_s13 = sld [smem:[#allocation32_spill]] }
  0x38   : > { %s6003_s12 = sld [smem:[#allocation35_spill]] }
  0x39   : > { %s5017_s20 = scalar_lea.vmem %s5997_s17, %s4051_s5  ;;  %s1280_s17 = sadd.s32 %s4061_s28, %s4060_s3 }
  0x3a   : > { %s5022_s8 = scalar_lea.vmem %s5998_s11, %s4046_s1  ;;  %s4062_s22 = sshll.u32 %s1280_s17, 2 }
  0x3b   : > { %s6005_s29 = sld [smem:[#allocation36_spill]] }
  0x3c   : > { %s6008_s25 = sld [smem:[#allocation38_spill]] }
  0x3d   : > { %s5045_s30 = scalar_lea.vmem %s6002_s13, %s4062_s22  ;;  %s6009_s13 = sld [smem:[#allocation39_spill]] }
  0x3e   : > { %s5051_s7 = scalar_lea.vmem %s6003_s12, %s4984_s24  ;;  %s6010_s0 = sld [smem:[#allocation40_spill]] }
  0x3f   : > { %6004 = sst [smem:[#allocation14_spill]] %s5051_s7 }
  0x40   : > { %s6013_s5 = sld [smem:[#allocation42_spill]] }
  0x41   : > { %s5057_s4 = scalar_lea.vmem %s6005_s29, %s4984_s24  ;;  %s6011_s29 = sld [smem:[#allocation41_spill]] }
  0x42   : > { %6006 = sst [smem:[#allocation15_spill]] %s5057_s4  ;;  %s1311_s23 = scalar_lea.vmem %s6008_s25, %s6077_s26 }
  0x43   : > { %s1314_s16 = scalar_lea.vmem %s6009_s13, %s6077_s26  ;;  %s6012_s4 = sshll.u32 %s6077_s26, 1 }
  0x44   : > { %s5075_s15 = scalar_lea.vmem %s6010_s0, %s4984_s24  ;;  %s6014_s18 = sld [smem:[#allocation4_spill]] }
  0x46   : > { %s5086_s6 = scalar_lea.vmem %s6013_s5, %s6012_s4 }
  0x47   : > { %s1322_s7 = scalar_lea.vmem %s6011_s29, %s6077_s26 }
  0x4a   : > { %p4071_p7 = scmp.ne.s32.totalorder %s6014_s18, 0 }
  0x4b   : > { %s6015_s25 = sld [smem:[#allocation12_spill]] (!%p4071_p7) }
  0x4c   : > { %1336 = sbr.rel (%p4071_p7) target bundleno = 320 (0x140), region = 120  ;;  %s6016_s13 = sld [smem:[#allocation11_spill]] (!%p4071_p7) }
  0x4d   : > { %s6017_s24 = sld [smem:[#allocation10_spill]] (!%p4071_p7) }
  0x51   : > { %v5090_v0 = vld [vmem:[%s6015_s25 + $0x38] sm:$0xff]  ;;  %v5104_v4 = vld [vmem:[%s6015_s25 + $0x30] sm:$0xff]  ;;  %v5120_v8 = vld [vmem:[%s6015_s25 + $0x28] sm:$0xff]  ;;  %vm1824_vm0 = vcmask 520192  }
  0x52   : > { %v5093_v1 = vld [vmem:[%s6015_s25 + $0x78] sm:$0xff]  ;;  %1746 = vmatpush.bf16.msra.mxu0 %v5090_v0  ;;  %v5107_v5 = vld [vmem:[%s6015_s25 + $0x70] sm:$0xff]  ;;  %v5123_v9 = vld [vmem:[%s6015_s25 + $0x68] sm:$0xff] }
  0x53   : > { %v5096_v2 = vld [vmem:[%s6015_s25 + $0xb8] sm:$0xff]  ;;  %1759 = vmatpush.bf16.msra.mxu1 %v5093_v1  ;;  %v5112_v6 = vld [vmem:[%s6015_s25 + $0xb0] sm:$0xff]  ;;  %v5128_v10 = vld [vmem:[%s6015_s25 + $0xa8] sm:$0xff] }
  0x54   : > { %v5099_v3 = vld [vmem:[%s6015_s25 + $0xf8] sm:$0xff]  ;;  %1772 = vmatpush.bf16.msra.mxu2 %v5096_v2  ;;  %v5115_v7 = vld [vmem:[%s6015_s25 + $0xf0] sm:$0xff]  ;;  %v5131_v11 = vld [vmem:[%s6015_s25 + $0xe8] sm:$0xff] }
  0x55   : > { %1785 = vmatpush.bf16.msra.mxu3 %v5099_v3  ;;  %v5136_v12 = vld [vmem:[%s6015_s25 + $0x20] sm:$0xff]  ;;  %v5152_v16 = vld [vmem:[%s6015_s25 + $0x18] sm:$0xff]  ;;  %v5168_v20 = vld [vmem:[%s6015_s25 + $0x10] sm:$0xff] }
  0x56   : > { %1747 = vmatpush.bf16.msra.mxu0 %v5104_v4  ;;  %v5139_v13 = vld [vmem:[%s6015_s25 + $0x60] sm:$0xff]  ;;  %v5155_v17 = vld [vmem:[%s6015_s25 + $0x58] sm:$0xff]  ;;  %v5171_v21 = vld [vmem:[%s6015_s25 + $0x50] sm:$0xff] }
  0x57   : > { %1760 = vmatpush.bf16.msra.mxu1 %v5107_v5  ;;  %v5144_v14 = vld [vmem:[%s6015_s25 + $0xa0] sm:$0xff]  ;;  %v5160_v18 = vld [vmem:[%s6015_s25 + $0x98] sm:$0xff]  ;;  %v5176_v22 = vld [vmem:[%s6015_s25 + $0x90] sm:$0xff] }
  0x58   : > { %1773 = vmatpush.bf16.msra.mxu2 %v5112_v6  ;;  %v5147_v15 = vld [vmem:[%s6015_s25 + $0xe0] sm:$0xff]  ;;  %v5163_v19 = vld [vmem:[%s6015_s25 + $0xd8] sm:$0xff]  ;;  %v5179_v23 = vld [vmem:[%s6015_s25 + $0xd0] sm:$0xff] }
  0x59   : > { %1786 = vmatpush.bf16.msra.mxu3 %v5115_v7  ;;  %v5184_v24 = vld [vmem:[%s6015_s25 + $0x8] sm:$0xff]  ;;  %v1434_v28 = vld [vmem:[%s6016_s13] sm:$0x77]  ;;  %v5216_v38 = vld [vmem:[%s6015_s25 + $0x138] sm:$0xff] }
  0x5a   : > { %1748 = vmatpush.bf16.msra.mxu0 %v5120_v8  ;;  %v5187_v25 = vld [vmem:[%s6015_s25 + $0x48] sm:$0xff]  ;;  %v5202_v30 = vld [vmem:[%s6015_s25] sm:$0xff]  ;;  %v1440_v32 = vunpack.c.l.b16 %v1434_v28  ;;  %v1441_v37 = vunpack.c.h.b16 %v1434_v28  ;;  %v5219_v39 = vld [vmem:[%s6015_s25 + $0x178] sm:$0xff] }
  0x5b   : > { %1761 = vmatpush.bf16.msra.mxu1 %v5123_v9  ;;  %v5190_v26 = vld [vmem:[%s6015_s25 + $0x88] sm:$0xff]  ;;  %v5205_v31 = vld [vmem:[%s6015_s25 + $0x40] sm:$0xff]  ;;  %v5228_v44 = vld [vmem:[%s6015_s25 + $0x130] sm:$0xff] }
  0x5c   : > { %1774 = vmatpush.bf16.msra.mxu2 %v5128_v10  ;;  %v5195_v27 = vld [vmem:[%s6015_s25 + $0xc8] sm:$0xff]  ;;  %v5210_v34 = vld [vmem:[%s6015_s25 + $0x80] sm:$0xff]  ;;  %v1446_v40 = vpack.c.b16 %v1440_v32, %v1440_v32  ;;  %v1447_v43 = vpack.c.b16 %v1441_v37, %v1441_v37  ;;  %v5231_v45 = vld [vmem:[%s6015_s25 + $0x170] sm:$0xff] }
  0x5d   : > { %1787 = vmatpush.bf16.msra.mxu3 %v5131_v11  ;;  %v1435_v29 = vld [vmem:[%s6016_s13 + $0x8] sm:$0x77]  ;;  %v5213_v35 = vld [vmem:[%s6015_s25 + $0xc0] sm:$0xff]  ;;  %v4536_v50 = vld [vmem:[%s6015_s25 + $0x118] sm:$0xff] }
  0x5e   : > { %1749 = vmatpush.bf16.msra.mxu0 %v5136_v12  ;;  %v1442_v33 = vunpack.c.l.b16 %v1435_v29  ;;  %v1443_v36 = vunpack.c.h.b16 %v1435_v29  ;;  %v4538_v46 = vld [vmem:[%s6015_s25 + $0x128] sm:$0xff]  ;;  %v4537_v48 = vld [vmem:[%s6015_s25 + $0x120] sm:$0xff]  ;;  %v4544_v51 = vld [vmem:[%s6015_s25 + $0x158] sm:$0xff] }
  0x5f   : > { %1762 = vmatpush.bf16.msra.mxu1 %v5139_v13  ;;  %v4546_v47 = vld [vmem:[%s6015_s25 + $0x168] sm:$0xff]  ;;  %v4545_v49 = vld [vmem:[%s6015_s25 + $0x160] sm:$0xff]  ;;  %v4535_v52 = vld [vmem:[%s6015_s25 + $0x110] sm:$0xff] }
  0x60   : > { %1775 = vmatpush.bf16.msra.mxu2 %v5144_v14  ;;  %v1448_v41 = vpack.c.b16 %v1442_v33, %v1442_v33  ;;  %v1449_v42 = vpack.c.b16 %v1443_v36, %v1443_v36  ;;  %v4543_v53 = vld [vmem:[%s6015_s25 + $0x150] sm:$0xff]  ;;  %v4534_v54 = vld [vmem:[%s6015_s25 + $0x108] sm:$0xff]  ;;  %v4264_v57 = vld [vmem:[%s6016_s13 + $0x18] sm:$0x77] }
  0x61   : > { %1788 = vmatpush.bf16.msra.mxu3 %v5147_v15  ;;  %v4542_v55 = vld [vmem:[%s6015_s25 + $0x148] sm:$0xff]  ;;  %v1436_v56 = vld [vmem:[%s6016_s13 + $0x10] sm:$0x77]  ;;  %v4533_v58 = vld [vmem:[%s6015_s25 + $0x100] sm:$0xff]  ;;  %v1833_v61 = vunpack.c.l.b16 %v4264_v57  ;;  %v1834_v62 = vunpack.c.h.b16 %v4264_v57 }
  0x62   : > { %1750 = vmatpush.bf16.msra.mxu0 %v5152_v16  ;;  %v4541_v59 = vld [vmem:[%s6015_s25 + $0x140] sm:$0xff]  ;;  %v1444_v60 = vunpack.c.l.b16 %v1436_v56  ;;  %v1445_v63 = vunpack.c.h.b16 %v1436_v56 }
  0x63   : > { %1763 = vmatpush.bf16.msra.mxu1 %v5155_v17 }
  0x64   : > { %1776 = vmatpush.bf16.msra.mxu2 %v5160_v18 }
  0x65   : > { %1789 = vmatpush.bf16.msra.mxu3 %v5163_v19 }
  0x66   : > { %1751 = vmatpush.bf16.msra.mxu0 %v5168_v20 }
  0x67   : > { %1764 = vmatpush.bf16.msra.mxu1 %v5171_v21 }
  0x68   : > { %1777 = vmatpush.bf16.msra.mxu2 %v5176_v22 }
  0x69   : > { %1790 = vmatpush.bf16.msra.mxu3 %v5179_v23 }
  0x6a   : > { %1752 = vmatpush.bf16.msra.mxu0 %v5184_v24 }
  0x6b   : > { %1765 = vmatpush.bf16.msra.mxu1 %v5187_v25 }
  0x6c   : > { %1778 = vmatpush.bf16.msra.mxu2 %v5190_v26 }
  0x6d   : > { %1791 = vmatpush.bf16.msra.mxu3 %v5195_v27 }
  0x6e   : > { %1753 = vmatpush.bf16.msra.mxu0 %v5202_v30 }
  0x6f   : > { %1766 = vmatpush.bf16.msra.mxu1 %v5205_v31 }
  0x70   : > { %1779 = vmatpush.bf16.msra.mxu2 %v5210_v34 }
  0x71   : > { %1792 = vmatpush.bf16.msra.mxu3 %v5213_v35  ;;  %1754 = vmatmul.bf16.vlgmr.msra.gmra.mxu0 %v1446_v40 }
  0x72   : > { %1798 = vmatpush.bf16.msrb.mxu0 %v5216_v38  ;;  %1767 = vmatmul.bf16.vlgmr.msra.gmra.mxu1 %v1447_v43 }
  0x73   : > { %1811 = vmatpush.bf16.msrb.mxu1 %v5219_v39  ;;  %1780 = vmatmul.bf16.vlgmr.msra.gmra.mxu2 %v1448_v41 }
  0x74   : > { %1851 = vmatpush.bf16.msrb.mxu2 %v5090_v0  ;;  %1793 = vmatmul.bf16.vlgmr.msra.gmra.mxu3 %v1449_v42  ;;  %v1450_v0 = vpack.c.b16 %v1444_v60, %v1444_v60 }
  0x75   : > { %1864 = vmatpush.bf16.msrb.mxu3 %v5093_v1  ;;  %v1839_v1 = vpack.c.b16 %v1833_v61, %v1833_v61 }
  0x76   : > { %1799 = vmatpush.bf16.msrb.mxu0 %v5228_v44 }
  0x77   : > { %1812 = vmatpush.bf16.msrb.mxu1 %v5231_v45 }
  0x78   : > { %1852 = vmatpush.bf16.msrb.mxu2 %v5104_v4  ;;  %v1840_v4 = vpack.c.b16 %v1834_v62, %v1834_v62 }
  0x79   : > { %1865 = vmatpush.bf16.msrb.mxu3 %v5107_v5  ;;  %v1451_v5 = vpack.c.b16 %v1445_v63, %v1445_v63 }
  0x7a   : > { %1800 = vmatpush.bf16.msrb.mxu0 %v4538_v46 }
  0x7b   : > { %1813 = vmatpush.bf16.msrb.mxu1 %v4546_v47 }
  0x7c   : > { %1853 = vmatpush.bf16.msrb.mxu2 %v5120_v8 }
  0x7d   : > { %1866 = vmatpush.bf16.msrb.mxu3 %v5123_v9 }
  0x7e   : > { %1801 = vmatpush.bf16.msrb.mxu0 %v4537_v48 }
  0x7f   : > { %1814 = vmatpush.bf16.msrb.mxu1 %v4545_v49 }
  0x80   : > { %1854 = vmatpush.bf16.msrb.mxu2 %v5136_v12 }
  0x81   : > { %1867 = vmatpush.bf16.msrb.mxu3 %v5139_v13 }
  0x82   : > { %1802 = vmatpush.bf16.msrb.mxu0 %v4536_v50 }
  0x83   : > { %1815 = vmatpush.bf16.msrb.mxu1 %v4544_v51 }
  0x84   : > { %1855 = vmatpush.bf16.msrb.mxu2 %v5152_v16 }
  0x85   : > { %1868 = vmatpush.bf16.msrb.mxu3 %v5155_v17 }
  0x86   : > { %1803 = vmatpush.bf16.msrb.mxu0 %v4535_v52 }
  0x87   : > { %1816 = vmatpush.bf16.msrb.mxu1 %v4543_v53 }
  0x88   : > { %1856 = vmatpush.bf16.msrb.mxu2 %v5168_v20  ;;  %v1433_v20 = vld [vmem:[%s6017_s24] sm:$0x1f] }
  0x89   : > { %1869 = vmatpush.bf16.msrb.mxu3 %v5171_v21 }
  0x8a   : > { %1804 = vmatpush.bf16.msrb.mxu0 %v4534_v54 }
  0x8b   : > { %1817 = vmatpush.bf16.msrb.mxu1 %v4542_v55 }
  0x8c   : > { %1857 = vmatpush.bf16.msrb.mxu2 %v5184_v24 }
  0x8d   : > { %1870 = vmatpush.bf16.msrb.mxu3 %v5187_v25 }
  0x8e   : > { %1805 = vmatpush.bf16.msrb.mxu0 %v4533_v58 }
  0x8f   : > { %1818 = vmatpush.bf16.msrb.mxu1 %v4541_v59 }
  0x90   : > { %1858 = vmatpush.bf16.msrb.mxu2 %v5202_v30 }
  0x91   : > { %1871 = vmatpush.bf16.msrb.mxu3 %v5205_v31  ;;  %1806 = vmatmul.bf16.vlgmr.msrb.gmra.mxu0 %v1450_v0 }
  0x92   : > { %1877 = vmatpush.bf16.msra.mxu0 %v5096_v2  ;;  %1819 = vmatmul.bf16.vlgmr.msrb.gmra.mxu1 %v1451_v5  ;;  %v4265_v2 = vld [vmem:[%s6016_s13 + $0x20] sm:$0x77] }
  0x93   : > { %1890 = vmatpush.bf16.msra.mxu1 %v5099_v3  ;;  %1859 = vmatmul.bf16.vlgmr.msrb.gmra.mxu2 %v1839_v1  ;;  %v4266_v3 = vld [vmem:[%s6016_s13 + $0x28] sm:$0x77] }
  0x94   : > { %1903 = vmatpush.bf16.msra.mxu2 %v5216_v38  ;;  %1872 = vmatmul.bf16.vlgmr.msrb.gmra.mxu3 %v1840_v4  ;;  %v1837_v8 = vunpack.c.l.b16 %v4266_v3  ;;  %v1838_v9 = vunpack.c.h.b16 %v4266_v3 }
  0x95   : > { %1916 = vmatpush.bf16.msra.mxu3 %v5219_v39 }
  0x96   : > { %1878 = vmatpush.bf16.msra.mxu0 %v5112_v6  ;;  %v1835_v6 = vunpack.c.l.b16 %v4265_v2  ;;  %v1843_v12 = vpack.c.b16 %v1837_v8, %v1837_v8  ;;  %v1844_v13 = vpack.c.b16 %v1838_v9, %v1838_v9 }
  0x97   : > { %1891 = vmatpush.bf16.msra.mxu1 %v5115_v7  ;;  %v1836_v7 = vunpack.c.h.b16 %v4265_v2 }
  0x98   : > { %1904 = vmatpush.bf16.msra.mxu2 %v5228_v44 }
  0x99   : > { %1917 = vmatpush.bf16.msra.mxu3 %v5231_v45 }
  0x9a   : > { %1879 = vmatpush.bf16.msra.mxu0 %v5128_v10  ;;  %v1841_v10 = vpack.c.b16 %v1835_v6, %v1835_v6 }
  0x9b   : > { %1892 = vmatpush.bf16.msra.mxu1 %v5131_v11  ;;  %v1842_v11 = vpack.c.b16 %v1836_v7, %v1836_v7 }
  0x9c   : > { %1905 = vmatpush.bf16.msra.mxu2 %v4538_v46 }
  0x9d   : > { %1918 = vmatpush.bf16.msra.mxu3 %v4546_v47 }
  0x9e   : > { %1880 = vmatpush.bf16.msra.mxu0 %v5144_v14 }
  0x9f   : > { %1893 = vmatpush.bf16.msra.mxu1 %v5147_v15 }
  0xa0   : > { %1906 = vmatpush.bf16.msra.mxu2 %v4537_v48 }
  0xa1   : > { %1919 = vmatpush.bf16.msra.mxu3 %v4545_v49 }
  0xa2   : > { %1881 = vmatpush.bf16.msra.mxu0 %v5160_v18 }
  0xa3   : > { %1894 = vmatpush.bf16.msra.mxu1 %v5163_v19 }
  0xa4   : > { %1907 = vmatpush.bf16.msra.mxu2 %v4536_v50 }
  0xa5   : > { %1920 = vmatpush.bf16.msra.mxu3 %v4544_v51 }
  0xa6   : > { %1882 = vmatpush.bf16.msra.mxu0 %v5176_v22 }
  0xa7   : > { %1895 = vmatpush.bf16.msra.mxu1 %v5179_v23 }
  0xa8   : > { %1908 = vmatpush.bf16.msra.mxu2 %v4535_v52 }
  0xa9   : > { %1921 = vmatpush.bf16.msra.mxu3 %v4543_v53 }
  0xaa   : > { %1883 = vmatpush.bf16.msra.mxu0 %v5190_v26 }
  0xab   : > { %1896 = vmatpush.bf16.msra.mxu1 %v5195_v27 }
  0xac   : > { %1909 = vmatpush.bf16.msra.mxu2 %v4534_v54 }
  0xad   : > { %1922 = vmatpush.bf16.msra.mxu3 %v4542_v55 }
  0xae   : > { %1884 = vmatpush.bf16.msra.mxu0 %v5210_v34 }
  0xaf   : > { %1897 = vmatpush.bf16.msra.mxu1 %v5213_v35 }
  0xb0   : > { %1910 = vmatpush.bf16.msra.mxu2 %v4533_v58 }
  0xb1   : > { %1923 = vmatpush.bf16.msra.mxu3 %v4541_v59  ;;  %1885 = vmatmul.bf16.vlgmr.msra.gmra.mxu0 %v1841_v10 }
  0xb2   : > { %1898 = vmatmul.bf16.vlgmr.msra.gmra.mxu1 %v1842_v11 }
  0xb3   : > { %1911 = vmatmul.bf16.vlgmr.msra.gmra.mxu2 %v1843_v12 }
  0xb4   : > { %1924 = vmatmul.bf16.vlgmr.msra.gmra.mxu3 %v1844_v13 }
  0xee   : > { %v1755_v14 = vpop.f32.mrf.mxu0 }
  0xef   : > { %v1768_v15 = vpop.f32.mrf.mxu1  ;;  %v1756_v22 = vadd.f32 %v1755_v14, %v1433_v20 }
  0xf1   : > { %v1769_v24 = vadd.f32 %v1768_v15, %v1756_v22 }
  0xf6   : > { %v1781_v16 = vpop.f32.mrf.mxu2  ;;  %v1757_v18 = vpop.f32.mrf.mxu0 }
  0xf7   : > { %v1794_v17 = vpop.f32.mrf.mxu3  ;;  %v1770_v19 = vpop.f32.mrf.mxu1  ;;  %v1782_v25 = vadd.f32 %v1781_v16, %v1769_v24 }
  0xf9   : > { %v1795_v26 = vadd.f32 %v1794_v17, %v1782_v25 }
  0xfe   : > { %v1783_v21 = vpop.f32.mrf.mxu2 }
  0xff   : > { %v1796_v23 = vpop.f32.mrf.mxu3 }
 0x10e   : > { %v1807_v27 = vpop.f32.mrf.mxu0 }
 0x10f   : > { %v1808_v28 = vadd.f32 %v1807_v27, %v1795_v26  ;;  %v1820_v29 = vpop.f32.mrf.mxu1 }
 0x111   : > { %v1821_v30 = vadd.f32 %v1820_v29, %v1808_v28 }
 0x113   : > { %1825 = vst.msk [vmem:[#allocation2] sm:$0x1f] %vm1824_vm0, %v1821_v30 }
 0x116   : > { %v1860_v31 = vpop.f32.mrf.mxu2  ;;  %v1809_v33 = vpop.f32.mrf.mxu0 }
 0x117   : > { %v1873_v32 = vpop.f32.mrf.mxu3  ;;  %v1822_v34 = vpop.f32.mrf.mxu1  ;;  %v1861_v37 = vadd.f32 %v1860_v31, %v1433_v20 }
 0x119   : > { %v1874_v38 = vadd.f32 %v1873_v32, %v1861_v37 }
 0x11e   : > { %v1862_v35 = vpop.f32.mrf.mxu2 }
 0x11f   : > { %v1875_v36 = vpop.f32.mrf.mxu3 }
 0x12e   : > { %v1886_v39 = vpop.f32.mrf.mxu0 }
 0x12f   : > { %v1899_v40 = vpop.f32.mrf.mxu1  ;;  %v1887_v41 = vadd.f32 %v1886_v39, %v1874_v38 }
 0x131   : > { %v1900_v42 = vadd.f32 %v1899_v40, %v1887_v41 }
 0x136   : > { %v1912_v43 = vpop.f32.mrf.mxu2  ;;  %v1888_v46 = vpop.f32.mrf.mxu0 }
 0x137   : > { %v1925_v44 = vpop.f32.mrf.mxu3  ;;  %v1913_v45 = vadd.f32 %v1912_v43, %v1900_v42  ;;  %v1901_v47 = vpop.f32.mrf.mxu1 }
 0x139   : > { %v1926_v48 = vadd.f32 %v1925_v44, %v1913_v45 }
 0x13b   : > { %1930 = vst.msk [vmem:[#allocation2 + $0x8] sm:$0x1f] %vm1824_vm0, %v1926_v48 }
 0x13e   : > { %v1914_v49 = vpop.f32.mrf.mxu2 }
 0x13f   : > { %v1927_v50 = vpop.f32.mrf.mxu3 }
 0x140 PF: > { %v5290_v51 = vld [vmem:[#allocation2] sm:$0x1f]  ;;  %vm1996_vm1 = vcmask 520192   ;;  %s6018_s4 = sld [smem:[#allocation13_spill]]  ;;  %v4775_v53 = vmov 64.0   ;;  %vm2080_vm6 = vcmask 523264   ;;  %s6039_s17 = scalar_lea.vmem %s5922_s10, %s4972_s21 }
 0x141   : > { %v1997_v52 = vsel %vm1996_vm1, %v5290_v51, 0.0  ;;  %4657 = vrcp.f32 %v4775_v53  ;;  %s6020_s27 = sld [smem:[#allocation24_spill]]  ;;  %vm2152_vm7 = vcmask 1041408   ;;  %vm2153_vm8 = vcmask 1042432   ;;  %s4777_s18 = smov 112  }
 0x142   : > { %1998 = vadd.xlane.f32.xlu0 %v1997_v52  ;;  %s6022_s3 = sld [smem:[#allocation25_spill]]  ;;  %v4776_v44 = vmov 65535   ;;  %s4778_s25 = smov 48   ;;  %vm2114_vm9 = vcmask 130048   ;;  %vm2134_vm10 = vcmask 36864   ;;  %vm2148_vm11 = vcmask 39936  }
 0x143   : > { %s6024_s19 = sld [smem:[#allocation27_spill]]  ;;  %v2154_v45 = vsel %vm2152_vm7, 4294967295, %v4776_v44  ;;  %s4779_s13 = smov 64   ;;  %vm2173_vm12 = vcmask 124928   ;;  %vm2174_vm13 = vsmask.f32 2304 }
 0x144   : > { %v5371_v50 = vsel %vm2153_vm8, %v2154_v45, 0  ;;  %s4780_s24 = smov 96   ;;  %s4782_s1 = smov 32   ;;  %vm5396_vm14 = vmand %vm2173_vm12, %vm2174_vm13  ;;  %vm2241_vm15 = vcmask 256128  }
 0x145   : > { %s4783_s22 = smov 16   ;;  %vm5432_vm0 = vmand %vm2241_vm15, %vm2174_vm13 }
 0x146   : > { %v4293_v1 = vld [vmem:[%s6018_s4 + $0x30] sm:$0xf]  ;;  %v4556_v4 = vld [vmem:[%s6018_s4 + $0x34] sm:$0xf0]  ;;  %v4555_v5 = vld [vmem:[%s6018_s4 + $0x34] sm:$0xf] }
 0x147   : > { %v4658_v54 = vpop.eup %4657  ;;  %v5302_v2 = vor.u32 %v4556_v4, %v4293_v1  ;;  %v4295_v3 = vld [vmem:[%s6018_s4 + $0x38] sm:$0xf0]  ;;  %v4285_v7 = vld [vmem:[%s6018_s4 + $0x20] sm:$0xf]  ;;  %v4554_v8 = vld [vmem:[%s6018_s4 + $0x24] sm:$0xf0]  ;;  %s6021_s11 = scalar_lea.vmem %s6020_s27, %s4972_s21 }
 0x148   : > { %v2001_v55 = vmul.f32 64.0, %v4658_v54  ;;  %vm2005_vm2 = vweird.f32 %v4658_v54  ;;  %v5305_v6 = vor.u32 %v4555_v5, %v4295_v3  ;;  %v4553_v9 = vld [vmem:[%s6018_s4 + $0x24] sm:$0xf]  ;;  %v5312_v10 = vor.u32 %v4554_v8, %v4285_v7  ;;  %v4287_v11 = vld [vmem:[%s6018_s4 + $0x28] sm:$0xf0]  ;;  %s6023_s28 = scalar_lea.vmem %s6022_s3, %s4972_s21  ;;  %s6037_s3 = scalar_lea.vmem %s5921_s9, %s4972_s21 }
 0x149   : > { %2088 = vmatpush.bf16.msra.mxu0 %v5302_v2  ;;  %v5315_v12 = vor.u32 %v4553_v9, %v4287_v11  ;;  %v4277_v13 = vld [vmem:[%s6018_s4 + $0x10] sm:$0xf]  ;;  %v4552_v14 = vld [vmem:[%s6018_s4 + $0x14] sm:$0xf0]  ;;  %v4551_v15 = vld [vmem:[%s6018_s4 + $0x14] sm:$0xf]  ;;  %s6025_s5 = scalar_lea.vmem %s6024_s19, %s4994_s2 }
 0x14a   : > { %v2002_v56 = vsub.f32 1.0, %v2001_v55  ;;  %2101 = vmatpush.bf16.msra.mxu1 %v5305_v6  ;;  %v5322_v16 = vor.u32 %v4552_v14, %v4277_v13  ;;  %v4279_v17 = vld [vmem:[%s6018_s4 + $0x18] sm:$0xf0]  ;;  %v4269_v18 = vld [vmem:[%s6018_s4] sm:$0xf] }
 0x14b   : > { %v4550_v19 = vld [vmem:[%s6018_s4 + $0x4] sm:$0xf0]  ;;  %v5327_v20 = vor.u32 %v4551_v15, %v4279_v17  ;;  %v4549_v21 = vld [vmem:[%s6018_s4 + $0x4] sm:$0xf]  ;;  %v4271_v22 = vld [vmem:[%s6018_s4 + $0x8] sm:$0xf0] }
 0x14c   : > { %v2003_v57 = vmul.f32 %v4658_v54, %v2002_v56  ;;  %v5332_v23 = vor.u32 %v4550_v19, %v4269_v18  ;;  %v5335_v24 = vor.u32 %v4549_v21, %v4271_v22  ;;  %v5345_v34 = vld [vmem:[%s6021_s11] ss:$0 sm:$0xff]  ;;  %s4781_s4 = smov 80   ;;  %s6034_s11 = sld [smem:[#allocation29_spill]] }
 0x14d   : > { %2089 = vmatpush.bf16.msra.mxu0 %v5312_v10  ;;  %v5352_v37 = vld [vmem:[%s6023_s28] ss:$0 sm:$0xff] }
 0x14e   : > { %v2004_v58 = vadd.f32 %v4658_v54, %v2003_v57  ;;  %2102 = vmatpush.bf16.msra.mxu1 %v5315_v12  ;;  %v5363_v41 = vld [vmem:[%s6025_s5] sm:$0x3] }
 0x14f   : > { %v2036_v42 = vperm.slane %v5363_v41, 0  ;;  %v2037_v43 = vperm.slane %v5363_v41, 1 }
 0x150   : > { %v5294_v59 = vsel %vm2005_vm2, %v4658_v54, %v2004_v58  ;;  %vm2307_vm2 = vcmask 387328  }
 0x151   : > { %6019 = vst [vmem:[#allocation16_spill] sm:$0xff] %v5294_v59  ;;  %2090 = vmatpush.bf16.msra.mxu0 %v5322_v16 }
 0x152   : > { %2103 = vmatpush.bf16.msra.mxu1 %v5327_v20  ;;  %s6035_s12 = scalar_lea.vmem %s6034_s11, %s4972_s21 }
 0x155   : > { %2091 = vmatpush.bf16.msra.mxu0 %v5332_v23 }
 0x156   : > { %2104 = vmatpush.bf16.msra.mxu1 %v5335_v24 }
 0x1b5   : > { %v1999_v60 = vpop.xlane.xlu0 %1998 }
 0x1b6   : > { %v2007_v61 = vmul.f32 %v5294_v59, %v1999_v60 }
 0x1b8   : > { %v2008_v62 = vsub.f32 %v5290_v51, %v2007_v61 }
 0x1ba   : > { %v2009_v63 = vmul.f32 %v2008_v62, %v2008_v62 }
 0x1bc   : > { %v2010_v0 = vsel %vm1996_vm1, %v2009_v63, 0.0 }
 0x1bd   : > { %2011 = vadd.xlane.f32.xlu0 %v2010_v0 }
 0x230   : > { %v2012_v25 = vpop.xlane.xlu0 %2011 }
 0x231   : > { %v2013_v26 = vmul.f32 %v2012_v25, %v5294_v59 }
 0x233   : > { %v2014_v27 = vadd.f32 1e-06, %v2013_v26 }
 0x235   : > { %4659 = vrsqrt.f32 %v2014_v27  ;;  %vm2021_vm4 = vweird.f32 %v2014_v27 }
 0x23b   : > { %v4660_v28 = vpop.eup %4659 }
 0x23c   : > { %v2016_v29 = vmul.f32 %v4660_v28, %v2014_v27  ;;  %vm2022_vm3 = vweird.f32 %v4660_v28  ;;  %v2176_v27 = vld [vmem:[#allocation3] sm:$0x7] }
 0x23d   : > { %vm2023_vm5 = vmor %vm2021_vm4, %vm2022_vm3  ;;  %vm2373_vm4 = vcmask 518528  }
 0x23e   : > { %v2017_v30 = vmul.f32 %v4660_v28, %v2016_v29  ;;  %vm5451_vm3 = vmand %vm2307_vm2, %vm2174_vm13 }
 0x240   : > { %v2018_v31 = vmul.f32 0.5, %v2017_v30 }
 0x242   : > { %v2019_v32 = vsub.f32 1.5, %v2018_v31 }
 0x244   : > { %v2020_v33 = vmul.f32 %v4660_v28, %v2019_v32 }
 0x246   : > { %v2024_v35 = vsel %vm2023_vm5, %v4660_v28, %v2020_v33  ;;  %vm5458_vm5 = vmand %vm2373_vm4, %vm2174_vm13 }
 0x247   : > { %v2025_v36 = vmul.f32 %v2024_v35, %v2008_v62 }
 0x249   : > { %v2029_v38 = vmul.f32 %v5345_v34, %v2025_v36 }
 0x24b   : > { %v2033_v39 = vadd.f32 %v5352_v37, %v2029_v38 }
 0x24d   : > { %v2034_v40 = vpack.c.bf16 %v2033_v39, %v2033_v39 }
 0x24f   : > { %4299 = vmatmul.msk.bf16.vlgmr.msra.gmra.mxu0 %vm2080_vm6, %v2034_v40  ;;  %4300 = vmatmul.msk.bf16.vlgmr.msra.gmra.mxu1 %vm2080_vm6, %v2034_v40 }
 0x2cc   : > { %v2093_v46 = vpop.f32.mrf.mxu0  ;;  %v2106_v47 = vpop.f32.mrf.mxu1 }
 0x2cd   : > { %v2094_v48 = vadd.f32 %v2093_v46, %v2036_v42  ;;  %v2107_v49 = vadd.f32 %v2106_v47, %v2037_v43 }
 0x2cf   : > { %v2110_v52 = vpack.c.bf16 %v2094_v48, %v2094_v48  ;;  %v5373_v53 = vpack.c.bf16 %v2107_v49, %v2107_v49 }
 0x2d1   : > { %2179 = vrot.lane.b32.xlu0 %v2110_v52, %s4777_s18  ;;  %2181 = vrot.lane.b32.xlu2 %v2110_v52, %s4778_s25  ;;  %v2157_v54 = vand.u32 %v5371_v50, %v5373_v53 }
 0x2d2   : > { %2112 = vrot.lane.b32.xlu1 %v2110_v52, %s4779_s13 }
 0x2d3   : > { %2166 = vmatpush.bf16.msra.mxu3 %v2157_v54 }
 0x2d4   : > { %v2095_v55 = vpop.f32.mrf.mxu0  ;;  %v2108_v56 = vpop.f32.mrf.mxu1 }
 0x2d9   : > { %2246 = vrot.lane.b32.xlu0 %v2110_v52, %s4780_s24 }
 0x2e1   : > { %2312 = vrot.lane.b32.xlu0 %v2110_v52, %s4781_s4 }
 0x32b   : > { %v2182_v57 = vpop.permute.xlu2 %2181 }
 0x32c   : > { %v2187_v58 = vsel %vm2114_vm9, %v2182_v57, 0 }
 0x32d   : > { %2196 = vmatpush.bf16.xpose.msrb.mxu3 %v2187_v58 }
 0x343   : > { %v2180_v18 = vpop.permute.xlu0 %2179 }
 0x344   : > { %v2113_v60 = vpop.permute.xlu1 %2112 }
 0x345   : > { %v2119_v61 = vsel %vm2114_vm9, %v2113_v60, 0 }
 0x346   : > { %2128 = vmatpush.bf16.xpose.msra.mxu2 %v2119_v61 }
 0x34b   : > { %v2247_v21 = vpop.permute.xlu0 %2246 }
 0x34d   : > { %4301 = vmatmul.msk.bf16.vlgmr.msra.gmra.mxu2 %vm2114_vm9, %v2110_v52 }
 0x353   : > { %v2313_v22 = vpop.permute.xlu0 %2312 }
 0x3d0   : > { %v2130_v62 = vpop.f32.mrf.mxu2 }
 0x3d1   : > { %v2135_v63 = vsel %vm2134_vm10, %v2130_v62, -inf }
 0x3d2   : > { %2136 = vmax.xlane.f32.xlu1 %v2135_v63 }
 0x3d8   : > { %v2132_v0 = vpop.f32.mrf.mxu2 }
 0x445   : > { %v2137_v1 = vpop.xlane.xlu1 %2136 }
 0x446   : > { %v2138_v4 = vsub.f32 %v2130_v62, %v2137_v1 }
 0x448   : > { %v2139_v5 = vmul.f32 1.442695, %v2138_v4 }
 0x44a   : > { %4661 = vpow2.f32 %v2139_v5 }
 0x450   : > { %v4662_v3 = vpop.eup %4661 }
 0x451   : > { %v2141_v7 = vsel %vm2134_vm10, %v4662_v3, 0.0 }
 0x452   : > { %2142 = vadd.xlane.f32.xlu2 %v2141_v7 }
 0x46a   : > { %2248 = vrot.lane.b32.xlu2 %v2110_v52, %s4782_s1 }
 0x472   : > { %2314 = vrot.lane.b32.xlu2 %v2110_v52, %s4783_s22 }
 0x4c5   : > { %v2143_v8 = vpop.xlane.xlu2 %2142 }
 0x4c6   : > { %4663 = vrcp.f32 %v2143_v8 }
 0x4cc   : > { %v4664_v9 = vpop.eup %4663 }
 0x4cd   : > { %v2145_v11 = vmul.f32 %v4664_v9, %v4662_v3  ;;  %v2249_v13 = vpop.permute.xlu2 %2248 }
 0x4ce   : > { %v2254_v15 = vsel %vm2114_vm9, %v2249_v13, 0 }
 0x4cf   : > { %v2146_v14 = vpack.c.bf16 %v2145_v11, %v2145_v11 }
 0x4d1   : > { %4302 = vmatmul.msk.bf16.vlgmr.msra.gmra.mxu3 %vm2148_vm11, %v2146_v14 }
 0x4d2   : > { %2263 = vmatpush.bf16.xpose.msra.mxu3 %v2254_v15 }
 0x4d5   : > { %v2315_v17 = vpop.permute.xlu2 %2314 }
 0x4d6   : > { %v2320_v19 = vsel %vm2114_vm9, %v2315_v17, 0 }
 0x4e1   : > { %4303 = vmatmul.msk.bf16.vlgmr.msrb.gmra.mxu3 %vm2114_vm9, %v2180_v18 }
 0x4e2   : > { %2329 = vmatpush.bf16.xpose.msrb.mxu3 %v2320_v19 }
 0x4f1   : > { %4305 = vmatmul.msk.bf16.vlgmr.msra.gmra.mxu3 %vm2114_vm9, %v2247_v21 }
 0x501   : > { %4307 = vmatmul.msk.bf16.vlgmr.msrb.gmra.mxu3 %vm2114_vm9, %v2313_v22 }
 0x554   : > { %v2168_v25 = vpop.f32.mrf.mxu3 }
 0x555   : > { %v2172_v28 = vpack.c.bf16 %v2168_v25, %v2168_v25 }
 0x557   : > { %v2177_v29 = vsel %vm5396_vm14, %v2172_v28, %v2176_v27 }
 0x558   : > { %2178 = vst [vmem:[#allocation3] sm:$0x7] %v2177_v29 }
 0x55c   : > { %v2170_v30 = vpop.f32.mrf.mxu3 }
 0x564   : > { %v2198_v31 = vpop.f32.mrf.mxu3 }
 0x565   : > { %v2202_v32 = vsel %vm2134_vm10, %v2198_v31, -inf }
 0x566   : > { %2203 = vmax.xlane.f32.xlu2 %v2202_v32 }
 0x56c   : > { %v2200_v33 = vpop.f32.mrf.mxu3 }
 0x574   : > { %v2265_v35 = vpop.f32.mrf.mxu3 }
 0x575   : > { %v2269_v36 = vsel %vm2134_vm10, %v2265_v35, -inf }
 0x576   : > { %2270 = vmax.xlane.f32.xlu1 %v2269_v36  ;;  %v5424_v36 = vld [vmem:[%s5017_s20 + $0x18] sm:$0xff] }
 0x577   : > { %2410 = vmatpush.bf16.msrb.mxu0 %v5424_v36 }
 0x57c   : > { %v2267_v38 = vpop.f32.mrf.mxu3 }
 0x57d   : > { %v5428_v38 = vld [vmem:[%s5017_s20 + $0x10] sm:$0xff] }
 0x57e   : > { %2411 = vmatpush.bf16.msrb.mxu0 %v5428_v38 }
 0x584   : > { %v2331_v39 = vpop.f32.mrf.mxu3 }
 0x585   : > { %v2335_v40 = vsel %vm2134_vm10, %v2331_v39, -inf }
 0x586   : > { %2336 = vmax.xlane.f32.xlu0 %v2335_v40  ;;  %v2243_v40 = vld [vmem:[#allocation3] sm:$0x7] }
 0x58c   : > { %v2333_v44 = vpop.f32.mrf.mxu3 }
 0x58f   : > { %2215 = vrot.lane.b32.xlu1 %v5373_v53, %s4777_s18 }
 0x5d9   : > { %v2204_v45 = vpop.xlane.xlu2 %2203 }
 0x5da   : > { %v2205_v46 = vsub.f32 %v2198_v31, %v2204_v45 }
 0x5dc   : > { %v2206_v47 = vmul.f32 1.442695, %v2205_v46  ;;  %v5439_v46 = vld [vmem:[%s5017_s20 + $0x8] sm:$0xff] }
 0x5dd   : > { %2412 = vmatpush.bf16.msrb.mxu0 %v5439_v46 }
 0x5de   : > { %4665 = vpow2.f32 %v2206_v47  ;;  %v5443_v47 = vld [vmem:[%s5017_s20] sm:$0xff]  ;;  %s6041_s20 = sld [smem:[#allocation31_spill]] }
 0x5e1   : > { %2413 = vmatpush.bf16.msrb.mxu0 %v5443_v47 }
 0x5e4   : > { %v4666_v48 = vpop.eup %4665  ;;  %s6042_s27 = scalar_lea.vmem %s6041_s20, %s4994_s2 }
 0x5e5   : > { %v2208_v49 = vsel %vm2134_vm10, %v4666_v48, 0.0 }
 0x5e6   : > { %2209 = vadd.xlane.f32.xlu1 %v2208_v49 }
 0x5e9   : > { %v2271_v52 = vpop.xlane.xlu1 %2270 }
 0x5ea   : > { %v2272_v54 = vsub.f32 %v2265_v35, %v2271_v52 }
 0x5ec   : > { %v2273_v55 = vmul.f32 1.442695, %v2272_v54 }
 0x5ee   : > { %4667 = vpow2.f32 %v2273_v55 }
 0x5f4   : > { %v4668_v56 = vpop.eup %4667 }
 0x5f5   : > { %v2275_v57 = vsel %vm2134_vm10, %v4668_v56, 0.0 }
 0x5f6   : > { %2276 = vadd.xlane.f32.xlu2 %v2275_v57 }
 0x5f9   : > { %v2337_v58 = vpop.xlane.xlu0 %2336 }
 0x5fa   : > { %v2338_v60 = vsub.f32 %v2331_v39, %v2337_v58 }
 0x5fc   : > { %v2339_v61 = vmul.f32 1.442695, %v2338_v60 }
 0x5fe   : > { %4669 = vpow2.f32 %v2339_v61 }
 0x5ff   : > { %2281 = vrot.lane.b32.xlu1 %v5373_v53, %s4780_s24 }
 0x601   : > { %v2216_v62 = vpop.permute.xlu1 %2215 }
 0x602   : > { %v2221_v63 = vand.u32 %v2216_v62, %v5371_v50 }
 0x604   : > { %v4670_v0 = vpop.eup %4669  ;;  %2230 = vmatpush.bf16.msrb.mxu2 %v2221_v63 }
 0x605   : > { %v2341_v1 = vsel %vm2134_vm10, %v4670_v0, 0.0 }
 0x606   : > { %2342 = vadd.xlane.f32.xlu0 %v2341_v1 }
 0x60e   : > { %2347 = vrot.lane.b32.xlu2 %v5373_v53, %s4781_s4 }
 0x659   : > { %v2210_v4 = vpop.xlane.xlu1 %2209 }
 0x65a   : > { %4671 = vrcp.f32 %v2210_v4 }
 0x660   : > { %v4672_v5 = vpop.eup %4671 }
 0x661   : > { %v2212_v3 = vmul.f32 %v4672_v5, %v4666_v48  ;;  %v5446_v48 = vld [vmem:[#allocation2 + $0x8] sm:$0x1f] }
 0x662   : > { %v2740_v49 = vsel %vm1996_vm1, %v5446_v48, 0.0 }
 0x663   : > { %v2213_v7 = vpack.c.bf16 %v2212_v3, %v2212_v3  ;;  %2741 = vadd.xlane.f32.xlu2 %v2740_v49 }
 0x665   : > { %4304 = vmatmul.msk.bf16.vlgmr.msrb.gmra.mxu2 %vm2148_vm11, %v2213_v7 }
 0x669   : > { %v2277_v8 = vpop.xlane.xlu2 %2276 }
 0x66a   : > { %4673 = vrcp.f32 %v2277_v8 }
 0x670   : > { %v4674_v9 = vpop.eup %4673 }
 0x671   : > { %v2279_v11 = vmul.f32 %v4674_v9, %v4668_v56  ;;  %v2282_v13 = vpop.permute.xlu1 %2281  ;;  %v2348_v14 = vpop.permute.xlu2 %2347 }
 0x672   : > { %v2287_v15 = vand.u32 %v2282_v13, %v5371_v50  ;;  %v2353_v17 = vand.u32 %v2348_v14, %v5371_v50 }
 0x673   : > { %v2280_v18 = vpack.c.bf16 %v2279_v11, %v2279_v11 }
 0x674   : > { %2296 = vmatpush.bf16.msra.mxu2 %v2287_v15 }
 0x677   : > { %4306 = vmatmul.msk.bf16.vlgmr.msra.gmra.mxu2 %vm2148_vm11, %v2280_v18 }
 0x678   : > { %2362 = vmatpush.bf16.msrb.mxu2 %v2353_v17 }
 0x679   : > { %v2343_v53 = vpop.xlane.xlu0 %2342 }
 0x67a   : > { %4675 = vrcp.f32 %v2343_v53  ;;  %v4352_v53 = vld [vmem:[%s5022_s8 + $0x30] sm:$0xf] }
 0x680   : > { %v4676_v19 = vpop.eup %4675 }
 0x681   : > { %v2345_v21 = vmul.f32 %v4676_v19, %v4670_v0  ;;  %v5470_v0 = vld [vmem:[%s6035_s12] ss:$0 sm:$0xff]  ;;  %v4568_v19 = vld [vmem:[%s5022_s8 + $0x34] sm:$0xf0] }
 0x682   : > { %6036 = vst [vmem:[#allocation17_spill] sm:$0xff] %v5470_v0 }
 0x683   : > { %v2346_v22 = vpack.c.bf16 %v2345_v21, %v2345_v21  ;;  %v4567_v21 = vld [vmem:[%s5022_s8 + $0x34] sm:$0xf] }
 0x687   : > { %4308 = vmatmul.msk.bf16.vlgmr.msrb.gmra.mxu2 %vm2148_vm11, %v2346_v22  ;;  %v5495_v22 = vor.u32 %v4568_v19, %v4352_v53  ;;  %v5555_v53 = vld [vmem:[%s6039_s17] ss:$0 sm:$0xff] }
 0x688   : > { %6040 = vst [vmem:[#allocation19_spill] sm:$0xff] %v5555_v53 }
 0x689   : > { %2507 = vmatpush.bf16.msrb.mxu1 %v5495_v22 }
 0x6d6   : > { %v2742_v63 = vpop.xlane.xlu2 %2741 }
 0x6d7   : > { %v2743_v1 = vmul.f32 %v2742_v63, %v5294_v59 }
 0x6d9   : > { %v5478_v7 = vsub.f32 %v5446_v48, %v2743_v1 }
 0x6db   : > { %v2745_v9 = vmul.f32 %v5478_v7, %v5478_v7 }
 0x6dd   : > { %v2746_v13 = vsel %vm1996_vm1, %v2745_v9, 0.0 }
 0x6e8   : > { %v2232_v25 = vpop.f32.mrf.mxu2 }
 0x6e9   : > { %v2236_v27 = vpack.c.bf16 %v2232_v25, %v2232_v25  ;;  %v4354_v25 = vld [vmem:[%s5022_s8 + $0x38] sm:$0xf0] }
 0x6eb   : > { %2238 = vrot.lane.b32.xlu1 %v2236_v27, %s4783_s22  ;;  %v5498_v27 = vor.u32 %v4567_v21, %v4354_v25 }
 0x6ed   : > { %2520 = vmatpush.bf16.msra.mxu3 %v5498_v27 }
 0x6f0   : > { %v2234_v28 = vpop.f32.mrf.mxu2 }
 0x6f1   : > { %v4344_v28 = vld [vmem:[%s5022_s8 + $0x20] sm:$0xf] }
 0x6fa   : > { %v2298_v29 = vpop.f32.mrf.mxu2 }
 0x6fb   : > { %v2302_v30 = vpack.c.bf16 %v2298_v29, %v2298_v29  ;;  %v4566_v29 = vld [vmem:[%s5022_s8 + $0x24] sm:$0xf0] }
 0x6fd   : > { %2304 = vrot.lane.b32.xlu0 %v2302_v30, %s4782_s1  ;;  %v4565_v30 = vld [vmem:[%s5022_s8 + $0x24] sm:$0xf] }
 0x702   : > { %v2300_v31 = vpop.f32.mrf.mxu2 }
 0x703   : > { %v5505_v31 = vor.u32 %v4566_v29, %v4344_v28 }
 0x705   : > { %2508 = vmatpush.bf16.msrb.mxu1 %v5505_v31 }
 0x70a   : > { %v2364_v32 = vpop.f32.mrf.mxu2 }
 0x70b   : > { %v2368_v33 = vpack.c.bf16 %v2364_v32, %v2364_v32  ;;  %v4346_v32 = vld [vmem:[%s5022_s8 + $0x28] sm:$0xf0] }
 0x70d   : > { %2370 = vrot.lane.b32.xlu1 %v2368_v33, %s4778_s25  ;;  %v5508_v33 = vor.u32 %v4565_v30, %v4346_v32 }
 0x70f   : > { %2521 = vmatpush.bf16.msra.mxu3 %v5508_v33 }
 0x712   : > { %v2366_v35 = vpop.f32.mrf.mxu2 }
 0x75d   : > { %v2239_v44 = vpop.permute.xlu1 %2238 }
 0x75e   : > { %v2244_v45 = vsel %vm5432_vm0, %v2239_v44, %v2243_v40  ;;  %v4336_v40 = vld [vmem:[%s5022_s8 + $0x10] sm:$0xf]  ;;  %v4564_v44 = vld [vmem:[%s5022_s8 + $0x14] sm:$0xf0] }
 0x75f   : > { %2245 = vst [vmem:[#allocation3] sm:$0x7] %v2244_v45  ;;  %v4563_v45 = vld [vmem:[%s5022_s8 + $0x14] sm:$0xf]  ;;  %v5515_v49 = vor.u32 %v4564_v44, %v4336_v40  ;;  %v5571_v40 = vld [vmem:[%s6042_s27] sm:$0x3] }
 0x760   : > { %6043 = vst [vmem:[#allocation20_spill] sm:$0xff] %v5571_v40  ;;  %v5574_v44 = vld [vmem:[%s5045_s30 + $0x38] sm:$0xff] }
 0x761   : > { %2509 = vmatpush.bf16.msrb.mxu1 %v5515_v49  ;;  %2710 = vmatpush.bf16.msra.mxu2 %v5574_v44 }
 0x766   : > { %v2309_v54 = vld [vmem:[#allocation3] sm:$0x7] }
 0x76f   : > { %v2305_v55 = vpop.permute.xlu0 %2304 }
 0x770   : > { %v2310_v56 = vsel %vm5451_vm3, %v2305_v55, %v2309_v54  ;;  %v4338_v54 = vld [vmem:[%s5022_s8 + $0x18] sm:$0xf0]  ;;  %v4328_v55 = vld [vmem:[%s5022_s8] sm:$0xf] }
 0x771   : > { %2311 = vst [vmem:[#allocation3] sm:$0x7] %v2310_v56  ;;  %v4562_v56 = vld [vmem:[%s5022_s8 + $0x4] sm:$0xf0] }
 0x772   : > { %v5526_v63 = vor.u32 %v4562_v56, %v4328_v55  ;;  %v5947_v56 = vperm.slane %v5571_v40, 1 }
 0x774   : > { %2510 = vmatpush.bf16.msrb.mxu1 %v5526_v63 }
 0x778   : > { %v2375_v58 = vld [vmem:[#allocation3] sm:$0x7]  ;;  %2772 = vmatpush.bf16.msra.mxu1 %v5302_v2 }
 0x77c   : > { %2773 = vmatpush.bf16.msra.mxu1 %v5312_v10 }
 0x77f   : > { %v2371_v60 = vpop.permute.xlu1 %2370 }
 0x780   : > { %v2376_v61 = vsel %vm5458_vm5, %v2371_v60, %v2375_v58  ;;  %v5520_v58 = vor.u32 %v4563_v45, %v4338_v54  ;;  %v4561_v60 = vld [vmem:[%s5022_s8 + $0x4] sm:$0xf]  ;;  %2774 = vmatpush.bf16.msra.mxu1 %v5322_v16  ;;  %v5547_v16 = vld [vmem:[%s6037_s3] ss:$0 sm:$0xff]  ;;  %v5587_v54 = vld [vmem:[%s5045_s30 + $0x78] sm:$0xff] }
 0x781   : > { %2377 = vst [vmem:[#allocation3] sm:$0x7] %v2376_v61  ;;  %v4330_v61 = vld [vmem:[%s5022_s8 + $0x8] sm:$0xf0]  ;;  %2723 = vmatpush.bf16.msra.mxu0 %v5587_v54 }
 0x782   : > { %2522 = vmatpush.bf16.msra.mxu3 %v5520_v58  ;;  %v5529_v1 = vor.u32 %v4561_v60, %v4330_v61  ;;  %6038 = vst [vmem:[#allocation18_spill] sm:$0xff] %v5547_v16  ;;  %v5595_v60 = vld [vmem:[%s5045_s30 + $0x28] sm:$0xff] }
 0x784   : > { %2775 = vmatpush.bf16.msra.mxu1 %v5332_v23 }
 0x786   : > { %2523 = vmatpush.bf16.msra.mxu3 %v5529_v1 }
 0x788   : > { %v2378_v62 = vld [vmem:[#allocation3] sm:$0x7] }
 0x789   : > { %4325 = vmatmul.msk.bf16.vlgmr.msrb.gmra.mxu0 %vm2080_vm6, %v2378_v62 }
 0x78a   : > { %2785 = vmatpush.bf16.msrb.mxu3 %v5305_v6 }
 0x78e   : > { %2786 = vmatpush.bf16.msrb.mxu3 %v5315_v12 }
 0x792   : > { %2787 = vmatpush.bf16.msrb.mxu3 %v5327_v20 }
 0x796   : > { %2788 = vmatpush.bf16.msrb.mxu3 %v5335_v24 }
 0x806   : > { %v2415_v4 = vpop.f32.mrf.mxu0 }
 0x807   : > { %v2419_v5 = vadd.f32 %v2415_v4, %v5290_v51 }
 0x809   : > { %v5475_v3 = vadd.f32 %v5470_v0, %v2419_v5 }
 0x80b   : > { %v2424_v8 = vsel %vm1996_vm1, %v5475_v3, 0.0 }
 0x80c   : > { %2425 = vadd.xlane.f32.xlu1 %v2424_v8 }
 0x80e   : > { %v2417_v11 = vpop.f32.mrf.mxu0 }
 0x814   : > { %2747 = vadd.xlane.f32.xlu1 %v2746_v13 }
 0x87f   : > { %v2426_v51 = vpop.xlane.xlu1 %2425 }
 0x880   : > { %v2427_v14 = vmul.f32 %v2426_v51, %v5294_v59 }
 0x882   : > { %v5487_v15 = vsub.f32 %v5475_v3, %v2427_v14 }
 0x884   : > { %v2429_v17 = vmul.f32 %v5487_v15, %v5487_v15 }
 0x886   : > { %v2430_v18 = vsel %vm1996_vm1, %v2429_v17, 0.0 }
 0x887   : > { %2431 = vadd.xlane.f32.xlu0 %v2430_v18  ;;  %v2748_v35 = vpop.xlane.xlu1 %2747 }
 0x888   : > { %v2749_v62 = vmul.f32 %v2748_v35, %v5294_v59 }
 0x88a   : > { %v2750_v4 = vadd.f32 1e-06, %v2749_v62  ;;  %v5602_v62 = vld [vmem:[%s5045_s30 + $0x70] sm:$0xff] }
 0x88b   : > { %2724 = vmatpush.bf16.msra.mxu0 %v5602_v62 }
 0x88c   : > { %4677 = vrsqrt.f32 %v2750_v4  ;;  %vm2757_vm13 = vweird.f32 %v2750_v4 }
 0x892   : > { %v4678_v11 = vpop.eup %4677 }
 0x893   : > { %v2752_v13 = vmul.f32 %v4678_v11, %v2750_v4  ;;  %vm2758_vm15 = vweird.f32 %v4678_v11 }
 0x894   : > { %vm2759_vm2 = vmor %vm2757_vm13, %vm2758_vm15 }
 0x895   : > { %v2753_v51 = vmul.f32 %v4678_v11, %v2752_v13 }
 0x897   : > { %v2754_v17 = vmul.f32 0.5, %v2753_v51  ;;  %v5622_v51 = vld [vmem:[%s5045_s30 + $0x18] sm:$0xff] }
 0x899   : > { %v2755_v20 = vsub.f32 1.5, %v2754_v17 }
 0x89b   : > { %v2756_v21 = vmul.f32 %v4678_v11, %v2755_v20 }
 0x89d   : > { %v2760_v29 = vsel %vm2759_vm2, %v4678_v11, %v2756_v21  ;;  %v5642_v21 = vld [vmem:[%s5045_s30 + $0x58] sm:$0xff] }
 0x8fa   : > { %v2432_v5 = vpop.xlane.xlu0 %2431 }
 0x8fb   : > { %v2433_v8 = vmul.f32 %v2432_v5, %v5294_v59 }
 0x8fd   : > { %v2434_v9 = vadd.f32 1e-06, %v2433_v8 }
 0x8ff   : > { %4679 = vrsqrt.f32 %v2434_v9  ;;  %vm2441_vm8 = vweird.f32 %v2434_v9 }
 0x905   : > { %v4680_v2 = vpop.eup %4679 }
 0x906   : > { %v2436_v6 = vmul.f32 %v4680_v2, %v2434_v9  ;;  %vm2442_vm7 = vweird.f32 %v4680_v2  ;;  %v5611_v9 = vld [vmem:[%s5045_s30 + $0x20] sm:$0xff] }
 0x907   : > { %vm2443_vm12 = vmor %vm2441_vm8, %vm2442_vm7 }
 0x908   : > { %v2437_v10 = vmul.f32 %v4680_v2, %v2436_v6  ;;  %v5618_v6 = vld [vmem:[%s5045_s30 + $0x68] sm:$0xff] }
 0x909   : > { %2725 = vmatpush.bf16.msra.mxu0 %v5618_v6 }
 0x90a   : > { %v2438_v14 = vmul.f32 0.5, %v2437_v10 }
 0x90c   : > { %v2439_v12 = vsub.f32 1.5, %v2438_v14  ;;  %v5629_v14 = vld [vmem:[%s5045_s30 + $0x60] sm:$0xff] }
 0x90d   : > { %2726 = vmatpush.bf16.msra.mxu0 %v5629_v14 }
 0x90e   : > { %v2440_v18 = vmul.f32 %v4680_v2, %v2439_v12 }
 0x910   : > { %v2444_v23 = vsel %vm2443_vm12, %v4680_v2, %v2440_v18  ;;  %v5634_v18 = vld [vmem:[%s5045_s30 + $0x10] sm:$0xff] }
 0x911   : > { %v2445_v24 = vmul.f32 %v2444_v23, %v5487_v15  ;;  %v2761_v15 = vmul.f32 %v2760_v29, %v5478_v7  ;;  %v5948_v7 = vperm.slane %v5571_v40, 0  ;;  %2727 = vmatpush.bf16.msra.mxu0 %v5642_v21  ;;  %v5649_v29 = vld [vmem:[%s5045_s30 + $0x8] sm:$0xff] }
 0x913   : > { %v2449_v19 = vmul.f32 %v5547_v16, %v2445_v24  ;;  %v2762_v30 = vmul.f32 %v5345_v34, %v2761_v15  ;;  %v5579_v34 = vld [vmem:[%s5045_s30 + $0x30] sm:$0xff] }
 0x914   : > { %2711 = vmatpush.bf16.msra.mxu2 %v5579_v34 }
 0x915   : > { %v2453_v25 = vadd.f32 %v5555_v53, %v2449_v19  ;;  %v2763_v32 = vadd.f32 %v5352_v37, %v2762_v30 }
 0x917   : > { %v2454_v28 = vpack.c.bf16 %v2453_v25, %v2453_v25  ;;  %v2764_v35 = vpack.c.bf16 %v2763_v32, %v2763_v32 }
 0x918   : > { %2712 = vmatpush.bf16.msra.mxu2 %v5595_v60 }
 0x919   : > { %4358 = vmatmul.msk.bf16.vlgmr.msrb.gmra.mxu1 %vm2080_vm6, %v2454_v28  ;;  %4359 = vmatmul.msk.bf16.vlgmr.msra.gmra.mxu3 %vm2080_vm6, %v2454_v28 }
 0x91c   : > { %2713 = vmatpush.bf16.msra.mxu2 %v5611_v9 }
 0x920   : > { %2714 = vmatpush.bf16.msra.mxu2 %v5622_v51 }
 0x924   : > { %2715 = vmatpush.bf16.msra.mxu2 %v5634_v18 }
 0x928   : > { %2716 = vmatpush.bf16.msra.mxu2 %v5649_v29 }
 0x929   : > { %4424 = vmatmul.msk.bf16.vlgmr.msra.gmra.mxu1 %vm2080_vm6, %v2764_v35  ;;  %4425 = vmatmul.msk.bf16.vlgmr.msrb.gmra.mxu3 %vm2080_vm6, %v2764_v35 }
 0x996   : > { %v2512_v37 = vpop.f32.mrf.mxu1 }
 0x997   : > { %v5583_v45 = vadd.f32 %v2512_v37, %v5948_v7 }
 0x999   : > { %v5590_v55 = vmul.f32 0.70710677, %v5583_v45 }
 0x99b   : > { %v5598_v61 = vand.u32 2147483647, %v5590_v55 }
 0x99c   : > { %v2525_v4 = vpop.f32.mrf.mxu3 }
 0x99d   : > { %v2539_v5 = vmul.f32 0.3275911, %v5598_v61  ;;  %v5607_v8 = vadd.f32 %v2525_v4, %v5947_v56 }
 0x99e   : > { %v2514_v11 = vpop.f32.mrf.mxu1 }
 0x99f   : > { %v2541_v13 = vadd.f32 1.0, %v2539_v5  ;;  %v5614_v2 = vmul.f32 0.70710677, %v5607_v8  ;;  %v5665_v5 = vld [vmem:[%s5045_s30] sm:$0xff] }
 0x9a0   : > { %2717 = vmatpush.bf16.msra.mxu2 %v5665_v5 }
 0x9a1   : > { %4681 = vrcp.f32 %v2541_v13  ;;  %v5625_v10 = vand.u32 2147483647, %v5614_v2  ;;  %v2554_v30 = vand.u32 2147483648, %v2541_v13  ;;  %v2552_v35 = vand.u32 2147483647, %v2541_v13 }
 0x9a2   : > { %vm2548_vm7 = vweird.f32 %v2541_v13 }
 0x9a3   : > { %v2540_v17 = vmul.f32 0.3275911, %v5625_v10  ;;  %vm2553_vm12 = vcmp.eq.f32.partialorder %v2552_v35, 8.507059e+37  ;;  %v2592_v40 = vsub.f32 0.0, %v5625_v10 }
 0x9a4   : > { %v2527_v12 = vpop.f32.mrf.mxu3 }
 0x9a5   : > { %v5636_v20 = vadd.f32 1.0, %v2540_v17 }
 0x9a6   : > { %v2777_v23 = vpop.f32.mrf.mxu1 }
 0x9a7   : > { %v4682_v24 = vpop.eup %4681  ;;  %v2778_v19 = vadd.f32 %v2777_v23, %v2036_v42  ;;  %4683 = vrcp.f32 %v5636_v20  ;;  %v5656_v42 = vld [vmem:[%s5045_s30 + $0x50] sm:$0xff]  ;;  %v2555_v23 = vor.u32 1.1754944e-38, %v2554_v30  ;;  %vm2563_vm15 = vweird.f32 %v5636_v20 }
 0x9a8   : > { %v2544_v25 = vmul.f32 %v4682_v24, %v2541_v13  ;;  %vm2549_vm4 = vweird.f32 %v4682_v24  ;;  %2728 = vmatpush.bf16.msra.mxu0 %v5656_v42 }
 0x9a9   : > { %v5645_v28 = vpack.c.bf16 %v2778_v19, %v2778_v19  ;;  %vm2550_vm8 = vmor %vm2548_vm7, %vm2549_vm4  ;;  %vm2533_vm7 = vcmp.ge.f32.partialorder %v5590_v55, 0.0 }
 0x9aa   : > { %v2545_v15 = vsub.f32 1.0, %v2544_v25 }
 0x9ab   : > { %2853 = vrot.lane.b32.xlu1 %v5645_v28, %s4777_s18  ;;  %2855 = vrot.lane.b32.xlu0 %v5645_v28, %s4778_s25 }
 0x9ac   : > { %v2546_v32 = vmul.f32 %v4682_v24, %v2545_v15  ;;  %2796 = vrot.lane.b32.xlu2 %v5645_v28, %s4779_s13  ;;  %v2790_v37 = vpop.f32.mrf.mxu3  ;;  %v5671_v15 = vld [vmem:[%s5045_s30 + $0x48] sm:$0xff]  ;;  %s6044_s13 = scalar_lea.vmem %s5926_s14, %s4972_s21  ;;  %s6052_s21 = sld [smem:[#allocation4_spill]] }
 0x9ad   : > { %v2791_v4 = vadd.f32 %v2790_v37, %v2037_v43  ;;  %v4684_v11 = vpop.eup %4683  ;;  %v2591_v43 = vsub.f32 0.0, %v5598_v61  ;;  %2729 = vmatpush.bf16.msra.mxu0 %v5671_v15 }
 0x9ae   : > { %v2547_v17 = vadd.f32 %v4682_v24, %v2546_v32  ;;  %v2779_v12 = vpop.f32.mrf.mxu1  ;;  %v2559_v19 = vmul.f32 %v4684_v11, %v5636_v20  ;;  %v2569_v32 = vand.u32 2147483648, %v5636_v20  ;;  %vm2564_vm13 = vweird.f32 %v4684_v11 }
 0x9af   : > { %v5668_v25 = vpack.c.bf16 %v2791_v4, %v2791_v4  ;;  %v2567_v12 = vand.u32 2147483647, %v5636_v20  ;;  %vm2565_vm2 = vmor %vm2563_vm15, %vm2564_vm13 }
 0x9b0   : > { %v2551_v56 = vsel %vm2550_vm8, %v4682_v24, %v2547_v17  ;;  %v2560_v37 = vsub.f32 1.0, %v2559_v19  ;;  %v2593_v17 = vmul.f32 %v2591_v43, %v5598_v61  ;;  %v2594_v61 = vmul.f32 %v2592_v40, %v5625_v10 }
 0x9b1   : > { %v2556_v41 = vsel %vm2553_vm12, %v2555_v23, %v2551_v56  ;;  %v2834_v13 = vand.u32 %v5668_v25, %v5371_v50  ;;  %v5683_v56 = vld [vmem:[%s5045_s30 + $0x40] sm:$0xff]  ;;  %vm2568_vm4 = vcmp.eq.f32.partialorder %v2567_v12, 8.507059e+37  ;;  %v4784_v40 = vmov -1.0  }
 0x9b2   : > { %v2573_v30 = vmul.f32 1.0614054, %v2556_v41  ;;  %v2561_v4 = vmul.f32 %v4684_v11, %v2560_v37  ;;  %2730 = vmatpush.bf16.msra.mxu0 %v5683_v56  ;;  %v2570_v37 = vor.u32 1.1754944e-38, %v2569_v32  ;;  %v2595_v53 = vmul.f32 1.442695, %v2593_v17  ;;  %p4437_p8 = scmp.ne.s32.totalorder %s6052_s21, 1 }
 0x9b3   : > { %2843 = vmatpush.bf16.msra.mxu3 %v2834_v13  ;;  %2984 = vrot.lane.b32.xlu1 %v5645_v28, %s4783_s22  ;;  %v2535_v10 = vsel %vm2533_vm7, 1.0, %v4784_v40  ;;  %vm2534_vm8 = vcmp.ge.f32.partialorder %v5614_v2, 0.0  ;;  %s6058_s8 = sld [smem:[#allocation34_spill]] (!%p4437_p8) }
 0x9b4   : > { %v2575_v24 = vadd.f32 -1.4531521, %v2573_v30  ;;  %2920 = vrot.lane.b32.xlu0 %v5645_v28, %s4782_s1  ;;  %2918 = vrot.lane.b32.xlu2 %v5645_v28, %s4780_s24  ;;  %v2792_v35 = vpop.f32.mrf.mxu3  ;;  %v2562_v23 = vadd.f32 %v4684_v11, %v2561_v4  ;;  %4685 = vpow2.f32 %v2595_v53  ;;  %v2597_v4 = vmul.f32 1.442695, %v2594_v61  ;;  %s6060_s29 = sld [smem:[#allocation37_spill]] (!%p4437_p8) }
 0x9b6   : > { %v2577_v19 = vmul.f32 %v2575_v24, %v2556_v41  ;;  %v2566_v13 = vsel %vm2565_vm2, %v4684_v11, %v2562_v23  ;;  %4687 = vpow2.f32 %v2597_v4 }
 0x9b7   : > { %v2571_v7 = vsel %vm2568_vm4, %v2570_v37, %v2566_v13 }
 0x9b8   : > { %v2579_v30 = vadd.f32 1.4214138, %v2577_v19  ;;  %v2574_v16 = vmul.f32 1.0614054, %v2571_v7 }
 0x9b9   : > { %s6059_s0 = scalar_lea.vmem (!%p4437_p8), %s6058_s8, %s6077_s26 }
 0x9ba   : > { %v2581_v59 = vmul.f32 %v2579_v30, %v2556_v41  ;;  %v2576_v35 = vadd.f32 -1.4531521, %v2574_v16  ;;  %v4686_v23 = vpop.eup %4685  ;;  %v2529_v30 = vmul.f32 0.5, %v5583_v45  ;;  %s6061_s17 = scalar_lea.vmem (!%p4437_p8), %s6060_s29, %s6077_s26 }
 0x9bc   : > { %v2583_v0 = vadd.f32 -0.28449672, %v2581_v59  ;;  %2982 = vrot.lane.b32.xlu0 %v5645_v28, %s4781_s4  ;;  %v2578_v20 = vmul.f32 %v2576_v35, %v2571_v7 }
 0x9be   : > { %v2585_v43 = vmul.f32 %v2583_v0, %v2556_v41  ;;  %v2580_v32 = vadd.f32 1.4214138, %v2578_v20  ;;  %v4688_v0 = vpop.eup %4687 }
 0x9c0   : > { %v2587_v11 = vadd.f32 0.2548296, %v2585_v43  ;;  %v2582_v12 = vmul.f32 %v2580_v32, %v2571_v7  ;;  %v2536_v43 = vsel %vm2534_vm8, 1.0, %v4784_v40 }
 0x9c2   : > { %v2589_v24 = vmul.f32 %v2587_v11, %v2556_v41  ;;  %v2584_v19 = vadd.f32 -0.28449672, %v2582_v12  ;;  %v2530_v11 = vmul.f32 0.5, %v5607_v8 }
 0x9c4   : > { %v2599_v17 = vmul.f32 %v4686_v23, %v2589_v24  ;;  %v2586_v59 = vmul.f32 %v2584_v19, %v2571_v7 }
 0x9c6   : > { %v2601_v16 = vsub.f32 1.0, %v2599_v17  ;;  %v2588_v37 = vadd.f32 0.2548296, %v2586_v59 }
 0x9c8   : > { %v2603_v53 = vmul.f32 %v2601_v16, %v2535_v10  ;;  %v2590_v13 = vmul.f32 %v2588_v37, %v2571_v7 }
 0x9ca   : > { %v2605_v35 = vadd.f32 1.0, %v2603_v53  ;;  %v2600_v41 = vmul.f32 %v4688_v0, %v2590_v13 }
 0x9cc   : > { %v2607_v61 = vmul.f32 %v2605_v35, %v2529_v30  ;;  %v2602_v20 = vsub.f32 1.0, %v2600_v41 }
 0x9ce   : > { %v2609_v55 = vpack.c.bf16 %v2607_v61, %v2607_v61  ;;  %v2604_v32 = vmul.f32 %v2602_v20, %v2536_v43 }
 0x9d0   : > { %2718 = vmatmul.bf16.vlgmr.msra.gmra.mxu2 %v2609_v55  ;;  %v2606_v4 = vadd.f32 1.0, %v2604_v32 }
 0x9d2   : > { %v2608_v12 = vmul.f32 %v2606_v4, %v2530_v11 }
 0x9d4   : > { %v2610_v24 = vpack.c.bf16 %v2608_v12, %v2608_v12 }
 0x9d6   : > { %2731 = vmatmul.bf16.vlgmr.msra.gmra.mxu0 %v2610_v24 }
 0xa06   : > { %v2797_v7 = vpop.permute.xlu2 %2796 }
 0xa07   : > { %v2802_v45 = vsel %vm2114_vm9, %v2797_v7, 0 }
 0xa08   : > { %2811 = vmatpush.bf16.xpose.msrb.mxu1 %v2802_v45 }
 0xa0f   : > { %4426 = vmatmul.msk.bf16.vlgmr.msrb.gmra.mxu1 %vm2114_vm9, %v5645_v28  ;;  %v2919_v28 = vpop.permute.xlu2 %2918 }
 0xa1d   : > { %v2854_v2 = vpop.permute.xlu1 %2853  ;;  %v2856_v23 = vpop.permute.xlu0 %2855 }
 0xa1e   : > { %v2861_v19 = vsel %vm2114_vm9, %v2856_v23, 0 }
 0xa1f   : > { %2870 = vmatpush.bf16.xpose.msrb.mxu2 %v2861_v19 }
 0xa25   : > { %v2985_v17 = vpop.permute.xlu1 %2984 }
 0xa26   : > { %v2990_v59 = vsel %vm2114_vm9, %v2985_v17, 0  ;;  %v2921_v8 = vpop.permute.xlu0 %2920  ;;  %4428 = vmatmul.msk.bf16.vlgmr.msrb.gmra.mxu2 %vm2114_vm9, %v2854_v2 }
 0xa27   : > { %v2926_v16 = vsel %vm2114_vm9, %v2921_v8, 0  ;;  %2999 = vmatpush.bf16.xpose.msra.mxu2 %v2990_v59 }
 0xa28   : > { %2935 = vmatpush.bf16.xpose.msra.mxu1 %v2926_v16 }
 0xa2e   : > { %v2983_v10 = vpop.permute.xlu0 %2982 }
 0xa2f   : > { %3110 = vmatpush.bf16.msrb.mxu2 %v5498_v27  ;;  %4430 = vmatmul.msk.bf16.vlgmr.msra.gmra.mxu1 %vm2114_vm9, %v2919_v28 }
 0xa30   : > { %3054 = vmatpush.bf16.msrb.mxu1 %v5424_v36  ;;  %v5731_v36 = vld [vmem:[%s6044_s13] ss:$0 sm:$0xff] }
 0xa33   : > { %3111 = vmatpush.bf16.msrb.mxu2 %v5508_v33 }
 0xa34   : > { %3055 = vmatpush.bf16.msrb.mxu1 %v5428_v38 }
 0xa36   : > { %4432 = vmatmul.msk.bf16.vlgmr.msra.gmra.mxu2 %vm2114_vm9, %v2983_v10 }
 0xa37   : > { %3112 = vmatpush.bf16.msrb.mxu2 %v5520_v58 }
 0xa38   : > { %3056 = vmatpush.bf16.msrb.mxu1 %v5439_v46 }
 0xa3b   : > { %3113 = vmatpush.bf16.msrb.mxu2 %v5529_v1 }
 0xa3c   : > { %3057 = vmatpush.bf16.msrb.mxu1 %v5443_v47 }
 0xa40   : > { %3214 = vmatpush.bf16.msra.mxu1 %v5587_v54 }
 0xa44   : > { %3215 = vmatpush.bf16.msra.mxu1 %v5602_v62 }
 0xa48   : > { %3216 = vmatpush.bf16.msra.mxu1 %v5618_v6 }
 0xa4c   : > { %3217 = vmatpush.bf16.msra.mxu1 %v5629_v14 }
 0xa50   : > { %3218 = vmatpush.bf16.msra.mxu1 %v5642_v21 }
 0xa53   : > { %v2719_v38 = vpop.f32.mrf.mxu2  ;;  %v2732_v47 = vpop.f32.mrf.mxu0 }
 0xa54   : > { %3219 = vmatpush.bf16.msra.mxu1 %v5656_v42  ;;  %v2720_v46 = vadd.f32 %v5731_v36, %v2719_v38 }
 0xa56   : > { %v2733_v27 = vadd.f32 %v2732_v47, %v2720_v46 }
 0xa58   : > { %3220 = vmatpush.bf16.msra.mxu1 %v5671_v15  ;;  %v2736_v33 = vadd.f32 %v2733_v27, %v5475_v3 }
 0xa5a   : > { %2737 = vst.msk [vmem:[#allocation2] sm:$0x1f] %vm1996_vm1, %v2736_v33 }
 0xa5b   : > { %v2721_v58 = vpop.f32.mrf.mxu2  ;;  %v2734_v1 = vpop.f32.mrf.mxu0 }
 0xa5c   : > { %3221 = vmatpush.bf16.msra.mxu1 %v5683_v56 }
 0xa8c   : > { %v2813_v54 = vpop.f32.mrf.mxu1 }
 0xa8d   : > { %v2817_v62 = vsel %vm2134_vm10, %v2813_v54, -inf }
 0xa8e   : > { %2818 = vmax.xlane.f32.xlu2 %v2817_v62 }
 0xa94   : > { %v2815_v6 = vpop.f32.mrf.mxu1 }
 0xaa9   : > { %v2872_v14 = vpop.f32.mrf.mxu2 }
 0xaaa   : > { %v2876_v21 = vsel %vm2134_vm10, %v2872_v14, -inf }
 0xaab   : > { %2877 = vmax.xlane.f32.xlu1 %v2876_v21 }
 0xaac   : > { %v2937_v42 = vpop.f32.mrf.mxu1 }
 0xaad   : > { %v2941_v15 = vsel %vm2134_vm10, %v2937_v42, -inf }
 0xaae   : > { %2942 = vmax.xlane.f32.xlu0 %v2941_v15 }
 0xab1   : > { %v2874_v56 = vpop.f32.mrf.mxu2 }
 0xab4   : > { %v2939_v37 = vpop.f32.mrf.mxu1 }
 0xab9   : > { %v3001_v3 = vpop.f32.mrf.mxu2 }
 0xaba   : > { %v3005_v53 = vsel %vm2134_vm10, %v3001_v3, -inf }
 0xabb   : > { %3006 = vmax.xlane.f32.xlu2 %v3005_v53 }
 0xac1   : > { %v3003_v13 = vpop.f32.mrf.mxu2 }
 0xb01   : > { %v2819_v0 = vpop.xlane.xlu2 %2818 }
 0xb02   : > { %v2820_v30 = vsub.f32 %v2813_v54, %v2819_v0 }
 0xb04   : > { %v2821_v35 = vmul.f32 1.442695, %v2820_v30 }
 0xb06   : > { %4689 = vpow2.f32 %v2821_v35 }
 0xb0c   : > { %v4690_v41 = vpop.eup %4689 }
 0xb0d   : > { %v2823_v61 = vsel %vm2134_vm10, %v4690_v41, 0.0 }
 0xb0e   : > { %2824 = vadd.xlane.f32.xlu1 %v2823_v61 }
 0xb1e   : > { %v2878_v20 = vpop.xlane.xlu1 %2877 }
 0xb1f   : > { %v2879_v55 = vsub.f32 %v2872_v14, %v2878_v20 }
 0xb21   : > { %v2880_v43 = vmul.f32 1.442695, %v2879_v55  ;;  %v2943_v32 = vpop.xlane.xlu0 %2942 }
 0xb22   : > { %v2944_v11 = vsub.f32 %v2937_v42, %v2943_v32 }
 0xb23   : > { %4691 = vpow2.f32 %v2880_v43 }
 0xb24   : > { %v2945_v4 = vmul.f32 1.442695, %v2944_v11  ;;  %v6045_v11 = vld [vmem:[#allocation17_spill] sm:$0xff] }
 0xb26   : > { %4693 = vpow2.f32 %v2945_v4 }
 0xb27   : > { %2889 = vrot.lane.b32.xlu1 %v5668_v25, %s4777_s18  ;;  %s6053_s18 = sld [smem:[#allocation15_spill]] (!%p4437_p8) }
 0xb29   : > { %v4692_v12 = vpop.eup %4691 }
 0xb2a   : > { %v2882_v24 = vsel %vm2134_vm10, %v4692_v12, 0.0 }
 0xb2b   : > { %2883 = vadd.xlane.f32.xlu0 %v2882_v24 }
 0xb2c   : > { %v4694_v7 = vpop.eup %4693 }
 0xb2d   : > { %v2947_v45 = vsel %vm2134_vm10, %v4694_v7, 0.0 }
 0xb2e   : > { %2948 = vadd.xlane.f32.xlu2 %v2947_v45  ;;  %v3007_v2 = vpop.xlane.xlu2 %3006 }
 0xb2f   : > { %v3008_v23 = vsub.f32 %v3001_v3, %v3007_v2 }
 0xb31   : > { %v3009_v19 = vmul.f32 1.442695, %v3008_v23 }
 0xb33   : > { %4695 = vpow2.f32 %v3009_v19 }
 0xb39   : > { %v4696_v17 = vpop.eup %4695 }
 0xb3a   : > { %v3011_v59 = vsel %vm2134_vm10, %v4696_v17, 0.0 }
 0xb3b   : > { %3012 = vadd.xlane.f32.xlu2 %v3011_v59 }
 0xb3f   : > { %2953 = vrot.lane.b32.xlu0 %v5668_v25, %s4780_s24 }
 0xb53   : > { %3017 = vrot.lane.b32.xlu2 %v5668_v25, %s4781_s4 }
 0xb81   : > { %v2825_v8 = vpop.xlane.xlu1 %2824 }
 0xb82   : > { %4697 = vrcp.f32 %v2825_v8 }
 0xb88   : > { %v4698_v16 = vpop.eup %4697 }
 0xb89   : > { %v2827_v28 = vmul.f32 %v4698_v16, %v4690_v41 }
 0xb8b   : > { %v2828_v10 = vpack.c.bf16 %v2827_v28, %v2827_v28 }
 0xb8d   : > { %4427 = vmatmul.msk.bf16.vlgmr.msra.gmra.mxu3 %vm2148_vm11, %v2828_v10 }
 0xb99   : > { %v2890_v38 = vpop.permute.xlu1 %2889 }
 0xb9a   : > { %v2895_v46 = vand.u32 %v2890_v38, %v5371_v50 }
 0xb9c   : > { %2904 = vmatpush.bf16.msrb.mxu0 %v2895_v46 }
 0xb9e   : > { %v2884_v47 = vpop.xlane.xlu0 %2883 }
 0xb9f   : > { %4699 = vrcp.f32 %v2884_v47 }
 0xba1   : > { %v2949_v33 = vpop.xlane.xlu2 %2948 }
 0xba2   : > { %4701 = vrcp.f32 %v2949_v33 }
 0xba5   : > { %v4700_v27 = vpop.eup %4699 }
 0xba6   : > { %v2886_v58 = vmul.f32 %v4700_v27, %v4692_v12  ;;  %v6047_v27 = vld [vmem:[#allocation18_spill] sm:$0xff] }
 0xba8   : > { %v2887_v1 = vpack.c.bf16 %v2886_v58, %v2886_v58  ;;  %v4702_v25 = vpop.eup %4701  ;;  %v6048_v58 = vld [vmem:[#allocation19_spill] sm:$0xff] }
 0xba9   : > { %v2951_v62 = vmul.f32 %v4702_v25, %v4694_v7  ;;  %v6046_v7 = vld [vmem:[#allocation16_spill] sm:$0xff] }
 0xbaa   : > { %4429 = vmatmul.msk.bf16.vlgmr.msrb.gmra.mxu0 %vm2148_vm11, %v2887_v1 }
 0xbab   : > { %v2952_v42 = vpack.c.bf16 %v2951_v62, %v2951_v62 }
 0xbae   : > { %v3013_v54 = vpop.xlane.xlu2 %3012 }
 0xbaf   : > { %4703 = vrcp.f32 %v3013_v54 }
 0xbb1   : > { %v2954_v6 = vpop.permute.xlu0 %2953 }
 0xbb2   : > { %v2959_v14 = vand.u32 %v2954_v6, %v5371_v50  ;;  %v6049_v6 = vld [vmem:[#allocation20_spill] sm:$0xff] }
 0xbb4   : > { %2968 = vmatpush.bf16.msrb.mxu3 %v2959_v14  ;;  %v6050_v14 = vperm.slane %v6049_v6, 0 }
 0xbb5   : > { %v4704_v21 = vpop.eup %4703 }
 0xbb6   : > { %v3015_v15 = vmul.f32 %v4704_v21, %v4696_v17  ;;  %v3018_v56 = vpop.permute.xlu2 %3017 }
 0xbb7   : > { %v3023_v37 = vand.u32 %v3018_v56, %v5371_v50  ;;  %4431 = vmatmul.msk.bf16.vlgmr.msrb.gmra.mxu3 %vm2148_vm11, %v2952_v42  ;;  %v6051_v42 = vperm.slane %v6049_v6, 1 }
 0xbb8   : > { %3097 = vmatpush.bf16.msra.mxu3 %v5495_v22  ;;  %v3016_v3 = vpack.c.bf16 %v3015_v15, %v3015_v15 }
 0xbb9   : > { %3032 = vmatpush.bf16.msra.mxu0 %v3023_v37 }
 0xbbc   : > { %3098 = vmatpush.bf16.msra.mxu3 %v5505_v31  ;;  %4433 = vmatmul.msk.bf16.vlgmr.msra.gmra.mxu0 %vm2148_vm11, %v3016_v3  ;;  %v2850_v31 = vld [vmem:[#allocation3] sm:$0x7] }
 0xbbd   : > { %3201 = vmatpush.bf16.msrb.mxu0 %v5574_v44 }
 0xbc0   : > { %3099 = vmatpush.bf16.msra.mxu3 %v5515_v49 }
 0xbc1   : > { %3202 = vmatpush.bf16.msrb.mxu0 %v5579_v34 }
 0xbc4   : > { %3100 = vmatpush.bf16.msra.mxu3 %v5526_v63 }
 0xbc5   : > { %3203 = vmatpush.bf16.msrb.mxu0 %v5595_v60 }
 0xbc9   : > { %3204 = vmatpush.bf16.msrb.mxu0 %v5611_v9 }
 0xbcd   : > { %3205 = vmatpush.bf16.msrb.mxu0 %v5622_v51 }
 0xbd1   : > { %3206 = vmatpush.bf16.msrb.mxu0 %v5634_v18 }
 0xbd5   : > { %3207 = vmatpush.bf16.msrb.mxu0 %v5649_v29 }
 0xbd9   : > { %3208 = vmatpush.bf16.msrb.mxu0 %v5665_v5 }
 0xc10   : > { %v2845_v50 = vpop.f32.mrf.mxu3 }
 0xc11   : > { %v2849_v22 = vpack.c.bf16 %v2845_v50, %v2845_v50 }
 0xc13   : > { %v2851_v49 = vsel %vm5396_vm14, %v2849_v22, %v2850_v31 }
 0xc14   : > { %2852 = vst [vmem:[#allocation3] sm:$0x7] %v2851_v49 }
 0xc18   : > { %v2847_v63 = vpop.f32.mrf.mxu3 }
 0xc1b   : > { %v2915_v13 = vld [vmem:[#allocation3] sm:$0x7] }
 0xc27   : > { %v2906_v44 = vpop.f32.mrf.mxu0 }
 0xc28   : > { %v2910_v34 = vpack.c.bf16 %v2906_v44, %v2906_v44 }
 0xc2a   : > { %2912 = vrot.lane.b32.xlu0 %v2910_v34, %s4783_s22 }
 0xc2f   : > { %v2908_v60 = vpop.f32.mrf.mxu0 }
 0xc39   : > { %v3034_v9 = vpop.f32.mrf.mxu0 }
 0xc3a   : > { %v3038_v51 = vpack.c.bf16 %v3034_v9, %v3034_v9  ;;  %v2970_v18 = vpop.f32.mrf.mxu3 }
 0xc3b   : > { %v2974_v53 = vpack.c.bf16 %v2970_v18, %v2970_v18 }
 0xc3c   : > { %3040 = vrot.lane.b32.xlu0 %v3038_v51, %s4778_s25  ;;  %s6054_s25 = sld [smem:[#allocation14_spill]] (!%p4437_p8) }
 0xc3d   : > { %2976 = vrot.lane.b32.xlu1 %v2974_v53, %s4782_s1  ;;  %s6056_s1 = sld [smem:[#allocation33_spill]] (!%p4437_p8) }
 0xc41   : > { %v3036_v29 = vpop.f32.mrf.mxu0 }
 0xc42   : > { %v2972_v5 = vpop.f32.mrf.mxu3 }
 0xc43   : > { %s6057_s22 = scalar_lea.vmem (!%p4437_p8), %s6056_s1, %s6077_s26 }
 0xc9c   : > { %v2913_v26 = vpop.permute.xlu0 %2912 }
 0xc9d   : > { %v2916_v0 = vsel %vm5432_vm0, %v2913_v26, %v2915_v13 }
 0xc9e   : > { %2917 = vst [vmem:[#allocation3] sm:$0x7] %v2916_v0 }
 0xca5   : > { %v2979_v30 = vld [vmem:[#allocation3] sm:$0x7] }
 0xcae   : > { %v3041_v61 = vpop.permute.xlu0 %3040 }
 0xcaf   : > { %v2977_v35 = vpop.permute.xlu1 %2976 }
 0xcb0   : > { %v2980_v41 = vsel %vm5451_vm3, %v2977_v35, %v2979_v30 }
 0xcb1   : > { %2981 = vst [vmem:[#allocation3] sm:$0x7] %v2980_v41 }
 0xcb8   : > { %v3043_v20 = vld [vmem:[#allocation3] sm:$0x7] }
 0xcb9   : > { %v3044_v55 = vsel %vm5458_vm5, %v3041_v61, %v3043_v20 }
 0xcba   : > { %3045 = vst [vmem:[#allocation3] sm:$0x7] %v3044_v55 }
 0xcc1   : > { %v3046_v43 = vld [vmem:[#allocation3] sm:$0x7] }
 0xcc2   : > { %4434 = vmatmul.msk.bf16.vlgmr.msrb.gmra.mxu1 %vm2080_vm6, %v3046_v43 }
 0xd3f   : > { %v3059_v32 = vpop.f32.mrf.mxu1 }
 0xd40   : > { %v3063_v39 = vadd.f32 %v3059_v32, %v5446_v48 }
 0xd42   : > { %v5784_v4 = vadd.f32 %v6045_v11, %v3063_v39 }
 0xd44   : > { %v3065_v52 = vsel %vm1996_vm1, %v5784_v4, 0.0 }
 0xd45   : > { %3066 = vadd.xlane.f32.xlu1 %v3065_v52 }
 0xd47   : > { %v3061_v12 = vpop.f32.mrf.mxu1 }
 0xdb8   : > { %v3067_v24 = vpop.xlane.xlu1 %3066 }
 0xdb9   : > { %v3068_v45 = vmul.f32 %v3067_v24, %v6046_v7 }
 0xdbb   : > { %v3069_v57 = vsub.f32 %v5784_v4, %v3068_v45 }
 0xdbd   : > { %v3070_v2 = vmul.f32 %v3069_v57, %v3069_v57 }
 0xdbf   : > { %v3071_v23 = vsel %vm1996_vm1, %v3070_v2, 0.0 }
 0xdc0   : > { %3072 = vadd.xlane.f32.xlu2 %v3071_v23 }
 0xe33   : > { %v3073_v19 = vpop.xlane.xlu2 %3072 }
 0xe34   : > { %v3074_v48 = vmul.f32 %v3073_v19, %v6046_v7 }
 0xe36   : > { %v3075_v17 = vadd.f32 1e-06, %v3074_v48 }
 0xe38   : > { %4705 = vrsqrt.f32 %v3075_v17  ;;  %vm3082_vm10 = vweird.f32 %v3075_v17 }
 0xe3e   : > { %v4706_v59 = vpop.eup %4705 }
 0xe3f   : > { %v3077_v8 = vmul.f32 %v4706_v59, %v3075_v17  ;;  %vm3083_vm9 = vweird.f32 %v4706_v59 }
 0xe40   : > { %vm3084_vm11 = vmor %vm3082_vm10, %vm3083_vm9 }
 0xe41   : > { %v3078_v16 = vmul.f32 %v4706_v59, %v3077_v8 }
 0xe43   : > { %v3079_v28 = vmul.f32 0.5, %v3078_v16 }
 0xe45   : > { %v3080_v10 = vsub.f32 1.5, %v3079_v28 }
 0xe47   : > { %v3081_v38 = vmul.f32 %v4706_v59, %v3080_v10 }
 0xe49   : > { %v3085_v46 = vsel %vm3084_vm11, %v4706_v59, %v3081_v38 }
 0xe4a   : > { %v3086_v47 = vmul.f32 %v3085_v46, %v3069_v57 }
 0xe4c   : > { %v3087_v33 = vmul.f32 %v6047_v27, %v3086_v47 }
 0xe4e   : > { %v3088_v1 = vadd.f32 %v6048_v58, %v3087_v33 }
 0xe50   : > { %v3089_v25 = vpack.c.bf16 %v3088_v1, %v3088_v1 }
 0xe52   : > { %4435 = vmatmul.msk.bf16.vlgmr.msra.gmra.mxu3 %vm2080_vm6, %v3089_v25  ;;  %4436 = vmatmul.msk.bf16.vlgmr.msrb.gmra.mxu2 %vm2080_vm6, %v3089_v25 }
 0xed5   : > { %v3102_v54 = vpop.f32.mrf.mxu3  ;;  %v3115_v62 = vpop.f32.mrf.mxu2 }
 0xed6   : > { %v5798_v21 = vadd.f32 %v3102_v54, %v6050_v14  ;;  %v5802_v15 = vadd.f32 %v3115_v62, %v6051_v42 }
 0xed8   : > { %v5805_v56 = vmul.f32 0.70710677, %v5798_v21  ;;  %v5808_v37 = vmul.f32 0.70710677, %v5802_v15 }
 0xeda   : > { %v3127_v3 = vand.u32 2147483647, %v5805_v56  ;;  %v3128_v50 = vand.u32 2147483647, %v5808_v37  ;;  %vm3123_vm4 = vcmp.ge.f32.partialorder %v5805_v56, 0.0  ;;  %vm3124_vm7 = vcmp.ge.f32.partialorder %v5808_v37, 0.0 }
 0xedc   : > { %v3129_v22 = vmul.f32 0.3275911, %v3127_v3  ;;  %v3130_v31 = vmul.f32 0.3275911, %v3128_v50  ;;  %v3181_v39 = vsub.f32 0.0, %v3127_v3  ;;  %v3182_v24 = vsub.f32 0.0, %v3128_v50 }
 0xedd   : > { %v3104_v49 = vpop.f32.mrf.mxu3  ;;  %v3117_v63 = vpop.f32.mrf.mxu2 }
 0xede   : > { %v3131_v44 = vadd.f32 1.0, %v3129_v22  ;;  %v3132_v34 = vadd.f32 1.0, %v3130_v31  ;;  %v3183_v57 = vmul.f32 %v3181_v39, %v3127_v3  ;;  %v3184_v19 = vmul.f32 %v3182_v24, %v3128_v50 }
 0xedf   : > { %v3125_v3 = vsel %vm3123_vm4, 1.0, %v4784_v40  ;;  %v3126_v31 = vsel %vm3124_vm7, 1.0, %v4784_v40  ;;  %v3119_v63 = vmul.f32 0.5, %v5798_v21 }
 0xee0   : > { %4707 = vrcp.f32 %v3131_v44  ;;  %v3144_v29 = vand.u32 2147483648, %v3131_v44  ;;  %v3142_v26 = vand.u32 2147483647, %v3131_v44  ;;  %v3159_v0 = vand.u32 2147483648, %v3132_v34 }
 0xee1   : > { %4709 = vrcp.f32 %v3132_v34  ;;  %v3157_v35 = vand.u32 2147483647, %v3132_v34  ;;  %vm3138_vm3 = vweird.f32 %v3131_v44  ;;  %vm3153_vm12 = vweird.f32 %v3132_v34 }
 0xee2   : > { %v3145_v61 = vor.u32 1.1754944e-38, %v3144_v29  ;;  %vm3143_vm13 = vcmp.eq.f32.partialorder %v3142_v26, 8.507059e+37  ;;  %v3160_v43 = vor.u32 1.1754944e-38, %v3159_v0  ;;  %v3185_v59 = vmul.f32 1.442695, %v3183_v57 }
 0xee3   : > { %vm3158_vm2 = vcmp.eq.f32.partialorder %v3157_v35, 8.507059e+37  ;;  %v3187_v28 = vmul.f32 1.442695, %v3184_v19 }
 0xee4   : > { %4711 = vpow2.f32 %v3185_v59 }
 0xee5   : > { %4713 = vpow2.f32 %v3187_v28 }
 0xee6   : > { %v4708_v60 = vpop.eup %4707 }
 0xee7   : > { %v4710_v9 = vpop.eup %4709  ;;  %v3134_v51 = vmul.f32 %v4708_v60, %v3131_v44  ;;  %vm3139_vm14 = vweird.f32 %v4708_v60 }
 0xee8   : > { %v3149_v18 = vmul.f32 %v4710_v9, %v3132_v34  ;;  %vm3154_vm0 = vweird.f32 %v4710_v9  ;;  %vm3140_vm5 = vmor %vm3138_vm3, %vm3139_vm14  ;;  %v3120_v34 = vmul.f32 0.5, %v5802_v15 }
 0xee9   : > { %v3135_v53 = vsub.f32 1.0, %v3134_v51  ;;  %vm3155_vm15 = vmor %vm3153_vm12, %vm3154_vm0 }
 0xeea   : > { %v3150_v5 = vsub.f32 1.0, %v3149_v18  ;;  %v4712_v25 = vpop.eup %4711 }
 0xeeb   : > { %v3136_v13 = vmul.f32 %v4708_v60, %v3135_v53  ;;  %v4714_v62 = vpop.eup %4713 }
 0xeec   : > { %v3151_v30 = vmul.f32 %v4710_v9, %v3150_v5 }
 0xeed   : > { %v3137_v41 = vadd.f32 %v4708_v60, %v3136_v13 }
 0xeee   : > { %v3152_v20 = vadd.f32 %v4710_v9, %v3151_v30 }
 0xeef   : > { %v3141_v55 = vsel %vm3140_vm5, %v4708_v60, %v3137_v41 }
 0xef0   : > { %v3146_v32 = vsel %vm3143_vm13, %v3145_v61, %v3141_v55  ;;  %v3156_v11 = vsel %vm3155_vm15, %v4710_v9, %v3152_v20 }
 0xef1   : > { %v3163_v52 = vmul.f32 1.0614054, %v3146_v32  ;;  %v3161_v12 = vsel %vm3158_vm2, %v3160_v43, %v3156_v11 }
 0xef2   : > { %v3164_v7 = vmul.f32 1.0614054, %v3161_v12 }
 0xef3   : > { %v3165_v45 = vadd.f32 -1.4531521, %v3163_v52 }
 0xef4   : > { %v3166_v2 = vadd.f32 -1.4531521, %v3164_v7 }
 0xef5   : > { %v3167_v23 = vmul.f32 %v3165_v45, %v3146_v32 }
 0xef6   : > { %v3168_v48 = vmul.f32 %v3166_v2, %v3161_v12 }
 0xef7   : > { %v3169_v17 = vadd.f32 1.4214138, %v3167_v23 }
 0xef8   : > { %v3170_v8 = vadd.f32 1.4214138, %v3168_v48 }
 0xef9   : > { %v3171_v16 = vmul.f32 %v3169_v17, %v3146_v32 }
 0xefa   : > { %v3172_v10 = vmul.f32 %v3170_v8, %v3161_v12 }
 0xefb   : > { %v3173_v38 = vadd.f32 -0.28449672, %v3171_v16 }
 0xefc   : > { %v3174_v46 = vadd.f32 -0.28449672, %v3172_v10 }
 0xefd   : > { %v3175_v47 = vmul.f32 %v3173_v38, %v3146_v32 }
 0xefe   : > { %v3176_v27 = vmul.f32 %v3174_v46, %v3161_v12 }
 0xeff   : > { %v3177_v33 = vadd.f32 0.2548296, %v3175_v47 }
 0xf00   : > { %v3178_v58 = vadd.f32 0.2548296, %v3176_v27 }
 0xf01   : > { %v3179_v1 = vmul.f32 %v3177_v33, %v3146_v32 }
 0xf02   : > { %v3180_v54 = vmul.f32 %v3178_v58, %v3161_v12 }
 0xf03   : > { %v3189_v6 = vmul.f32 %v4712_v25, %v3179_v1 }
 0xf04   : > { %v3190_v14 = vmul.f32 %v4714_v62, %v3180_v54 }
 0xf05   : > { %v3191_v42 = vsub.f32 1.0, %v3189_v6 }
 0xf06   : > { %v3192_v50 = vsub.f32 1.0, %v3190_v14 }
 0xf07   : > { %v3193_v22 = vmul.f32 %v3191_v42, %v3125_v3 }
 0xf08   : > { %v3194_v49 = vmul.f32 %v3192_v50, %v3126_v31 }
 0xf09   : > { %v3195_v44 = vadd.f32 1.0, %v3193_v22 }
 0xf0a   : > { %v3196_v60 = vadd.f32 1.0, %v3194_v49 }
 0xf0b   : > { %v3197_v9 = vmul.f32 %v3195_v44, %v3119_v63 }
 0xf0c   : > { %v3198_v56 = vmul.f32 %v3196_v60, %v3120_v34 }
 0xf0d   : > { %v3199_v51 = vpack.c.bf16 %v3197_v9, %v3197_v9 }
 0xf0e   : > { %v3200_v18 = vpack.c.bf16 %v3198_v56, %v3198_v56 }
 0xf0f   : > { %3209 = vmatmul.bf16.vlgmr.msrb.gmra.mxu0 %v3199_v51 }
 0xf10   : > { %3222 = vmatmul.bf16.vlgmr.msra.gmra.mxu1 %v3200_v18 }
 0xf8c   : > { %v3210_v37 = vpop.f32.mrf.mxu0 }
 0xf8d   : > { %v3211_v53 = vadd.f32 %v5731_v36, %v3210_v37  ;;  %v3223_v29 = vpop.f32.mrf.mxu1 }
 0xf8f   : > { %v3224_v5 = vadd.f32 %v3223_v29, %v3211_v53 }
 0xf91   : > { %v3227_v40 = vadd.f32 %v3224_v5, %v5784_v4  ;;  %3232 = sbr.rel (%p4437_p8) target bundleno = 4821 (0x12d5), region = 124 }
 0xf93   : > { %3228 = vst.msk [vmem:[#allocation2 + $0x8] sm:$0x1f] %vm1996_vm1, %v3227_v40 }
 0xf94   : > { %v3212_v21 = vpop.f32.mrf.mxu0 }
 0xf95   : > { %v3225_v13 = vpop.f32.mrf.mxu1 }
 0xf96   : > { %v3268_v15 = vld [vmem:[#allocation2] sm:$0x1f]  ;;  %v6055_v35 = vld [vmem:[#allocation16_spill] sm:$0xff]  ;;  %v4590_v45 = vld [vmem:[%s6053_s18 + $0x8] sm:$0xff]  ;;  %vm3385_vm3 = vcmask 258048  }
 0xf97   : > { %v3269_v26 = vsel %vm1996_vm1, %v3268_v15, 0.0  ;;  %v4592_v52 = vld [vmem:[%s6053_s18 + $0x18] sm:$0xff]  ;;  %v4591_v24 = vld [vmem:[%s6053_s18 + $0x10] sm:$0xff]  ;;  %v4586_v57 = vld [vmem:[%s6054_s25 + $0x8] sm:$0xff] }
 0xf98   : > { %3270 = vadd.xlane.f32.xlu0 %v3269_v26  ;;  %v4588_v12 = vld [vmem:[%s6054_s25 + $0x18] sm:$0xff]  ;;  %3334 = vmatpush.bf16.msra.mxu0 %v4592_v52  ;;  %v4587_v7 = vld [vmem:[%s6054_s25 + $0x10] sm:$0xff]  ;;  %v4589_v2 = vld [vmem:[%s6053_s18] sm:$0xff] }
 0xf99   : > { %3371 = vmatpush.bf16.msra.mxu1 %v4588_v12  ;;  %3506 = vmatpush.bf16.msra.mxu3 %v4592_v52  ;;  %v4585_v23 = vld [vmem:[%s6054_s25] sm:$0xff] }
 0xf9a   : > { %v3473_v0 = vld [vmem:[#allocation2 + $0x8] sm:$0x1f]  ;;  %v4717_v1 = vld [vmem:[%s6057_s22] ss:$0 sm:$0xff] }
 0xf9b   : > { %v3474_v36 = vsel %vm1996_vm1, %v3473_v0, 0.0  ;;  %v4718_v6 = vld [vmem:[%s6059_s0] ss:$0 sm:$0xff] }
 0xf9c   : > { %3335 = vmatpush.bf16.msra.mxu0 %v4591_v24  ;;  %v4719_v9 = vld [vmem:[%s6061_s17] ss:$0 sm:$0xff] }
 0xf9d   : > { %3372 = vmatpush.bf16.msra.mxu1 %v4587_v7  ;;  %3507 = vmatpush.bf16.msra.mxu3 %v4591_v24  ;;  %v4720_v53 = vld [vmem:[%s1311_s23] ss:$0 sm:$0xff] }
 0xfa0   : > { %3475 = vadd.xlane.f32.xlu0 %v3474_v36  ;;  %3336 = vmatpush.bf16.msra.mxu0 %v4590_v45 }
 0xfa1   : > { %3373 = vmatpush.bf16.msra.mxu1 %v4586_v57  ;;  %3508 = vmatpush.bf16.msra.mxu3 %v4590_v45  ;;  %v4595_v45 = vld [vmem:[%s5075_s15 + $0x10] sm:$0xff] }
 0xfa4   : > { %3337 = vmatpush.bf16.msra.mxu0 %v4589_v2 }
 0xfa5   : > { %3374 = vmatpush.bf16.msra.mxu1 %v4585_v23  ;;  %3509 = vmatpush.bf16.msra.mxu3 %v4589_v2  ;;  %v4594_v2 = vld [vmem:[%s5075_s15 + $0x8] sm:$0xff] }
 0xfa8   : > { %3519 = vmatpush.bf16.msrb.mxu0 %v4588_v12  ;;  %v4596_v12 = vld [vmem:[%s5075_s15 + $0x18] sm:$0xff] }
 0xfa9   : > { %3453 = vmatpush.bf16.msra.mxu2 %v4596_v12  ;;  %3567 = vmatpush.bf16.msrb.mxu1 %v4596_v12 }
 0xfac   : > { %3520 = vmatpush.bf16.msrb.mxu0 %v4587_v7 }
 0xfad   : > { %3454 = vmatpush.bf16.msra.mxu2 %v4595_v45  ;;  %3568 = vmatpush.bf16.msrb.mxu1 %v4595_v45 }
 0xfb0   : > { %3521 = vmatpush.bf16.msrb.mxu0 %v4586_v57 }
 0xfb1   : > { %3455 = vmatpush.bf16.msra.mxu2 %v4594_v2  ;;  %3569 = vmatpush.bf16.msrb.mxu1 %v4594_v2 }
 0xfb4   : > { %3522 = vmatpush.bf16.msrb.mxu0 %v4585_v23 }
0x100b   : > { %v3271_v30 = vpop.xlane.xlu0 %3270 }
0x100c   : > { %v3272_v4 = vmul.f32 %v3271_v30, %v6055_v35 }
0x100e   : > { %v3273_v41 = vsub.f32 %v3268_v15, %v3272_v4 }
0x1010   : > { %v3274_v61 = vmul.f32 %v3273_v41, %v3273_v41 }
0x1012   : > { %v3275_v20 = vsel %vm1996_vm1, %v3274_v61, 0.0 }
0x1013   : > { %3276 = vadd.xlane.f32.xlu1 %v3275_v20  ;;  %v3476_v55 = vpop.xlane.xlu0 %3475  ;;  %v4721_v20 = vld [vmem:[%s1314_s16] ss:$0 sm:$0xff] }
0x1014   : > { %v3477_v43 = vmul.f32 %v3476_v55, %v6055_v35  ;;  %v4785_v55 = vmov 0  }
0x1015   : > { %4715 = vset.pattern.permute.xlu0 %v4785_v55  ;;  %4716 = vset.pattern.permute.xlu1 %v4785_v55 }
0x1016   : > { %v5827_v32 = vsub.f32 %v3473_v0, %v3477_v43 }
0x1018   : > { %v3479_v39 = vmul.f32 %v5827_v32, %v5827_v32 }
0x101a   : > { %v3480_v11 = vsel %vm1996_vm1, %v3479_v39, 0.0 }
0x101b   : > { %3481 = vadd.xlane.f32.xlu1 %v3480_v11 }
0x1086   : > { %v3277_v19 = vpop.xlane.xlu1 %3276 }
0x1087   : > { %v3278_v48 = vmul.f32 %v3277_v19, %v6055_v35 }
0x1089   : > { %v3279_v17 = vadd.f32 1e-06, %v3278_v48 }
0x108b   : > { %4723 = vrsqrt.f32 %v3279_v17  ;;  %vm3286_vm9 = vweird.f32 %v3279_v17 }
0x108e   : > { %v3482_v59 = vpop.xlane.xlu1 %3481 }
0x108f   : > { %v3483_v8 = vmul.f32 %v3482_v59, %v6055_v35 }
0x1091   : > { %v4724_v16 = vpop.eup %4723  ;;  %v3484_v28 = vadd.f32 1e-06, %v3483_v8 }
0x1092   : > { %v3281_v10 = vmul.f32 %v4724_v16, %v3279_v17  ;;  %vm3287_vm8 = vweird.f32 %v4724_v16 }
0x1093   : > { %4725 = vrsqrt.f32 %v3484_v28  ;;  %vm3288_vm10 = vmor %vm3286_vm9, %vm3287_vm8  ;;  %vm3491_vm14 = vweird.f32 %v3484_v28 }
0x1094   : > { %v3282_v38 = vmul.f32 %v4724_v16, %v3281_v10 }
0x1096   : > { %v3283_v46 = vmul.f32 0.5, %v3282_v38 }
0x1098   : > { %v3284_v47 = vsub.f32 1.5, %v3283_v46 }
0x1099   : > { %v4726_v27 = vpop.eup %4725 }
0x109a   : > { %v3285_v33 = vmul.f32 %v4724_v16, %v3284_v47  ;;  %v3486_v58 = vmul.f32 %v4726_v27, %v3484_v28  ;;  %vm3492_vm11 = vweird.f32 %v4726_v27 }
0x109b   : > { %vm3493_vm0 = vmor %vm3491_vm14, %vm3492_vm11 }
0x109c   : > { %v3487_v25 = vmul.f32 %v4726_v27, %v3486_v58  ;;  %v3289_v54 = vsel %vm3288_vm10, %v4724_v16, %v3285_v33 }
0x109d   : > { %v3290_v62 = vmul.f32 %v3289_v54, %v3273_v41 }
0x109e   : > { %v3488_v14 = vmul.f32 0.5, %v3487_v25 }
0x109f   : > { %v3294_v42 = vmul.f32 %v4717_v1, %v3290_v62 }
0x10a0   : > { %v3489_v3 = vsub.f32 1.5, %v3488_v14 }
0x10a1   : > { %v5852_v50 = vadd.f32 %v4718_v6, %v3294_v42 }
0x10a2   : > { %v3490_v22 = vmul.f32 %v4726_v27, %v3489_v3  ;;  %v4593_v3 = vld [vmem:[%s5075_s15] sm:$0xff] }
0x10a3   : > { %v3299_v31 = vpack.c.bf16 %v5852_v50, %v5852_v50  ;;  %3456 = vmatpush.bf16.msra.mxu2 %v4593_v3  ;;  %3570 = vmatpush.bf16.msrb.mxu1 %v4593_v3 }
0x10a4   : > { %v3494_v49 = vsel %vm3493_vm0, %v4726_v27, %v3490_v22 }
0x10a5   : > { %4455 = vmatmul.msk.bf16.vlgmr.msra.gmra.mxu0 %vm2080_vm6, %v3299_v31  ;;  %4472 = vmatmul.msk.bf16.vlgmr.msra.gmra.mxu1 %vm2080_vm6, %v3299_v31  ;;  %v3495_v63 = vmul.f32 %v3494_v49, %v5827_v32 }
0x10a7   : > { %v3496_v44 = vmul.f32 %v4717_v1, %v3495_v63 }
0x10a9   : > { %v5859_v34 = vadd.f32 %v4718_v6, %v3496_v44 }
0x10ab   : > { %v3498_v60 = vpack.c.bf16 %v5859_v34, %v5859_v34 }
0x10ad   : > { %4491 = vmatmul.msk.bf16.vlgmr.msra.gmra.mxu3 %vm2080_vm6, %v3498_v60 }
0x10b5   : > { %4492 = vmatmul.msk.bf16.vlgmr.msrb.gmra.mxu0 %vm2080_vm6, %v3498_v60 }
0x1122   : > { %v3339_v56 = vpop.f32.mrf.mxu0  ;;  %v3376_v51 = vpop.f32.mrf.mxu1 }
0x1123   : > { %v3340_v18 = vadd.f32 %v4719_v9, %v3339_v56 }
0x1125   : > { %v3377_v37 = vadd.f32 %v3376_v51, %v3340_v18  ;;  %v4722_v51 = vld [vmem:[%s1322_s7] ss:$0 sm:$0xff]  ;;  %v4786_v18 = vmov 0.0  }
0x1127   : > { %v3380_v29 = vmax.f32 %v3377_v37, 0.0 }
0x1129   : > { %v3384_v5 = vmul.f32 %v4720_v53, %v3380_v29 }
0x112a   : > { %v3341_v40 = vpop.f32.mrf.mxu0  ;;  %v3378_v21 = vpop.f32.mrf.mxu1 }
0x112b   : > { %v3386_v13 = vsel %vm3385_vm3, %v3384_v5, 0.0 }
0x112c   : > { %3387 = vadd.xlane.f32.xlu2 %v3386_v13 }
0x1130   : > { %v3511_v15 = vpop.f32.mrf.mxu3 }
0x1131   : > { %v3512_v26 = vadd.f32 %v4719_v9, %v3511_v15  ;;  %v3263_v9 = vlaneseq }
0x1132   : > { %v3524_v0 = vpop.f32.mrf.mxu0 }
0x1133   : > { %v3525_v36 = vadd.f32 %v3524_v0, %v3512_v26  ;;  %v3264_v56 = vshrl.u32 %v3263_v9, 7 }
0x1135   : > { %v3528_v30 = vmax.f32 %v3525_v36, 0.0  ;;  %vm3265_vm9 = vcmp.gt.s32.totalorder %v3264_v56, 0 }
0x1136   : > { %v4438_v37 = vsel %vm3265_vm9, 1.0, %v4786_v18 }
0x1137   : > { %v3529_v35 = vmul.f32 %v4720_v53, %v3528_v30 }
0x1138   : > { %v3513_v4 = vpop.f32.mrf.mxu3 }
0x1139   : > { %v3530_v41 = vsel %vm3385_vm3, %v3529_v35, 0.0 }
0x113a   : > { %v3526_v61 = vpop.f32.mrf.mxu0  ;;  %3531 = vadd.xlane.f32.xlu2 %v3530_v41 }
0x119f   : > { %v3388_v43 = vpop.xlane.xlu2 %3387 }
0x11a0   : > { %v3392_v32 = vadd.f32 %v4721_v20, %v3388_v43 }
0x11a2   : > { %v4473_v39 = vmul.f32 -1.442695, %v3392_v32 }
0x11a4   : > { %4727 = vpow2.f32 %v4473_v39 }
0x11aa   : > { %v4728_v11 = vpop.eup %4727 }
0x11ab   : > { %v3396_v52 = vadd.f32 1.0, %v4728_v11 }
0x11ad   : > { %4729 = vrcp.f32 %v3396_v52  ;;  %v3532_v24 = vpop.xlane.xlu2 %3531  ;;  %v3408_v17 = vand.u32 2147483648, %v3396_v52  ;;  %v3406_v16 = vand.u32 2147483647, %v3396_v52  ;;  %vm3402_vm12 = vweird.f32 %v3396_v52 }
0x11ae   : > { %v3533_v7 = vadd.f32 %v4721_v20, %v3532_v24 }
0x11af   : > { %v3409_v38 = vor.u32 1.1754944e-38, %v3408_v17  ;;  %vm3407_vm15 = vcmp.eq.f32.partialorder %v3406_v16, 8.507059e+37 }
0x11b0   : > { %v4493_v57 = vmul.f32 -1.442695, %v3533_v7 }
0x11b2   : > { %4731 = vpow2.f32 %v4493_v57 }
0x11b3   : > { %v4730_v23 = vpop.eup %4729 }
0x11b4   : > { %v3398_v19 = vmul.f32 %v4730_v23, %v3396_v52  ;;  %vm3403_vm5 = vweird.f32 %v4730_v23 }
0x11b5   : > { %vm3404_vm13 = vmor %vm3402_vm12, %vm3403_vm5 }
0x11b6   : > { %v3399_v48 = vsub.f32 1.0, %v3398_v19 }
0x11b8   : > { %v4732_v59 = vpop.eup %4731  ;;  %v3400_v8 = vmul.f32 %v4730_v23, %v3399_v48 }
0x11b9   : > { %v3537_v28 = vadd.f32 1.0, %v4732_v59 }
0x11ba   : > { %v3401_v10 = vadd.f32 %v4730_v23, %v3400_v8 }
0x11bb   : > { %4733 = vrcp.f32 %v3537_v28  ;;  %v3549_v1 = vand.u32 2147483648, %v3537_v28  ;;  %v3547_v54 = vand.u32 2147483647, %v3537_v28  ;;  %vm3543_vm4 = vweird.f32 %v3537_v28 }
0x11bc   : > { %v3405_v46 = vsel %vm3404_vm13, %v4730_v23, %v3401_v10 }
0x11bd   : > { %v3410_v47 = vsel %vm3407_vm15, %v3409_v38, %v3405_v46  ;;  %v3550_v6 = vor.u32 1.1754944e-38, %v3549_v1  ;;  %vm3548_vm8 = vcmp.eq.f32.partialorder %v3547_v54, 8.507059e+37 }
0x11be   : > { %3414 = vperm.xlu0 %4715, %v3410_v47  }
0x11c1   : > { %v4734_v27 = vpop.eup %4733 }
0x11c2   : > { %v3539_v33 = vmul.f32 %v4734_v27, %v3537_v28  ;;  %vm3544_vm2 = vweird.f32 %v4734_v27 }
0x11c3   : > { %vm3545_vm7 = vmor %vm3543_vm4, %vm3544_vm2 }
0x11c4   : > { %v3540_v58 = vsub.f32 1.0, %v3539_v33 }
0x11c6   : > { %v3541_v25 = vmul.f32 %v4734_v27, %v3540_v58 }
0x11c8   : > { %v3542_v62 = vadd.f32 %v4734_v27, %v3541_v25 }
0x11ca   : > { %v3546_v14 = vsel %vm3545_vm7, %v4734_v27, %v3542_v62 }
0x11cb   : > { %v3551_v42 = vsel %vm3548_vm8, %v3550_v6, %v3546_v14 }
0x11cc   : > { %3555 = vperm.xlu1 %4716, %v3551_v42  }
0x1230   : > { %v3415_v22 = vpop.permute.xlu0 %3414 }
0x1231   : > { %v3417_v31 = vmul.f32 %v3415_v22, %v5852_v50 }
0x1233   : > { %v3418_v49 = vpack.c.bf16 %v3417_v31, %v3417_v31 }
0x1235   : > { %4490 = vmatmul.msk.bf16.vlgmr.msra.gmra.mxu2 %vm2080_vm6, %v3418_v49 }
0x123e   : > { %v3556_v63 = vpop.permute.xlu1 %3555 }
0x123f   : > { %v3558_v44 = vmul.f32 %v3556_v63, %v5859_v34 }
0x1241   : > { %v3559_v60 = vpack.c.bf16 %v3558_v44, %v3558_v44 }
0x1243   : > { %4494 = vmatmul.msk.bf16.vlgmr.msrb.gmra.mxu1 %vm2080_vm6, %v3559_v60  ;;  %vm3471_vm6 = vcmask 516096  }
0x12b8   : > { %v3458_v50 = vpop.f32.mrf.mxu2 }
0x12b9   : > { %v3459_v53 = vadd.f32 %v4722_v51, %v3458_v50 }
0x12bb   : > { %v3462_v29 = vmul.f32 %v4438_v37, %v3459_v53 }
0x12bd   : > { %v3463_v5 = vsel %vm1996_vm1, %v3462_v29, 0.0 }
0x12be   : > { %v3464_v40 = vrot.slane %v3463_v5, 4 }
0x12c0   : > { %v3465_v34 = vadd.f32 %v3464_v40, %v3463_v5  ;;  %v3460_v21 = vpop.f32.mrf.mxu2  ;;  %v3572_v13 = vpop.f32.mrf.mxu1 }
0x12c1   : > { %v3573_v15 = vadd.f32 %v4722_v51, %v3572_v13 }
0x12c2   : > { %v3466_v26 = vrot.slane %v3465_v34, 2 }
0x12c3   : > { %v3576_v0 = vmul.f32 %v4438_v37, %v3573_v15 }
0x12c4   : > { %v3467_v36 = vadd.f32 %v3466_v26, %v3465_v34 }
0x12c5   : > { %v3577_v30 = vsel %vm1996_vm1, %v3576_v0, 0.0 }
0x12c6   : > { %v3468_v35 = vrot.slane %v3467_v36, 1  ;;  %v3578_v4 = vrot.slane %v3577_v30, 4 }
0x12c8   : > { %v3469_v41 = vadd.f32 %v3468_v35, %v3467_v36  ;;  %v3579_v61 = vadd.f32 %v3578_v4, %v3577_v30  ;;  %v3574_v20 = vpop.f32.mrf.mxu1 }
0x12ca   : > { %v3470_v55 = vmul.f32 0.25, %v3469_v41  ;;  %v3580_v43 = vrot.slane %v3579_v61, 2 }
0x12cc   : > { %3472 = vst.msk [vmem:[%s5086_s6] sm:$0x1] %vm3471_vm6, %v3470_v55  ;;  %v3581_v32 = vadd.f32 %v3580_v43, %v3579_v61 }
0x12ce   : > { %v3582_v39 = vrot.slane %v3581_v32, 1 }
0x12d0   : > { %v3583_v11 = vadd.f32 %v3582_v39, %v3581_v32 }
0x12d2   : > { %v3584_v52 = vmul.f32 0.25, %v3583_v11 }
0x12d4   : > { %4495 = vst.msk [vmem:[%s5086_s6 + $0x1] sm:$0x1] %vm3471_vm6, %v3584_v52 }
0x12d5 PF: > { %s6065_s26 = sld [smem:[#allocation7_spill]] }
0x12d6   : > { %s6066_s5 = sld [smem:[#allocation5_spill]] }
0x12d7   : > { %s6068_s27 = sld [smem:[#allocation8_spill]] }
0x12d8   : > { %s6069_s28 = sld [smem:[#allocation9_spill]] }
0x12db   : > { %s34_s6 = sadd.s32 1, %s6065_s26   ;;  %s6067_s26 = sld [smem:[#allocation6_spill]] }
0x12dc   : > { %p31_p9 = scmp.ge.s32.totalorder %s34_s6, 8  }
0x12de   :  { %33 = sbr.rel (!%p31_p9) target bundleno = 23 (0x17), region = 227 }

// kernel: vit_gate_attention_forward.1
= control target key start
LH: loop header
LB: loop body
LE: loop exit
PB: predicated region body
PF: predicated region fallthrough
CT: control target
= control target key end

     0   :  { %s4881_s26 = smov 0   ;;  %s4883_s27 = smov 0   ;;  %s5879_s0 = inlined_call_operand.vmem [shape: bf16[3,2,5,768], index: 0, kind: input, shape index: {}]   ;;  %s5880_s1 = inlined_call_operand.vmem [shape: f32[3,5,64], index: 1, kind: input, shape index: {}]   ;;  %s5881_s2 = inlined_call_operand.vmem [shape: bf16[3,768,64], index: 2, kind: input, shape index: {}]   ;;  %s5882_s3 = inlined_call_operand.vmem [shape: f32[3,2,1,64], index: 3, kind: input, shape index: {}]   ;;  %s5883_s4 = inlined_call_operand.vmem [shape: f32[3,2,1,64], index: 4, kind: input, shape index: {}]   ;;  %s5884_s5 = inlined_call_operand.vmem [shape: bf16[3,2,64,192], index: 5, kind: input, shape index: {}]   ;;  %s5885_s6 = inlined_call_operand.vmem [shape: f32[3,2,1,192], index: 6, kind: input, shape index: {}]   ;;  %s5886_s7 = inlined_call_operand.vmem [shape: bf16[3,2,64,64], index: 7, kind: input, shape index: {}]   ;;  %s5887_s8 = inlined_call_operand.vmem [shape: f32[3,2,1,64], index: 8, kind: input, shape index: {}]   ;;  %s5888_s9 = inlined_call_operand.vmem [shape: f32[3,2,1,64], index: 9, kind: input, shape index: {}]   ;;  %s5889_s10 = inlined_call_operand.vmem [shape: f32[3,2,1,64], index: 10, kind: input, shape index: {}]   ;;  %s5890_s11 = inlined_call_operand.vmem [shape: bf16[3,2,64,256], index: 11, kind: input, shape index: {}]   ;;  %s5891_s12 = inlined_call_operand.vmem [shape: f32[3,2,1,256], index: 12, kind: input, shape index: {}]   ;;  %s5892_s13 = inlined_call_operand.vmem [shape: bf16[3,2,256,64], index: 13, kind: input, shape index: {}]   ;;  %s5893_s14 = inlined_call_operand.vmem [shape: f32[3,2,1,64], index: 14, kind: input, shape index: {}]   ;;  %s5894_s15 = inlined_call_operand.vmem [shape: f32[3,1,64], index: 15, kind: input, shape index: {}]   ;;  %s5895_s16 = inlined_call_operand.vmem [shape: f32[3,1,64], index: 16, kind: input, shape index: {}]   ;;  %s5896_s17 = inlined_call_operand.vmem [shape: bf16[3,64,32], index: 17, kind: input, shape index: {}]   ;;  %s5897_s18 = inlined_call_operand.vmem [shape: bf16[3,64,32], index: 18, kind: input, shape index: {}]   ;;  %s5898_s19 = inlined_call_operand.vmem [shape: f32[3,1,32], index: 19, kind: input, shape index: {}]   ;;  %s5899_s20 = inlined_call_operand.vmem [shape: f32[3,1,32], index: 20, kind: input, shape index: {}]   ;;  %s5900_s21 = inlined_call_operand.vmem [shape: f32[3,1,1], index: 21, kind: input, shape index: {}]   ;;  %s5901_s22 = inlined_call_operand.vmem [shape: bf16[3,64,64], index: 22, kind: input, shape index: {}]   ;;  %s5902_s23 = inlined_call_operand.vmem [shape: f32[3,1,64], index: 23, kind: input, shape index: {}]   ;;  %s5903_s24 = inlined_call_operand.vmem [shape: f32[3,2,1,64], index: 24, kind: output, shape index: {}]  }
   0x1   :  { %5924 = sst [smem:[#allocation21_spill]] %s5879_s0  ;;  %s4885_s28 = smov 0  }
   0x2   :  { %5925 = sst [smem:[#allocation22_spill]] %s5880_s1 }
   0x3   :  { %5926 = sst [smem:[#allocation23_spill]] %s5881_s2 }
   0x4   :  { %5927 = sst [smem:[#allocation24_spill]] %s5882_s3 }
   0x5   :  { %5928 = sst [smem:[#allocation25_spill]] %s5883_s4 }
   0x6   :  { %5929 = sst [smem:[#allocation26_spill]] %s5884_s5  ;;  %s4879_s5 = smov 0  }
   0x7   :  { %5930 = sst [smem:[#allocation27_spill]] %s5885_s6  ;;  %s4887_s6 = smov 0  }
   0x8   :  { %5931 = sst [smem:[#allocation28_spill]] %s5886_s7 }
   0x9   :  { %5932 = sst [smem:[#allocation29_spill]] %s5887_s8 }
   0xa   :  { %5933 = sst [smem:[#allocation30_spill]] %s5890_s11 }
   0xb   :  { %5934 = sst [smem:[#allocation31_spill]] %s5891_s12 }
   0xc   :  { %5935 = sst [smem:[#allocation32_spill]] %s5892_s13 }
   0xd   :  { %5936 = sst [smem:[#allocation33_spill]] %s5894_s15 }
   0xe   :  { %5937 = sst [smem:[#allocation34_spill]] %s5895_s16 }
   0xf   :  { %5938 = sst [smem:[#allocation35_spill]] %s5896_s17 }
  0x10   :  { %5939 = sst [smem:[#allocation36_spill]] %s5897_s18 }
  0x11   :  { %5940 = sst [smem:[#allocation37_spill]] %s5898_s19 }
  0x12   :  { %5941 = sst [smem:[#allocation38_spill]] %s5899_s20 }
  0x13   :  { %5942 = sst [smem:[#allocation39_spill]] %s5900_s21 }
  0x14   :  { %5943 = sst [smem:[#allocation40_spill]] %s5901_s22 }
  0x15   :  { %5944 = sst [smem:[#allocation41_spill]] %s5902_s23 }
  0x16   :  { %5945 = sst [smem:[#allocation42_spill]] %s5903_s24 }
  0x17 LB: > { %5946 = sst [smem:[#allocation4_spill]] %s4724_s5  ;;  %s46_s2 = sadd.s32 1, %s4732_s27  ;;  %s4740_s6 = sphi %s4887_s6, %s34_s6   ;;  %s4736_s28 = sphi %s4885_s28, %s6036_s28   ;;  %s4732_s27 = sphi %s4883_s27, %s6035_s27   ;;  %s4728_s26 = sphi %s4881_s26, %s6034_s26   ;;  %s4724_s5 = sphi %s4879_s5, %s6033_s5  }
  0x18   : > { %5947 = sst [smem:[#allocation5_spill]] %s4732_s27  ;;  %s53_s29 = sadd.s32 1, %s4736_s28 }
  0x19   : > { %5948 = sst [smem:[#allocation6_spill]] %s4736_s28  ;;  %p47_p0 = scmp.ge.s32.totalorder %s46_s2, 2 }
  0x1a   : > { %5949 = sst [smem:[#allocation7_spill]] %s4740_s6  ;;  %p4005_p1 = scmp.ge.s32.totalorder %s4740_s6, 1 }
  0x1b   : > { %p966_p2 = scmp.lt.s32.totalorder %s4740_s6, 7  ;;  %s6038_s2 = smov (%p47_p0, %s46_s2), 0 }
  0x1c   : > { %5950 = sst [smem:[#allocation8_spill]] %s6038_s2  ;;  %s6040_s29 = smov (!%p47_p0, %s53_s29), %s4736_s28 }
  0x1d   : > { %p967_p3 = pnand %p4005_p1, %p966_p2  ;;  %p55_p4 = scmp.ge.s32.totalorder %s6040_s29, 3 }
  0x1f   : > { %s6042_s29 = smov (%p55_p4, %s6040_s29), 0  ;;  %970 = sbr.rel (%p967_p3) target bundleno = 4821 (0x12d5), region = 116 }
  0x20   : > { %5951 = sst [smem:[#allocation9_spill]] %s6042_s29 }
  0x24   : > { %p1177_p5 = scmp.lt.s32.totalorder %s4728_s26, 2  ;;  %p1198_p6 = scmp.lt.s32.totalorder %s4724_s5, 1 }
  0x25   : > { %s5952_s8 = sld [smem:[#allocation22_spill]] }
  0x26   : > { %s6044_s26 = smov (!%p1177_p5, %s4728_s26), 2  ;;  %s5954_s28 = sld [smem:[#allocation21_spill]] }
  0x27   : > { %s4915_s0 = scalar_select %p1198_p6, %s4724_s5, 1 }
  0x28   : > { %s4564_s7 = smul.u32 48, %s6044_s26  ;;  %s4007_s30 = sshll.u32 %s6044_s26, 3 }
  0x29   : > { %s4565_s1 = smul.u32 384, %s6044_s26  ;;  %s5908_s6 = sshll.u32 %s6044_s26, 1 }
  0x2a   : > { %s5956_s23 = sld [smem:[#allocation23_spill]]  ;;  %s4939_s21 = sadd.s32 %s5908_s6, %s4915_s0 }
  0x2b   : > { %s4922_s4 = scalar_lea.vmem %s5952_s8, %s4007_s30  ;;  %s4951_s24 = sshll.u32 %s6044_s26, 5 }
  0x2c   : > { %5953 = sst [smem:[#allocation10_spill]] %s4922_s4  ;;  %s4928_s27 = scalar_lea.vmem %s5954_s28, %s4564_s7 }
  0x2d   : > { %5955 = sst [smem:[#allocation11_spill]] %s4928_s27  ;;  %s4011_s4 = sshll.u32 %s4915_s0, 4 }
  0x2e   : > { %s4014_s5 = sshll.u32 %s4915_s0, 1  ;;  %s4015_s6 = sshll.u32 %s6044_s26, 2 }
  0x2f   : > { %s5960_s27 = sld [smem:[#allocation26_spill]]  ;;  %s4961_s2 = sadd.s32 %s4015_s6, %s4014_s5 }
  0x30   : > { %s4934_s22 = scalar_lea.vmem %s5956_s23, %s4565_s1  ;;  %s1216_s23 = sadd.s32 %s4951_s24, %s4011_s4 }
  0x31   : > { %5957 = sst [smem:[#allocation12_spill]] %s4934_s22  ;;  %s4013_s1 = sshll.u32 %s1216_s23, 2 }
  0x32   : > { %s4016_s8 = sshll.u32 %s4915_s0, 3  ;;  %s4017_s23 = sshll.u32 %s6044_s26, 4 }
  0x33   : > { %s1233_s30 = sadd.s32 %s4017_s23, %s4016_s8  ;;  %s5964_s17 = sld [smem:[#allocation28_spill]] }
  0x34   : > { %s4018_s5 = sshll.u32 %s1233_s30, 2  ;;  %s5965_s11 = sld [smem:[#allocation30_spill]] }
  0x35   : > { %s4959_s25 = scalar_lea.vmem %s5960_s27, %s4013_s1  ;;  %s4027_s3 = sshll.u32 %s4915_s0, 5 }
  0x36   : > { %5961 = sst [smem:[#allocation13_spill]] %s4959_s25  ;;  %s4028_s28 = sshll.u32 %s6044_s26, 6 }
  0x37   : > { %s5969_s13 = sld [smem:[#allocation32_spill]] }
  0x38   : > { %s5970_s12 = sld [smem:[#allocation35_spill]] }
  0x39   : > { %s4984_s20 = scalar_lea.vmem %s5964_s17, %s4018_s5  ;;  %s1280_s17 = sadd.s32 %s4028_s28, %s4027_s3 }
  0x3a   : > { %s4989_s8 = scalar_lea.vmem %s5965_s11, %s4013_s1  ;;  %s4029_s22 = sshll.u32 %s1280_s17, 2 }
  0x3b   : > { %s5972_s29 = sld [smem:[#allocation36_spill]] }
  0x3c   : > { %s5975_s25 = sld [smem:[#allocation38_spill]] }
  0x3d   : > { %s5012_s30 = scalar_lea.vmem %s5969_s13, %s4029_s22  ;;  %s5976_s13 = sld [smem:[#allocation39_spill]] }
  0x3e   : > { %s5018_s7 = scalar_lea.vmem %s5970_s12, %s4951_s24  ;;  %s5977_s0 = sld [smem:[#allocation40_spill]] }
  0x3f   : > { %5971 = sst [smem:[#allocation14_spill]] %s5018_s7 }
  0x40   : > { %s5980_s5 = sld [smem:[#allocation42_spill]] }
  0x41   : > { %s5024_s4 = scalar_lea.vmem %s5972_s29, %s4951_s24  ;;  %s5978_s29 = sld [smem:[#allocation41_spill]] }
  0x42   : > { %5973 = sst [smem:[#allocation15_spill]] %s5024_s4  ;;  %s1311_s23 = scalar_lea.vmem %s5975_s25, %s6044_s26 }
  0x43   : > { %s1314_s16 = scalar_lea.vmem %s5976_s13, %s6044_s26  ;;  %s5979_s4 = sshll.u32 %s6044_s26, 1 }
  0x44   : > { %s5042_s15 = scalar_lea.vmem %s5977_s0, %s4951_s24  ;;  %s5981_s18 = sld [smem:[#allocation4_spill]] }
  0x46   : > { %s5053_s6 = scalar_lea.vmem %s5980_s5, %s5979_s4 }
  0x47   : > { %s1322_s7 = scalar_lea.vmem %s5978_s29, %s6044_s26 }
  0x4a   : > { %p4038_p7 = scmp.ne.s32.totalorder %s5981_s18, 0 }
  0x4b   : > { %s5982_s25 = sld [smem:[#allocation12_spill]] (!%p4038_p7) }
  0x4c   : > { %1336 = sbr.rel (%p4038_p7) target bundleno = 320 (0x140), region = 120  ;;  %s5983_s13 = sld [smem:[#allocation11_spill]] (!%p4038_p7) }
  0x4d   : > { %s5984_s24 = sld [smem:[#allocation10_spill]] (!%p4038_p7) }
  0x51   : > { %v5057_v0 = vld [vmem:[%s5982_s25 + $0x38] sm:$0xff]  ;;  %v5071_v4 = vld [vmem:[%s5982_s25 + $0x30] sm:$0xff]  ;;  %v5087_v8 = vld [vmem:[%s5982_s25 + $0x28] sm:$0xff]  ;;  %vm1824_vm0 = vcmask 520192  }
  0x52   : > { %v5060_v1 = vld [vmem:[%s5982_s25 + $0x78] sm:$0xff]  ;;  %1746 = vmatpush.bf16.msra.mxu0 %v5057_v0  ;;  %v5074_v5 = vld [vmem:[%s5982_s25 + $0x70] sm:$0xff]  ;;  %v5090_v9 = vld [vmem:[%s5982_s25 + $0x68] sm:$0xff] }
  0x53   : > { %v5063_v2 = vld [vmem:[%s5982_s25 + $0xb8] sm:$0xff]  ;;  %1759 = vmatpush.bf16.msra.mxu1 %v5060_v1  ;;  %v5079_v6 = vld [vmem:[%s5982_s25 + $0xb0] sm:$0xff]  ;;  %v5095_v10 = vld [vmem:[%s5982_s25 + $0xa8] sm:$0xff] }
  0x54   : > { %v5066_v3 = vld [vmem:[%s5982_s25 + $0xf8] sm:$0xff]  ;;  %1772 = vmatpush.bf16.msra.mxu2 %v5063_v2  ;;  %v5082_v7 = vld [vmem:[%s5982_s25 + $0xf0] sm:$0xff]  ;;  %v5098_v11 = vld [vmem:[%s5982_s25 + $0xe8] sm:$0xff] }
  0x55   : > { %1785 = vmatpush.bf16.msra.mxu3 %v5066_v3  ;;  %v5103_v12 = vld [vmem:[%s5982_s25 + $0x20] sm:$0xff]  ;;  %v5119_v16 = vld [vmem:[%s5982_s25 + $0x18] sm:$0xff]  ;;  %v5135_v20 = vld [vmem:[%s5982_s25 + $0x10] sm:$0xff] }
  0x56   : > { %1747 = vmatpush.bf16.msra.mxu0 %v5071_v4  ;;  %v5106_v13 = vld [vmem:[%s5982_s25 + $0x60] sm:$0xff]  ;;  %v5122_v17 = vld [vmem:[%s5982_s25 + $0x58] sm:$0xff]  ;;  %v5138_v21 = vld [vmem:[%s5982_s25 + $0x50] sm:$0xff] }
  0x57   : > { %1760 = vmatpush.bf16.msra.mxu1 %v5074_v5  ;;  %v5111_v14 = vld [vmem:[%s5982_s25 + $0xa0] sm:$0xff]  ;;  %v5127_v18 = vld [vmem:[%s5982_s25 + $0x98] sm:$0xff]  ;;  %v5143_v22 = vld [vmem:[%s5982_s25 + $0x90] sm:$0xff] }
  0x58   : > { %1773 = vmatpush.bf16.msra.mxu2 %v5079_v6  ;;  %v5114_v15 = vld [vmem:[%s5982_s25 + $0xe0] sm:$0xff]  ;;  %v5130_v19 = vld [vmem:[%s5982_s25 + $0xd8] sm:$0xff]  ;;  %v5146_v23 = vld [vmem:[%s5982_s25 + $0xd0] sm:$0xff] }
  0x59   : > { %1786 = vmatpush.bf16.msra.mxu3 %v5082_v7  ;;  %v5151_v24 = vld [vmem:[%s5982_s25 + $0x8] sm:$0xff]  ;;  %v1434_v28 = vld [vmem:[%s5983_s13] sm:$0x77]  ;;  %v5183_v38 = vld [vmem:[%s5982_s25 + $0x138] sm:$0xff] }
  0x5a   : > { %1748 = vmatpush.bf16.msra.mxu0 %v5087_v8  ;;  %v5154_v25 = vld [vmem:[%s5982_s25 + $0x48] sm:$0xff]  ;;  %v5169_v30 = vld [vmem:[%s5982_s25] sm:$0xff]  ;;  %v1440_v32 = vunpack.c.l.b16 %v1434_v28  ;;  %v1441_v37 = vunpack.c.h.b16 %v1434_v28  ;;  %v5186_v39 = vld [vmem:[%s5982_s25 + $0x178] sm:$0xff] }
  0x5b   : > { %1761 = vmatpush.bf16.msra.mxu1 %v5090_v9  ;;  %v5157_v26 = vld [vmem:[%s5982_s25 + $0x88] sm:$0xff]  ;;  %v5172_v31 = vld [vmem:[%s5982_s25 + $0x40] sm:$0xff]  ;;  %v5195_v44 = vld [vmem:[%s5982_s25 + $0x130] sm:$0xff] }
  0x5c   : > { %1774 = vmatpush.bf16.msra.mxu2 %v5095_v10  ;;  %v5162_v27 = vld [vmem:[%s5982_s25 + $0xc8] sm:$0xff]  ;;  %v5177_v34 = vld [vmem:[%s5982_s25 + $0x80] sm:$0xff]  ;;  %v1446_v40 = vpack.c.b16 %v1440_v32, %v1440_v32  ;;  %v1447_v43 = vpack.c.b16 %v1441_v37, %v1441_v37  ;;  %v5198_v45 = vld [vmem:[%s5982_s25 + $0x170] sm:$0xff] }
  0x5d   : > { %1787 = vmatpush.bf16.msra.mxu3 %v5098_v11  ;;  %v1435_v29 = vld [vmem:[%s5983_s13 + $0x8] sm:$0x77]  ;;  %v5180_v35 = vld [vmem:[%s5982_s25 + $0xc0] sm:$0xff]  ;;  %v4503_v50 = vld [vmem:[%s5982_s25 + $0x118] sm:$0xff] }
  0x5e   : > { %1749 = vmatpush.bf16.msra.mxu0 %v5103_v12  ;;  %v1442_v33 = vunpack.c.l.b16 %v1435_v29  ;;  %v1443_v36 = vunpack.c.h.b16 %v1435_v29  ;;  %v4505_v46 = vld [vmem:[%s5982_s25 + $0x128] sm:$0xff]  ;;  %v4504_v48 = vld [vmem:[%s5982_s25 + $0x120] sm:$0xff]  ;;  %v4511_v51 = vld [vmem:[%s5982_s25 + $0x158] sm:$0xff] }
  0x5f   : > { %1762 = vmatpush.bf16.msra.mxu1 %v5106_v13  ;;  %v4513_v47 = vld [vmem:[%s5982_s25 + $0x168] sm:$0xff]  ;;  %v4512_v49 = vld [vmem:[%s5982_s25 + $0x160] sm:$0xff]  ;;  %v4502_v52 = vld [vmem:[%s5982_s25 + $0x110] sm:$0xff] }
  0x60   : > { %1775 = vmatpush.bf16.msra.mxu2 %v5111_v14  ;;  %v1448_v41 = vpack.c.b16 %v1442_v33, %v1442_v33  ;;  %v1449_v42 = vpack.c.b16 %v1443_v36, %v1443_v36  ;;  %v4510_v53 = vld [vmem:[%s5982_s25 + $0x150] sm:$0xff]  ;;  %v4501_v54 = vld [vmem:[%s5982_s25 + $0x108] sm:$0xff]  ;;  %v4231_v57 = vld [vmem:[%s5983_s13 + $0x18] sm:$0x77] }
  0x61   : > { %1788 = vmatpush.bf16.msra.mxu3 %v5114_v15  ;;  %v4509_v55 = vld [vmem:[%s5982_s25 + $0x148] sm:$0xff]  ;;  %v1436_v56 = vld [vmem:[%s5983_s13 + $0x10] sm:$0x77]  ;;  %v4500_v58 = vld [vmem:[%s5982_s25 + $0x100] sm:$0xff]  ;;  %v1833_v61 = vunpack.c.l.b16 %v4231_v57  ;;  %v1834_v62 = vunpack.c.h.b16 %v4231_v57 }
  0x62   : > { %1750 = vmatpush.bf16.msra.mxu0 %v5119_v16  ;;  %v4508_v59 = vld [vmem:[%s5982_s25 + $0x140] sm:$0xff]  ;;  %v1444_v60 = vunpack.c.l.b16 %v1436_v56  ;;  %v1445_v63 = vunpack.c.h.b16 %v1436_v56 }
  0x63   : > { %1763 = vmatpush.bf16.msra.mxu1 %v5122_v17 }
  0x64   : > { %1776 = vmatpush.bf16.msra.mxu2 %v5127_v18 }
  0x65   : > { %1789 = vmatpush.bf16.msra.mxu3 %v5130_v19 }
  0x66   : > { %1751 = vmatpush.bf16.msra.mxu0 %v5135_v20 }
  0x67   : > { %1764 = vmatpush.bf16.msra.mxu1 %v5138_v21 }
  0x68   : > { %1777 = vmatpush.bf16.msra.mxu2 %v5143_v22 }
  0x69   : > { %1790 = vmatpush.bf16.msra.mxu3 %v5146_v23 }
  0x6a   : > { %1752 = vmatpush.bf16.msra.mxu0 %v5151_v24 }
  0x6b   : > { %1765 = vmatpush.bf16.msra.mxu1 %v5154_v25 }
  0x6c   : > { %1778 = vmatpush.bf16.msra.mxu2 %v5157_v26 }
  0x6d   : > { %1791 = vmatpush.bf16.msra.mxu3 %v5162_v27 }
  0x6e   : > { %1753 = vmatpush.bf16.msra.mxu0 %v5169_v30 }
  0x6f   : > { %1766 = vmatpush.bf16.msra.mxu1 %v5172_v31 }
  0x70   : > { %1779 = vmatpush.bf16.msra.mxu2 %v5177_v34 }
  0x71   : > { %1792 = vmatpush.bf16.msra.mxu3 %v5180_v35  ;;  %1754 = vmatmul.bf16.vlgmr.msra.gmra.mxu0 %v1446_v40 }
  0x72   : > { %1798 = vmatpush.bf16.msrb.mxu0 %v5183_v38  ;;  %1767 = vmatmul.bf16.vlgmr.msra.gmra.mxu1 %v1447_v43 }
  0x73   : > { %1811 = vmatpush.bf16.msrb.mxu1 %v5186_v39  ;;  %1780 = vmatmul.bf16.vlgmr.msra.gmra.mxu2 %v1448_v41 }
  0x74   : > { %1851 = vmatpush.bf16.msrb.mxu2 %v5057_v0  ;;  %1793 = vmatmul.bf16.vlgmr.msra.gmra.mxu3 %v1449_v42  ;;  %v1450_v0 = vpack.c.b16 %v1444_v60, %v1444_v60 }
  0x75   : > { %1864 = vmatpush.bf16.msrb.mxu3 %v5060_v1  ;;  %v1839_v1 = vpack.c.b16 %v1833_v61, %v1833_v61 }
  0x76   : > { %1799 = vmatpush.bf16.msrb.mxu0 %v5195_v44 }
  0x77   : > { %1812 = vmatpush.bf16.msrb.mxu1 %v5198_v45 }
  0x78   : > { %1852 = vmatpush.bf16.msrb.mxu2 %v5071_v4  ;;  %v1840_v4 = vpack.c.b16 %v1834_v62, %v1834_v62 }
  0x79   : > { %1865 = vmatpush.bf16.msrb.mxu3 %v5074_v5  ;;  %v1451_v5 = vpack.c.b16 %v1445_v63, %v1445_v63 }
  0x7a   : > { %1800 = vmatpush.bf16.msrb.mxu0 %v4505_v46 }
  0x7b   : > { %1813 = vmatpush.bf16.msrb.mxu1 %v4513_v47 }
  0x7c   : > { %1853 = vmatpush.bf16.msrb.mxu2 %v5087_v8 }
  0x7d   : > { %1866 = vmatpush.bf16.msrb.mxu3 %v5090_v9 }
  0x7e   : > { %1801 = vmatpush.bf16.msrb.mxu0 %v4504_v48 }
  0x7f   : > { %1814 = vmatpush.bf16.msrb.mxu1 %v4512_v49 }
  0x80   : > { %1854 = vmatpush.bf16.msrb.mxu2 %v5103_v12 }
  0x81   : > { %1867 = vmatpush.bf16.msrb.mxu3 %v5106_v13 }
  0x82   : > { %1802 = vmatpush.bf16.msrb.mxu0 %v4503_v50 }
  0x83   : > { %1815 = vmatpush.bf16.msrb.mxu1 %v4511_v51 }
  0x84   : > { %1855 = vmatpush.bf16.msrb.mxu2 %v5119_v16 }
  0x85   : > { %1868 = vmatpush.bf16.msrb.mxu3 %v5122_v17 }
  0x86   : > { %1803 = vmatpush.bf16.msrb.mxu0 %v4502_v52 }
  0x87   : > { %1816 = vmatpush.bf16.msrb.mxu1 %v4510_v53 }
  0x88   : > { %1856 = vmatpush.bf16.msrb.mxu2 %v5135_v20  ;;  %v1433_v20 = vld [vmem:[%s5984_s24] sm:$0x1f] }
  0x89   : > { %1869 = vmatpush.bf16.msrb.mxu3 %v5138_v21 }
  0x8a   : > { %1804 = vmatpush.bf16.msrb.mxu0 %v4501_v54 }
  0x8b   : > { %1817 = vmatpush.bf16.msrb.mxu1 %v4509_v55 }
  0x8c   : > { %1857 = vmatpush.bf16.msrb.mxu2 %v5151_v24 }
  0x8d   : > { %1870 = vmatpush.bf16.msrb.mxu3 %v5154_v25 }
  0x8e   : > { %1805 = vmatpush.bf16.msrb.mxu0 %v4500_v58 }
  0x8f   : > { %1818 = vmatpush.bf16.msrb.mxu1 %v4508_v59 }
  0x90   : > { %1858 = vmatpush.bf16.msrb.mxu2 %v5169_v30 }
  0x91   : > { %1871 = vmatpush.bf16.msrb.mxu3 %v5172_v31  ;;  %1806 = vmatmul.bf16.vlgmr.msrb.gmra.mxu0 %v1450_v0 }
  0x92   : > { %1877 = vmatpush.bf16.msra.mxu0 %v5063_v2  ;;  %1819 = vmatmul.bf16.vlgmr.msrb.gmra.mxu1 %v1451_v5  ;;  %v4232_v2 = vld [vmem:[%s5983_s13 + $0x20] sm:$0x77] }
  0x93   : > { %1890 = vmatpush.bf16.msra.mxu1 %v5066_v3  ;;  %1859 = vmatmul.bf16.vlgmr.msrb.gmra.mxu2 %v1839_v1  ;;  %v4233_v3 = vld [vmem:[%s5983_s13 + $0x28] sm:$0x77] }
  0x94   : > { %1903 = vmatpush.bf16.msra.mxu2 %v5183_v38  ;;  %1872 = vmatmul.bf16.vlgmr.msrb.gmra.mxu3 %v1840_v4  ;;  %v1837_v8 = vunpack.c.l.b16 %v4233_v3  ;;  %v1838_v9 = vunpack.c.h.b16 %v4233_v3 }
  0x95   : > { %1916 = vmatpush.bf16.msra.mxu3 %v5186_v39 }
  0x96   : > { %1878 = vmatpush.bf16.msra.mxu0 %v5079_v6  ;;  %v1835_v6 = vunpack.c.l.b16 %v4232_v2  ;;  %v1843_v12 = vpack.c.b16 %v1837_v8, %v1837_v8  ;;  %v1844_v13 = vpack.c.b16 %v1838_v9, %v1838_v9 }
  0x97   : > { %1891 = vmatpush.bf16.msra.mxu1 %v5082_v7  ;;  %v1836_v7 = vunpack.c.h.b16 %v4232_v2 }
  0x98   : > { %1904 = vmatpush.bf16.msra.mxu2 %v5195_v44 }
  0x99   : > { %1917 = vmatpush.bf16.msra.mxu3 %v5198_v45 }
  0x9a   : > { %1879 = vmatpush.bf16.msra.mxu0 %v5095_v10  ;;  %v1841_v10 = vpack.c.b16 %v1835_v6, %v1835_v6 }
  0x9b   : > { %1892 = vmatpush.bf16.msra.mxu1 %v5098_v11  ;;  %v1842_v11 = vpack.c.b16 %v1836_v7, %v1836_v7 }
  0x9c   : > { %1905 = vmatpush.bf16.msra.mxu2 %v4505_v46 }
  0x9d   : > { %1918 = vmatpush.bf16.msra.mxu3 %v4513_v47 }
  0x9e   : > { %1880 = vmatpush.bf16.msra.mxu0 %v5111_v14 }
  0x9f   : > { %1893 = vmatpush.bf16.msra.mxu1 %v5114_v15 }
  0xa0   : > { %1906 = vmatpush.bf16.msra.mxu2 %v4504_v48 }
  0xa1   : > { %1919 = vmatpush.bf16.msra.mxu3 %v4512_v49 }
  0xa2   : > { %1881 = vmatpush.bf16.msra.mxu0 %v5127_v18 }
  0xa3   : > { %1894 = vmatpush.bf16.msra.mxu1 %v5130_v19 }
  0xa4   : > { %1907 = vmatpush.bf16.msra.mxu2 %v4503_v50 }
  0xa5   : > { %1920 = vmatpush.bf16.msra.mxu3 %v4511_v51 }
  0xa6   : > { %1882 = vmatpush.bf16.msra.mxu0 %v5143_v22 }
  0xa7   : > { %1895 = vmatpush.bf16.msra.mxu1 %v5146_v23 }
  0xa8   : > { %1908 = vmatpush.bf16.msra.mxu2 %v4502_v52 }
  0xa9   : > { %1921 = vmatpush.bf16.msra.mxu3 %v4510_v53 }
  0xaa   : > { %1883 = vmatpush.bf16.msra.mxu0 %v5157_v26 }
  0xab   : > { %1896 = vmatpush.bf16.msra.mxu1 %v5162_v27 }
  0xac   : > { %1909 = vmatpush.bf16.msra.mxu2 %v4501_v54 }
  0xad   : > { %1922 = vmatpush.bf16.msra.mxu3 %v4509_v55 }
  0xae   : > { %1884 = vmatpush.bf16.msra.mxu0 %v5177_v34 }
  0xaf   : > { %1897 = vmatpush.bf16.msra.mxu1 %v5180_v35 }
  0xb0   : > { %1910 = vmatpush.bf16.msra.mxu2 %v4500_v58 }
  0xb1   : > { %1923 = vmatpush.bf16.msra.mxu3 %v4508_v59  ;;  %1885 = vmatmul.bf16.vlgmr.msra.gmra.mxu0 %v1841_v10 }
  0xb2   : > { %1898 = vmatmul.bf16.vlgmr.msra.gmra.mxu1 %v1842_v11 }
  0xb3   : > { %1911 = vmatmul.bf16.vlgmr.msra.gmra.mxu2 %v1843_v12 }
  0xb4   : > { %1924 = vmatmul.bf16.vlgmr.msra.gmra.mxu3 %v1844_v13 }
  0xee   : > { %v1755_v14 = vpop.f32.mrf.mxu0 }
  0xef   : > { %v1768_v15 = vpop.f32.mrf.mxu1  ;;  %v1756_v22 = vadd.f32 %v1755_v14, %v1433_v20 }
  0xf1   : > { %v1769_v24 = vadd.f32 %v1768_v15, %v1756_v22 }
  0xf6   : > { %v1781_v16 = vpop.f32.mrf.mxu2  ;;  %v1757_v18 = vpop.f32.mrf.mxu0 }
  0xf7   : > { %v1794_v17 = vpop.f32.mrf.mxu3  ;;  %v1770_v19 = vpop.f32.mrf.mxu1  ;;  %v1782_v25 = vadd.f32 %v1781_v16, %v1769_v24 }
  0xf9   : > { %v1795_v26 = vadd.f32 %v1794_v17, %v1782_v25 }
  0xfe   : > { %v1783_v21 = vpop.f32.mrf.mxu2 }
  0xff   : > { %v1796_v23 = vpop.f32.mrf.mxu3 }
 0x10e   : > { %v1807_v27 = vpop.f32.mrf.mxu0 }
 0x10f   : > { %v1808_v28 = vadd.f32 %v1807_v27, %v1795_v26  ;;  %v1820_v29 = vpop.f32.mrf.mxu1 }
 0x111   : > { %v1821_v30 = vadd.f32 %v1820_v29, %v1808_v28 }
 0x113   : > { %1825 = vst.msk [vmem:[#allocation2] sm:$0x1f] %vm1824_vm0, %v1821_v30 }
 0x116   : > { %v1860_v31 = vpop.f32.mrf.mxu2  ;;  %v1809_v33 = vpop.f32.mrf.mxu0 }
 0x117   : > { %v1873_v32 = vpop.f32.mrf.mxu3  ;;  %v1822_v34 = vpop.f32.mrf.mxu1  ;;  %v1861_v37 = vadd.f32 %v1860_v31, %v1433_v20 }
 0x119   : > { %v1874_v38 = vadd.f32 %v1873_v32, %v1861_v37 }
 0x11e   : > { %v1862_v35 = vpop.f32.mrf.mxu2 }
 0x11f   : > { %v1875_v36 = vpop.f32.mrf.mxu3 }
 0x12e   : > { %v1886_v39 = vpop.f32.mrf.mxu0 }
 0x12f   : > { %v1899_v40 = vpop.f32.mrf.mxu1  ;;  %v1887_v41 = vadd.f32 %v1886_v39, %v1874_v38 }
 0x131   : > { %v1900_v42 = vadd.f32 %v1899_v40, %v1887_v41 }
 0x136   : > { %v1912_v43 = vpop.f32.mrf.mxu2  ;;  %v1888_v46 = vpop.f32.mrf.mxu0 }
 0x137   : > { %v1925_v44 = vpop.f32.mrf.mxu3  ;;  %v1913_v45 = vadd.f32 %v1912_v43, %v1900_v42  ;;  %v1901_v47 = vpop.f32.mrf.mxu1 }
 0x139   : > { %v1926_v48 = vadd.f32 %v1925_v44, %v1913_v45 }
 0x13b   : > { %1930 = vst.msk [vmem:[#allocation2 + $0x8] sm:$0x1f] %vm1824_vm0, %v1926_v48 }
 0x13e   : > { %v1914_v49 = vpop.f32.mrf.mxu2 }
 0x13f   : > { %v1927_v50 = vpop.f32.mrf.mxu3 }
 0x140 PF: > { %v5257_v51 = vld [vmem:[#allocation2] sm:$0x1f]  ;;  %vm1996_vm1 = vcmask 520192   ;;  %s5985_s4 = sld [smem:[#allocation13_spill]]  ;;  %v4742_v53 = vmov 64.0   ;;  %vm2080_vm6 = vcmask 523264   ;;  %s6006_s17 = scalar_lea.vmem %s5889_s10, %s4939_s21 }
 0x141   : > { %v1997_v52 = vsel %vm1996_vm1, %v5257_v51, 0.0  ;;  %4624 = vrcp.f32 %v4742_v53  ;;  %s5987_s27 = sld [smem:[#allocation24_spill]]  ;;  %vm2152_vm7 = vcmask 1041408   ;;  %vm2153_vm8 = vcmask 1042432   ;;  %s4744_s18 = smov 112  }
 0x142   : > { %1998 = vadd.xlane.f32.xlu0 %v1997_v52  ;;  %s5989_s3 = sld [smem:[#allocation25_spill]]  ;;  %v4743_v44 = vmov 65535   ;;  %s4745_s25 = smov 48   ;;  %vm2114_vm9 = vcmask 130048   ;;  %vm2134_vm10 = vcmask 36864   ;;  %vm2148_vm11 = vcmask 39936  }
 0x143   : > { %s5991_s19 = sld [smem:[#allocation27_spill]]  ;;  %v2154_v45 = vsel %vm2152_vm7, 4294967295, %v4743_v44  ;;  %s4746_s13 = smov 64   ;;  %vm2173_vm12 = vcmask 124928   ;;  %vm2174_vm13 = vsmask.f32 2304 }
 0x144   : > { %v5338_v50 = vsel %vm2153_vm8, %v2154_v45, 0  ;;  %s4747_s24 = smov 96   ;;  %s4749_s1 = smov 32   ;;  %vm5363_vm14 = vmand %vm2173_vm12, %vm2174_vm13  ;;  %vm2241_vm15 = vcmask 256128  }
 0x145   : > { %s4750_s22 = smov 16   ;;  %vm5399_vm0 = vmand %vm2241_vm15, %vm2174_vm13 }
 0x146   : > { %v4260_v1 = vld [vmem:[%s5985_s4 + $0x30] sm:$0xf]  ;;  %v4523_v4 = vld [vmem:[%s5985_s4 + $0x34] sm:$0xf0]  ;;  %v4522_v5 = vld [vmem:[%s5985_s4 + $0x34] sm:$0xf] }
 0x147   : > { %v4625_v54 = vpop.eup %4624  ;;  %v5269_v2 = vor.u32 %v4523_v4, %v4260_v1  ;;  %v4262_v3 = vld [vmem:[%s5985_s4 + $0x38] sm:$0xf0]  ;;  %v4252_v7 = vld [vmem:[%s5985_s4 + $0x20] sm:$0xf]  ;;  %v4521_v8 = vld [vmem:[%s5985_s4 + $0x24] sm:$0xf0]  ;;  %s5988_s11 = scalar_lea.vmem %s5987_s27, %s4939_s21 }
 0x148   : > { %v2001_v55 = vmul.f32 64.0, %v4625_v54  ;;  %vm2005_vm2 = vweird.f32 %v4625_v54  ;;  %v5272_v6 = vor.u32 %v4522_v5, %v4262_v3  ;;  %v4520_v9 = vld [vmem:[%s5985_s4 + $0x24] sm:$0xf]  ;;  %v5279_v10 = vor.u32 %v4521_v8, %v4252_v7  ;;  %v4254_v11 = vld [vmem:[%s5985_s4 + $0x28] sm:$0xf0]  ;;  %s5990_s28 = scalar_lea.vmem %s5989_s3, %s4939_s21  ;;  %s6004_s3 = scalar_lea.vmem %s5888_s9, %s4939_s21 }
 0x149   : > { %2088 = vmatpush.bf16.msra.mxu0 %v5269_v2  ;;  %v5282_v12 = vor.u32 %v4520_v9, %v4254_v11  ;;  %v4244_v13 = vld [vmem:[%s5985_s4 + $0x10] sm:$0xf]  ;;  %v4519_v14 = vld [vmem:[%s5985_s4 + $0x14] sm:$0xf0]  ;;  %v4518_v15 = vld [vmem:[%s5985_s4 + $0x14] sm:$0xf]  ;;  %s5992_s5 = scalar_lea.vmem %s5991_s19, %s4961_s2 }
 0x14a   : > { %v2002_v56 = vsub.f32 1.0, %v2001_v55  ;;  %2101 = vmatpush.bf16.msra.mxu1 %v5272_v6  ;;  %v5289_v16 = vor.u32 %v4519_v14, %v4244_v13  ;;  %v4246_v17 = vld [vmem:[%s5985_s4 + $0x18] sm:$0xf0]  ;;  %v4236_v18 = vld [vmem:[%s5985_s4] sm:$0xf] }
 0x14b   : > { %v4517_v19 = vld [vmem:[%s5985_s4 + $0x4] sm:$0xf0]  ;;  %v5294_v20 = vor.u32 %v4518_v15, %v4246_v17  ;;  %v4516_v21 = vld [vmem:[%s5985_s4 + $0x4] sm:$0xf]  ;;  %v4238_v22 = vld [vmem:[%s5985_s4 + $0x8] sm:$0xf0] }
 0x14c   : > { %v2003_v57 = vmul.f32 %v4625_v54, %v2002_v56  ;;  %v5299_v23 = vor.u32 %v4517_v19, %v4236_v18  ;;  %v5302_v24 = vor.u32 %v4516_v21, %v4238_v22  ;;  %v5312_v34 = vld [vmem:[%s5988_s11] ss:$0 sm:$0xff]  ;;  %s4748_s4 = smov 80   ;;  %s6001_s11 = sld [smem:[#allocation29_spill]] }
 0x14d   : > { %2089 = vmatpush.bf16.msra.mxu0 %v5279_v10  ;;  %v5319_v37 = vld [vmem:[%s5990_s28] ss:$0 sm:$0xff] }
 0x14e   : > { %v2004_v58 = vadd.f32 %v4625_v54, %v2003_v57  ;;  %2102 = vmatpush.bf16.msra.mxu1 %v5282_v12  ;;  %v5330_v41 = vld [vmem:[%s5992_s5] sm:$0x3] }
 0x14f   : > { %v2036_v42 = vperm.slane %v5330_v41, 0  ;;  %v2037_v43 = vperm.slane %v5330_v41, 1 }
 0x150   : > { %v5261_v59 = vsel %vm2005_vm2, %v4625_v54, %v2004_v58  ;;  %vm2307_vm2 = vcmask 387328  }
 0x151   : > { %5986 = vst [vmem:[#allocation16_spill] sm:$0xff] %v5261_v59  ;;  %2090 = vmatpush.bf16.msra.mxu0 %v5289_v16 }
 0x152   : > { %2103 = vmatpush.bf16.msra.mxu1 %v5294_v20  ;;  %s6002_s12 = scalar_lea.vmem %s6001_s11, %s4939_s21 }
 0x155   : > { %2091 = vmatpush.bf16.msra.mxu0 %v5299_v23 }
 0x156   : > { %2104 = vmatpush.bf16.msra.mxu1 %v5302_v24 }
 0x1b5   : > { %v1999_v60 = vpop.xlane.xlu0 %1998 }
 0x1b6   : > { %v2007_v61 = vmul.f32 %v5261_v59, %v1999_v60 }
 0x1b8   : > { %v2008_v62 = vsub.f32 %v5257_v51, %v2007_v61 }
 0x1ba   : > { %v2009_v63 = vmul.f32 %v2008_v62, %v2008_v62 }
 0x1bc   : > { %v2010_v0 = vsel %vm1996_vm1, %v2009_v63, 0.0 }
 0x1bd   : > { %2011 = vadd.xlane.f32.xlu0 %v2010_v0 }
 0x230   : > { %v2012_v25 = vpop.xlane.xlu0 %2011 }
 0x231   : > { %v2013_v26 = vmul.f32 %v2012_v25, %v5261_v59 }
 0x233   : > { %v2014_v27 = vadd.f32 1e-06, %v2013_v26 }
 0x235   : > { %4626 = vrsqrt.f32 %v2014_v27  ;;  %vm2021_vm4 = vweird.f32 %v2014_v27 }
 0x23b   : > { %v4627_v28 = vpop.eup %4626 }
 0x23c   : > { %v2016_v29 = vmul.f32 %v4627_v28, %v2014_v27  ;;  %vm2022_vm3 = vweird.f32 %v4627_v28  ;;  %v2176_v27 = vld [vmem:[#allocation3] sm:$0x7] }
 0x23d   : > { %vm2023_vm5 = vmor %vm2021_vm4, %vm2022_vm3  ;;  %vm2373_vm4 = vcmask 518528  }
 0x23e   : > { %v2017_v30 = vmul.f32 %v4627_v28, %v2016_v29  ;;  %vm5418_vm3 = vmand %vm2307_vm2, %vm2174_vm13 }
 0x240   : > { %v2018_v31 = vmul.f32 0.5, %v2017_v30 }
 0x242   : > { %v2019_v32 = vsub.f32 1.5, %v2018_v31 }
 0x244   : > { %v2020_v33 = vmul.f32 %v4627_v28, %v2019_v32 }
 0x246   : > { %v2024_v35 = vsel %vm2023_vm5, %v4627_v28, %v2020_v33  ;;  %vm5425_vm5 = vmand %vm2373_vm4, %vm2174_vm13 }
 0x247   : > { %v2025_v36 = vmul.f32 %v2024_v35, %v2008_v62 }
 0x249   : > { %v2029_v38 = vmul.f32 %v5312_v34, %v2025_v36 }
 0x24b   : > { %v2033_v39 = vadd.f32 %v5319_v37, %v2029_v38 }
 0x24d   : > { %v2034_v40 = vpack.c.bf16 %v2033_v39, %v2033_v39 }
 0x24f   : > { %4266 = vmatmul.msk.bf16.vlgmr.msra.gmra.mxu0 %vm2080_vm6, %v2034_v40  ;;  %4267 = vmatmul.msk.bf16.vlgmr.msra.gmra.mxu1 %vm2080_vm6, %v2034_v40 }
 0x2cc   : > { %v2093_v46 = vpop.f32.mrf.mxu0  ;;  %v2106_v47 = vpop.f32.mrf.mxu1 }
 0x2cd   : > { %v2094_v48 = vadd.f32 %v2093_v46, %v2036_v42  ;;  %v2107_v49 = vadd.f32 %v2106_v47, %v2037_v43 }
 0x2cf   : > { %v2110_v52 = vpack.c.bf16 %v2094_v48, %v2094_v48  ;;  %v5340_v53 = vpack.c.bf16 %v2107_v49, %v2107_v49 }
 0x2d1   : > { %2179 = vrot.lane.b32.xlu0 %v2110_v52, %s4744_s18  ;;  %2181 = vrot.lane.b32.xlu2 %v2110_v52, %s4745_s25  ;;  %v2157_v54 = vand.u32 %v5338_v50, %v5340_v53 }
 0x2d2   : > { %2112 = vrot.lane.b32.xlu1 %v2110_v52, %s4746_s13 }
 0x2d3   : > { %2166 = vmatpush.bf16.msra.mxu3 %v2157_v54 }
 0x2d4   : > { %v2095_v55 = vpop.f32.mrf.mxu0  ;;  %v2108_v56 = vpop.f32.mrf.mxu1 }
 0x2d9   : > { %2246 = vrot.lane.b32.xlu0 %v2110_v52, %s4747_s24 }
 0x2e1   : > { %2312 = vrot.lane.b32.xlu0 %v2110_v52, %s4748_s4 }
 0x32b   : > { %v2182_v57 = vpop.permute.xlu2 %2181 }
 0x32c   : > { %v2187_v58 = vsel %vm2114_vm9, %v2182_v57, 0 }
 0x32d   : > { %2196 = vmatpush.bf16.xpose.msrb.mxu3 %v2187_v58 }
 0x343   : > { %v2180_v18 = vpop.permute.xlu0 %2179 }
 0x344   : > { %v2113_v60 = vpop.permute.xlu1 %2112 }
 0x345   : > { %v2119_v61 = vsel %vm2114_vm9, %v2113_v60, 0 }
 0x346   : > { %2128 = vmatpush.bf16.xpose.msra.mxu2 %v2119_v61 }
 0x34b   : > { %v2247_v21 = vpop.permute.xlu0 %2246 }
 0x34d   : > { %4268 = vmatmul.msk.bf16.vlgmr.msra.gmra.mxu2 %vm2114_vm9, %v2110_v52 }
 0x353   : > { %v2313_v22 = vpop.permute.xlu0 %2312 }
 0x3d0   : > { %v2130_v62 = vpop.f32.mrf.mxu2 }
 0x3d1   : > { %v2135_v63 = vsel %vm2134_vm10, %v2130_v62, -inf }
 0x3d2   : > { %2136 = vmax.xlane.f32.xlu1 %v2135_v63 }
 0x3d8   : > { %v2132_v0 = vpop.f32.mrf.mxu2 }
 0x445   : > { %v2137_v1 = vpop.xlane.xlu1 %2136 }
 0x446   : > { %v2138_v4 = vsub.f32 %v2130_v62, %v2137_v1 }
 0x448   : > { %v2139_v5 = vmul.f32 1.442695, %v2138_v4 }
 0x44a   : > { %4628 = vpow2.f32 %v2139_v5 }
 0x450   : > { %v4629_v3 = vpop.eup %4628 }
 0x451   : > { %v2141_v7 = vsel %vm2134_vm10, %v4629_v3, 0.0 }
 0x452   : > { %2142 = vadd.xlane.f32.xlu2 %v2141_v7 }
 0x46a   : > { %2248 = vrot.lane.b32.xlu2 %v2110_v52, %s4749_s1 }
 0x472   : > { %2314 = vrot.lane.b32.xlu2 %v2110_v52, %s4750_s22 }
 0x4c5   : > { %v2143_v8 = vpop.xlane.xlu2 %2142 }
 0x4c6   : > { %4630 = vrcp.f32 %v2143_v8 }
 0x4cc   : > { %v4631_v9 = vpop.eup %4630 }
 0x4cd   : > { %v2145_v11 = vmul.f32 %v4631_v9, %v4629_v3  ;;  %v2249_v13 = vpop.permute.xlu2 %2248 }
 0x4ce   : > { %v2254_v15 = vsel %vm2114_vm9, %v2249_v13, 0 }
 0x4cf   : > { %v2146_v14 = vpack.c.bf16 %v2145_v11, %v2145_v11 }
 0x4d1   : > { %4269 = vmatmul.msk.bf16.vlgmr.msra.gmra.mxu3 %vm2148_vm11, %v2146_v14 }
 0x4d2   : > { %2263 = vmatpush.bf16.xpose.msra.mxu3 %v2254_v15 }
 0x4d5   : > { %v2315_v17 = vpop.permute.xlu2 %2314 }
 0x4d6   : > { %v2320_v19 = vsel %vm2114_vm9, %v2315_v17, 0 }
 0x4e1   : > { %4270 = vmatmul.msk.bf16.vlgmr.msrb.gmra.mxu3 %vm2114_vm9, %v2180_v18 }
 0x4e2   : > { %2329 = vmatpush.bf16.xpose.msrb.mxu3 %v2320_v19 }
 0x4f1   : > { %4272 = vmatmul.msk.bf16.vlgmr.msra.gmra.mxu3 %vm2114_vm9, %v2247_v21 }
 0x501   : > { %4274 = vmatmul.msk.bf16.vlgmr.msrb.gmra.mxu3 %vm2114_vm9, %v2313_v22 }
 0x554   : > { %v2168_v25 = vpop.f32.mrf.mxu3 }
 0x555   : > { %v2172_v28 = vpack.c.bf16 %v2168_v25, %v2168_v25 }
 0x557   : > { %v2177_v29 = vsel %vm5363_vm14, %v2172_v28, %v2176_v27 }
 0x558   : > { %2178 = vst [vmem:[#allocation3] sm:$0x7] %v2177_v29 }
 0x55c   : > { %v2170_v30 = vpop.f32.mrf.mxu3 }
 0x564   : > { %v2198_v31 = vpop.f32.mrf.mxu3 }
 0x565   : > { %v2202_v32 = vsel %vm2134_vm10, %v2198_v31, -inf }
 0x566   : > { %2203 = vmax.xlane.f32.xlu2 %v2202_v32 }
 0x56c   : > { %v2200_v33 = vpop.f32.mrf.mxu3 }
 0x574   : > { %v2265_v35 = vpop.f32.mrf.mxu3 }
 0x575   : > { %v2269_v36 = vsel %vm2134_vm10, %v2265_v35, -inf }
 0x576   : > { %2270 = vmax.xlane.f32.xlu1 %v2269_v36  ;;  %v5391_v36 = vld [vmem:[%s4984_s20 + $0x18] sm:$0xff] }
 0x577   : > { %2410 = vmatpush.bf16.msrb.mxu0 %v5391_v36 }
 0x57c   : > { %v2267_v38 = vpop.f32.mrf.mxu3 }
 0x57d   : > { %v5395_v38 = vld [vmem:[%s4984_s20 + $0x10] sm:$0xff] }
 0x57e   : > { %2411 = vmatpush.bf16.msrb.mxu0 %v5395_v38 }
 0x584   : > { %v2331_v39 = vpop.f32.mrf.mxu3 }
 0x585   : > { %v2335_v40 = vsel %vm2134_vm10, %v2331_v39, -inf }
 0x586   : > { %2336 = vmax.xlane.f32.xlu0 %v2335_v40  ;;  %v2243_v40 = vld [vmem:[#allocation3] sm:$0x7] }
 0x58c   : > { %v2333_v44 = vpop.f32.mrf.mxu3 }
 0x58f   : > { %2215 = vrot.lane.b32.xlu1 %v5340_v53, %s4744_s18 }
 0x5d9   : > { %v2204_v45 = vpop.xlane.xlu2 %2203 }
 0x5da   : > { %v2205_v46 = vsub.f32 %v2198_v31, %v2204_v45 }
 0x5dc   : > { %v2206_v47 = vmul.f32 1.442695, %v2205_v46  ;;  %v5406_v46 = vld [vmem:[%s4984_s20 + $0x8] sm:$0xff] }
 0x5dd   : > { %2412 = vmatpush.bf16.msrb.mxu0 %v5406_v46 }
 0x5de   : > { %4632 = vpow2.f32 %v2206_v47  ;;  %v5410_v47 = vld [vmem:[%s4984_s20] sm:$0xff]  ;;  %s6008_s20 = sld [smem:[#allocation31_spill]] }
 0x5e1   : > { %2413 = vmatpush.bf16.msrb.mxu0 %v5410_v47 }
 0x5e4   : > { %v4633_v48 = vpop.eup %4632  ;;  %s6009_s27 = scalar_lea.vmem %s6008_s20, %s4961_s2 }
 0x5e5   : > { %v2208_v49 = vsel %vm2134_vm10, %v4633_v48, 0.0 }
 0x5e6   : > { %2209 = vadd.xlane.f32.xlu1 %v2208_v49 }
 0x5e9   : > { %v2271_v52 = vpop.xlane.xlu1 %2270 }
 0x5ea   : > { %v2272_v54 = vsub.f32 %v2265_v35, %v2271_v52 }
 0x5ec   : > { %v2273_v55 = vmul.f32 1.442695, %v2272_v54 }
 0x5ee   : > { %4634 = vpow2.f32 %v2273_v55 }
 0x5f4   : > { %v4635_v56 = vpop.eup %4634 }
 0x5f5   : > { %v2275_v57 = vsel %vm2134_vm10, %v4635_v56, 0.0 }
 0x5f6   : > { %2276 = vadd.xlane.f32.xlu2 %v2275_v57 }
 0x5f9   : > { %v2337_v58 = vpop.xlane.xlu0 %2336 }
 0x5fa   : > { %v2338_v60 = vsub.f32 %v2331_v39, %v2337_v58 }
 0x5fc   : > { %v2339_v61 = vmul.f32 1.442695, %v2338_v60 }
 0x5fe   : > { %4636 = vpow2.f32 %v2339_v61 }
 0x5ff   : > { %2281 = vrot.lane.b32.xlu1 %v5340_v53, %s4747_s24 }
 0x601   : > { %v2216_v62 = vpop.permute.xlu1 %2215 }
 0x602   : > { %v2221_v63 = vand.u32 %v2216_v62, %v5338_v50 }
 0x604   : > { %v4637_v0 = vpop.eup %4636  ;;  %2230 = vmatpush.bf16.msrb.mxu2 %v2221_v63 }
 0x605   : > { %v2341_v1 = vsel %vm2134_vm10, %v4637_v0, 0.0 }
 0x606   : > { %2342 = vadd.xlane.f32.xlu0 %v2341_v1 }
 0x60e   : > { %2347 = vrot.lane.b32.xlu2 %v5340_v53, %s4748_s4 }
 0x659   : > { %v2210_v4 = vpop.xlane.xlu1 %2209 }
 0x65a   : > { %4638 = vrcp.f32 %v2210_v4 }
 0x660   : > { %v4639_v5 = vpop.eup %4638 }
 0x661   : > { %v2212_v3 = vmul.f32 %v4639_v5, %v4633_v48  ;;  %v5413_v48 = vld [vmem:[#allocation2 + $0x8] sm:$0x1f] }
 0x662   : > { %v2740_v49 = vsel %vm1996_vm1, %v5413_v48, 0.0 }
 0x663   : > { %v2213_v7 = vpack.c.bf16 %v2212_v3, %v2212_v3  ;;  %2741 = vadd.xlane.f32.xlu2 %v2740_v49 }
 0x665   : > { %4271 = vmatmul.msk.bf16.vlgmr.msrb.gmra.mxu2 %vm2148_vm11, %v2213_v7 }
 0x669   : > { %v2277_v8 = vpop.xlane.xlu2 %2276 }
 0x66a   : > { %4640 = vrcp.f32 %v2277_v8 }
 0x670   : > { %v4641_v9 = vpop.eup %4640 }
 0x671   : > { %v2279_v11 = vmul.f32 %v4641_v9, %v4635_v56  ;;  %v2282_v13 = vpop.permute.xlu1 %2281  ;;  %v2348_v14 = vpop.permute.xlu2 %2347 }
 0x672   : > { %v2287_v15 = vand.u32 %v2282_v13, %v5338_v50  ;;  %v2353_v17 = vand.u32 %v2348_v14, %v5338_v50 }
 0x673   : > { %v2280_v18 = vpack.c.bf16 %v2279_v11, %v2279_v11 }
 0x674   : > { %2296 = vmatpush.bf16.msra.mxu2 %v2287_v15 }
 0x677   : > { %4273 = vmatmul.msk.bf16.vlgmr.msra.gmra.mxu2 %vm2148_vm11, %v2280_v18 }
 0x678   : > { %2362 = vmatpush.bf16.msrb.mxu2 %v2353_v17 }
 0x679   : > { %v2343_v53 = vpop.xlane.xlu0 %2342 }
 0x67a   : > { %4642 = vrcp.f32 %v2343_v53  ;;  %v4319_v53 = vld [vmem:[%s4989_s8 + $0x30] sm:$0xf] }
 0x680   : > { %v4643_v19 = vpop.eup %4642 }
 0x681   : > { %v2345_v21 = vmul.f32 %v4643_v19, %v4637_v0  ;;  %v5437_v0 = vld [vmem:[%s6002_s12] ss:$0 sm:$0xff]  ;;  %v4535_v19 = vld [vmem:[%s4989_s8 + $0x34] sm:$0xf0] }
 0x682   : > { %6003 = vst [vmem:[#allocation17_spill] sm:$0xff] %v5437_v0 }
 0x683   : > { %v2346_v22 = vpack.c.bf16 %v2345_v21, %v2345_v21  ;;  %v4534_v21 = vld [vmem:[%s4989_s8 + $0x34] sm:$0xf] }
 0x687   : > { %4275 = vmatmul.msk.bf16.vlgmr.msrb.gmra.mxu2 %vm2148_vm11, %v2346_v22  ;;  %v5462_v22 = vor.u32 %v4535_v19, %v4319_v53  ;;  %v5522_v53 = vld [vmem:[%s6006_s17] ss:$0 sm:$0xff] }
 0x688   : > { %6007 = vst [vmem:[#allocation19_spill] sm:$0xff] %v5522_v53 }
 0x689   : > { %2507 = vmatpush.bf16.msrb.mxu1 %v5462_v22 }
 0x6d6   : > { %v2742_v63 = vpop.xlane.xlu2 %2741 }
 0x6d7   : > { %v2743_v1 = vmul.f32 %v2742_v63, %v5261_v59 }
 0x6d9   : > { %v5445_v7 = vsub.f32 %v5413_v48, %v2743_v1 }
 0x6db   : > { %v2745_v9 = vmul.f32 %v5445_v7, %v5445_v7 }
 0x6dd   : > { %v2746_v13 = vsel %vm1996_vm1, %v2745_v9, 0.0 }
 0x6e8   : > { %v2232_v25 = vpop.f32.mrf.mxu2 }
 0x6e9   : > { %v2236_v27 = vpack.c.bf16 %v2232_v25, %v2232_v25  ;;  %v4321_v25 = vld [vmem:[%s4989_s8 + $0x38] sm:$0xf0] }
 0x6eb   : > { %2238 = vrot.lane.b32.xlu1 %v2236_v27, %s4750_s22  ;;  %v5465_v27 = vor.u32 %v4534_v21, %v4321_v25 }
 0x6ed   : > { %2520 = vmatpush.bf16.msra.mxu3 %v5465_v27 }
 0x6f0   : > { %v2234_v28 = vpop.f32.mrf.mxu2 }
 0x6f1   : > { %v4311_v28 = vld [vmem:[%s4989_s8 + $0x20] sm:$0xf] }
 0x6fa   : > { %v2298_v29 = vpop.f32.mrf.mxu2 }
 0x6fb   : > { %v2302_v30 = vpack.c.bf16 %v2298_v29, %v2298_v29  ;;  %v4533_v29 = vld [vmem:[%s4989_s8 + $0x24] sm:$0xf0] }
 0x6fd   : > { %2304 = vrot.lane.b32.xlu0 %v2302_v30, %s4749_s1  ;;  %v4532_v30 = vld [vmem:[%s4989_s8 + $0x24] sm:$0xf] }
 0x702   : > { %v2300_v31 = vpop.f32.mrf.mxu2 }
 0x703   : > { %v5472_v31 = vor.u32 %v4533_v29, %v4311_v28 }
 0x705   : > { %2508 = vmatpush.bf16.msrb.mxu1 %v5472_v31 }
 0x70a   : > { %v2364_v32 = vpop.f32.mrf.mxu2 }
 0x70b   : > { %v2368_v33 = vpack.c.bf16 %v2364_v32, %v2364_v32  ;;  %v4313_v32 = vld [vmem:[%s4989_s8 + $0x28] sm:$0xf0] }
 0x70d   : > { %2370 = vrot.lane.b32.xlu1 %v2368_v33, %s4745_s25  ;;  %v5475_v33 = vor.u32 %v4532_v30, %v4313_v32 }
 0x70f   : > { %2521 = vmatpush.bf16.msra.mxu3 %v5475_v33 }
 0x712   : > { %v2366_v35 = vpop.f32.mrf.mxu2 }
 0x75d   : > { %v2239_v44 = vpop.permute.xlu1 %2238 }
 0x75e   : > { %v2244_v45 = vsel %vm5399_vm0, %v2239_v44, %v2243_v40  ;;  %v4303_v40 = vld [vmem:[%s4989_s8 + $0x10] sm:$0xf]  ;;  %v4531_v44 = vld [vmem:[%s4989_s8 + $0x14] sm:$0xf0] }
 0x75f   : > { %2245 = vst [vmem:[#allocation3] sm:$0x7] %v2244_v45  ;;  %v4530_v45 = vld [vmem:[%s4989_s8 + $0x14] sm:$0xf]  ;;  %v5482_v49 = vor.u32 %v4531_v44, %v4303_v40  ;;  %v5538_v40 = vld [vmem:[%s6009_s27] sm:$0x3] }
 0x760   : > { %6010 = vst [vmem:[#allocation20_spill] sm:$0xff] %v5538_v40  ;;  %v5541_v44 = vld [vmem:[%s5012_s30 + $0x38] sm:$0xff] }
 0x761   : > { %2509 = vmatpush.bf16.msrb.mxu1 %v5482_v49  ;;  %2710 = vmatpush.bf16.msra.mxu2 %v5541_v44 }
 0x766   : > { %v2309_v54 = vld [vmem:[#allocation3] sm:$0x7] }
 0x76f   : > { %v2305_v55 = vpop.permute.xlu0 %2304 }
 0x770   : > { %v2310_v56 = vsel %vm5418_vm3, %v2305_v55, %v2309_v54  ;;  %v4305_v54 = vld [vmem:[%s4989_s8 + $0x18] sm:$0xf0]  ;;  %v4295_v55 = vld [vmem:[%s4989_s8] sm:$0xf] }
 0x771   : > { %2311 = vst [vmem:[#allocation3] sm:$0x7] %v2310_v56  ;;  %v4529_v56 = vld [vmem:[%s4989_s8 + $0x4] sm:$0xf0] }
 0x772   : > { %v5493_v63 = vor.u32 %v4529_v56, %v4295_v55  ;;  %v5914_v56 = vperm.slane %v5538_v40, 1 }
 0x774   : > { %2510 = vmatpush.bf16.msrb.mxu1 %v5493_v63 }
 0x778   : > { %v2375_v58 = vld [vmem:[#allocation3] sm:$0x7]  ;;  %2772 = vmatpush.bf16.msra.mxu1 %v5269_v2 }
 0x77c   : > { %2773 = vmatpush.bf16.msra.mxu1 %v5279_v10 }
 0x77f   : > { %v2371_v60 = vpop.permute.xlu1 %2370 }
 0x780   : > { %v2376_v61 = vsel %vm5425_vm5, %v2371_v60, %v2375_v58  ;;  %v5487_v58 = vor.u32 %v4530_v45, %v4305_v54  ;;  %v4528_v60 = vld [vmem:[%s4989_s8 + $0x4] sm:$0xf]  ;;  %2774 = vmatpush.bf16.msra.mxu1 %v5289_v16  ;;  %v5514_v16 = vld [vmem:[%s6004_s3] ss:$0 sm:$0xff]  ;;  %v5554_v54 = vld [vmem:[%s5012_s30 + $0x78] sm:$0xff] }
 0x781   : > { %2377 = vst [vmem:[#allocation3] sm:$0x7] %v2376_v61  ;;  %v4297_v61 = vld [vmem:[%s4989_s8 + $0x8] sm:$0xf0]  ;;  %2723 = vmatpush.bf16.msra.mxu0 %v5554_v54 }
 0x782   : > { %2522 = vmatpush.bf16.msra.mxu3 %v5487_v58  ;;  %v5496_v1 = vor.u32 %v4528_v60, %v4297_v61  ;;  %6005 = vst [vmem:[#allocation18_spill] sm:$0xff] %v5514_v16  ;;  %v5562_v60 = vld [vmem:[%s5012_s30 + $0x28] sm:$0xff] }
 0x784   : > { %2775 = vmatpush.bf16.msra.mxu1 %v5299_v23 }
 0x786   : > { %2523 = vmatpush.bf16.msra.mxu3 %v5496_v1 }
 0x788   : > { %v2378_v62 = vld [vmem:[#allocation3] sm:$0x7] }
 0x789   : > { %4292 = vmatmul.msk.bf16.vlgmr.msrb.gmra.mxu0 %vm2080_vm6, %v2378_v62 }
 0x78a   : > { %2785 = vmatpush.bf16.msrb.mxu3 %v5272_v6 }
 0x78e   : > { %2786 = vmatpush.bf16.msrb.mxu3 %v5282_v12 }
 0x792   : > { %2787 = vmatpush.bf16.msrb.mxu3 %v5294_v20 }
 0x796   : > { %2788 = vmatpush.bf16.msrb.mxu3 %v5302_v24 }
 0x806   : > { %v2415_v4 = vpop.f32.mrf.mxu0 }
 0x807   : > { %v2419_v5 = vadd.f32 %v2415_v4, %v5257_v51 }
 0x809   : > { %v5442_v3 = vadd.f32 %v5437_v0, %v2419_v5 }
 0x80b   : > { %v2424_v8 = vsel %vm1996_vm1, %v5442_v3, 0.0 }
 0x80c   : > { %2425 = vadd.xlane.f32.xlu1 %v2424_v8 }
 0x80e   : > { %v2417_v11 = vpop.f32.mrf.mxu0 }
 0x814   : > { %2747 = vadd.xlane.f32.xlu1 %v2746_v13 }
 0x87f   : > { %v2426_v51 = vpop.xlane.xlu1 %2425 }
 0x880   : > { %v2427_v14 = vmul.f32 %v2426_v51, %v5261_v59 }
 0x882   : > { %v5454_v15 = vsub.f32 %v5442_v3, %v2427_v14 }
 0x884   : > { %v2429_v17 = vmul.f32 %v5454_v15, %v5454_v15 }
 0x886   : > { %v2430_v18 = vsel %vm1996_vm1, %v2429_v17, 0.0 }
 0x887   : > { %2431 = vadd.xlane.f32.xlu0 %v2430_v18  ;;  %v2748_v35 = vpop.xlane.xlu1 %2747 }
 0x888   : > { %v2749_v62 = vmul.f32 %v2748_v35, %v5261_v59 }
 0x88a   : > { %v2750_v4 = vadd.f32 1e-06, %v2749_v62  ;;  %v5569_v62 = vld [vmem:[%s5012_s30 + $0x70] sm:$0xff] }
 0x88b   : > { %2724 = vmatpush.bf16.msra.mxu0 %v5569_v62 }
 0x88c   : > { %4644 = vrsqrt.f32 %v2750_v4  ;;  %vm2757_vm13 = vweird.f32 %v2750_v4 }
 0x892   : > { %v4645_v11 = vpop.eup %4644 }
 0x893   : > { %v2752_v13 = vmul.f32 %v4645_v11, %v2750_v4  ;;  %vm2758_vm15 = vweird.f32 %v4645_v11 }
 0x894   : > { %vm2759_vm2 = vmor %vm2757_vm13, %vm2758_vm15 }
 0x895   : > { %v2753_v51 = vmul.f32 %v4645_v11, %v2752_v13 }
 0x897   : > { %v2754_v17 = vmul.f32 0.5, %v2753_v51  ;;  %v5589_v51 = vld [vmem:[%s5012_s30 + $0x18] sm:$0xff] }
 0x899   : > { %v2755_v20 = vsub.f32 1.5, %v2754_v17 }
 0x89b   : > { %v2756_v21 = vmul.f32 %v4645_v11, %v2755_v20 }
 0x89d   : > { %v2760_v29 = vsel %vm2759_vm2, %v4645_v11, %v2756_v21  ;;  %v5609_v21 = vld [vmem:[%s5012_s30 + $0x58] sm:$0xff] }
 0x8fa   : > { %v2432_v5 = vpop.xlane.xlu0 %2431 }
 0x8fb   : > { %v2433_v8 = vmul.f32 %v2432_v5, %v5261_v59 }
 0x8fd   : > { %v2434_v9 = vadd.f32 1e-06, %v2433_v8 }
 0x8ff   : > { %4646 = vrsqrt.f32 %v2434_v9  ;;  %vm2441_vm8 = vweird.f32 %v2434_v9 }
 0x905   : > { %v4647_v2 = vpop.eup %4646 }
 0x906   : > { %v2436_v6 = vmul.f32 %v4647_v2, %v2434_v9  ;;  %vm2442_vm7 = vweird.f32 %v4647_v2  ;;  %v5578_v9 = vld [vmem:[%s5012_s30 + $0x20] sm:$0xff] }
 0x907   : > { %vm2443_vm12 = vmor %vm2441_vm8, %vm2442_vm7 }
 0x908   : > { %v2437_v10 = vmul.f32 %v4647_v2, %v2436_v6  ;;  %v5585_v6 = vld [vmem:[%s5012_s30 + $0x68] sm:$0xff] }
 0x909   : > { %2725 = vmatpush.bf16.msra.mxu0 %v5585_v6 }
 0x90a   : > { %v2438_v14 = vmul.f32 0.5, %v2437_v10 }
 0x90c   : > { %v2439_v12 = vsub.f32 1.5, %v2438_v14  ;;  %v5596_v14 = vld [vmem:[%s5012_s30 + $0x60] sm:$0xff] }
 0x90d   : > { %2726 = vmatpush.bf16.msra.mxu0 %v5596_v14 }
 0x90e   : > { %v2440_v18 = vmul.f32 %v4647_v2, %v2439_v12 }
 0x910   : > { %v2444_v23 = vsel %vm2443_vm12, %v4647_v2, %v2440_v18  ;;  %v5601_v18 = vld [vmem:[%s5012_s30 + $0x10] sm:$0xff] }
 0x911   : > { %v2445_v24 = vmul.f32 %v2444_v23, %v5454_v15  ;;  %v2761_v15 = vmul.f32 %v2760_v29, %v5445_v7  ;;  %v5915_v7 = vperm.slane %v5538_v40, 0  ;;  %2727 = vmatpush.bf16.msra.mxu0 %v5609_v21  ;;  %v5616_v29 = vld [vmem:[%s5012_s30 + $0x8] sm:$0xff] }
 0x913   : > { %v2449_v19 = vmul.f32 %v5514_v16, %v2445_v24  ;;  %v2762_v30 = vmul.f32 %v5312_v34, %v2761_v15  ;;  %v5546_v34 = vld [vmem:[%s5012_s30 + $0x30] sm:$0xff] }
 0x914   : > { %2711 = vmatpush.bf16.msra.mxu2 %v5546_v34 }
 0x915   : > { %v2453_v25 = vadd.f32 %v5522_v53, %v2449_v19  ;;  %v2763_v32 = vadd.f32 %v5319_v37, %v2762_v30 }
 0x917   : > { %v2454_v28 = vpack.c.bf16 %v2453_v25, %v2453_v25  ;;  %v2764_v35 = vpack.c.bf16 %v2763_v32, %v2763_v32 }
 0x918   : > { %2712 = vmatpush.bf16.msra.mxu2 %v5562_v60 }
 0x919   : > { %4325 = vmatmul.msk.bf16.vlgmr.msrb.gmra.mxu1 %vm2080_vm6, %v2454_v28  ;;  %4326 = vmatmul.msk.bf16.vlgmr.msra.gmra.mxu3 %vm2080_vm6, %v2454_v28 }
 0x91c   : > { %2713 = vmatpush.bf16.msra.mxu2 %v5578_v9 }
 0x920   : > { %2714 = vmatpush.bf16.msra.mxu2 %v5589_v51 }
 0x924   : > { %2715 = vmatpush.bf16.msra.mxu2 %v5601_v18 }
 0x928   : > { %2716 = vmatpush.bf16.msra.mxu2 %v5616_v29 }
 0x929   : > { %4391 = vmatmul.msk.bf16.vlgmr.msra.gmra.mxu1 %vm2080_vm6, %v2764_v35  ;;  %4392 = vmatmul.msk.bf16.vlgmr.msrb.gmra.mxu3 %vm2080_vm6, %v2764_v35 }
 0x996   : > { %v2512_v37 = vpop.f32.mrf.mxu1 }
 0x997   : > { %v5550_v45 = vadd.f32 %v2512_v37, %v5915_v7 }
 0x999   : > { %v5557_v55 = vmul.f32 0.70710677, %v5550_v45 }
 0x99b   : > { %v5565_v61 = vand.u32 2147483647, %v5557_v55 }
 0x99c   : > { %v2525_v4 = vpop.f32.mrf.mxu3 }
 0x99d   : > { %v2539_v5 = vmul.f32 0.3275911, %v5565_v61  ;;  %v5574_v8 = vadd.f32 %v2525_v4, %v5914_v56 }
 0x99e   : > { %v2514_v11 = vpop.f32.mrf.mxu1 }
 0x99f   : > { %v2541_v13 = vadd.f32 1.0, %v2539_v5  ;;  %v5581_v2 = vmul.f32 0.70710677, %v5574_v8  ;;  %v5632_v5 = vld [vmem:[%s5012_s30] sm:$0xff] }
 0x9a0   : > { %2717 = vmatpush.bf16.msra.mxu2 %v5632_v5 }
 0x9a1   : > { %4648 = vrcp.f32 %v2541_v13  ;;  %v5592_v10 = vand.u32 2147483647, %v5581_v2  ;;  %v2554_v30 = vand.u32 2147483648, %v2541_v13  ;;  %v2552_v35 = vand.u32 2147483647, %v2541_v13 }
 0x9a2   : > { %vm2548_vm7 = vweird.f32 %v2541_v13 }
 0x9a3   : > { %v2540_v17 = vmul.f32 0.3275911, %v5592_v10  ;;  %vm2553_vm12 = vcmp.eq.f32.partialorder %v2552_v35, 8.507059e+37  ;;  %v2592_v40 = vsub.f32 0.0, %v5592_v10 }
 0x9a4   : > { %v2527_v12 = vpop.f32.mrf.mxu3 }
 0x9a5   : > { %v5603_v20 = vadd.f32 1.0, %v2540_v17 }
 0x9a6   : > { %v2777_v23 = vpop.f32.mrf.mxu1 }
 0x9a7   : > { %v4649_v24 = vpop.eup %4648  ;;  %v2778_v19 = vadd.f32 %v2777_v23, %v2036_v42  ;;  %4650 = vrcp.f32 %v5603_v20  ;;  %v5623_v42 = vld [vmem:[%s5012_s30 + $0x50] sm:$0xff]  ;;  %v2555_v23 = vor.u32 1.1754944e-38, %v2554_v30  ;;  %vm2563_vm15 = vweird.f32 %v5603_v20 }
 0x9a8   : > { %v2544_v25 = vmul.f32 %v4649_v24, %v2541_v13  ;;  %vm2549_vm4 = vweird.f32 %v4649_v24  ;;  %2728 = vmatpush.bf16.msra.mxu0 %v5623_v42 }
 0x9a9   : > { %v5612_v28 = vpack.c.bf16 %v2778_v19, %v2778_v19  ;;  %vm2550_vm8 = vmor %vm2548_vm7, %vm2549_vm4  ;;  %vm2533_vm7 = vcmp.ge.f32.partialorder %v5557_v55, 0.0 }
 0x9aa   : > { %v2545_v15 = vsub.f32 1.0, %v2544_v25 }
 0x9ab   : > { %2853 = vrot.lane.b32.xlu1 %v5612_v28, %s4744_s18  ;;  %2855 = vrot.lane.b32.xlu0 %v5612_v28, %s4745_s25 }
 0x9ac   : > { %v2546_v32 = vmul.f32 %v4649_v24, %v2545_v15  ;;  %2796 = vrot.lane.b32.xlu2 %v5612_v28, %s4746_s13  ;;  %v2790_v37 = vpop.f32.mrf.mxu3  ;;  %v5638_v15 = vld [vmem:[%s5012_s30 + $0x48] sm:$0xff]  ;;  %s6011_s13 = scalar_lea.vmem %s5893_s14, %s4939_s21  ;;  %s6019_s21 = sld [smem:[#allocation4_spill]] }
 0x9ad   : > { %v2791_v4 = vadd.f32 %v2790_v37, %v2037_v43  ;;  %v4651_v11 = vpop.eup %4650  ;;  %v2591_v43 = vsub.f32 0.0, %v5565_v61  ;;  %2729 = vmatpush.bf16.msra.mxu0 %v5638_v15 }
 0x9ae   : > { %v2547_v17 = vadd.f32 %v4649_v24, %v2546_v32  ;;  %v2779_v12 = vpop.f32.mrf.mxu1  ;;  %v2559_v19 = vmul.f32 %v4651_v11, %v5603_v20  ;;  %v2569_v32 = vand.u32 2147483648, %v5603_v20  ;;  %vm2564_vm13 = vweird.f32 %v4651_v11 }
 0x9af   : > { %v5635_v25 = vpack.c.bf16 %v2791_v4, %v2791_v4  ;;  %v2567_v12 = vand.u32 2147483647, %v5603_v20  ;;  %vm2565_vm2 = vmor %vm2563_vm15, %vm2564_vm13 }
 0x9b0   : > { %v2551_v56 = vsel %vm2550_vm8, %v4649_v24, %v2547_v17  ;;  %v2560_v37 = vsub.f32 1.0, %v2559_v19  ;;  %v2593_v17 = vmul.f32 %v2591_v43, %v5565_v61  ;;  %v2594_v61 = vmul.f32 %v2592_v40, %v5592_v10 }
 0x9b1   : > { %v2556_v41 = vsel %vm2553_vm12, %v2555_v23, %v2551_v56  ;;  %v2834_v13 = vand.u32 %v5635_v25, %v5338_v50  ;;  %v5650_v56 = vld [vmem:[%s5012_s30 + $0x40] sm:$0xff]  ;;  %vm2568_vm4 = vcmp.eq.f32.partialorder %v2567_v12, 8.507059e+37  ;;  %v4751_v40 = vmov -1.0  }
 0x9b2   : > { %v2573_v30 = vmul.f32 1.0614054, %v2556_v41  ;;  %v2561_v4 = vmul.f32 %v4651_v11, %v2560_v37  ;;  %2730 = vmatpush.bf16.msra.mxu0 %v5650_v56  ;;  %v2570_v37 = vor.u32 1.1754944e-38, %v2569_v32  ;;  %v2595_v53 = vmul.f32 1.442695, %v2593_v17  ;;  %p4404_p8 = scmp.ne.s32.totalorder %s6019_s21, 1 }
 0x9b3   : > { %2843 = vmatpush.bf16.msra.mxu3 %v2834_v13  ;;  %2984 = vrot.lane.b32.xlu1 %v5612_v28, %s4750_s22  ;;  %v2535_v10 = vsel %vm2533_vm7, 1.0, %v4751_v40  ;;  %vm2534_vm8 = vcmp.ge.f32.partialorder %v5581_v2, 0.0  ;;  %s6025_s8 = sld [smem:[#allocation34_spill]] (!%p4404_p8) }
 0x9b4   : > { %v2575_v24 = vadd.f32 -1.4531521, %v2573_v30  ;;  %2920 = vrot.lane.b32.xlu0 %v5612_v28, %s4749_s1  ;;  %2918 = vrot.lane.b32.xlu2 %v5612_v28, %s4747_s24  ;;  %v2792_v35 = vpop.f32.mrf.mxu3  ;;  %v2562_v23 = vadd.f32 %v4651_v11, %v2561_v4  ;;  %4652 = vpow2.f32 %v2595_v53  ;;  %v2597_v4 = vmul.f32 1.442695, %v2594_v61  ;;  %s6027_s29 = sld [smem:[#allocation37_spill]] (!%p4404_p8) }
 0x9b6   : > { %v2577_v19 = vmul.f32 %v2575_v24, %v2556_v41  ;;  %v2566_v13 = vsel %vm2565_vm2, %v4651_v11, %v2562_v23  ;;  %4654 = vpow2.f32 %v2597_v4 }
 0x9b7   : > { %v2571_v7 = vsel %vm2568_vm4, %v2570_v37, %v2566_v13 }
 0x9b8   : > { %v2579_v30 = vadd.f32 1.4214138, %v2577_v19  ;;  %v2574_v16 = vmul.f32 1.0614054, %v2571_v7 }
 0x9b9   : > { %s6026_s0 = scalar_lea.vmem (!%p4404_p8), %s6025_s8, %s6044_s26 }
 0x9ba   : > { %v2581_v59 = vmul.f32 %v2579_v30, %v2556_v41  ;;  %v2576_v35 = vadd.f32 -1.4531521, %v2574_v16  ;;  %v4653_v23 = vpop.eup %4652  ;;  %v2529_v30 = vmul.f32 0.5, %v5550_v45  ;;  %s6028_s17 = scalar_lea.vmem (!%p4404_p8), %s6027_s29, %s6044_s26 }
 0x9bc   : > { %v2583_v0 = vadd.f32 -0.28449672, %v2581_v59  ;;  %2982 = vrot.lane.b32.xlu0 %v5612_v28, %s4748_s4  ;;  %v2578_v20 = vmul.f32 %v2576_v35, %v2571_v7 }
 0x9be   : > { %v2585_v43 = vmul.f32 %v2583_v0, %v2556_v41  ;;  %v2580_v32 = vadd.f32 1.4214138, %v2578_v20  ;;  %v4655_v0 = vpop.eup %4654 }
 0x9c0   : > { %v2587_v11 = vadd.f32 0.2548296, %v2585_v43  ;;  %v2582_v12 = vmul.f32 %v2580_v32, %v2571_v7  ;;  %v2536_v43 = vsel %vm2534_vm8, 1.0, %v4751_v40 }
 0x9c2   : > { %v2589_v24 = vmul.f32 %v2587_v11, %v2556_v41  ;;  %v2584_v19 = vadd.f32 -0.28449672, %v2582_v12  ;;  %v2530_v11 = vmul.f32 0.5, %v5574_v8 }
 0x9c4   : > { %v2599_v17 = vmul.f32 %v4653_v23, %v2589_v24  ;;  %v2586_v59 = vmul.f32 %v2584_v19, %v2571_v7 }
 0x9c6   : > { %v2601_v16 = vsub.f32 1.0, %v2599_v17  ;;  %v2588_v37 = vadd.f32 0.2548296, %v2586_v59 }
 0x9c8   : > { %v2603_v53 = vmul.f32 %v2601_v16, %v2535_v10  ;;  %v2590_v13 = vmul.f32 %v2588_v37, %v2571_v7 }
 0x9ca   : > { %v2605_v35 = vadd.f32 1.0, %v2603_v53  ;;  %v2600_v41 = vmul.f32 %v4655_v0, %v2590_v13 }
 0x9cc   : > { %v2607_v61 = vmul.f32 %v2605_v35, %v2529_v30  ;;  %v2602_v20 = vsub.f32 1.0, %v2600_v41 }
 0x9ce   : > { %v2609_v55 = vpack.c.bf16 %v2607_v61, %v2607_v61  ;;  %v2604_v32 = vmul.f32 %v2602_v20, %v2536_v43 }
 0x9d0   : > { %2718 = vmatmul.bf16.vlgmr.msra.gmra.mxu2 %v2609_v55  ;;  %v2606_v4 = vadd.f32 1.0, %v2604_v32 }
 0x9d2   : > { %v2608_v12 = vmul.f32 %v2606_v4, %v2530_v11 }
 0x9d4   : > { %v2610_v24 = vpack.c.bf16 %v2608_v12, %v2608_v12 }
 0x9d6   : > { %2731 = vmatmul.bf16.vlgmr.msra.gmra.mxu0 %v2610_v24 }
 0xa06   : > { %v2797_v7 = vpop.permute.xlu2 %2796 }
 0xa07   : > { %v2802_v45 = vsel %vm2114_vm9, %v2797_v7, 0 }
 0xa08   : > { %2811 = vmatpush.bf16.xpose.msrb.mxu1 %v2802_v45 }
 0xa0f   : > { %4393 = vmatmul.msk.bf16.vlgmr.msrb.gmra.mxu1 %vm2114_vm9, %v5612_v28  ;;  %v2919_v28 = vpop.permute.xlu2 %2918 }
 0xa1d   : > { %v2854_v2 = vpop.permute.xlu1 %2853  ;;  %v2856_v23 = vpop.permute.xlu0 %2855 }
 0xa1e   : > { %v2861_v19 = vsel %vm2114_vm9, %v2856_v23, 0 }
 0xa1f   : > { %2870 = vmatpush.bf16.xpose.msrb.mxu2 %v2861_v19 }
 0xa25   : > { %v2985_v17 = vpop.permute.xlu1 %2984 }
 0xa26   : > { %v2990_v59 = vsel %vm2114_vm9, %v2985_v17, 0  ;;  %v2921_v8 = vpop.permute.xlu0 %2920  ;;  %4395 = vmatmul.msk.bf16.vlgmr.msrb.gmra.mxu2 %vm2114_vm9, %v2854_v2 }
 0xa27   : > { %v2926_v16 = vsel %vm2114_vm9, %v2921_v8, 0  ;;  %2999 = vmatpush.bf16.xpose.msra.mxu2 %v2990_v59 }
 0xa28   : > { %2935 = vmatpush.bf16.xpose.msra.mxu1 %v2926_v16 }
 0xa2e   : > { %v2983_v10 = vpop.permute.xlu0 %2982 }
 0xa2f   : > { %3110 = vmatpush.bf16.msrb.mxu2 %v5465_v27  ;;  %4397 = vmatmul.msk.bf16.vlgmr.msra.gmra.mxu1 %vm2114_vm9, %v2919_v28 }
 0xa30   : > { %3054 = vmatpush.bf16.msrb.mxu1 %v5391_v36  ;;  %v5698_v36 = vld [vmem:[%s6011_s13] ss:$0 sm:$0xff] }
 0xa33   : > { %3111 = vmatpush.bf16.msrb.mxu2 %v5475_v33 }
 0xa34   : > { %3055 = vmatpush.bf16.msrb.mxu1 %v5395_v38 }
 0xa36   : > { %4399 = vmatmul.msk.bf16.vlgmr.msra.gmra.mxu2 %vm2114_vm9, %v2983_v10 }
 0xa37   : > { %3112 = vmatpush.bf16.msrb.mxu2 %v5487_v58 }
 0xa38   : > { %3056 = vmatpush.bf16.msrb.mxu1 %v5406_v46 }
 0xa3b   : > { %3113 = vmatpush.bf16.msrb.mxu2 %v5496_v1 }
 0xa3c   : > { %3057 = vmatpush.bf16.msrb.mxu1 %v5410_v47 }
 0xa40   : > { %3214 = vmatpush.bf16.msra.mxu1 %v5554_v54 }
 0xa44   : > { %3215 = vmatpush.bf16.msra.mxu1 %v5569_v62 }
 0xa48   : > { %3216 = vmatpush.bf16.msra.mxu1 %v5585_v6 }
 0xa4c   : > { %3217 = vmatpush.bf16.msra.mxu1 %v5596_v14 }
 0xa50   : > { %3218 = vmatpush.bf16.msra.mxu1 %v5609_v21 }
 0xa53   : > { %v2719_v38 = vpop.f32.mrf.mxu2  ;;  %v2732_v47 = vpop.f32.mrf.mxu0 }
 0xa54   : > { %3219 = vmatpush.bf16.msra.mxu1 %v5623_v42  ;;  %v2720_v46 = vadd.f32 %v5698_v36, %v2719_v38 }
 0xa56   : > { %v2733_v27 = vadd.f32 %v2732_v47, %v2720_v46 }
 0xa58   : > { %3220 = vmatpush.bf16.msra.mxu1 %v5638_v15  ;;  %v2736_v33 = vadd.f32 %v2733_v27, %v5442_v3 }
 0xa5a   : > { %2737 = vst.msk [vmem:[#allocation2] sm:$0x1f] %vm1996_vm1, %v2736_v33 }
 0xa5b   : > { %v2721_v58 = vpop.f32.mrf.mxu2  ;;  %v2734_v1 = vpop.f32.mrf.mxu0 }
 0xa5c   : > { %3221 = vmatpush.bf16.msra.mxu1 %v5650_v56 }
 0xa8c   : > { %v2813_v54 = vpop.f32.mrf.mxu1 }
 0xa8d   : > { %v2817_v62 = vsel %vm2134_vm10, %v2813_v54, -inf }
 0xa8e   : > { %2818 = vmax.xlane.f32.xlu2 %v2817_v62 }
 0xa94   : > { %v2815_v6 = vpop.f32.mrf.mxu1 }
 0xaa9   : > { %v2872_v14 = vpop.f32.mrf.mxu2 }
 0xaaa   : > { %v2876_v21 = vsel %vm2134_vm10, %v2872_v14, -inf }
 0xaab   : > { %2877 = vmax.xlane.f32.xlu1 %v2876_v21 }
 0xaac   : > { %v2937_v42 = vpop.f32.mrf.mxu1 }
 0xaad   : > { %v2941_v15 = vsel %vm2134_vm10, %v2937_v42, -inf }
 0xaae   : > { %2942 = vmax.xlane.f32.xlu0 %v2941_v15 }
 0xab1   : > { %v2874_v56 = vpop.f32.mrf.mxu2 }
 0xab4   : > { %v2939_v37 = vpop.f32.mrf.mxu1 }
 0xab9   : > { %v3001_v3 = vpop.f32.mrf.mxu2 }
 0xaba   : > { %v3005_v53 = vsel %vm2134_vm10, %v3001_v3, -inf }
 0xabb   : > { %3006 = vmax.xlane.f32.xlu2 %v3005_v53 }
 0xac1   : > { %v3003_v13 = vpop.f32.mrf.mxu2 }
 0xb01   : > { %v2819_v0 = vpop.xlane.xlu2 %2818 }
 0xb02   : > { %v2820_v30 = vsub.f32 %v2813_v54, %v2819_v0 }
 0xb04   : > { %v2821_v35 = vmul.f32 1.442695, %v2820_v30 }
 0xb06   : > { %4656 = vpow2.f32 %v2821_v35 }
 0xb0c   : > { %v4657_v41 = vpop.eup %4656 }
 0xb0d   : > { %v2823_v61 = vsel %vm2134_vm10, %v4657_v41, 0.0 }
 0xb0e   : > { %2824 = vadd.xlane.f32.xlu1 %v2823_v61 }
 0xb1e   : > { %v2878_v20 = vpop.xlane.xlu1 %2877 }
 0xb1f   : > { %v2879_v55 = vsub.f32 %v2872_v14, %v2878_v20 }
 0xb21   : > { %v2880_v43 = vmul.f32 1.442695, %v2879_v55  ;;  %v2943_v32 = vpop.xlane.xlu0 %2942 }
 0xb22   : > { %v2944_v11 = vsub.f32 %v2937_v42, %v2943_v32 }
 0xb23   : > { %4658 = vpow2.f32 %v2880_v43 }
 0xb24   : > { %v2945_v4 = vmul.f32 1.442695, %v2944_v11  ;;  %v6012_v11 = vld [vmem:[#allocation17_spill] sm:$0xff] }
 0xb26   : > { %4660 = vpow2.f32 %v2945_v4 }
 0xb27   : > { %2889 = vrot.lane.b32.xlu1 %v5635_v25, %s4744_s18  ;;  %s6020_s18 = sld [smem:[#allocation15_spill]] (!%p4404_p8) }
 0xb29   : > { %v4659_v12 = vpop.eup %4658 }
 0xb2a   : > { %v2882_v24 = vsel %vm2134_vm10, %v4659_v12, 0.0 }
 0xb2b   : > { %2883 = vadd.xlane.f32.xlu0 %v2882_v24 }
 0xb2c   : > { %v4661_v7 = vpop.eup %4660 }
 0xb2d   : > { %v2947_v45 = vsel %vm2134_vm10, %v4661_v7, 0.0 }
 0xb2e   : > { %2948 = vadd.xlane.f32.xlu2 %v2947_v45  ;;  %v3007_v2 = vpop.xlane.xlu2 %3006 }
 0xb2f   : > { %v3008_v23 = vsub.f32 %v3001_v3, %v3007_v2 }
 0xb31   : > { %v3009_v19 = vmul.f32 1.442695, %v3008_v23 }
 0xb33   : > { %4662 = vpow2.f32 %v3009_v19 }
 0xb39   : > { %v4663_v17 = vpop.eup %4662 }
 0xb3a   : > { %v3011_v59 = vsel %vm2134_vm10, %v4663_v17, 0.0 }
 0xb3b   : > { %3012 = vadd.xlane.f32.xlu2 %v3011_v59 }
 0xb3f   : > { %2953 = vrot.lane.b32.xlu0 %v5635_v25, %s4747_s24 }
 0xb53   : > { %3017 = vrot.lane.b32.xlu2 %v5635_v25, %s4748_s4 }
 0xb81   : > { %v2825_v8 = vpop.xlane.xlu1 %2824 }
 0xb82   : > { %4664 = vrcp.f32 %v2825_v8 }
 0xb88   : > { %v4665_v16 = vpop.eup %4664 }
 0xb89   : > { %v2827_v28 = vmul.f32 %v4665_v16, %v4657_v41 }
 0xb8b   : > { %v2828_v10 = vpack.c.bf16 %v2827_v28, %v2827_v28 }
 0xb8d   : > { %4394 = vmatmul.msk.bf16.vlgmr.msra.gmra.mxu3 %vm2148_vm11, %v2828_v10 }
 0xb99   : > { %v2890_v38 = vpop.permute.xlu1 %2889 }
 0xb9a   : > { %v2895_v46 = vand.u32 %v2890_v38, %v5338_v50 }
 0xb9c   : > { %2904 = vmatpush.bf16.msrb.mxu0 %v2895_v46 }
 0xb9e   : > { %v2884_v47 = vpop.xlane.xlu0 %2883 }
 0xb9f   : > { %4666 = vrcp.f32 %v2884_v47 }
 0xba1   : > { %v2949_v33 = vpop.xlane.xlu2 %2948 }
 0xba2   : > { %4668 = vrcp.f32 %v2949_v33 }
 0xba5   : > { %v4667_v27 = vpop.eup %4666 }
 0xba6   : > { %v2886_v58 = vmul.f32 %v4667_v27, %v4659_v12  ;;  %v6014_v27 = vld [vmem:[#allocation18_spill] sm:$0xff] }
 0xba8   : > { %v2887_v1 = vpack.c.bf16 %v2886_v58, %v2886_v58  ;;  %v4669_v25 = vpop.eup %4668  ;;  %v6015_v58 = vld [vmem:[#allocation19_spill] sm:$0xff] }
 0xba9   : > { %v2951_v62 = vmul.f32 %v4669_v25, %v4661_v7  ;;  %v6013_v7 = vld [vmem:[#allocation16_spill] sm:$0xff] }
 0xbaa   : > { %4396 = vmatmul.msk.bf16.vlgmr.msrb.gmra.mxu0 %vm2148_vm11, %v2887_v1 }
 0xbab   : > { %v2952_v42 = vpack.c.bf16 %v2951_v62, %v2951_v62 }
 0xbae   : > { %v3013_v54 = vpop.xlane.xlu2 %3012 }
 0xbaf   : > { %4670 = vrcp.f32 %v3013_v54 }
 0xbb1   : > { %v2954_v6 = vpop.permute.xlu0 %2953 }
 0xbb2   : > { %v2959_v14 = vand.u32 %v2954_v6, %v5338_v50  ;;  %v6016_v6 = vld [vmem:[#allocation20_spill] sm:$0xff] }
 0xbb4   : > { %2968 = vmatpush.bf16.msrb.mxu3 %v2959_v14  ;;  %v6017_v14 = vperm.slane %v6016_v6, 0 }
 0xbb5   : > { %v4671_v21 = vpop.eup %4670 }
 0xbb6   : > { %v3015_v15 = vmul.f32 %v4671_v21, %v4663_v17  ;;  %v3018_v56 = vpop.permute.xlu2 %3017 }
 0xbb7   : > { %v3023_v37 = vand.u32 %v3018_v56, %v5338_v50  ;;  %4398 = vmatmul.msk.bf16.vlgmr.msrb.gmra.mxu3 %vm2148_vm11, %v2952_v42  ;;  %v6018_v42 = vperm.slane %v6016_v6, 1 }
 0xbb8   : > { %3097 = vmatpush.bf16.msra.mxu3 %v5462_v22  ;;  %v3016_v3 = vpack.c.bf16 %v3015_v15, %v3015_v15 }
 0xbb9   : > { %3032 = vmatpush.bf16.msra.mxu0 %v3023_v37 }
 0xbbc   : > { %3098 = vmatpush.bf16.msra.mxu3 %v5472_v31  ;;  %4400 = vmatmul.msk.bf16.vlgmr.msra.gmra.mxu0 %vm2148_vm11, %v3016_v3  ;;  %v2850_v31 = vld [vmem:[#allocation3] sm:$0x7] }
 0xbbd   : > { %3201 = vmatpush.bf16.msrb.mxu0 %v5541_v44 }
 0xbc0   : > { %3099 = vmatpush.bf16.msra.mxu3 %v5482_v49 }
 0xbc1   : > { %3202 = vmatpush.bf16.msrb.mxu0 %v5546_v34 }
 0xbc4   : > { %3100 = vmatpush.bf16.msra.mxu3 %v5493_v63 }
 0xbc5   : > { %3203 = vmatpush.bf16.msrb.mxu0 %v5562_v60 }
 0xbc9   : > { %3204 = vmatpush.bf16.msrb.mxu0 %v5578_v9 }
 0xbcd   : > { %3205 = vmatpush.bf16.msrb.mxu0 %v5589_v51 }
 0xbd1   : > { %3206 = vmatpush.bf16.msrb.mxu0 %v5601_v18 }
 0xbd5   : > { %3207 = vmatpush.bf16.msrb.mxu0 %v5616_v29 }
 0xbd9   : > { %3208 = vmatpush.bf16.msrb.mxu0 %v5632_v5 }
 0xc10   : > { %v2845_v50 = vpop.f32.mrf.mxu3 }
 0xc11   : > { %v2849_v22 = vpack.c.bf16 %v2845_v50, %v2845_v50 }
 0xc13   : > { %v2851_v49 = vsel %vm5363_vm14, %v2849_v22, %v2850_v31 }
 0xc14   : > { %2852 = vst [vmem:[#allocation3] sm:$0x7] %v2851_v49 }
 0xc18   : > { %v2847_v63 = vpop.f32.mrf.mxu3 }
 0xc1b   : > { %v2915_v13 = vld [vmem:[#allocation3] sm:$0x7] }
 0xc27   : > { %v2906_v44 = vpop.f32.mrf.mxu0 }
 0xc28   : > { %v2910_v34 = vpack.c.bf16 %v2906_v44, %v2906_v44 }
 0xc2a   : > { %2912 = vrot.lane.b32.xlu0 %v2910_v34, %s4750_s22 }
 0xc2f   : > { %v2908_v60 = vpop.f32.mrf.mxu0 }
 0xc39   : > { %v3034_v9 = vpop.f32.mrf.mxu0 }
 0xc3a   : > { %v3038_v51 = vpack.c.bf16 %v3034_v9, %v3034_v9  ;;  %v2970_v18 = vpop.f32.mrf.mxu3 }
 0xc3b   : > { %v2974_v53 = vpack.c.bf16 %v2970_v18, %v2970_v18 }
 0xc3c   : > { %3040 = vrot.lane.b32.xlu0 %v3038_v51, %s4745_s25  ;;  %s6021_s25 = sld [smem:[#allocation14_spill]] (!%p4404_p8) }
 0xc3d   : > { %2976 = vrot.lane.b32.xlu1 %v2974_v53, %s4749_s1  ;;  %s6023_s1 = sld [smem:[#allocation33_spill]] (!%p4404_p8) }
 0xc41   : > { %v3036_v29 = vpop.f32.mrf.mxu0 }
 0xc42   : > { %v2972_v5 = vpop.f32.mrf.mxu3 }
 0xc43   : > { %s6024_s22 = scalar_lea.vmem (!%p4404_p8), %s6023_s1, %s6044_s26 }
 0xc9c   : > { %v2913_v26 = vpop.permute.xlu0 %2912 }
 0xc9d   : > { %v2916_v0 = vsel %vm5399_vm0, %v2913_v26, %v2915_v13 }
 0xc9e   : > { %2917 = vst [vmem:[#allocation3] sm:$0x7] %v2916_v0 }
 0xca5   : > { %v2979_v30 = vld [vmem:[#allocation3] sm:$0x7] }
 0xcae   : > { %v3041_v61 = vpop.permute.xlu0 %3040 }
 0xcaf   : > { %v2977_v35 = vpop.permute.xlu1 %2976 }
 0xcb0   : > { %v2980_v41 = vsel %vm5418_vm3, %v2977_v35, %v2979_v30 }
 0xcb1   : > { %2981 = vst [vmem:[#allocation3] sm:$0x7] %v2980_v41 }
 0xcb8   : > { %v3043_v20 = vld [vmem:[#allocation3] sm:$0x7] }
 0xcb9   : > { %v3044_v55 = vsel %vm5425_vm5, %v3041_v61, %v3043_v20 }
 0xcba   : > { %3045 = vst [vmem:[#allocation3] sm:$0x7] %v3044_v55 }
 0xcc1   : > { %v3046_v43 = vld [vmem:[#allocation3] sm:$0x7] }
 0xcc2   : > { %4401 = vmatmul.msk.bf16.vlgmr.msrb.gmra.mxu1 %vm2080_vm6, %v3046_v43 }
 0xd3f   : > { %v3059_v32 = vpop.f32.mrf.mxu1 }
 0xd40   : > { %v3063_v39 = vadd.f32 %v3059_v32, %v5413_v48 }
 0xd42   : > { %v5751_v4 = vadd.f32 %v6012_v11, %v3063_v39 }
 0xd44   : > { %v3065_v52 = vsel %vm1996_vm1, %v5751_v4, 0.0 }
 0xd45   : > { %3066 = vadd.xlane.f32.xlu1 %v3065_v52 }
 0xd47   : > { %v3061_v12 = vpop.f32.mrf.mxu1 }
 0xdb8   : > { %v3067_v24 = vpop.xlane.xlu1 %3066 }
 0xdb9   : > { %v3068_v45 = vmul.f32 %v3067_v24, %v6013_v7 }
 0xdbb   : > { %v3069_v57 = vsub.f32 %v5751_v4, %v3068_v45 }
 0xdbd   : > { %v3070_v2 = vmul.f32 %v3069_v57, %v3069_v57 }
 0xdbf   : > { %v3071_v23 = vsel %vm1996_vm1, %v3070_v2, 0.0 }
 0xdc0   : > { %3072 = vadd.xlane.f32.xlu2 %v3071_v23 }
 0xe33   : > { %v3073_v19 = vpop.xlane.xlu2 %3072 }
 0xe34   : > { %v3074_v48 = vmul.f32 %v3073_v19, %v6013_v7 }
 0xe36   : > { %v3075_v17 = vadd.f32 1e-06, %v3074_v48 }
 0xe38   : > { %4672 = vrsqrt.f32 %v3075_v17  ;;  %vm3082_vm10 = vweird.f32 %v3075_v17 }
 0xe3e   : > { %v4673_v59 = vpop.eup %4672 }
 0xe3f   : > { %v3077_v8 = vmul.f32 %v4673_v59, %v3075_v17  ;;  %vm3083_vm9 = vweird.f32 %v4673_v59 }
 0xe40   : > { %vm3084_vm11 = vmor %vm3082_vm10, %vm3083_vm9 }
 0xe41   : > { %v3078_v16 = vmul.f32 %v4673_v59, %v3077_v8 }
 0xe43   : > { %v3079_v28 = vmul.f32 0.5, %v3078_v16 }
 0xe45   : > { %v3080_v10 = vsub.f32 1.5, %v3079_v28 }
 0xe47   : > { %v3081_v38 = vmul.f32 %v4673_v59, %v3080_v10 }
 0xe49   : > { %v3085_v46 = vsel %vm3084_vm11, %v4673_v59, %v3081_v38 }
 0xe4a   : > { %v3086_v47 = vmul.f32 %v3085_v46, %v3069_v57 }
 0xe4c   : > { %v3087_v33 = vmul.f32 %v6014_v27, %v3086_v47 }
 0xe4e   : > { %v3088_v1 = vadd.f32 %v6015_v58, %v3087_v33 }
 0xe50   : > { %v3089_v25 = vpack.c.bf16 %v3088_v1, %v3088_v1 }
 0xe52   : > { %4402 = vmatmul.msk.bf16.vlgmr.msra.gmra.mxu3 %vm2080_vm6, %v3089_v25  ;;  %4403 = vmatmul.msk.bf16.vlgmr.msrb.gmra.mxu2 %vm2080_vm6, %v3089_v25 }
 0xed5   : > { %v3102_v54 = vpop.f32.mrf.mxu3  ;;  %v3115_v62 = vpop.f32.mrf.mxu2 }
 0xed6   : > { %v5765_v21 = vadd.f32 %v3102_v54, %v6017_v14  ;;  %v5769_v15 = vadd.f32 %v3115_v62, %v6018_v42 }
 0xed8   : > { %v5772_v56 = vmul.f32 0.70710677, %v5765_v21  ;;  %v5775_v37 = vmul.f32 0.70710677, %v5769_v15 }
 0xeda   : > { %v3127_v3 = vand.u32 2147483647, %v5772_v56  ;;  %v3128_v50 = vand.u32 2147483647, %v5775_v37  ;;  %vm3123_vm4 = vcmp.ge.f32.partialorder %v5772_v56, 0.0  ;;  %vm3124_vm7 = vcmp.ge.f32.partialorder %v5775_v37, 0.0 }
 0xedc   : > { %v3129_v22 = vmul.f32 0.3275911, %v3127_v3  ;;  %v3130_v31 = vmul.f32 0.3275911, %v3128_v50  ;;  %v3181_v39 = vsub.f32 0.0, %v3127_v3  ;;  %v3182_v24 = vsub.f32 0.0, %v3128_v50 }
 0xedd   : > { %v3104_v49 = vpop.f32.mrf.mxu3  ;;  %v3117_v63 = vpop.f32.mrf.mxu2 }
 0xede   : > { %v3131_v44 = vadd.f32 1.0, %v3129_v22  ;;  %v3132_v34 = vadd.f32 1.0, %v3130_v31  ;;  %v3183_v57 = vmul.f32 %v3181_v39, %v3127_v3  ;;  %v3184_v19 = vmul.f32 %v3182_v24, %v3128_v50 }
 0xedf   : > { %v3125_v3 = vsel %vm3123_vm4, 1.0, %v4751_v40  ;;  %v3126_v31 = vsel %vm3124_vm7, 1.0, %v4751_v40  ;;  %v3119_v63 = vmul.f32 0.5, %v5765_v21 }
 0xee0   : > { %4674 = vrcp.f32 %v3131_v44  ;;  %v3144_v29 = vand.u32 2147483648, %v3131_v44  ;;  %v3142_v26 = vand.u32 2147483647, %v3131_v44  ;;  %v3159_v0 = vand.u32 2147483648, %v3132_v34 }
 0xee1   : > { %4676 = vrcp.f32 %v3132_v34  ;;  %v3157_v35 = vand.u32 2147483647, %v3132_v34  ;;  %vm3138_vm3 = vweird.f32 %v3131_v44  ;;  %vm3153_vm12 = vweird.f32 %v3132_v34 }
 0xee2   : > { %v3145_v61 = vor.u32 1.1754944e-38, %v3144_v29  ;;  %vm3143_vm13 = vcmp.eq.f32.partialorder %v3142_v26, 8.507059e+37  ;;  %v3160_v43 = vor.u32 1.1754944e-38, %v3159_v0  ;;  %v3185_v59 = vmul.f32 1.442695, %v3183_v57 }
 0xee3   : > { %vm3158_vm2 = vcmp.eq.f32.partialorder %v3157_v35, 8.507059e+37  ;;  %v3187_v28 = vmul.f32 1.442695, %v3184_v19 }
 0xee4   : > { %4678 = vpow2.f32 %v3185_v59 }
 0xee5   : > { %4680 = vpow2.f32 %v3187_v28 }
 0xee6   : > { %v4675_v60 = vpop.eup %4674 }
 0xee7   : > { %v4677_v9 = vpop.eup %4676  ;;  %v3134_v51 = vmul.f32 %v4675_v60, %v3131_v44  ;;  %vm3139_vm14 = vweird.f32 %v4675_v60 }
 0xee8   : > { %v3149_v18 = vmul.f32 %v4677_v9, %v3132_v34  ;;  %vm3154_vm0 = vweird.f32 %v4677_v9  ;;  %vm3140_vm5 = vmor %vm3138_vm3, %vm3139_vm14  ;;  %v3120_v34 = vmul.f32 0.5, %v5769_v15 }
 0xee9   : > { %v3135_v53 = vsub.f32 1.0, %v3134_v51  ;;  %vm3155_vm15 = vmor %vm3153_vm12, %vm3154_vm0 }
 0xeea   : > { %v3150_v5 = vsub.f32 1.0, %v3149_v18  ;;  %v4679_v25 = vpop.eup %4678 }
 0xeeb   : > { %v3136_v13 = vmul.f32 %v4675_v60, %v3135_v53  ;;  %v4681_v62 = vpop.eup %4680 }
 0xeec   : > { %v3151_v30 = vmul.f32 %v4677_v9, %v3150_v5 }
 0xeed   : > { %v3137_v41 = vadd.f32 %v4675_v60, %v3136_v13 }
 0xeee   : > { %v3152_v20 = vadd.f32 %v4677_v9, %v3151_v30 }
 0xeef   : > { %v3141_v55 = vsel %vm3140_vm5, %v4675_v60, %v3137_v41 }
 0xef0   : > { %v3146_v32 = vsel %vm3143_vm13, %v3145_v61, %v3141_v55  ;;  %v3156_v11 = vsel %vm3155_vm15, %v4677_v9, %v3152_v20 }
 0xef1   : > { %v3163_v52 = vmul.f32 1.0614054, %v3146_v32  ;;  %v3161_v12 = vsel %vm3158_vm2, %v3160_v43, %v3156_v11 }
 0xef2   : > { %v3164_v7 = vmul.f32 1.0614054, %v3161_v12 }
 0xef3   : > { %v3165_v45 = vadd.f32 -1.4531521, %v3163_v52 }
 0xef4   : > { %v3166_v2 = vadd.f32 -1.4531521, %v3164_v7 }
 0xef5   : > { %v3167_v23 = vmul.f32 %v3165_v45, %v3146_v32 }
 0xef6   : > { %v3168_v48 = vmul.f32 %v3166_v2, %v3161_v12 }
 0xef7   : > { %v3169_v17 = vadd.f32 1.4214138, %v3167_v23 }
 0xef8   : > { %v3170_v8 = vadd.f32 1.4214138, %v3168_v48 }
 0xef9   : > { %v3171_v16 = vmul.f32 %v3169_v17, %v3146_v32 }
 0xefa   : > { %v3172_v10 = vmul.f32 %v3170_v8, %v3161_v12 }
 0xefb   : > { %v3173_v38 = vadd.f32 -0.28449672, %v3171_v16 }
 0xefc   : > { %v3174_v46 = vadd.f32 -0.28449672, %v3172_v10 }
 0xefd   : > { %v3175_v47 = vmul.f32 %v3173_v38, %v3146_v32 }
 0xefe   : > { %v3176_v27 = vmul.f32 %v3174_v46, %v3161_v12 }
 0xeff   : > { %v3177_v33 = vadd.f32 0.2548296, %v3175_v47 }
 0xf00   : > { %v3178_v58 = vadd.f32 0.2548296, %v3176_v27 }
 0xf01   : > { %v3179_v1 = vmul.f32 %v3177_v33, %v3146_v32 }
 0xf02   : > { %v3180_v54 = vmul.f32 %v3178_v58, %v3161_v12 }
 0xf03   : > { %v3189_v6 = vmul.f32 %v4679_v25, %v3179_v1 }
 0xf04   : > { %v3190_v14 = vmul.f32 %v4681_v62, %v3180_v54 }
 0xf05   : > { %v3191_v42 = vsub.f32 1.0, %v3189_v6 }
 0xf06   : > { %v3192_v50 = vsub.f32 1.0, %v3190_v14 }
 0xf07   : > { %v3193_v22 = vmul.f32 %v3191_v42, %v3125_v3 }
 0xf08   : > { %v3194_v49 = vmul.f32 %v3192_v50, %v3126_v31 }
 0xf09   : > { %v3195_v44 = vadd.f32 1.0, %v3193_v22 }
 0xf0a   : > { %v3196_v60 = vadd.f32 1.0, %v3194_v49 }
 0xf0b   : > { %v3197_v9 = vmul.f32 %v3195_v44, %v3119_v63 }
 0xf0c   : > { %v3198_v56 = vmul.f32 %v3196_v60, %v3120_v34 }
 0xf0d   : > { %v3199_v51 = vpack.c.bf16 %v3197_v9, %v3197_v9 }
 0xf0e   : > { %v3200_v18 = vpack.c.bf16 %v3198_v56, %v3198_v56 }
 0xf0f   : > { %3209 = vmatmul.bf16.vlgmr.msrb.gmra.mxu0 %v3199_v51 }
 0xf10   : > { %3222 = vmatmul.bf16.vlgmr.msra.gmra.mxu1 %v3200_v18 }
 0xf8c   : > { %v3210_v37 = vpop.f32.mrf.mxu0 }
 0xf8d   : > { %v3211_v53 = vadd.f32 %v5698_v36, %v3210_v37  ;;  %v3223_v29 = vpop.f32.mrf.mxu1 }
 0xf8f   : > { %v3224_v5 = vadd.f32 %v3223_v29, %v3211_v53 }
 0xf91   : > { %v3227_v40 = vadd.f32 %v3224_v5, %v5751_v4  ;;  %3232 = sbr.rel (%p4404_p8) target bundleno = 4821 (0x12d5), region = 124 }
 0xf93   : > { %3228 = vst.msk [vmem:[#allocation2 + $0x8] sm:$0x1f] %vm1996_vm1, %v3227_v40 }
 0xf94   : > { %v3212_v21 = vpop.f32.mrf.mxu0 }
 0xf95   : > { %v3225_v13 = vpop.f32.mrf.mxu1 }
 0xf96   : > { %v3268_v15 = vld [vmem:[#allocation2] sm:$0x1f]  ;;  %v6022_v35 = vld [vmem:[#allocation16_spill] sm:$0xff]  ;;  %v4557_v45 = vld [vmem:[%s6020_s18 + $0x8] sm:$0xff]  ;;  %vm3385_vm3 = vcmask 258048  }
 0xf97   : > { %v3269_v26 = vsel %vm1996_vm1, %v3268_v15, 0.0  ;;  %v4559_v52 = vld [vmem:[%s6020_s18 + $0x18] sm:$0xff]  ;;  %v4558_v24 = vld [vmem:[%s6020_s18 + $0x10] sm:$0xff]  ;;  %v4553_v57 = vld [vmem:[%s6021_s25 + $0x8] sm:$0xff] }
 0xf98   : > { %3270 = vadd.xlane.f32.xlu0 %v3269_v26  ;;  %v4555_v12 = vld [vmem:[%s6021_s25 + $0x18] sm:$0xff]  ;;  %3334 = vmatpush.bf16.msra.mxu0 %v4559_v52  ;;  %v4554_v7 = vld [vmem:[%s6021_s25 + $0x10] sm:$0xff]  ;;  %v4556_v2 = vld [vmem:[%s6020_s18] sm:$0xff] }
 0xf99   : > { %3371 = vmatpush.bf16.msra.mxu1 %v4555_v12  ;;  %3506 = vmatpush.bf16.msra.mxu3 %v4559_v52  ;;  %v4552_v23 = vld [vmem:[%s6021_s25] sm:$0xff] }
 0xf9a   : > { %v3473_v0 = vld [vmem:[#allocation2 + $0x8] sm:$0x1f]  ;;  %v4684_v1 = vld [vmem:[%s6024_s22] ss:$0 sm:$0xff] }
 0xf9b   : > { %v3474_v36 = vsel %vm1996_vm1, %v3473_v0, 0.0  ;;  %v4685_v6 = vld [vmem:[%s6026_s0] ss:$0 sm:$0xff] }
 0xf9c   : > { %3335 = vmatpush.bf16.msra.mxu0 %v4558_v24  ;;  %v4686_v9 = vld [vmem:[%s6028_s17] ss:$0 sm:$0xff] }
 0xf9d   : > { %3372 = vmatpush.bf16.msra.mxu1 %v4554_v7  ;;  %3507 = vmatpush.bf16.msra.mxu3 %v4558_v24  ;;  %v4687_v53 = vld [vmem:[%s1311_s23] ss:$0 sm:$0xff] }
 0xfa0   : > { %3475 = vadd.xlane.f32.xlu0 %v3474_v36  ;;  %3336 = vmatpush.bf16.msra.mxu0 %v4557_v45 }
 0xfa1   : > { %3373 = vmatpush.bf16.msra.mxu1 %v4553_v57  ;;  %3508 = vmatpush.bf16.msra.mxu3 %v4557_v45  ;;  %v4562_v45 = vld [vmem:[%s5042_s15 + $0x10] sm:$0xff] }
 0xfa4   : > { %3337 = vmatpush.bf16.msra.mxu0 %v4556_v2 }
 0xfa5   : > { %3374 = vmatpush.bf16.msra.mxu1 %v4552_v23  ;;  %3509 = vmatpush.bf16.msra.mxu3 %v4556_v2  ;;  %v4561_v2 = vld [vmem:[%s5042_s15 + $0x8] sm:$0xff] }
 0xfa8   : > { %3519 = vmatpush.bf16.msrb.mxu0 %v4555_v12  ;;  %v4563_v12 = vld [vmem:[%s5042_s15 + $0x18] sm:$0xff] }
 0xfa9   : > { %3453 = vmatpush.bf16.msra.mxu2 %v4563_v12  ;;  %3567 = vmatpush.bf16.msrb.mxu1 %v4563_v12 }
 0xfac   : > { %3520 = vmatpush.bf16.msrb.mxu0 %v4554_v7 }
 0xfad   : > { %3454 = vmatpush.bf16.msra.mxu2 %v4562_v45  ;;  %3568 = vmatpush.bf16.msrb.mxu1 %v4562_v45 }
 0xfb0   : > { %3521 = vmatpush.bf16.msrb.mxu0 %v4553_v57 }
 0xfb1   : > { %3455 = vmatpush.bf16.msra.mxu2 %v4561_v2  ;;  %3569 = vmatpush.bf16.msrb.mxu1 %v4561_v2 }
 0xfb4   : > { %3522 = vmatpush.bf16.msrb.mxu0 %v4552_v23 }
0x100b   : > { %v3271_v30 = vpop.xlane.xlu0 %3270 }
0x100c   : > { %v3272_v4 = vmul.f32 %v3271_v30, %v6022_v35 }
0x100e   : > { %v3273_v41 = vsub.f32 %v3268_v15, %v3272_v4 }
0x1010   : > { %v3274_v61 = vmul.f32 %v3273_v41, %v3273_v41 }
0x1012   : > { %v3275_v20 = vsel %vm1996_vm1, %v3274_v61, 0.0 }
0x1013   : > { %3276 = vadd.xlane.f32.xlu1 %v3275_v20  ;;  %v3476_v55 = vpop.xlane.xlu0 %3475  ;;  %v4688_v20 = vld [vmem:[%s1314_s16] ss:$0 sm:$0xff] }
0x1014   : > { %v3477_v43 = vmul.f32 %v3476_v55, %v6022_v35  ;;  %v4752_v55 = vmov 0  }
0x1015   : > { %4682 = vset.pattern.permute.xlu0 %v4752_v55  ;;  %4683 = vset.pattern.permute.xlu1 %v4752_v55 }
0x1016   : > { %v5794_v32 = vsub.f32 %v3473_v0, %v3477_v43 }
0x1018   : > { %v3479_v39 = vmul.f32 %v5794_v32, %v5794_v32 }
0x101a   : > { %v3480_v11 = vsel %vm1996_vm1, %v3479_v39, 0.0 }
0x101b   : > { %3481 = vadd.xlane.f32.xlu1 %v3480_v11 }
0x1086   : > { %v3277_v19 = vpop.xlane.xlu1 %3276 }
0x1087   : > { %v3278_v48 = vmul.f32 %v3277_v19, %v6022_v35 }
0x1089   : > { %v3279_v17 = vadd.f32 1e-06, %v3278_v48 }
0x108b   : > { %4690 = vrsqrt.f32 %v3279_v17  ;;  %vm3286_vm9 = vweird.f32 %v3279_v17 }
0x108e   : > { %v3482_v59 = vpop.xlane.xlu1 %3481 }
0x108f   : > { %v3483_v8 = vmul.f32 %v3482_v59, %v6022_v35 }
0x1091   : > { %v4691_v16 = vpop.eup %4690  ;;  %v3484_v28 = vadd.f32 1e-06, %v3483_v8 }
0x1092   : > { %v3281_v10 = vmul.f32 %v4691_v16, %v3279_v17  ;;  %vm3287_vm8 = vweird.f32 %v4691_v16 }
0x1093   : > { %4692 = vrsqrt.f32 %v3484_v28  ;;  %vm3288_vm10 = vmor %vm3286_vm9, %vm3287_vm8  ;;  %vm3491_vm14 = vweird.f32 %v3484_v28 }
0x1094   : > { %v3282_v38 = vmul.f32 %v4691_v16, %v3281_v10 }
0x1096   : > { %v3283_v46 = vmul.f32 0.5, %v3282_v38 }
0x1098   : > { %v3284_v47 = vsub.f32 1.5, %v3283_v46 }
0x1099   : > { %v4693_v27 = vpop.eup %4692 }
0x109a   : > { %v3285_v33 = vmul.f32 %v4691_v16, %v3284_v47  ;;  %v3486_v58 = vmul.f32 %v4693_v27, %v3484_v28  ;;  %vm3492_vm11 = vweird.f32 %v4693_v27 }
0x109b   : > { %vm3493_vm0 = vmor %vm3491_vm14, %vm3492_vm11 }
0x109c   : > { %v3487_v25 = vmul.f32 %v4693_v27, %v3486_v58  ;;  %v3289_v54 = vsel %vm3288_vm10, %v4691_v16, %v3285_v33 }
0x109d   : > { %v3290_v62 = vmul.f32 %v3289_v54, %v3273_v41 }
0x109e   : > { %v3488_v14 = vmul.f32 0.5, %v3487_v25 }
0x109f   : > { %v3294_v42 = vmul.f32 %v4684_v1, %v3290_v62 }
0x10a0   : > { %v3489_v3 = vsub.f32 1.5, %v3488_v14 }
0x10a1   : > { %v5819_v50 = vadd.f32 %v4685_v6, %v3294_v42 }
0x10a2   : > { %v3490_v22 = vmul.f32 %v4693_v27, %v3489_v3  ;;  %v4560_v3 = vld [vmem:[%s5042_s15] sm:$0xff] }
0x10a3   : > { %v3299_v31 = vpack.c.bf16 %v5819_v50, %v5819_v50  ;;  %3456 = vmatpush.bf16.msra.mxu2 %v4560_v3  ;;  %3570 = vmatpush.bf16.msrb.mxu1 %v4560_v3 }
0x10a4   : > { %v3494_v49 = vsel %vm3493_vm0, %v4693_v27, %v3490_v22 }
0x10a5   : > { %4422 = vmatmul.msk.bf16.vlgmr.msra.gmra.mxu0 %vm2080_vm6, %v3299_v31  ;;  %4439 = vmatmul.msk.bf16.vlgmr.msra.gmra.mxu1 %vm2080_vm6, %v3299_v31  ;;  %v3495_v63 = vmul.f32 %v3494_v49, %v5794_v32 }
0x10a7   : > { %v3496_v44 = vmul.f32 %v4684_v1, %v3495_v63 }
0x10a9   : > { %v5826_v34 = vadd.f32 %v4685_v6, %v3496_v44 }
0x10ab   : > { %v3498_v60 = vpack.c.bf16 %v5826_v34, %v5826_v34 }
0x10ad   : > { %4458 = vmatmul.msk.bf16.vlgmr.msra.gmra.mxu3 %vm2080_vm6, %v3498_v60 }
0x10b5   : > { %4459 = vmatmul.msk.bf16.vlgmr.msrb.gmra.mxu0 %vm2080_vm6, %v3498_v60 }
0x1122   : > { %v3339_v56 = vpop.f32.mrf.mxu0  ;;  %v3376_v51 = vpop.f32.mrf.mxu1 }
0x1123   : > { %v3340_v18 = vadd.f32 %v4686_v9, %v3339_v56 }
0x1125   : > { %v3377_v37 = vadd.f32 %v3376_v51, %v3340_v18  ;;  %v4689_v51 = vld [vmem:[%s1322_s7] ss:$0 sm:$0xff]  ;;  %v4753_v18 = vmov 0.0  }
0x1127   : > { %v3380_v29 = vmax.f32 %v3377_v37, 0.0 }
0x1129   : > { %v3384_v5 = vmul.f32 %v4687_v53, %v3380_v29 }
0x112a   : > { %v3341_v40 = vpop.f32.mrf.mxu0  ;;  %v3378_v21 = vpop.f32.mrf.mxu1 }
0x112b   : > { %v3386_v13 = vsel %vm3385_vm3, %v3384_v5, 0.0 }
0x112c   : > { %3387 = vadd.xlane.f32.xlu2 %v3386_v13 }
0x1130   : > { %v3511_v15 = vpop.f32.mrf.mxu3 }
0x1131   : > { %v3512_v26 = vadd.f32 %v4686_v9, %v3511_v15  ;;  %v3263_v9 = vlaneseq }
0x1132   : > { %v3524_v0 = vpop.f32.mrf.mxu0 }
0x1133   : > { %v3525_v36 = vadd.f32 %v3524_v0, %v3512_v26  ;;  %v3264_v56 = vshrl.u32 %v3263_v9, 7 }
0x1135   : > { %v3528_v30 = vmax.f32 %v3525_v36, 0.0  ;;  %vm3265_vm9 = vcmp.gt.s32.totalorder %v3264_v56, 0 }
0x1136   : > { %v4405_v37 = vsel %vm3265_vm9, 1.0, %v4753_v18 }
0x1137   : > { %v3529_v35 = vmul.f32 %v4687_v53, %v3528_v30 }
0x1138   : > { %v3513_v4 = vpop.f32.mrf.mxu3 }
0x1139   : > { %v3530_v41 = vsel %vm3385_vm3, %v3529_v35, 0.0 }
0x113a   : > { %v3526_v61 = vpop.f32.mrf.mxu0  ;;  %3531 = vadd.xlane.f32.xlu2 %v3530_v41 }
0x119f   : > { %v3388_v43 = vpop.xlane.xlu2 %3387 }
0x11a0   : > { %v3392_v32 = vadd.f32 %v4688_v20, %v3388_v43 }
0x11a2   : > { %v4440_v39 = vmul.f32 -1.442695, %v3392_v32 }
0x11a4   : > { %4694 = vpow2.f32 %v4440_v39 }
0x11aa   : > { %v4695_v11 = vpop.eup %4694 }
0x11ab   : > { %v3396_v52 = vadd.f32 1.0, %v4695_v11 }
0x11ad   : > { %4696 = vrcp.f32 %v3396_v52  ;;  %v3532_v24 = vpop.xlane.xlu2 %3531  ;;  %v3408_v17 = vand.u32 2147483648, %v3396_v52  ;;  %v3406_v16 = vand.u32 2147483647, %v3396_v52  ;;  %vm3402_vm12 = vweird.f32 %v3396_v52 }
0x11ae   : > { %v3533_v7 = vadd.f32 %v4688_v20, %v3532_v24 }
0x11af   : > { %v3409_v38 = vor.u32 1.1754944e-38, %v3408_v17  ;;  %vm3407_vm15 = vcmp.eq.f32.partialorder %v3406_v16, 8.507059e+37 }
0x11b0   : > { %v4460_v57 = vmul.f32 -1.442695, %v3533_v7 }
0x11b2   : > { %4698 = vpow2.f32 %v4460_v57 }
0x11b3   : > { %v4697_v23 = vpop.eup %4696 }
0x11b4   : > { %v3398_v19 = vmul.f32 %v4697_v23, %v3396_v52  ;;  %vm3403_vm5 = vweird.f32 %v4697_v23 }
0x11b5   : > { %vm3404_vm13 = vmor %vm3402_vm12, %vm3403_vm5 }
0x11b6   : > { %v3399_v48 = vsub.f32 1.0, %v3398_v19 }
0x11b8   : > { %v4699_v59 = vpop.eup %4698  ;;  %v3400_v8 = vmul.f32 %v4697_v23, %v3399_v48 }
0x11b9   : > { %v3537_v28 = vadd.f32 1.0, %v4699_v59 }
0x11ba   : > { %v3401_v10 = vadd.f32 %v4697_v23, %v3400_v8 }
0x11bb   : > { %4700 = vrcp.f32 %v3537_v28  ;;  %v3549_v1 = vand.u32 2147483648, %v3537_v28  ;;  %v3547_v54 = vand.u32 2147483647, %v3537_v28  ;;  %vm3543_vm4 = vweird.f32 %v3537_v28 }
0x11bc   : > { %v3405_v46 = vsel %vm3404_vm13, %v4697_v23, %v3401_v10 }
0x11bd   : > { %v3410_v47 = vsel %vm3407_vm15, %v3409_v38, %v3405_v46  ;;  %v3550_v6 = vor.u32 1.1754944e-38, %v3549_v1  ;;  %vm3548_vm8 = vcmp.eq.f32.partialorder %v3547_v54, 8.507059e+37 }
0x11be   : > { %3414 = vperm.xlu0 %4682, %v3410_v47  }
0x11c1   : > { %v4701_v27 = vpop.eup %4700 }
0x11c2   : > { %v3539_v33 = vmul.f32 %v4701_v27, %v3537_v28  ;;  %vm3544_vm2 = vweird.f32 %v4701_v27 }
0x11c3   : > { %vm3545_vm7 = vmor %vm3543_vm4, %vm3544_vm2 }
0x11c4   : > { %v3540_v58 = vsub.f32 1.0, %v3539_v33 }
0x11c6   : > { %v3541_v25 = vmul.f32 %v4701_v27, %v3540_v58 }
0x11c8   : > { %v3542_v62 = vadd.f32 %v4701_v27, %v3541_v25 }
0x11ca   : > { %v3546_v14 = vsel %vm3545_vm7, %v4701_v27, %v3542_v62 }
0x11cb   : > { %v3551_v42 = vsel %vm3548_vm8, %v3550_v6, %v3546_v14 }
0x11cc   : > { %3555 = vperm.xlu1 %4683, %v3551_v42  }
0x1230   : > { %v3415_v22 = vpop.permute.xlu0 %3414 }
0x1231   : > { %v3417_v31 = vmul.f32 %v3415_v22, %v5819_v50 }
0x1233   : > { %v3418_v49 = vpack.c.bf16 %v3417_v31, %v3417_v31 }
0x1235   : > { %4457 = vmatmul.msk.bf16.vlgmr.msra.gmra.mxu2 %vm2080_vm6, %v3418_v49 }
0x123e   : > { %v3556_v63 = vpop.permute.xlu1 %3555 }
0x123f   : > { %v3558_v44 = vmul.f32 %v3556_v63, %v5826_v34 }
0x1241   : > { %v3559_v60 = vpack.c.bf16 %v3558_v44, %v3558_v44 }
0x1243   : > { %4461 = vmatmul.msk.bf16.vlgmr.msrb.gmra.mxu1 %vm2080_vm6, %v3559_v60  ;;  %vm3471_vm6 = vcmask 516096  }
0x12b8   : > { %v3458_v50 = vpop.f32.mrf.mxu2 }
0x12b9   : > { %v3459_v53 = vadd.f32 %v4689_v51, %v3458_v50 }
0x12bb   : > { %v3462_v29 = vmul.f32 %v4405_v37, %v3459_v53 }
0x12bd   : > { %v3463_v5 = vsel %vm1996_vm1, %v3462_v29, 0.0 }
0x12be   : > { %v3464_v40 = vrot.slane %v3463_v5, 4 }
0x12c0   : > { %v3465_v34 = vadd.f32 %v3464_v40, %v3463_v5  ;;  %v3460_v21 = vpop.f32.mrf.mxu2  ;;  %v3572_v13 = vpop.f32.mrf.mxu1 }
0x12c1   : > { %v3573_v15 = vadd.f32 %v4689_v51, %v3572_v13 }
0x12c2   : > { %v3466_v26 = vrot.slane %v3465_v34, 2 }
0x12c3   : > { %v3576_v0 = vmul.f32 %v4405_v37, %v3573_v15 }
0x12c4   : > { %v3467_v36 = vadd.f32 %v3466_v26, %v3465_v34 }
0x12c5   : > { %v3577_v30 = vsel %vm1996_vm1, %v3576_v0, 0.0 }
0x12c6   : > { %v3468_v35 = vrot.slane %v3467_v36, 1  ;;  %v3578_v4 = vrot.slane %v3577_v30, 4 }
0x12c8   : > { %v3469_v41 = vadd.f32 %v3468_v35, %v3467_v36  ;;  %v3579_v61 = vadd.f32 %v3578_v4, %v3577_v30  ;;  %v3574_v20 = vpop.f32.mrf.mxu1 }
0x12ca   : > { %v3470_v55 = vmul.f32 0.25, %v3469_v41  ;;  %v3580_v43 = vrot.slane %v3579_v61, 2 }
0x12cc   : > { %3472 = vst.msk [vmem:[%s5053_s6] sm:$0x1] %vm3471_vm6, %v3470_v55  ;;  %v3581_v32 = vadd.f32 %v3580_v43, %v3579_v61 }
0x12ce   : > { %v3582_v39 = vrot.slane %v3581_v32, 1 }
0x12d0   : > { %v3583_v11 = vadd.f32 %v3582_v39, %v3581_v32 }
0x12d2   : > { %v3584_v52 = vmul.f32 0.25, %v3583_v11 }
0x12d4   : > { %4462 = vst.msk [vmem:[%s5053_s6 + $0x1] sm:$0x1] %vm3471_vm6, %v3584_v52 }
0x12d5 PF: > { %s6032_s26 = sld [smem:[#allocation7_spill]] }
0x12d6   : > { %s6033_s5 = sld [smem:[#allocation5_spill]] }
0x12d7   : > { %s6035_s27 = sld [smem:[#allocation8_spill]] }
0x12d8   : > { %s6036_s28 = sld [smem:[#allocation9_spill]] }
0x12db   : > { %s34_s6 = sadd.s32 1, %s6032_s26   ;;  %s6034_s26 = sld [smem:[#allocation6_spill]] }
0x12dc   : > { %p31_p9 = scmp.ge.s32.totalorder %s34_s6, 8  }
0x12de   :  { %33 = sbr.rel (!%p31_p9) target bundleno = 23 (0x17), region = 227 }

</bundles_post_ra>
